<compile_context>
chip_gen: v7x
topology: tpu7x:2x2x1
jax: 0.10.0
libtpu: 0.0.40
codegen_flags: <defaults>
</compile_context>

<pallas_src>
import jax
import jax.numpy as jnp
import numpy as np
from jax.experimental import pallas as pl
from jax.experimental.pallas import tpu as pltpu

# Keep f32 "highest" so the XLA reference matches the in-kernel f32 matmuls
# tightly; the network's FLOPs are negligible so this costs nothing here.
jax.config.update("jax_default_matmul_precision", "highest")

N_CLASSES = 10


# ----------------------------------------------------------------------------
# Kernel 1: conv1+pool -> conv2+pool -> fc1 -> fc2, per sample (grid=(B,))
# ----------------------------------------------------------------------------
def _feature_kernel(x_ref, w1_ref, b1_ref, w2_ref, b2_ref,
                    wf1_ref, bf1_ref, wf2_ref, bf2_ref,
                    o_ref, p1_ref, p2_ref):
    def conv_relu_pool(src_ref, w_ref, b_row, n_rows):
        """5x5 valid conv + ReLU + 2x2 max-pool, fully fused.

        src_ref: (H_in, W_in*Cin) rows of one image / feature map.
        w_ref:   (KH, 2, W_in*Cin, Wp*Cout) Toeplitz matrices (dj = col parity).
        Returns (n_rows, Wp*Cout) pooled+ReLU'd map (row = pooled H index).
        """
        kh_total = w_ref.shape[0]
        acc = [[None, None], [None, None]]          # [di][dj]
        for kh in range(kh_total):
            rhs = [w_ref[kh, 0], w_ref[kh, 1]]
            for di in range(2):
                # rows di+kh, di+kh+2, ... -> conv output rows 2i+di, input row +kh
                lhs = src_ref[pl.ds(di + kh, n_rows, stride=2), :]
                for dj in range(2):
                    d = jnp.dot(lhs, rhs[dj], preferred_element_type=jnp.float32)
                    acc[di][dj] = d if acc[di][dj] is None else acc[di][dj] + d
        pooled = jnp.maximum(jnp.maximum(acc[0][0], acc[0][1]),
                             jnp.maximum(acc[1][0], acc[1][1]))
        # bias is constant across the 2x2 window and ReLU is monotone, so
        # relu(max(...) + b) == maxpool(relu(conv + b)).
        return jnp.maximum(pooled + b_row, 0.0)

    # conv1 (3->4) + ReLU + pool : (32, 96) -> (14, 56)   [56 = 14 cols * 4 ch]
    p1_ref[...] = conv_relu_pool(x_ref, w1_ref, b1_ref[...], 14)
    # conv2 (4->12) + ReLU + pool: (14, 56) -> (5, 60)    [60 = 5 cols * 12 ch]
    p2_ref[...] = conv_relu_pool(p1_ref, w2_ref, b2_ref[...], 5)

    # fc1 (300->120) + ReLU; torch's NCHW flatten is baked into wf1's layout.
    y = bf1_ref[...]                                          # (1, 120)
    for h in range(5):
        y = y + jnp.dot(p2_ref[pl.ds(h, 1), :], wf1_ref[h],
                        preferred_element_type=jnp.float32)
    y = jnp.maximum(y, 0.0)

    # fc2 (120->64); no activation because similarity == 'C'.
    o_ref[...] = (jnp.dot(y, wf2_ref[...], preferred_element_type=jnp.float32)
                  + bf2_ref[...])


# ----------------------------------------------------------------------------
# Kernel 2: head (g_func + BatchNorm(batch stats) + sigmoid, cosine, g/h, softmax)
# NOTE: the whole batch lives in this single block so the BatchNorm1d batch
# statistics are exact (per the correctness concern about tiling the batch).
# ----------------------------------------------------------------------------
def _head_kernel(x_ref, hwa_ref, gb_ref, wn_ref, o_ref):
    x = x_ref[...]                                                     # (B, 64)
    # One MXU matmul produces both the cosine dots and g_func's linear output
    # (g_w is appended as the last column of hwa at prep time).
    z = jnp.dot(x, hwa_ref[...], preferred_element_type=jnp.float32)   # (B, C+1)
    dots = z[:, :N_CLASSES]
    g_lin = z[:, N_CLASSES:N_CLASSES + 1] + gb_ref[...]                # (B, 1)

    # BatchNorm1d(1) in training mode: batch statistics, gamma=1, beta=0, eps=1e-5.
    mu = jnp.mean(g_lin, axis=0, keepdims=True)
    var = jnp.mean((g_lin - mu) ** 2, axis=0, keepdims=True)
    g = jax.nn.sigmoid((g_lin - mu) * jax.lax.rsqrt(var + 1e-5))

    # cosine_layer: cosine similarity over the 64-d feature dim, eps=1e-8.
    xn = jnp.maximum(jnp.sqrt(jnp.sum(x * x, axis=-1, keepdims=True)), 1e-8)
    h = dots / (xn * wn_ref[...])                                      # (B, C)

    out = g / h
    out = out - jnp.max(out, axis=-1, keepdims=True)
    e = jnp.exp(out)
    o_ref[...] = e / jnp.sum(e, axis=-1, keepdims=True)


# ----------------------------------------------------------------------------
# One-time parameter preparation (host side; pure layout transformation)
# ----------------------------------------------------------------------------
def _conv_pool_weights(w_oihw, w_in):
    """torch conv weight (Cout,Cin,KH,KW) -> (KH, 2, W_in*Cin, (Wout//2)*Cout).

    mats[kh, dj][wi*Cin+ci, m*Cout+co] = w[co, ci, kh, (2m+dj+?)], i.e. a Toeplitz
    matrix so that  row_of_input @ mats[kh, dj]  yields the conv output for all
    output columns of parity dj, for one kh tap.
    """
    w = np.asarray(w_oihw, np.float32)
    cout, cin, kh_tot, kw_tot = w.shape
    w_out = w_in - kw_tot + 1
    wp = w_out // 2
    mats = np.zeros((kh_tot, 2, w_in * cin, wp * cout), np.float32)
    for kh in range(kh_tot):
        for dj in range(2):
            for m in range(wp):
                c = 2 * m + dj
                for kw in range(kw_tot):
                    wi = c + kw
                    mats[kh, dj, wi * cin:(wi + 1) * cin,
                         m * cout:(m + 1) * cout] = w[:, :, kh, kw].T
    return jnp.asarray(mats)


def _fc1_weights(fc1_w, hp=5, wp=5, cout=12):
    """torch fc1 weight (120, 300) -> (hp, wp*cout, 120) so that
    y = sum_h pooled2[h] @ W[h], with pooled2 columns laid out as m*cout + co
    and torch's NCHW flatten (co*25 + h*5 + m) folded in."""
    fw = np.asarray(fc1_w, np.float32)
    out_f = fw.shape[0]
    mats = np.zeros((hp, wp * cout, out_f), np.float32)
    for h in range(hp):
        for m in range(wp):
            for co in range(cout):
                mats[h, m * cout + co, :] = fw[:, co * (hp * wp) + h * wp + m]
    return jnp.asarray(mats)


def prepare_params(p):
    h_w = p["h_w"]                                                   # (64, 10)
    return {
        "w1": _conv_pool_weights(p["conv1_w"], 32),                  # (5,2,96,56)
        "b1": jnp.tile(p["conv1_b"], 14).reshape(1, 56),
        "w2": _conv_pool_weights(p["conv2_w"], 14),                  # (5,2,56,60)
        "b2": jnp.tile(p["conv2_b"], 5).reshape(1, 60),
        "wf1": _fc1_weights(p["fc1_w"]),                             # (5,60,120)
        "bf1": p["fc1_b"].reshape(1, -1),
        "wf2": jnp.asarray(p["fc2_w"]).T,                            # (120,64)
        "bf2": p["fc2_b"].reshape(1, -1),
        "hwa": jnp.concatenate([h_w, p["g_w"].T], axis=1),           # (64, 11)
        "gb": p["g_b"].reshape(1, 1),
        "wn": jnp.maximum(jnp.sqrt(jnp.sum(h_w * h_w, axis=0, keepdims=True)),
                          1e-8),                                     # (1, 10)
    }


# ----------------------------------------------------------------------------
# Forward pass
# ----------------------------------------------------------------------------
@jax.jit
def gen_odin_forward(x_nchw, kp):
    B = x_nchw.shape[0]
    # NCHW -> (B, H, W*C) rows.  Single tiny one-time layout op; everything
    # downstream stays in VMEM inside the two fused kernels.
    x = jnp.transpose(x_nchw, (0, 2, 3, 1)).reshape(B, 32, 32 * 3)

    feat = pl.pallas_call(
        _feature_kernel,
        out_shape=jax.ShapeDtypeStruct((B, 1, 64), jnp.float32),
        grid=(B,),
        in_specs=[
            pl.BlockSpec((None, 32, 96), lambda b: (b, 0, 0)),       # per-sample image
            pl.BlockSpec((5, 2, 96, 56), lambda b: (0, 0, 0, 0)),    # conv1 Toeplitz
            pl.BlockSpec((1, 56), lambda b: (0, 0)),
            pl.BlockSpec((5, 2, 56, 60), lambda b: (0, 0, 0, 0)),    # conv2 Toeplitz
            pl.BlockSpec((1, 60), lambda b: (0, 0)),
            pl.BlockSpec((5, 60, 120), lambda b: (0, 0, 0)),         # fc1 (stacked by h)
            pl.BlockSpec((1, 120), lambda b: (0, 0)),
            pl.BlockSpec((120, 64), lambda b: (0, 0)),               # fc2
            pl.BlockSpec((1, 64), lambda b: (0, 0)),
        ],
        out_specs=pl.BlockSpec((None, 1, 64), lambda b: (b, 0, 0)),
        scratch_shapes=[pltpu.VMEM((14, 56), jnp.float32),           # pooled conv1
                        pltpu.VMEM((5, 60), jnp.float32)],           # pooled conv2
        compiler_params=pltpu.CompilerParams(
            dimension_semantics=("parallel",)),                      # megacore on v7x
    )(x, kp["w1"], kp["b1"], kp["w2"], kp["b2"],
      kp["wf1"], kp["bf1"], kp["wf2"], kp["bf2"])

    feat2d = feat.reshape(B, 64)                                     # free reshape

    pred = pl.pallas_call(
        _head_kernel,
        out_shape=jax.ShapeDtypeStruct((B, N_CLASSES), jnp.float32),
        grid=(1,),
        in_specs=[
            pl.BlockSpec((B, 64), lambda i: (0, 0)),
            pl.BlockSpec((64, N_CLASSES + 1), lambda i: (0, 0)),
            pl.BlockSpec((1, 1), lambda i: (0, 0)),
            pl.BlockSpec((1, N_CLASSES), lambda i: (0, 0)),
        ],
        out_specs=pl.BlockSpec((B, N_CLASSES), lambda i: (0, 0)),
        compiler_params=pltpu.CompilerParams(
            dimension_semantics=("arbitrary",)),
    )(feat2d, kp["hwa"], kp["gb"], kp["wn"])
    return pred


# ----------------------------------------------------------------------------
# Pure-JAX reference (torch-layout params) for validation
# ----------------------------------------------------------------------------
def ref_forward(x, p):
    def conv(x, w, b):
        y = jax.lax.conv_general_dilated(
            x, w, (1, 1), "VALID", dimension_numbers=("NCHW", "OIHW", "NCHW"))
        return y + b[None, :, None, None]

    def pool(x):
        return jax.lax.reduce_window(
            x, -jnp.inf, jax.lax.max, (1, 1, 2, 2), (1, 1, 2, 2), "VALID")

    x = pool(jax.nn.relu(conv(x, p["conv1_w"], p["conv1_b"])))
    x = pool(jax.nn.relu(conv(x, p["conv2_w"], p["conv2_b"])))
    x = x.reshape(x.shape[0], -1)
    x = jax.nn.relu(x @ p["fc1_w"].T + p["fc1_b"])
    x = x @ p["fc2_w"].T + p["fc2_b"]
    g_lin = x @ p["g_w"].T + p["g_b"]
    mu = jnp.mean(g_lin, axis=0, keepdims=True)
    var = jnp.mean((g_lin - mu) ** 2, axis=0, keepdims=True)
    g = jax.nn.sigmoid((g_lin - mu) / jnp.sqrt(var + 1e-5))
    hw = p["h_w"]
    dots = x @ hw
    xn = jnp.maximum(jnp.linalg.norm(x, axis=-1, keepdims=True), 1e-8)
    wn = jnp.maximum(jnp.linalg.norm(hw, axis=0, keepdims=True), 1e-8)
    h = dots / (xn * wn)
    return jax.nn.softmax(g / h, axis=-1)


# ----------------------------------------------------------------------------
def make_params():
    ks = jax.random.split(jax.random.PRNGKey(42), 10)
    u = lambda k, shape, lo, hi: jax.random.uniform(k, shape, jnp.float32, lo, hi)
    return {
        "conv1_w": u(ks[0], (4, 3, 5, 5), -0.1, 0.1),
        "conv1_b": u(ks[1], (4,), -0.1, 0.1),
        "conv2_w": u(ks[2], (12, 4, 5, 5), -0.1, 0.1),
        "conv2_b": u(ks[3], (12,), -0.1, 0.1),
        "fc1_w": u(ks[4], (120, 300), -0.05, 0.05),
        "fc1_b": u(ks[5], (120,), -0.05, 0.05),
        "fc2_w": u(ks[6], (64, 120), -0.08, 0.08),
        "fc2_b": u(ks[7], (64,), -0.08, 0.08),
        "g_w": u(ks[8], (1, 64), -0.1, 0.1),
        "g_b": jnp.zeros((1,), jnp.float32),
        # cosine_layer weight: torch.rand((1, 64, 10)) ~ U[0,1); squeezed to (64,10)
        "h_w": jax.random.uniform(ks[9], (64, 10), jnp.float32, 0.0, 1.0),
    }


if __name__ == "__main__":
    params = make_params()
    kparams = prepare_params(params)
    # fc1 expects 12*5*5 features -> 32x32 spatial input (CIFAR-like), 3 channels.
    x = jax.random.normal(jax.random.PRNGKey(0), (2, 3, 32, 32), jnp.float32)

    pred = jax.block_until_ready(gen_odin_forward(x, kparams))
    ref = jax.block_until_ready(ref_forward(x, params))

    assert pred.shape == (2, 10), pred.shape
    np.testing.assert_allclose(np.asarray(pred), np.asarray(ref), rtol=1e-3, atol=1e-3)
    print("KERNEL_OK")
</pallas_src>

<mosaic_0001>
module attributes {stable_mosaic.version = 11 : i64} {
  func.func @_head_kernel(%arg0: i32, %arg1: memref<2x64xf32, #tpu.memory_space<vmem>>, %arg2: memref<64x11xf32, #tpu.memory_space<vmem>>, %arg3: memref<1x1xf32, #tpu.memory_space<vmem>>, %arg4: memref<1x10xf32, #tpu.memory_space<vmem>>, %arg5: memref<2x10xf32, #tpu.memory_space<vmem>>) attributes {dimension_semantics = [#tpu.dimension_semantics<arbitrary>], iteration_bounds = array<i64: 1>, scalar_prefetch = 0 : i64, scratch_operands = 0 : i64, tpu.core_type = #tpu.core_type<tc>, window_params = [{pipeline_mode = #tpu.pipeline_mode<synchronous>, transform_indices = @transform_0, window_bounds = array<i64: 2, 64>}, {pipeline_mode = #tpu.pipeline_mode<synchronous>, transform_indices = @transform_1, window_bounds = array<i64: 64, 11>}, {pipeline_mode = #tpu.pipeline_mode<synchronous>, transform_indices = @transform_2, window_bounds = array<i64: 1, 1>}, {pipeline_mode = #tpu.pipeline_mode<synchronous>, transform_indices = @transform_3, window_bounds = array<i64: 1, 10>}, {pipeline_mode = #tpu.pipeline_mode<synchronous>, transform_indices = @transform_4, window_bounds = array<i64: 2, 10>}]} {
    %c0 = arith.constant 0 : index
    %c0_0 = arith.constant 0 : index
    %0 = vector.load %arg1[%c0, %c0_0] : memref<2x64xf32, #tpu.memory_space<vmem>>, vector<2x64xf32>
    %c0_1 = arith.constant 0 : index
    %c0_2 = arith.constant 0 : index
    %1 = vector.load %arg2[%c0_1, %c0_2] : memref<64x11xf32, #tpu.memory_space<vmem>>, vector<64x11xf32>
    %cst = arith.constant dense<0.000000e+00> : vector<2x11xf32>
    %2 = tpu.matmul %0, %1, %cst {dimension_numbers = #tpu.dot_dimension_numbers<[1], [0], [0], [1], [0, 0, 1, 1], [], []>, precision = #tpu.contract_precision<fp32>} : vector<2x64xf32>, vector<64x11xf32>, vector<2x11xf32> -> vector<2x11xf32>
    %3 = vector.extract_strided_slice %2 {offsets = [0, 0], sizes = [2, 10], strides = [1, 1]} : vector<2x11xf32> to vector<2x10xf32>
    %4 = vector.extract_strided_slice %2 {offsets = [0, 10], sizes = [2, 1], strides = [1, 1]} : vector<2x11xf32> to vector<2x1xf32>
    %c0_3 = arith.constant 0 : index
    %c0_4 = arith.constant 0 : index
    %5 = vector.load %arg3[%c0_3, %c0_4] : memref<1x1xf32, #tpu.memory_space<vmem>>, vector<1x1xf32>
    %6 = vector.broadcast %5 : vector<1x1xf32> to vector<2x1xf32>
    %7 = arith.addf %4, %6 : vector<2x1xf32>
    %cst_5 = arith.constant dense<0.000000e+00> : vector<1xf32>
    %8 = vector.multi_reduction <add>, %7, %cst_5 [0] : vector<2x1xf32> to vector<1xf32>
    %9 = vector.shape_cast %8 : vector<1xf32> to vector<1x1xf32>
    %cst_6 = arith.constant 2.000000e+00 : f32
    %10 = vector.broadcast %cst_6 : f32 to vector<1x1xf32>
    %11 = arith.divf %9, %10 : vector<1x1xf32>
    %12 = vector.broadcast %11 : vector<1x1xf32> to vector<2x1xf32>
    %13 = arith.subf %7, %12 : vector<2x1xf32>
    %14 = arith.mulf %13, %13 : vector<2x1xf32>
    %cst_7 = arith.constant dense<0.000000e+00> : vector<1xf32>
    %15 = vector.multi_reduction <add>, %14, %cst_7 [0] : vector<2x1xf32> to vector<1xf32>
    %16 = vector.shape_cast %15 : vector<1xf32> to vector<1x1xf32>
    %cst_8 = arith.constant 2.000000e+00 : f32
    %17 = vector.broadcast %cst_8 : f32 to vector<1x1xf32>
    %18 = arith.divf %16, %17 : vector<1x1xf32>
    %19 = vector.broadcast %11 : vector<1x1xf32> to vector<2x1xf32>
    %20 = arith.subf %7, %19 : vector<2x1xf32>
    %cst_9 = arith.constant 9.99999974E-6 : f32
    %21 = vector.broadcast %cst_9 : f32 to vector<1x1xf32>
    %22 = arith.addf %18, %21 : vector<1x1xf32>
    %23 = math.rsqrt %22 : vector<1x1xf32>
    %24 = vector.broadcast %23 : vector<1x1xf32> to vector<2x1xf32>
    %25 = arith.mulf %20, %24 : vector<2x1xf32>
    %26 = arith.negf %25 : vector<2x1xf32>
    %27 = math.exp %26 : vector<2x1xf32>
    %cst_10 = arith.constant 1.000000e+00 : f32
    %28 = vector.broadcast %cst_10 : f32 to vector<2x1xf32>
    %29 = arith.addf %28, %27 : vector<2x1xf32>
    %30 = arith.divf %28, %29 : vector<2x1xf32>
    %31 = arith.mulf %0, %0 : vector<2x64xf32>
    %cst_11 = arith.constant dense<0.000000e+00> : vector<2xf32>
    %32 = vector.multi_reduction <add>, %31, %cst_11 [1] : vector<2x64xf32> to vector<2xf32>
    %33 = vector.shape_cast %32 : vector<2xf32> to vector<2x1xf32>
    %34 = math.sqrt %33 : vector<2x1xf32>
    %cst_12 = arith.constant 9.99999993E-9 : f32
    %35 = vector.broadcast %cst_12 : f32 to vector<2x1xf32>
    %36 = arith.maximumf %34, %35 : vector<2x1xf32>
    %c0_13 = arith.constant 0 : index
    %c0_14 = arith.constant 0 : index
    %37 = vector.load %arg4[%c0_13, %c0_14] : memref<1x10xf32, #tpu.memory_space<vmem>>, vector<1x10xf32>
    %38 = vector.broadcast %36 : vector<2x1xf32> to vector<2x10xf32>
    %39 = vector.broadcast %37 : vector<1x10xf32> to vector<2x10xf32>
    %40 = arith.mulf %38, %39 : vector<2x10xf32>
    %41 = arith.divf %3, %40 : vector<2x10xf32>
    %42 = vector.broadcast %30 : vector<2x1xf32> to vector<2x10xf32>
    %43 = arith.divf %42, %41 : vector<2x10xf32>
    %cst_15 = arith.constant dense<0xFF800000> : vector<2xf32>
    %44 = vector.multi_reduction <maximumf>, %43, %cst_15 [1] : vector<2x10xf32> to vector<2xf32>
    %45 = vector.shape_cast %44 : vector<2xf32> to vector<2x1xf32>
    %46 = vector.broadcast %45 : vector<2x1xf32> to vector<2x10xf32>
    %47 = arith.subf %43, %46 : vector<2x10xf32>
    %48 = math.exp %47 : vector<2x10xf32>
    %cst_16 = arith.constant dense<0.000000e+00> : vector<2xf32>
    %49 = vector.multi_reduction <add>, %48, %cst_16 [1] : vector<2x10xf32> to vector<2xf32>
    %50 = vector.shape_cast %49 : vector<2xf32> to vector<2x1xf32>
    %51 = vector.broadcast %50 : vector<2x1xf32> to vector<2x10xf32>
    %52 = arith.divf %48, %51 : vector<2x10xf32>
    %c0_17 = arith.constant 0 : index
    %c0_18 = arith.constant 0 : index
    %53 = vector.load %arg5[%c0_17, %c0_18] : memref<2x10xf32, #tpu.memory_space<vmem>>, vector<2x10xf32>
    tpu.vector_store %arg5[%c0_17, %c0_18], %52 {strides = array<i32>} : memref<2x10xf32, #tpu.memory_space<vmem>>, vector<2x10xf32>,
    return
  }
  func.func @transform_0(%arg0: i32) -> (i32, i32) {
    %c0_i32 = arith.constant 0 : i32
    %c0_i32_0 = arith.constant 0 : i32
    %c0_i32_1 = arith.constant 0 : i32
    return %c0_i32, %c0_i32_0 : i32, i32
  }
  func.func @transform_1(%arg0: i32) -> (i32, i32) {
    %c0_i32 = arith.constant 0 : i32
    %c0_i32_0 = arith.constant 0 : i32
    %c0_i32_1 = arith.constant 0 : i32
    return %c0_i32, %c0_i32_0 : i32, i32
  }
  func.func @transform_2(%arg0: i32) -> (i32, i32) {
    %c0_i32 = arith.constant 0 : i32
    %c0_i32_0 = arith.constant 0 : i32
    %c0_i32_1 = arith.constant 0 : i32
    return %c0_i32, %c0_i32_0 : i32, i32
  }
  func.func @transform_3(%arg0: i32) -> (i32, i32) {
    %c0_i32 = arith.constant 0 : i32
    %c0_i32_0 = arith.constant 0 : i32
    %c0_i32_1 = arith.constant 0 : i32
    return %c0_i32, %c0_i32_0 : i32, i32
  }
  func.func @transform_4(%arg0: i32) -> (i32, i32) {
    %c0_i32 = arith.constant 0 : i32
    %c0_i32_0 = arith.constant 0 : i32
    %c0_i32_1 = arith.constant 0 : i32
    return %c0_i32, %c0_i32_0 : i32, i32
  }
}

module attributes {stable_mosaic.version = 11 : i64} {
  func.func @_feature_kernel(%arg0: i32, %arg1: memref<1x32x96xf32, #tpu.memory_space<vmem>>, %arg2: memref<5x2x96x56xf32, #tpu.memory_space<vmem>>, %arg3: memref<1x56xf32, #tpu.memory_space<vmem>>, %arg4: memref<5x2x56x60xf32, #tpu.memory_space<vmem>>, %arg5: memref<1x60xf32, #tpu.memory_space<vmem>>, %arg6: memref<5x60x120xf32, #tpu.memory_space<vmem>>, %arg7: memref<1x120xf32, #tpu.memory_space<vmem>>, %arg8: memref<120x64xf32, #tpu.memory_space<vmem>>, %arg9: memref<1x64xf32, #tpu.memory_space<vmem>>, %arg10: memref<1x1x64xf32, #tpu.memory_space<vmem>>, %arg11: memref<14x56xf32, #tpu.memory_space<vmem>>, %arg12: memref<5x60xf32, #tpu.memory_space<vmem>>) attributes {dimension_semantics = [#tpu.dimension_semantics<parallel>], iteration_bounds = array<i64: 2>, scalar_prefetch = 0 : i64, scratch_operands = 2 : i64, tpu.core_type = #tpu.core_type<tc>, window_params = [{transform_indices = @transform_0, window_bounds = array<i64: 1, 32, 96>}, {pipeline_mode = #tpu.pipeline_mode<synchronous>, transform_indices = @transform_1, window_bounds = array<i64: 5, 2, 96, 56>}, {pipeline_mode = #tpu.pipeline_mode<synchronous>, transform_indices = @transform_2, window_bounds = array<i64: 1, 56>}, {pipeline_mode = #tpu.pipeline_mode<synchronous>, transform_indices = @transform_3, window_bounds = array<i64: 5, 2, 56, 60>}, {pipeline_mode = #tpu.pipeline_mode<synchronous>, transform_indices = @transform_4, window_bounds = array<i64: 1, 60>}, {pipeline_mode = #tpu.pipeline_mode<synchronous>, transform_indices = @transform_5, window_bounds = array<i64: 5, 60, 120>}, {pipeline_mode = #tpu.pipeline_mode<synchronous>, transform_indices = @transform_6, window_bounds = array<i64: 1, 120>}, {pipeline_mode = #tpu.pipeline_mode<synchronous>, transform_indices = @transform_7, window_bounds = array<i64: 120, 64>}, {pipeline_mode = #tpu.pipeline_mode<synchronous>, transform_indices = @transform_8, window_bounds = array<i64: 1, 64>}, {transform_indices = @transform_9, window_bounds = array<i64: 1, 1, 64>}]} {
    %c0 = arith.constant 0 : index
    %c0_0 = arith.constant 0 : index
    %0 = vector.load %arg3[%c0, %c0_0] : memref<1x56xf32, #tpu.memory_space<vmem>>, vector<1x56xf32>
    %c0_1 = arith.constant 0 : index
    %c0_2 = arith.constant 0 : index
    %c0_3 = arith.constant 0 : index
    %c0_4 = arith.constant 0 : index
    %1 = vector.load %arg2[%c0_1, %c0_2, %c0_3, %c0_4] : memref<5x2x96x56xf32, #tpu.memory_space<vmem>>, vector<1x1x96x56xf32>
    %2 = vector.shape_cast %1 : vector<1x1x96x56xf32> to vector<96x56xf32>
    %c0_5 = arith.constant 0 : index
    %c1 = arith.constant 1 : index
    %c0_6 = arith.constant 0 : index
    %c0_7 = arith.constant 0 : index
    %3 = vector.load %arg2[%c0_5, %c1, %c0_6, %c0_7] : memref<5x2x96x56xf32, #tpu.memory_space<vmem>>, vector<1x1x96x56xf32>
    %4 = vector.shape_cast %3 : vector<1x1x96x56xf32> to vector<96x56xf32>
    %c0_8 = arith.constant 0 : index
    %c0_9 = arith.constant 0 : index
    %c0_10 = arith.constant 0 : index
    %5 = tpu.strided_load %arg1[%c0_8, %c0_9, %c0_10] {strides = array<i32: 1, 2, 1>} : memref<1x32x96xf32, #tpu.memory_space<vmem>>, vector<1x14x96xf32>
    %6 = vector.shape_cast %5 : vector<1x14x96xf32> to vector<14x96xf32>
    %cst = arith.constant dense<0.000000e+00> : vector<14x56xf32>
    %7 = tpu.matmul %6, %2, %cst {dimension_numbers = #tpu.dot_dimension_numbers<[1], [0], [0], [1], [0, 0, 1, 1], [], []>, precision = #tpu.contract_precision<fp32>} : vector<14x96xf32>, vector<96x56xf32>, vector<14x56xf32> -> vector<14x56xf32>
    %cst_11 = arith.constant dense<0.000000e+00> : vector<14x56xf32>
    %8 = tpu.matmul %6, %4, %cst_11 {dimension_numbers = #tpu.dot_dimension_numbers<[1], [0], [0], [1], [0, 0, 1, 1], [], []>, precision = #tpu.contract_precision<fp32>} : vector<14x96xf32>, vector<96x56xf32>, vector<14x56xf32> -> vector<14x56xf32>
    %c0_12 = arith.constant 0 : index
    %c1_13 = arith.constant 1 : index
    %c0_14 = arith.constant 0 : index
    %9 = tpu.strided_load %arg1[%c0_12, %c1_13, %c0_14] {strides = array<i32: 1, 2, 1>} : memref<1x32x96xf32, #tpu.memory_space<vmem>>, vector<1x14x96xf32>
    %10 = vector.shape_cast %9 : vector<1x14x96xf32> to vector<14x96xf32>
    %cst_15 = arith.constant dense<0.000000e+00> : vector<14x56xf32>
    %11 = tpu.matmul %10, %2, %cst_15 {dimension_numbers = #tpu.dot_dimension_numbers<[1], [0], [0], [1], [0, 0, 1, 1], [], []>, precision = #tpu.contract_precision<fp32>} : vector<14x96xf32>, vector<96x56xf32>, vector<14x56xf32> -> vector<14x56xf32>
    %cst_16 = arith.constant dense<0.000000e+00> : vector<14x56xf32>
    %12 = tpu.matmul %10, %4, %cst_16 {dimension_numbers = #tpu.dot_dimension_numbers<[1], [0], [0], [1], [0, 0, 1, 1], [], []>, precision = #tpu.contract_precision<fp32>} : vector<14x96xf32>, vector<96x56xf32>, vector<14x56xf32> -> vector<14x56xf32>
    %c1_17 = arith.constant 1 : index
    %c0_18 = arith.constant 0 : index
    %c0_19 = arith.constant 0 : index
    %c0_20 = arith.constant 0 : index
    %13 = vector.load %arg2[%c1_17, %c0_18, %c0_19, %c0_20] : memref<5x2x96x56xf32, #tpu.memory_space<vmem>>, vector<1x1x96x56xf32>
    %14 = vector.shape_cast %13 : vector<1x1x96x56xf32> to vector<96x56xf32>
    %c1_21 = arith.constant 1 : index
    %c1_22 = arith.constant 1 : index
    %c0_23 = arith.constant 0 : index
    %c0_24 = arith.constant 0 : index
    %15 = vector.load %arg2[%c1_21, %c1_22, %c0_23, %c0_24] : memref<5x2x96x56xf32, #tpu.memory_space<vmem>>, vector<1x1x96x56xf32>
    %16 = vector.shape_cast %15 : vector<1x1x96x56xf32> to vector<96x56xf32>
    %c0_25 = arith.constant 0 : index
    %c1_26 = arith.constant 1 : index
    %c0_27 = arith.constant 0 : index
    %17 = tpu.strided_load %arg1[%c0_25, %c1_26, %c0_27] {strides = array<i32: 1, 2, 1>} : memref<1x32x96xf32, #tpu.memory_space<vmem>>, vector<1x14x96xf32>
    %18 = vector.shape_cast %17 : vector<1x14x96xf32> to vector<14x96xf32>
    %cst_28 = arith.constant dense<0.000000e+00> : vector<14x56xf32>
    %19 = tpu.matmul %18, %14, %cst_28 {dimension_numbers = #tpu.dot_dimension_numbers<[1], [0], [0], [1], [0, 0, 1, 1], [], []>, precision = #tpu.contract_precision<fp32>} : vector<14x96xf32>, vector<96x56xf32>, vector<14x56xf32> -> vector<14x56xf32>
    %20 = arith.addf %7, %19 : vector<14x56xf32>
    %cst_29 = arith.constant dense<0.000000e+00> : vector<14x56xf32>
    %21 = tpu.matmul %18, %16, %cst_29 {dimension_numbers = #tpu.dot_dimension_numbers<[1], [0], [0], [1], [0, 0, 1, 1], [], []>, precision = #tpu.contract_precision<fp32>} : vector<14x96xf32>, vector<96x56xf32>, vector<14x56xf32> -> vector<14x56xf32>
    %22 = arith.addf %8, %21 : vector<14x56xf32>
    %c0_30 = arith.constant 0 : index
    %c2 = arith.constant 2 : index
    %c0_31 = arith.constant 0 : index
    %23 = tpu.strided_load %arg1[%c0_30, %c2, %c0_31] {strides = array<i32: 1, 2, 1>} : memref<1x32x96xf32, #tpu.memory_space<vmem>>, vector<1x14x96xf32>
    %24 = vector.shape_cast %23 : vector<1x14x96xf32> to vector<14x96xf32>
    %cst_32 = arith.constant dense<0.000000e+00> : vector<14x56xf32>
    %25 = tpu.matmul %24, %14, %cst_32 {dimension_numbers = #tpu.dot_dimension_numbers<[1], [0], [0], [1], [0, 0, 1, 1], [], []>, precision = #tpu.contract_precision<fp32>} : vector<14x96xf32>, vector<96x56xf32>, vector<14x56xf32> -> vector<14x56xf32>
    %26 = arith.addf %11, %25 : vector<14x56xf32>
    %cst_33 = arith.constant dense<0.000000e+00> : vector<14x56xf32>
    %27 = tpu.matmul %24, %16, %cst_33 {dimension_numbers = #tpu.dot_dimension_numbers<[1], [0], [0], [1], [0, 0, 1, 1], [], []>, precision = #tpu.contract_precision<fp32>} : vector<14x96xf32>, vector<96x56xf32>, vector<14x56xf32> -> vector<14x56xf32>
    %28 = arith.addf %12, %27 : vector<14x56xf32>
    %c2_34 = arith.constant 2 : index
    %c0_35 = arith.constant 0 : index
    %c0_36 = arith.constant 0 : index
    %c0_37 = arith.constant 0 : index
    %29 = vector.load %arg2[%c2_34, %c0_35, %c0_36, %c0_37] : memref<5x2x96x56xf32, #tpu.memory_space<vmem>>, vector<1x1x96x56xf32>
    %30 = vector.shape_cast %29 : vector<1x1x96x56xf32> to vector<96x56xf32>
    %c2_38 = arith.constant 2 : index
    %c1_39 = arith.constant 1 : index
    %c0_40 = arith.constant 0 : index
    %c0_41 = arith.constant 0 : index
    %31 = vector.load %arg2[%c2_38, %c1_39, %c0_40, %c0_41] : memref<5x2x96x56xf32, #tpu.memory_space<vmem>>, vector<1x1x96x56xf32>
    %32 = vector.shape_cast %31 : vector<1x1x96x56xf32> to vector<96x56xf32>
    %c0_42 = arith.constant 0 : index
    %c2_43 = arith.constant 2 : index
    %c0_44 = arith.constant 0 : index
    %33 = tpu.strided_load %arg1[%c0_42, %c2_43, %c0_44] {strides = array<i32: 1, 2, 1>} : memref<1x32x96xf32, #tpu.memory_space<vmem>>, vector<1x14x96xf32>
    %34 = vector.shape_cast %33 : vector<1x14x96xf32> to vector<14x96xf32>
    %cst_45 = arith.constant dense<0.000000e+00> : vector<14x56xf32>
    %35 = tpu.matmul %34, %30, %cst_45 {dimension_numbers = #tpu.dot_dimension_numbers<[1], [0], [0], [1], [0, 0, 1, 1], [], []>, precision = #tpu.contract_precision<fp32>} : vector<14x96xf32>, vector<96x56xf32>, vector<14x56xf32> -> vector<14x56xf32>
    %36 = arith.addf %20, %35 : vector<14x56xf32>
    %cst_46 = arith.constant dense<0.000000e+00> : vector<14x56xf32>
    %37 = tpu.matmul %34, %32, %cst_46 {dimension_numbers = #tpu.dot_dimension_numbers<[1], [0], [0], [1], [0, 0, 1, 1], [], []>, precision = #tpu.contract_precision<fp32>} : vector<14x96xf32>, vector<96x56xf32>, vector<14x56xf32> -> vector<14x56xf32>
    %38 = arith.addf %22, %37 : vector<14x56xf32>
    %c0_47 = arith.constant 0 : index
    %c3 = arith.constant 3 : index
    %c0_48 = arith.constant 0 : index
    %39 = tpu.strided_load %arg1[%c0_47, %c3, %c0_48] {strides = array<i32: 1, 2, 1>} : memref<1x32x96xf32, #tpu.memory_space<vmem>>, vector<1x14x96xf32>
    %40 = vector.shape_cast %39 : vector<1x14x96xf32> to vector<14x96xf32>
    %cst_49 = arith.constant dense<0.000000e+00> : vector<14x56xf32>
    %41 = tpu.matmul %40, %30, %cst_49 {dimension_numbers = #tpu.dot_dimension_numbers<[1], [0], [0], [1], [0, 0, 1, 1], [], []>, precision = #tpu.contract_precision<fp32>} : vector<14x96xf32>, vector<96x56xf32>, vector<14x56xf32> -> vector<14x56xf32>
    %42 = arith.addf %26, %41 : vector<14x56xf32>
    %cst_50 = arith.constant dense<0.000000e+00> : vector<14x56xf32>
    %43 = tpu.matmul %40, %32, %cst_50 {dimension_numbers = #tpu.dot_dimension_numbers<[1], [0], [0], [1], [0, 0, 1, 1], [], []>, precision = #tpu.contract_precision<fp32>} : vector<14x96xf32>, vector<96x56xf32>, vector<14x56xf32> -> vector<14x56xf32>
    %44 = arith.addf %28, %43 : vector<14x56xf32>
    %c3_51 = arith.constant 3 : index
    %c0_52 = arith.constant 0 : index
    %c0_53 = arith.constant 0 : index
    %c0_54 = arith.constant 0 : index
    %45 = vector.load %arg2[%c3_51, %c0_52, %c0_53, %c0_54] : memref<5x2x96x56xf32, #tpu.memory_space<vmem>>, vector<1x1x96x56xf32>
    %46 = vector.shape_cast %45 : vector<1x1x96x56xf32> to vector<96x56xf32>
    %c3_55 = arith.constant 3 : index
    %c1_56 = arith.constant 1 : index
    %c0_57 = arith.constant 0 : index
    %c0_58 = arith.constant 0 : index
    %47 = vector.load %arg2[%c3_55, %c1_56, %c0_57, %c0_58] : memref<5x2x96x56xf32, #tpu.memory_space<vmem>>, vector<1x1x96x56xf32>
    %48 = vector.shape_cast %47 : vector<1x1x96x56xf32> to vector<96x56xf32>
    %c0_59 = arith.constant 0 : index
    %c3_60 = arith.constant 3 : index
    %c0_61 = arith.constant 0 : index
    %49 = tpu.strided_load %arg1[%c0_59, %c3_60, %c0_61] {strides = array<i32: 1, 2, 1>} : memref<1x32x96xf32, #tpu.memory_space<vmem>>, vector<1x14x96xf32>
    %50 = vector.shape_cast %49 : vector<1x14x96xf32> to vector<14x96xf32>
    %cst_62 = arith.constant dense<0.000000e+00> : vector<14x56xf32>
    %51 = tpu.matmul %50, %46, %cst_62 {dimension_numbers = #tpu.dot_dimension_numbers<[1], [0], [0], [1], [0, 0, 1, 1], [], []>, precision = #tpu.contract_precision<fp32>} : vector<14x96xf32>, vector<96x56xf32>, vector<14x56xf32> -> vector<14x56xf32>
    %52 = arith.addf %36, %51 : vector<14x56xf32>
    %cst_63 = arith.constant dense<0.000000e+00> : vector<14x56xf32>
    %53 = tpu.matmul %50, %48, %cst_63 {dimension_numbers = #tpu.dot_dimension_numbers<[1], [0], [0], [1], [0, 0, 1, 1], [], []>, precision = #tpu.contract_precision<fp32>} : vector<14x96xf32>, vector<96x56xf32>, vector<14x56xf32> -> vector<14x56xf32>
    %54 = arith.addf %38, %53 : vector<14x56xf32>
    %c0_64 = arith.constant 0 : index
    %c4 = arith.constant 4 : index
    %c0_65 = arith.constant 0 : index
    %55 = tpu.strided_load %arg1[%c0_64, %c4, %c0_65] {strides = array<i32: 1, 2, 1>} : memref<1x32x96xf32, #tpu.memory_space<vmem>>, vector<1x14x96xf32>
    %56 = vector.shape_cast %55 : vector<1x14x96xf32> to vector<14x96xf32>
    %cst_66 = arith.constant dense<0.000000e+00> : vector<14x56xf32>
    %57 = tpu.matmul %56, %46, %cst_66 {dimension_numbers = #tpu.dot_dimension_numbers<[1], [0], [0], [1], [0, 0, 1, 1], [], []>, precision = #tpu.contract_precision<fp32>} : vector<14x96xf32>, vector<96x56xf32>, vector<14x56xf32> -> vector<14x56xf32>
    %58 = arith.addf %42, %57 : vector<14x56xf32>
    %cst_67 = arith.constant dense<0.000000e+00> : vector<14x56xf32>
    %59 = tpu.matmul %56, %48, %cst_67 {dimension_numbers = #tpu.dot_dimension_numbers<[1], [0], [0], [1], [0, 0, 1, 1], [], []>, precision = #tpu.contract_precision<fp32>} : vector<14x96xf32>, vector<96x56xf32>, vector<14x56xf32> -> vector<14x56xf32>
    %60 = arith.addf %44, %59 : vector<14x56xf32>
    %c4_68 = arith.constant 4 : index
    %c0_69 = arith.constant 0 : index
    %c0_70 = arith.constant 0 : index
    %c0_71 = arith.constant 0 : index
    %61 = vector.load %arg2[%c4_68, %c0_69, %c0_70, %c0_71] : memref<5x2x96x56xf32, #tpu.memory_space<vmem>>, vector<1x1x96x56xf32>
    %62 = vector.shape_cast %61 : vector<1x1x96x56xf32> to vector<96x56xf32>
    %c4_72 = arith.constant 4 : index
    %c1_73 = arith.constant 1 : index
    %c0_74 = arith.constant 0 : index
    %c0_75 = arith.constant 0 : index
    %63 = vector.load %arg2[%c4_72, %c1_73, %c0_74, %c0_75] : memref<5x2x96x56xf32, #tpu.memory_space<vmem>>, vector<1x1x96x56xf32>
    %64 = vector.shape_cast %63 : vector<1x1x96x56xf32> to vector<96x56xf32>
    %c0_76 = arith.constant 0 : index
    %c4_77 = arith.constant 4 : index
    %c0_78 = arith.constant 0 : index
    %65 = tpu.strided_load %arg1[%c0_76, %c4_77, %c0_78] {strides = array<i32: 1, 2, 1>} : memref<1x32x96xf32, #tpu.memory_space<vmem>>, vector<1x14x96xf32>
    %66 = vector.shape_cast %65 : vector<1x14x96xf32> to vector<14x96xf32>
    %cst_79 = arith.constant dense<0.000000e+00> : vector<14x56xf32>
    %67 = tpu.matmul %66, %62, %cst_79 {dimension_numbers = #tpu.dot_dimension_numbers<[1], [0], [0], [1], [0, 0, 1, 1], [], []>, precision = #tpu.contract_precision<fp32>} : vector<14x96xf32>, vector<96x56xf32>, vector<14x56xf32> -> vector<14x56xf32>
    %68 = arith.addf %52, %67 : vector<14x56xf32>
    %cst_80 = arith.constant dense<0.000000e+00> : vector<14x56xf32>
    %69 = tpu.matmul %66, %64, %cst_80 {dimension_numbers = #tpu.dot_dimension_numbers<[1], [0], [0], [1], [0, 0, 1, 1], [], []>, precision = #tpu.contract_precision<fp32>} : vector<14x96xf32>, vector<96x56xf32>, vector<14x56xf32> -> vector<14x56xf32>
    %70 = arith.addf %54, %69 : vector<14x56xf32>
    %c0_81 = arith.constant 0 : index
    %c5 = arith.constant 5 : index
    %c0_82 = arith.constant 0 : index
    %71 = tpu.strided_load %arg1[%c0_81, %c5, %c0_82] {strides = array<i32: 1, 2, 1>} : memref<1x32x96xf32, #tpu.memory_space<vmem>>, vector<1x14x96xf32>
    %72 = vector.shape_cast %71 : vector<1x14x96xf32> to vector<14x96xf32>
    %cst_83 = arith.constant dense<0.000000e+00> : vector<14x56xf32>
    %73 = tpu.matmul %72, %62, %cst_83 {dimension_numbers = #tpu.dot_dimension_numbers<[1], [0], [0], [1], [0, 0, 1, 1], [], []>, precision = #tpu.contract_precision<fp32>} : vector<14x96xf32>, vector<96x56xf32>, vector<14x56xf32> -> vector<14x56xf32>
    %74 = arith.addf %58, %73 : vector<14x56xf32>
    %cst_84 = arith.constant dense<0.000000e+00> : vector<14x56xf32>
    %75 = tpu.matmul %72, %64, %cst_84 {dimension_numbers = #tpu.dot_dimension_numbers<[1], [0], [0], [1], [0, 0, 1, 1], [], []>, precision = #tpu.contract_precision<fp32>} : vector<14x96xf32>, vector<96x56xf32>, vector<14x56xf32> -> vector<14x56xf32>
    %76 = arith.addf %60, %75 : vector<14x56xf32>
    %77 = arith.maximumf %68, %70 : vector<14x56xf32>
    %78 = arith.maximumf %74, %76 : vector<14x56xf32>
    %79 = arith.maximumf %77, %78 : vector<14x56xf32>
    %80 = vector.broadcast %0 : vector<1x56xf32> to vector<14x56xf32>
    %81 = arith.addf %79, %80 : vector<14x56xf32>
    %cst_85 = arith.constant 0.000000e+00 : f32
    %82 = vector.broadcast %cst_85 : f32 to vector<14x56xf32>
    %83 = arith.maximumf %81, %82 : vector<14x56xf32>
    %c0_86 = arith.constant 0 : index
    %c0_87 = arith.constant 0 : index
    %84 = vector.load %arg11[%c0_86, %c0_87] : memref<14x56xf32, #tpu.memory_space<vmem>>, vector<14x56xf32>
    tpu.vector_store %arg11[%c0_86, %c0_87], %83 {strides = array<i32>} : memref<14x56xf32, #tpu.memory_space<vmem>>, vector<14x56xf32>,
    %c0_88 = arith.constant 0 : index
    %c0_89 = arith.constant 0 : index
    %85 = vector.load %arg5[%c0_88, %c0_89] : memref<1x60xf32, #tpu.memory_space<vmem>>, vector<1x60xf32>
    %c0_90 = arith.constant 0 : index
    %c0_91 = arith.constant 0 : index
    %c0_92 = arith.constant 0 : index
    %c0_93 = arith.constant 0 : index
    %86 = vector.load %arg4[%c0_90, %c0_91, %c0_92, %c0_93] : memref<5x2x56x60xf32, #tpu.memory_space<vmem>>, vector<1x1x56x60xf32>
    %87 = vector.shape_cast %86 : vector<1x1x56x60xf32> to vector<56x60xf32>
    %c0_94 = arith.constant 0 : index
    %c1_95 = arith.constant 1 : index
    %c0_96 = arith.constant 0 : index
    %c0_97 = arith.constant 0 : index
    %88 = vector.load %arg4[%c0_94, %c1_95, %c0_96, %c0_97] : memref<5x2x56x60xf32, #tpu.memory_space<vmem>>, vector<1x1x56x60xf32>
    %89 = vector.shape_cast %88 : vector<1x1x56x60xf32> to vector<56x60xf32>
    %c0_98 = arith.constant 0 : index
    %c0_99 = arith.constant 0 : index
    %90 = tpu.strided_load %arg11[%c0_98, %c0_99] {strides = array<i32: 2, 1>} : memref<14x56xf32, #tpu.memory_space<vmem>>, vector<5x56xf32>
    %cst_100 = arith.constant dense<0.000000e+00> : vector<5x60xf32>
    %91 = tpu.matmul %90, %87, %cst_100 {dimension_numbers = #tpu.dot_dimension_numbers<[1], [0], [0], [1], [0, 0, 1, 1], [], []>, precision = #tpu.contract_precision<fp32>} : vector<5x56xf32>, vector<56x60xf32>, vector<5x60xf32> -> vector<5x60xf32>
    %cst_101 = arith.constant dense<0.000000e+00> : vector<5x60xf32>
    %92 = tpu.matmul %90, %89, %cst_101 {dimension_numbers = #tpu.dot_dimension_numbers<[1], [0], [0], [1], [0, 0, 1, 1], [], []>, precision = #tpu.contract_precision<fp32>} : vector<5x56xf32>, vector<56x60xf32>, vector<5x60xf32> -> vector<5x60xf32>
    %c1_102 = arith.constant 1 : index
    %c0_103 = arith.constant 0 : index
    %93 = tpu.strided_load %arg11[%c1_102, %c0_103] {strides = array<i32: 2, 1>} : memref<14x56xf32, #tpu.memory_space<vmem>>, vector<5x56xf32>
    %cst_104 = arith.constant dense<0.000000e+00> : vector<5x60xf32>
    %94 = tpu.matmul %93, %87, %cst_104 {dimension_numbers = #tpu.dot_dimension_numbers<[1], [0], [0], [1], [0, 0, 1, 1], [], []>, precision = #tpu.contract_precision<fp32>} : vector<5x56xf32>, vector<56x60xf32>, vector<5x60xf32> -> vector<5x60xf32>
    %cst_105 = arith.constant dense<0.000000e+00> : vector<5x60xf32>
    %95 = tpu.matmul %93, %89, %cst_105 {dimension_numbers = #tpu.dot_dimension_numbers<[1], [0], [0], [1], [0, 0, 1, 1], [], []>, precision = #tpu.contract_precision<fp32>} : vector<5x56xf32>, vector<56x60xf32>, vector<5x60xf32> -> vector<5x60xf32>
    %c1_106 = arith.constant 1 : index
    %c0_107 = arith.constant 0 : index
    %c0_108 = arith.constant 0 : index
    %c0_109 = arith.constant 0 : index
    %96 = vector.load %arg4[%c1_106, %c0_107, %c0_108, %c0_109] : memref<5x2x56x60xf32, #tpu.memory_space<vmem>>, vector<1x1x56x60xf32>
    %97 = vector.shape_cast %96 : vector<1x1x56x60xf32> to vector<56x60xf32>
    %c1_110 = arith.constant 1 : index
    %c1_111 = arith.constant 1 : index
    %c0_112 = arith.constant 0 : index
    %c0_113 = arith.constant 0 : index
    %98 = vector.load %arg4[%c1_110, %c1_111, %c0_112, %c0_113] : memref<5x2x56x60xf32, #tpu.memory_space<vmem>>, vector<1x1x56x60xf32>
    %99 = vector.shape_cast %98 : vector<1x1x56x60xf32> to vector<56x60xf32>
    %c1_114 = arith.constant 1 : index
    %c0_115 = arith.constant 0 : index
    %100 = tpu.strided_load %arg11[%c1_114, %c0_115] {strides = array<i32: 2, 1>} : memref<14x56xf32, #tpu.memory_space<vmem>>, vector<5x56xf32>
    %cst_116 = arith.constant dense<0.000000e+00> : vector<5x60xf32>
    %101 = tpu.matmul %100, %97, %cst_116 {dimension_numbers = #tpu.dot_dimension_numbers<[1], [0], [0], [1], [0, 0, 1, 1], [], []>, precision = #tpu.contract_precision<fp32>} : vector<5x56xf32>, vector<56x60xf32>, vector<5x60xf32> -> vector<5x60xf32>
    %102 = arith.addf %91, %101 : vector<5x60xf32>
    %cst_117 = arith.constant dense<0.000000e+00> : vector<5x60xf32>
    %103 = tpu.matmul %100, %99, %cst_117 {dimension_numbers = #tpu.dot_dimension_numbers<[1], [0], [0], [1], [0, 0, 1, 1], [], []>, precision = #tpu.contract_precision<fp32>} : vector<5x56xf32>, vector<56x60xf32>, vector<5x60xf32> -> vector<5x60xf32>
    %104 = arith.addf %92, %103 : vector<5x60xf32>
    %c2_118 = arith.constant 2 : index
    %c0_119 = arith.constant 0 : index
    %105 = tpu.strided_load %arg11[%c2_118, %c0_119] {strides = array<i32: 2, 1>} : memref<14x56xf32, #tpu.memory_space<vmem>>, vector<5x56xf32>
    %cst_120 = arith.constant dense<0.000000e+00> : vector<5x60xf32>
    %106 = tpu.matmul %105, %97, %cst_120 {dimension_numbers = #tpu.dot_dimension_numbers<[1], [0], [0], [1], [0, 0, 1, 1], [], []>, precision = #tpu.contract_precision<fp32>} : vector<5x56xf32>, vector<56x60xf32>, vector<5x60xf32> -> vector<5x60xf32>
    %107 = arith.addf %94, %106 : vector<5x60xf32>
    %cst_121 = arith.constant dense<0.000000e+00> : vector<5x60xf32>
    %108 = tpu.matmul %105, %99, %cst_121 {dimension_numbers = #tpu.dot_dimension_numbers<[1], [0], [0], [1], [0, 0, 1, 1], [], []>, precision = #tpu.contract_precision<fp32>} : vector<5x56xf32>, vector<56x60xf32>, vector<5x60xf32> -> vector<5x60xf32>
    %109 = arith.addf %95, %108 : vector<5x60xf32>
    %c2_122 = arith.constant 2 : index
    %c0_123 = arith.constant 0 : index
    %c0_124 = arith.constant 0 : index
    %c0_125 = arith.constant 0 : index
    %110 = vector.load %arg4[%c2_122, %c0_123, %c0_124, %c0_125] : memref<5x2x56x60xf32, #tpu.memory_space<vmem>>, vector<1x1x56x60xf32>
    %111 = vector.shape_cast %110 : vector<1x1x56x60xf32> to vector<56x60xf32>
    %c2_126 = arith.constant 2 : index
    %c1_127 = arith.constant 1 : index
    %c0_128 = arith.constant 0 : index
    %c0_129 = arith.constant 0 : index
    %112 = vector.load %arg4[%c2_126, %c1_127, %c0_128, %c0_129] : memref<5x2x56x60xf32, #tpu.memory_space<vmem>>, vector<1x1x56x60xf32>
    %113 = vector.shape_cast %112 : vector<1x1x56x60xf32> to vector<56x60xf32>
    %c2_130 = arith.constant 2 : index
    %c0_131 = arith.constant 0 : index
    %114 = tpu.strided_load %arg11[%c2_130, %c0_131] {strides = array<i32: 2, 1>} : memref<14x56xf32, #tpu.memory_space<vmem>>, vector<5x56xf32>
    %cst_132 = arith.constant dense<0.000000e+00> : vector<5x60xf32>
    %115 = tpu.matmul %114, %111, %cst_132 {dimension_numbers = #tpu.dot_dimension_numbers<[1], [0], [0], [1], [0, 0, 1, 1], [], []>, precision = #tpu.contract_precision<fp32>} : vector<5x56xf32>, vector<56x60xf32>, vector<5x60xf32> -> vector<5x60xf32>
    %116 = arith.addf %102, %115 : vector<5x60xf32>
    %cst_133 = arith.constant dense<0.000000e+00> : vector<5x60xf32>
    %117 = tpu.matmul %114, %113, %cst_133 {dimension_numbers = #tpu.dot_dimension_numbers<[1], [0], [0], [1], [0, 0, 1, 1], [], []>, precision = #tpu.contract_precision<fp32>} : vector<5x56xf32>, vector<56x60xf32>, vector<5x60xf32> -> vector<5x60xf32>
    %118 = arith.addf %104, %117 : vector<5x60xf32>
    %c3_134 = arith.constant 3 : index
    %c0_135 = arith.constant 0 : index
    %119 = tpu.strided_load %arg11[%c3_134, %c0_135] {strides = array<i32: 2, 1>} : memref<14x56xf32, #tpu.memory_space<vmem>>, vector<5x56xf32>
    %cst_136 = arith.constant dense<0.000000e+00> : vector<5x60xf32>
    %120 = tpu.matmul %119, %111, %cst_136 {dimension_numbers = #tpu.dot_dimension_numbers<[1], [0], [0], [1], [0, 0, 1, 1], [], []>, precision = #tpu.contract_precision<fp32>} : vector<5x56xf32>, vector<56x60xf32>, vector<5x60xf32> -> vector<5x60xf32>
    %121 = arith.addf %107, %120 : vector<5x60xf32>
    %cst_137 = arith.constant dense<0.000000e+00> : vector<5x60xf32>
    %122 = tpu.matmul %119, %113, %cst_137 {dimension_numbers = #tpu.dot_dimension_numbers<[1], [0], [0], [1], [0, 0, 1, 1], [], []>, precision = #tpu.contract_precision<fp32>} : vector<5x56xf32>, vector<56x60xf32>, vector<5x60xf32> -> vector<5x60xf32>
    %123 = arith.addf %109, %122 : vector<5x60xf32>
    %c3_138 = arith.constant 3 : index
    %c0_139 = arith.constant 0 : index
    %c0_140 = arith.constant 0 : index
    %c0_141 = arith.constant 0 : index
    %124 = vector.load %arg4[%c3_138, %c0_139, %c0_140, %c0_141] : memref<5x2x56x60xf32, #tpu.memory_space<vmem>>, vector<1x1x56x60xf32>
    %125 = vector.shape_cast %124 : vector<1x1x56x60xf32> to vector<56x60xf32>
    %c3_142 = arith.constant 3 : index
    %c1_143 = arith.constant 1 : index
    %c0_144 = arith.constant 0 : index
    %c0_145 = arith.constant 0 : index
    %126 = vector.load %arg4[%c3_142, %c1_143, %c0_144, %c0_145] : memref<5x2x56x60xf32, #tpu.memory_space<vmem>>, vector<1x1x56x60xf32>
    %127 = vector.shape_cast %126 : vector<1x1x56x60xf32> to vector<56x60xf32>
    %c3_146 = arith.constant 3 : index
    %c0_147 = arith.constant 0 : index
    %128 = tpu.strided_load %arg11[%c3_146, %c0_147] {strides = array<i32: 2, 1>} : memref<14x56xf32, #tpu.memory_space<vmem>>, vector<5x56xf32>
    %cst_148 = arith.constant dense<0.000000e+00> : vector<5x60xf32>
    %129 = tpu.matmul %128, %125, %cst_148 {dimension_numbers = #tpu.dot_dimension_numbers<[1], [0], [0], [1], [0, 0, 1, 1], [], []>, precision = #tpu.contract_precision<fp32>} : vector<5x56xf32>, vector<56x60xf32>, vector<5x60xf32> -> vector<5x60xf32>
    %130 = arith.addf %116, %129 : vector<5x60xf32>
    %cst_149 = arith.constant dense<0.000000e+00> : vector<5x60xf32>
    %131 = tpu.matmul %128, %127, %cst_149 {dimension_numbers = #tpu.dot_dimension_numbers<[1], [0], [0], [1], [0, 0, 1, 1], [], []>, precision = #tpu.contract_precision<fp32>} : vector<5x56xf32>, vector<56x60xf32>, vector<5x60xf32> -> vector<5x60xf32>
    %132 = arith.addf %118, %131 : vector<5x60xf32>
    %c4_150 = arith.constant 4 : index
    %c0_151 = arith.constant 0 : index
    %133 = tpu.strided_load %arg11[%c4_150, %c0_151] {strides = array<i32: 2, 1>} : memref<14x56xf32, #tpu.memory_space<vmem>>, vector<5x56xf32>
    %cst_152 = arith.constant dense<0.000000e+00> : vector<5x60xf32>
    %134 = tpu.matmul %133, %125, %cst_152 {dimension_numbers = #tpu.dot_dimension_numbers<[1], [0], [0], [1], [0, 0, 1, 1], [], []>, precision = #tpu.contract_precision<fp32>} : vector<5x56xf32>, vector<56x60xf32>, vector<5x60xf32> -> vector<5x60xf32>
    %135 = arith.addf %121, %134 : vector<5x60xf32>
    %cst_153 = arith.constant dense<0.000000e+00> : vector<5x60xf32>
    %136 = tpu.matmul %133, %127, %cst_153 {dimension_numbers = #tpu.dot_dimension_numbers<[1], [0], [0], [1], [0, 0, 1, 1], [], []>, precision = #tpu.contract_precision<fp32>} : vector<5x56xf32>, vector<56x60xf32>, vector<5x60xf32> -> vector<5x60xf32>
    %137 = arith.addf %123, %136 : vector<5x60xf32>
    %c4_154 = arith.constant 4 : index
    %c0_155 = arith.constant 0 : index
    %c0_156 = arith.constant 0 : index
    %c0_157 = arith.constant 0 : index
    %138 = vector.load %arg4[%c4_154, %c0_155, %c0_156, %c0_157] : memref<5x2x56x60xf32, #tpu.memory_space<vmem>>, vector<1x1x56x60xf32>
    %139 = vector.shape_cast %138 : vector<1x1x56x60xf32> to vector<56x60xf32>
    %c4_158 = arith.constant 4 : index
    %c1_159 = arith.constant 1 : index
    %c0_160 = arith.constant 0 : index
    %c0_161 = arith.constant 0 : index
    %140 = vector.load %arg4[%c4_158, %c1_159, %c0_160, %c0_161] : memref<5x2x56x60xf32, #tpu.memory_space<vmem>>, vector<1x1x56x60xf32>
    %141 = vector.shape_cast %140 : vector<1x1x56x60xf32> to vector<56x60xf32>
    %c4_162 = arith.constant 4 : index
    %c0_163 = arith.constant 0 : index
    %142 = tpu.strided_load %arg11[%c4_162, %c0_163] {strides = array<i32: 2, 1>} : memref<14x56xf32, #tpu.memory_space<vmem>>, vector<5x56xf32>
    %cst_164 = arith.constant dense<0.000000e+00> : vector<5x60xf32>
    %143 = tpu.matmul %142, %139, %cst_164 {dimension_numbers = #tpu.dot_dimension_numbers<[1], [0], [0], [1], [0, 0, 1, 1], [], []>, precision = #tpu.contract_precision<fp32>} : vector<5x56xf32>, vector<56x60xf32>, vector<5x60xf32> -> vector<5x60xf32>
    %144 = arith.addf %130, %143 : vector<5x60xf32>
    %cst_165 = arith.constant dense<0.000000e+00> : vector<5x60xf32>
    %145 = tpu.matmul %142, %141, %cst_165 {dimension_numbers = #tpu.dot_dimension_numbers<[1], [0], [0], [1], [0, 0, 1, 1], [], []>, precision = #tpu.contract_precision<fp32>} : vector<5x56xf32>, vector<56x60xf32>, vector<5x60xf32> -> vector<5x60xf32>
    %146 = arith.addf %132, %145 : vector<5x60xf32>
    %c5_166 = arith.constant 5 : index
    %c0_167 = arith.constant 0 : index
    %147 = tpu.strided_load %arg11[%c5_166, %c0_167] {strides = array<i32: 2, 1>} : memref<14x56xf32, #tpu.memory_space<vmem>>, vector<5x56xf32>
    %cst_168 = arith.constant dense<0.000000e+00> : vector<5x60xf32>
    %148 = tpu.matmul %147, %139, %cst_168 {dimension_numbers = #tpu.dot_dimension_numbers<[1], [0], [0], [1], [0, 0, 1, 1], [], []>, precision = #tpu.contract_precision<fp32>} : vector<5x56xf32>, vector<56x60xf32>, vector<5x60xf32> -> vector<5x60xf32>
    %149 = arith.addf %135, %148 : vector<5x60xf32>
    %cst_169 = arith.constant dense<0.000000e+00> : vector<5x60xf32>
    %150 = tpu.matmul %147, %141, %cst_169 {dimension_numbers = #tpu.dot_dimension_numbers<[1], [0], [0], [1], [0, 0, 1, 1], [], []>, precision = #tpu.contract_precision<fp32>} : vector<5x56xf32>, vector<56x60xf32>, vector<5x60xf32> -> vector<5x60xf32>
    %151 = arith.addf %137, %150 : vector<5x60xf32>
    %152 = arith.maximumf %144, %146 : vector<5x60xf32>
    %153 = arith.maximumf %149, %151 : vector<5x60xf32>
    %154 = arith.maximumf %152, %153 : vector<5x60xf32>
    %155 = vector.broadcast %85 : vector<1x60xf32> to vector<5x60xf32>
    %156 = arith.addf %154, %155 : vector<5x60xf32>
    %cst_170 = arith.constant 0.000000e+00 : f32
    %157 = vector.broadcast %cst_170 : f32 to vector<5x60xf32>
    %158 = arith.maximumf %156, %157 : vector<5x60xf32>
    %c0_171 = arith.constant 0 : index
    %c0_172 = arith.constant 0 : index
    %159 = vector.load %arg12[%c0_171, %c0_172] : memref<5x60xf32, #tpu.memory_space<vmem>>, vector<5x60xf32>
    tpu.vector_store %arg12[%c0_171, %c0_172], %158 {strides = array<i32>} : memref<5x60xf32, #tpu.memory_space<vmem>>, vector<5x60xf32>,
    %c0_173 = arith.constant 0 : index
    %c0_174 = arith.constant 0 : index
    %160 = vector.load %arg7[%c0_173, %c0_174] : memref<1x120xf32, #tpu.memory_space<vmem>>, vector<1x120xf32>
    %c0_175 = arith.constant 0 : index
    %c0_176 = arith.constant 0 : index
    %161 = vector.load %arg12[%c0_175, %c0_176] : memref<5x60xf32, #tpu.memory_space<vmem>>, vector<1x60xf32>
    %c0_177 = arith.constant 0 : index
    %c0_178 = arith.constant 0 : index
    %c0_179 = arith.constant 0 : index
    %162 = vector.load %arg6[%c0_177, %c0_178, %c0_179] : memref<5x60x120xf32, #tpu.memory_space<vmem>>, vector<1x60x120xf32>
    %163 = vector.shape_cast %162 : vector<1x60x120xf32> to vector<60x120xf32>
    %cst_180 = arith.constant dense<0.000000e+00> : vector<1x120xf32>
    %164 = tpu.matmul %161, %163, %cst_180 {dimension_numbers = #tpu.dot_dimension_numbers<[1], [0], [0], [1], [0, 0, 1, 1], [], []>, precision = #tpu.contract_precision<fp32>} : vector<1x60xf32>, vector<60x120xf32>, vector<1x120xf32> -> vector<1x120xf32>
    %165 = arith.addf %160, %164 : vector<1x120xf32>
    %c1_181 = arith.constant 1 : index
    %c0_182 = arith.constant 0 : index
    %166 = vector.load %arg12[%c1_181, %c0_182] : memref<5x60xf32, #tpu.memory_space<vmem>>, vector<1x60xf32>
    %c1_183 = arith.constant 1 : index
    %c0_184 = arith.constant 0 : index
    %c0_185 = arith.constant 0 : index
    %167 = vector.load %arg6[%c1_183, %c0_184, %c0_185] : memref<5x60x120xf32, #tpu.memory_space<vmem>>, vector<1x60x120xf32>
    %168 = vector.shape_cast %167 : vector<1x60x120xf32> to vector<60x120xf32>
    %cst_186 = arith.constant dense<0.000000e+00> : vector<1x120xf32>
    %169 = tpu.matmul %166, %168, %cst_186 {dimension_numbers = #tpu.dot_dimension_numbers<[1], [0], [0], [1], [0, 0, 1, 1], [], []>, precision = #tpu.contract_precision<fp32>} : vector<1x60xf32>, vector<60x120xf32>, vector<1x120xf32> -> vector<1x120xf32>
    %170 = arith.addf %165, %169 : vector<1x120xf32>
    %c2_187 = arith.constant 2 : index
    %c0_188 = arith.constant 0 : index
    %171 = vector.load %arg12[%c2_187, %c0_188] : memref<5x60xf32, #tpu.memory_space<vmem>>, vector<1x60xf32>
    %c2_189 = arith.constant 2 : index
    %c0_190 = arith.constant 0 : index
    %c0_191 = arith.constant 0 : index
    %172 = vector.load %arg6[%c2_189, %c0_190, %c0_191] : memref<5x60x120xf32, #tpu.memory_space<vmem>>, vector<1x60x120xf32>
    %173 = vector.shape_cast %172 : vector<1x60x120xf32> to vector<60x120xf32>
    %cst_192 = arith.constant dense<0.000000e+00> : vector<1x120xf32>
    %174 = tpu.matmul %171, %173, %cst_192 {dimension_numbers = #tpu.dot_dimension_numbers<[1], [0], [0], [1], [0, 0, 1, 1], [], []>, precision = #tpu.contract_precision<fp32>} : vector<1x60xf32>, vector<60x120xf32>, vector<1x120xf32> -> vector<1x120xf32>
    %175 = arith.addf %170, %174 : vector<1x120xf32>
    %c3_193 = arith.constant 3 : index
    %c0_194 = arith.constant 0 : index
    %176 = vector.load %arg12[%c3_193, %c0_194] : memref<5x60xf32, #tpu.memory_space<vmem>>, vector<1x60xf32>
    %c3_195 = arith.constant 3 : index
    %c0_196 = arith.constant 0 : index
    %c0_197 = arith.constant 0 : index
    %177 = vector.load %arg6[%c3_195, %c0_196, %c0_197] : memref<5x60x120xf32, #tpu.memory_space<vmem>>, vector<1x60x120xf32>
    %178 = vector.shape_cast %177 : vector<1x60x120xf32> to vector<60x120xf32>
    %cst_198 = arith.constant dense<0.000000e+00> : vector<1x120xf32>
    %179 = tpu.matmul %176, %178, %cst_198 {dimension_numbers = #tpu.dot_dimension_numbers<[1], [0], [0], [1], [0, 0, 1, 1], [], []>, precision = #tpu.contract_precision<fp32>} : vector<1x60xf32>, vector<60x120xf32>, vector<1x120xf32> -> vector<1x120xf32>
    %180 = arith.addf %175, %179 : vector<1x120xf32>
    %c4_199 = arith.constant 4 : index
    %c0_200 = arith.constant 0 : index
    %181 = vector.load %arg12[%c4_199, %c0_200] : memref<5x60xf32, #tpu.memory_space<vmem>>, vector<1x60xf32>
    %c4_201 = arith.constant 4 : index
    %c0_202 = arith.constant 0 : index
    %c0_203 = arith.constant 0 : index
    %182 = vector.load %arg6[%c4_201, %c0_202, %c0_203] : memref<5x60x120xf32, #tpu.memory_space<vmem>>, vector<1x60x120xf32>
    %183 = vector.shape_cast %182 : vector<1x60x120xf32> to vector<60x120xf32>
    %cst_204 = arith.constant dense<0.000000e+00> : vector<1x120xf32>
    %184 = tpu.matmul %181, %183, %cst_204 {dimension_numbers = #tpu.dot_dimension_numbers<[1], [0], [0], [1], [0, 0, 1, 1], [], []>, precision = #tpu.contract_precision<fp32>} : vector<1x60xf32>, vector<60x120xf32>, vector<1x120xf32> -> vector<1x120xf32>
    %185 = arith.addf %180, %184 : vector<1x120xf32>
    %cst_205 = arith.constant 0.000000e+00 : f32
    %186 = vector.broadcast %cst_205 : f32 to vector<1x120xf32>
    %187 = arith.maximumf %185, %186 : vector<1x120xf32>
    %c0_206 = arith.constant 0 : index
    %c0_207 = arith.constant 0 : index
    %188 = vector.load %arg8[%c0_206, %c0_207] : memref<120x64xf32, #tpu.memory_space<vmem>>, vector<120x64xf32>
    %cst_208 = arith.constant dense<0.000000e+00> : vector<1x64xf32>
    %189 = tpu.matmul %187, %188, %cst_208 {dimension_numbers = #tpu.dot_dimension_numbers<[1], [0], [0], [1], [0, 0, 1, 1], [], []>, precision = #tpu.contract_precision<fp32>} : vector<1x120xf32>, vector<120x64xf32>, vector<1x64xf32> -> vector<1x64xf32>
    %c0_209 = arith.constant 0 : index
    %c0_210 = arith.constant 0 : index
    %190 = vector.load %arg9[%c0_209, %c0_210] : memref<1x64xf32, #tpu.memory_space<vmem>>, vector<1x64xf32>
    %191 = arith.addf %189, %190 : vector<1x64xf32>
    %c0_211 = arith.constant 0 : index
    %c0_212 = arith.constant 0 : index
    %c0_213 = arith.constant 0 : index
    %192 = vector.load %arg10[%c0_211, %c0_212, %c0_213] : memref<1x1x64xf32, #tpu.memory_space<vmem>>, vector<1x1x64xf32>
    %193 = vector.shape_cast %192 : vector<1x1x64xf32> to vector<1x64xf32>
    %194 = vector.shape_cast %191 : vector<1x64xf32> to vector<1x1x64xf32>
    tpu.vector_store %arg10[%c0_211, %c0_212, %c0_213], %194 {strides = array<i32>} : memref<1x1x64xf32, #tpu.memory_space<vmem>>, vector<1x1x64xf32>,
    return
  }
  func.func @transform_0(%arg0: i32) -> (i32, i32, i32) {
    %c0_i32 = arith.constant 0 : i32
    %c0_i32_0 = arith.constant 0 : i32
    %c0_i32_1 = arith.constant 0 : i32
    return %arg0, %c0_i32, %c0_i32_0 : i32, i32, i32
  }
  func.func @transform_1(%arg0: i32) -> (i32, i32, i32, i32) {
    %c0_i32 = arith.constant 0 : i32
    %c0_i32_0 = arith.constant 0 : i32
    %c0_i32_1 = arith.constant 0 : i32
    %c0_i32_2 = arith.constant 0 : i32
    %c0_i32_3 = arith.constant 0 : i32
    return %c0_i32, %c0_i32_0, %c0_i32_1, %c0_i32_2 : i32, i32, i32, i32
  }
  func.func @transform_2(%arg0: i32) -> (i32, i32) {
    %c0_i32 = arith.constant 0 : i32
    %c0_i32_0 = arith.constant 0 : i32
    %c0_i32_1 = arith.constant 0 : i32
    return %c0_i32, %c0_i32_0 : i32, i32
  }
  func.func @transform_3(%arg0: i32) -> (i32, i32, i32, i32) {
    %c0_i32 = arith.constant 0 : i32
    %c0_i32_0 = arith.constant 0 : i32
    %c0_i32_1 = arith.constant 0 : i32
    %c0_i32_2 = arith.constant 0 : i32
    %c0_i32_3 = arith.constant 0 : i32
    return %c0_i32, %c0_i32_0, %c0_i32_1, %c0_i32_2 : i32, i32, i32, i32
  }
  func.func @transform_4(%arg0: i32) -> (i32, i32) {
    %c0_i32 = arith.constant 0 : i32
    %c0_i32_0 = arith.constant 0 : i32
    %c0_i32_1 = arith.constant 0 : i32
    return %c0_i32, %c0_i32_0 : i32, i32
  }
  func.func @transform_5(%arg0: i32) -> (i32, i32, i32) {
    %c0_i32 = arith.constant 0 : i32
    %c0_i32_0 = arith.constant 0 : i32
    %c0_i32_1 = arith.constant 0 : i32
    %c0_i32_2 = arith.constant 0 : i32
    return %c0_i32, %c0_i32_0, %c0_i32_1 : i32, i32, i32
  }
  func.func @transform_6(%arg0: i32) -> (i32, i32) {
    %c0_i32 = arith.constant 0 : i32
    %c0_i32_0 = arith.constant 0 : i32
    %c0_i32_1 = arith.constant 0 : i32
    return %c0_i32, %c0_i32_0 : i32, i32
  }
  func.func @transform_7(%arg0: i32) -> (i32, i32) {
    %c0_i32 = arith.constant 0 : i32
    %c0_i32_0 = arith.constant 0 : i32
    %c0_i32_1 = arith.constant 0 : i32
    return %c0_i32, %c0_i32_0 : i32, i32
  }
  func.func @transform_8(%arg0: i32) -> (i32, i32) {
    %c0_i32 = arith.constant 0 : i32
    %c0_i32_0 = arith.constant 0 : i32
    %c0_i32_1 = arith.constant 0 : i32
    return %c0_i32, %c0_i32_0 : i32, i32
  }
  func.func @transform_9(%arg0: i32) -> (i32, i32, i32) {
    %c0_i32 = arith.constant 0 : i32
    %c0_i32_0 = arith.constant 0 : i32
    %c0_i32_1 = arith.constant 0 : i32
    return %arg0, %c0_i32, %c0_i32_0 : i32, i32, i32
  }
}

</mosaic_0001>

<bundles_post_ra>
// kernel: gen_odin_forward.3
= control target key start
LH: loop header
LB: loop body
LE: loop exit
PB: predicated region body
PF: predicated region fallthrough
CT: control target
= control target key end

     0   :  { %s1158_s0 = inlined_call_operand.vmem [shape: f32[2,64], index: 0, kind: input, shape index: {}]   ;;  %s1159_s1 = inlined_call_operand.vmem [shape: f32[64,11], index: 1, kind: input, shape index: {}]   ;;  %s1160_s2 = inlined_call_operand.<no memory space> [shape: f32[1,1], index: 2, kind: input, shape index: {}]   ;;  %s1161_s3 = inlined_call_operand.vmem [shape: f32[1,10], index: 3, kind: input, shape index: {}]   ;;  %s1162_s4 = inlined_call_operand.hbm [shape: f32[2,10], index: 4, kind: output, shape index: {}]  }
   0x1   :  { %v9_v0 = vstv %s1160_s2 }
   0x2   :  { %10 = vst [vmem:[#allocation2] sm:$0x1] %v9_v0 }
   0x3   :  { %v21_v1 = vld [vmem:[%s1159_s1] sm:$0xff]  ;;  %v22_v2 = vld [vmem:[%s1159_s1 + $0x8] sm:$0xff]  ;;  %v23_v3 = vld [vmem:[%s1159_s1 + $0x10] sm:$0xff]  ;;  %v966_v4 = vmov 0.0|0.0   ;;  %vm967_vm0 = vmmov 0   ;;  %v968_v13 = vmov 0.0  }
   0x4   :  { %837 = vmatprep.subr.bf16.mxu1 %v966_v4  ;;  %873 = vmatprep.subr.bf16.mxu0 %v966_v4  ;;  %v34_v5 = vand.u32 4294901760, %v21_v1  ;;  %v37_v6 = vand.u32 4294901760, %v22_v2  ;;  %v24_v7 = vld [vmem:[%s1159_s1 + $0x18] sm:$0xff]  ;;  %v40_v8 = vand.u32 4294901760, %v23_v3  ;;  %v25_v9 = vld [vmem:[%s1159_s1 + $0x20] sm:$0xff]  ;;  %v26_v10 = vld [vmem:[%s1159_s1 + $0x28] sm:$0xff] }
   0x5   :  { %v43_v11 = vand.u32 4294901760, %v24_v7  ;;  %v46_v12 = vand.u32 4294901760, %v25_v9  ;;  %739 = vmatprep.mubr.msk.f32.mxu1 %vm967_vm0, %v968_v13  ;;  %796 = vmatprep.mubr.msk.f32.mxu0 %vm967_vm0, %v968_v13  ;;  %vm29_vm1 = vcmask 523264   ;;  %v49_v17 = vand.u32 4294901760, %v26_v10  ;;  %v1033_v18 = vld [vmem:[%s1158_s0] sm:$0x3] }
   0x6   :  { %v1024_v14 = vpack.c.bf16 %v37_v6, %v34_v5  ;;  %v1026_v15 = vsub.f32 %v21_v1, %v34_v5  ;;  %v1028_v16 = vsub.f32 %v22_v2, %v37_v6  ;;  %v1035_v20 = vsub.f32 %v23_v3, %v40_v8  ;;  %v27_v22 = vld [vmem:[%s1159_s1 + $0x30] sm:$0xff]  ;;  %v28_v23 = vld [vmem:[%s1159_s1 + $0x38] sm:$0xff]  ;;  %s969_s8 = smov 10  }
   0x7   :  { %v1037_v21 = vsub.f32 %v24_v7, %v43_v11 }
   0x9   :  { %v666_v19 = vld [vmem:[#allocation2] ss:$0 sm:$0xff] }
   0xa   :  { %576 = vrot.lane.b32.xlu0 %v666_v19, %s969_s8 }
   0xb   :  { %11 = vsyncpa [#allocation4], 0  ;;  %839 = vmatpush3.bf16.msra.mxu1 %v1024_v14  ;;  %875 = vmatpush3.bf16.msra.mxu0 %v1024_v14  ;;  %v1047_v24 = vpack.c.bf16 %v43_v11, %v40_v8  ;;  %v31_v25 = vsel %vm29_vm1, %v1033_v18, 0  ;;  %v119_v27 = vand.u32 4294901760, %v1026_v15  ;;  %v126_v28 = vand.u32 4294901760, %v1028_v16 }
   0xc   :  { %840 = vmatprep.subr.bf16.mxu1 %v966_v4  ;;  %876 = vmatprep.subr.bf16.mxu0 %v966_v4  ;;  %v1053_v26 = vand.u32 4294901760, %v31_v25  ;;  %v1057_v29 = vpack.c.bf16 %v49_v17, %v46_v12  ;;  %v52_v30 = vand.u32 4294901760, %v27_v22  ;;  %v55_v31 = vand.u32 4294901760, %v28_v23 }
   0xd   :  { %v1059_v32 = vsub.f32 %v25_v9, %v46_v12  ;;  %v133_v34 = vand.u32 4294901760, %v1035_v20  ;;  %v140_v35 = vand.u32 4294901760, %v1037_v21  ;;  %v1068_v36 = vsub.f32 %v26_v10, %v49_v17 }
   0xe   :  { %v1062_v33 = vsub.f32 %v31_v25, %v1053_v26  ;;  %v120_v37 = vsub.f32 %v1026_v15, %v119_v27  ;;  %v127_v38 = vsub.f32 %v1028_v16, %v126_v28  ;;  %v1075_v40 = vpack.c.bf16 %v55_v31, %v52_v30 }
   0xf   :  { %842 = vmatpush3.bf16.msra.mxu1 %v1047_v24  ;;  %878 = vmatpush3.bf16.msra.mxu0 %v1047_v24  ;;  %v1077_v41 = vsub.f32 %v27_v22, %v52_v30  ;;  %v134_v43 = vsub.f32 %v1035_v20, %v133_v34  ;;  %v141_v44 = vsub.f32 %v1037_v21, %v140_v35  ;;  %v147_v45 = vand.u32 4294901760, %v1059_v32 }
  0x10   :  { %843 = vmatprep.subr.bf16.mxu1 %v966_v4  ;;  %879 = vmatprep.subr.bf16.mxu0 %v966_v4  ;;  %v108_v39 = vand.u32 4294901760, %v1062_v33  ;;  %v1085_v46 = vsub.f32 %v28_v23, %v55_v31  ;;  %v121_v47 = vand.u32 4294901760, %v120_v37  ;;  %v128_v48 = vand.u32 4294901760, %v127_v38 }
  0x11   :  { %v154_v49 = vand.u32 4294901760, %v1068_v36  ;;  %v886_v50 = vpack.c.bf16 %v126_v28, %v119_v27  ;;  %v135_v52 = vand.u32 4294901760, %v134_v43  ;;  %v142_v53 = vand.u32 4294901760, %v141_v44 }
  0x12   :  { %v109_v42 = vsub.f32 %v1062_v33, %v108_v39  ;;  %v148_v54 = vsub.f32 %v1059_v32, %v147_v45  ;;  %v850_v55 = vpack.c.bf16 %v128_v48, %v121_v47  ;;  %v161_v57 = vand.u32 4294901760, %v1077_v41 }
  0x13   :  { %845 = vmatpush3.bf16.msra.mxu1 %v1057_v29  ;;  %881 = vmatpush3.bf16.msra.mxu0 %v1057_v29  ;;  %v155_v56 = vsub.f32 %v1068_v36, %v154_v49  ;;  %v168_v58 = vand.u32 4294901760, %v1085_v46  ;;  %v853_v59 = vpack.c.bf16 %v142_v53, %v135_v52  ;;  %v889_v60 = vpack.c.bf16 %v140_v35, %v133_v34  ;;  %v668_v53 = vld [vmem:[%s1161_s3] ss:$0 sm:$0xff]  ;;  %s971_s3 = smov [#allocation3]  }
  0x14   :  { %846 = vmatprep.subr.bf16.mxu1 %v966_v4  ;;  %882 = vmatprep.subr.bf16.mxu0 %v966_v4  ;;  %v110_v51 = vand.u32 4294901760, %v109_v42  ;;  %v149_v61 = vand.u32 4294901760, %v148_v54  ;;  %v162_v63 = vsub.f32 %v1077_v41, %v161_v57  ;;  %v892_v2 = vpack.c.bf16 %v154_v49, %v147_v45  ;;  %s658_s9 = sshll.u32 %s971_s3, 4  ;;  %s659_s9 = int_to_ptr.vmem [resolvable:$true] %s658_s9 }
  0x15   :  { %v156_v62 = vand.u32 4294901760, %v155_v56  ;;  %v169_v0 = vsub.f32 %v1085_v46, %v168_v58  ;;  %v609_v6 = vmul.f32 %v1033_v18, %v1033_v18  ;;  %v895_v8 = vpack.c.bf16 %v168_v58, %v161_v57  ;;  %s942_s10 = scalar_lea.vmem %s659_s9, 32  ;;  %p947_p1 = scmp.lt.s32.totalorder %s659_s9, %s659_s9 }
  0x16   :  { %v163_v3 = vand.u32 4294901760, %v162_v63  ;;  %vm610_vm2 = vcmask 517120   ;;  %v862_v10 = vpack.c.bf16 %v1028_v16, %v1026_v15  ;;  %v865_v11 = vpack.c.bf16 %v1037_v21, %v1035_v20  ;;  %p943_p0 = scmp.ne.s32.totalorder %s659_s9, %s942_s10  ;;  %p948_p2 = scmp.lt.s32.totalorder %s942_s10, %s942_s10 }
  0x17   :  { %848 = vmatpush3.bf16.msra.mxu1 %v1075_v40  ;;  %884 = vmatpush3.bf16.msra.mxu0 %v1075_v40  ;;  %v856_v1 = vpack.c.bf16 %v156_v62, %v149_v61  ;;  %v170_v5 = vand.u32 4294901760, %v169_v0  ;;  %v611_v9 = vsel %vm610_vm2, %v609_v6, 0.0  ;;  %v868_v12 = vpack.c.bf16 %v1068_v36, %v1059_v32 }
  0x18   :  { %849 = vmatprep.subr.bf16.mxu1 %v966_v4  ;;  %885 = vmatprep.subr.bf16.mxu0 %v966_v4  ;;  %vm580_vm3 = vcmask 83024   ;;  %vm639_vm6 = vcmask 74752   ;;  %p949_p3 = por %p948_p2, %p947_p1 }
  0x19   :  { %v859_v7 = vpack.c.bf16 %v170_v5, %v163_v3 }
  0x1a   :  { %740 = vmatmul.mubr.f32.vlgmr.msra.gmra.mrb[0].mxu1 %v110_v51  ;;  %797 = vmatmul.mubr.f32.vlgmr.msra.gmra.mrb[0].mxu0 %v108_v39  ;;  %p950_p4 = pnand %p949_p3, %p943_p0 }
  0x1b   :  { %851 = vmatpush3.bf16.msra.mxu1 %v850_v55  ;;  %887 = vmatpush3.bf16.msra.mxu0 %v886_v50 }
  0x1c   :  { %852 = vmatprep.subr.bf16.mxu1 %v966_v4  ;;  %888 = vmatprep.subr.bf16.mxu0 %v966_v4 }
  0x1d   :  { %758 = vmatprep.mubr.msk.f32.mxu1 %vm967_vm0, %v968_v13  ;;  %815 = vmatprep.mubr.msk.f32.mxu0 %vm967_vm0, %v968_v13 }
  0x1f   :  { %854 = vmatpush3.bf16.msra.mxu1 %v853_v59  ;;  %890 = vmatpush3.bf16.msra.mxu0 %v889_v60 }
  0x20   :  { %855 = vmatprep.subr.bf16.mxu1 %v966_v4  ;;  %891 = vmatprep.subr.bf16.mxu0 %v966_v4 }
  0x23   :  { %857 = vmatpush3.bf16.msra.mxu1 %v856_v1  ;;  %893 = vmatpush3.bf16.msra.mxu0 %v892_v2 }
  0x24   :  { %858 = vmatprep.subr.bf16.mxu1 %v966_v4  ;;  %894 = vmatprep.subr.bf16.mxu0 %v966_v4 }
  0x27   :  { %860 = vmatpush3.bf16.msra.mxu1 %v859_v7  ;;  %896 = vmatpush3.bf16.msra.mxu0 %v895_v8 }
  0x28   :  { %861 = vmatprep.subr.bf16.mxu1 %v966_v4  ;;  %897 = vmatprep.subr.bf16.mxu0 %v966_v4 }
  0x29   :  { %612 = vadd.xlane.f32.xlu0 %v611_v9 }
  0x2a   :  { %759 = vmatmul.mubr.f32.vlgmr.msra.gmra.mrb[0].mxu1 %v1053_v26  ;;  %816 = vmatmul.mubr.f32.vlgmr.msra.gmra.mrb[0].mxu0 %v1053_v26 }
  0x2b   :  { %863 = vmatpush3.bf16.msra.mxu1 %v862_v10  ;;  %899 = vmatpush3.bf16.msra.mxu0 %v1024_v14  ;;  %v871_v14 = vpack.c.bf16 %v1085_v46, %v1077_v41 }
  0x2c   :  { %864 = vmatprep.subr.bf16.mxu1 %v966_v4  ;;  %900 = vmatprep.subr.bf16.mxu0 %v966_v4 }
  0x2d   :  { %777 = vmatprep.mubr.msk.f32.mxu1 %vm967_vm0, %v968_v13  ;;  %834 = vmatprep.mubr.msk.f32.mxu0 %vm967_vm0, %v968_v13  ;;  %v970_v13 = vmov 10  }
  0x2e   :  { %924 = vset.pattern.permute.xlu1 %v970_v13  ;;  %925 = vset.pattern.permute.xlu0 %v970_v13 }
  0x2f   :  { %866 = vmatpush3.bf16.msra.mxu1 %v865_v11  ;;  %902 = vmatpush3.bf16.msra.mxu0 %v1047_v24 }
  0x30   :  { %867 = vmatprep.subr.bf16.mxu1 %v966_v4  ;;  %903 = vmatprep.subr.bf16.mxu0 %v966_v4 }
  0x33   :  { %869 = vmatpush3.bf16.msra.mxu1 %v868_v12  ;;  %905 = vmatpush3.bf16.msra.mxu0 %v1057_v29 }
  0x34   :  { %870 = vmatprep.subr.bf16.mxu1 %v966_v4  ;;  %906 = vmatprep.subr.bf16.mxu0 %v966_v4 }
  0x37   :  { %872 = vmatpush3.bf16.msra.mxu1 %v871_v14  ;;  %908 = vmatpush3.bf16.msra.mxu0 %v1075_v40 }
  0x3a   :  { %778 = vmatmul.mubr.f32.vlgmr.msra.gmra.mrb[0].mxu1 %v1062_v33  ;;  %835 = vmatmul.mubr.f32.vlgmr.msra.gmra.mrb[0].mxu0 %v1053_v26 }
  0x7c   :  { %v577_v20 = vpop.permute.xlu0 %576 }
  0xb6   :  { %v613_v46 = vpop.xlane.xlu0 %612 }
  0xb7   :  { %vm616_vm4 = vcmp.eq.f32.partialorder %v613_v46, inf  ;;  %v619_v49 = vand.u32 2147483648, %v613_v46  ;;  %vm618_vm5 = vcmp.eq.f32.partialorder %v613_v46, 0.0 }
 0x10d   :  { %v311_v15 = vpop.f32.mrb[0].mxu1  ;;  %v566_v16 = vpop.f32.mrb[0].mxu0 }
 0x10e   :  { %v909_v17 = vadd.f32 %v566_v16, %v311_v15  ;;  %v779_v18 = vpop.f32.mrb[1].mxu1  ;;  %v836_v19 = vpop.f32.mrb[1].mxu0 }
 0x110   :  { %v579_v21 = vadd.f32 %v909_v17, %v577_v20 }
 0x112   :  { %v581_v22 = vsel %vm580_vm3, %v579_v21, 0.0 }
 0x113   :  { %v582_v4 = vrot.slane %v581_v22, 4 }
 0x115   :  { %v583_v23 = vadd.f32 %v582_v4, %v581_v22 }
 0x117   :  { %v584_v24 = vrot.slane %v583_v23, 2 }
 0x119   :  { %v585_v25 = vadd.f32 %v584_v24, %v583_v23 }
 0x11b   :  { %v586_v27 = vrot.slane %v585_v25, 1 }
 0x11d   :  { %v587_v28 = vadd.f32 %v586_v27, %v585_v25 }
 0x11f   :  { %v589_v29 = vmul.f32 0.5, %v587_v28 }
 0x121   :  { %v590_v26 = vsub.f32 %v579_v21, %v589_v29 }
 0x123   :  { %v591_v30 = vmul.f32 %v590_v26, %v590_v26 }
 0x125   :  { %v592_v31 = vsel %vm580_vm3, %v591_v30, 0.0 }
 0x126   :  { %v593_v32 = vrot.slane %v592_v31, 4 }
 0x128   :  { %v594_v33 = vadd.f32 %v593_v32, %v592_v31 }
 0x12a   :  { %v595_v34 = vrot.slane %v594_v33, 2 }
 0x12c   :  { %v596_v35 = vadd.f32 %v595_v34, %v594_v33 }
 0x12e   :  { %v597_v36 = vrot.slane %v596_v35, 1 }
 0x130   :  { %v598_v37 = vadd.f32 %v597_v36, %v596_v35 }
 0x132   :  { %v599_v38 = vmul.f32 0.5, %v598_v37 }
 0x134   :  { %v600_v39 = vadd.f32 1e-05, %v599_v38 }
 0x136   :  { %926 = vrsqrt.f32 %v600_v39 }
 0x140   :  { %v927_v40 = vpop.eup %926 }
 0x141   :  { %v602_v41 = vmul.f32 %v927_v40, %v590_v26 }
 0x143   :  { %v667_v42 = vmul.f32 -1.442695, %v602_v41 }
 0x145   :  { %928 = vpow2.f32 %v667_v42 }
 0x14f   :  { %v929_v43 = vpop.eup %928 }
 0x150   :  { %v606_v44 = vadd.f32 1.0, %v929_v43 }
 0x152   :  { %930 = vrcp.f32 %v606_v44 }
 0x153   :  { %932 = vrsqrt.f32 %v613_v46 }
 0x15c   :  { %v931_v45 = vpop.eup %930 }
 0x15d   :  { %634 = vperm.xlu1 %924, %v931_v45   ;;  %v933_v47 = vpop.eup %932 }
 0x15e   :  { %v615_v48 = vmul.f32 %v933_v47, %v613_v46 }
 0x160   :  { %v617_v50 = vsel %vm616_vm4, %v613_v46, %v615_v48 }
 0x161   :  { %v620_v51 = vsel %vm618_vm5, %v619_v49, %v617_v50 }
 0x162   :  { %v621_v52 = vmax.f32 %v620_v51, 1e-08 }
 0x164   :  { %v629_v54 = vmul.f32 %v668_v53, %v621_v52 }
 0x166   :  { %934 = vrcp.f32 %v629_v54 }
 0x170   :  { %v935_v55 = vpop.eup %934 }
 0x171   :  { %v631_v56 = vmul.f32 %v935_v55, %v909_v17 }
 0x173   :  { %936 = vrcp.f32 %v631_v56 }
 0x17d   :  { %v937_v57 = vpop.eup %936 }
 0x1dc   :  { %v635_v58 = vpop.permute.xlu1 %634 }
 0x1dd   :  { %v638_v59 = vmul.f32 %v937_v57, %v635_v58 }
 0x1df   :  { %v640_v60 = vsel %vm639_vm6, %v638_v59, -inf }
 0x1e0   :  { %641 = vmax.xlane.f32.xlu1 %v640_v60 }
 0x26d   :  { %v642_v61 = vpop.xlane.xlu1 %641 }
 0x26e   :  { %v643_v62 = vsub.f32 %v638_v59, %v642_v61 }
 0x270   :  { %v644_v63 = vmul.f32 1.442695, %v643_v62 }
 0x272   :  { %938 = vpow2.f32 %v644_v63 }
 0x27c   :  { %v939_v0 = vpop.eup %938 }
 0x27d   :  { %v646_v1 = vsel %vm639_vm6, %v939_v0, 0.0 }
 0x27e   :  { %647 = vadd.xlane.f32.xlu0 %v646_v1 }
 0x30b   :  { %v648_v2 = vpop.xlane.xlu0 %647 }
 0x30c   :  { %940 = vrcp.f32 %v648_v2 }
 0x316   :  { %v941_v3 = vpop.eup %940 }
 0x317   :  { %v650_v5 = vmul.f32 %v941_v3, %v939_v0 }
 0x319   :  { %651 = vst.msk [vmem:[#allocation3] sm:$0x3] %vm639_vm6, %v650_v5 }
 0x31a   :  { %953 = shalt.err (!%p950_p4)
}
 0x31b   :  { %s954_s13 = scalar_lea.hbm %s1162_s4, 32 }
 0x31c   :  { %p955_p5 = scmp.ne.s32.totalorder %s1162_s4, %s954_s13  ;;  %p958_p6 = scmp.lt.u32.totalorder %s954_s13, %s1162_s4 }
 0x31e   :  { %p960_p7 = pnand %p958_p6, %p955_p5 }
 0x320   :  { %963 = shalt.err (!%p960_p7)
}
 0x321   :  { %661 = dma.vmem_to_hbm [thread:$0]  %s659_s9, 32, %s1162_s4, [#allocation4]  }
 0x322   :  { %964 = dma.done.wait [#allocation4], 32  }
 0x323   :  { %965 = vsyncadd [#allocation4], 4294967264 }
 0x324   :  { %665 = vsyncpa [#allocation4], 1 }

// kernel: gen_odin_forward.2
= control target key start
LH: loop header
LB: loop body
LE: loop exit
PB: predicated region body
PF: predicated region fallthrough
CT: control target
= control target key end

     0   :  { %s41619_s30 = smov 0   ;;  %s49496_s0 = inlined_call_operand.vmem [shape: f32[2,32,96], index: 0, kind: input, shape index: {}]   ;;  %s49497_s1 = inlined_call_operand.vmem [shape: f32[5,2,96,56], index: 1, kind: input, shape index: {}]   ;;  %s49498_s2 = inlined_call_operand.vmem [shape: f32[1,56], index: 2, kind: input, shape index: {}]   ;;  %s49499_s3 = inlined_call_operand.vmem [shape: f32[5,2,56,60], index: 3, kind: input, shape index: {}]   ;;  %s49500_s4 = inlined_call_operand.vmem [shape: f32[1,60], index: 4, kind: input, shape index: {}]   ;;  %s49501_s5 = inlined_call_operand.vmem [shape: f32[5,60,120], index: 5, kind: input, shape index: {}]   ;;  %s49502_s6 = inlined_call_operand.vmem [shape: f32[1,120], index: 6, kind: input, shape index: {}]   ;;  %s49503_s7 = inlined_call_operand.vmem [shape: f32[120,64], index: 7, kind: input, shape index: {}]   ;;  %s49504_s8 = inlined_call_operand.vmem [shape: f32[1,64], index: 8, kind: input, shape index: {}]   ;;  %s49505_s9 = inlined_call_operand.vmem [shape: f32[2,1,64], index: 9, kind: output, shape index: {}]  }
   0x1 LB: > { %s27287_s10 = sadd.s32 4294967295, %s41564_s30   ;;  %p27291_p0 = scmp.ge.s32.totalorder %s41564_s30, 1  ;;  %s41564_s30 = sphi %s41619_s30, %s19_s30  }
   0x2   : > { %p287_p1 = scmp.lt.s32.totalorder %s41564_s30, 3 }
   0x4   : > { %p288_p2 = pnand %p27291_p0, %p287_p1 }
   0x6   : > { %291 = sbr.rel (%p288_p2) target bundleno = 4025 (0xfb9), region = 56 }
   0xd   : > { %v41630_v0 = vld [vmem:[%s49497_s1 + $0xc0] sm:$0xff]  ;;  %v41635_v1 = vld [vmem:[%s49497_s1 + $0xc8] sm:$0xff]  ;;  %p41644_p3 = scmp.lt.s32.totalorder %s27287_s10, 1  ;;  %vm388_vm0 = vcmask 785408   ;;  %v41659_v7 = vld [vmem:[%s49497_s1 + $0xd0] sm:$0xff]  ;;  %vm41567_vm1 = vmmov 0  }
   0xe   : > { %v41640_v2 = vld [vmem:[%s49497_s1] sm:$0xff]  ;;  %v396_v3 = vand.u32 4294901760, %v41630_v0  ;;  %v399_v4 = vand.u32 4294901760, %v41635_v1  ;;  %v41653_v5 = vld [vmem:[%s49497_s1 + $0x8] sm:$0xff]  ;;  %v41664_v8 = vld [vmem:[%s49497_s1 + $0xd8] sm:$0xff]  ;;  %v402_v10 = vand.u32 4294901760, %v41659_v7 }
   0xf   : > { %v1034_v6 = vand.u32 4294901760, %v41640_v2  ;;  %v1037_v9 = vand.u32 4294901760, %v41653_v5  ;;  %v405_v11 = vand.u32 4294901760, %v41664_v8  ;;  %v41672_v12 = vld [vmem:[%s49497_s1 + $0x10] sm:$0xff]  ;;  %v41677_v13 = vld [vmem:[%s49497_s1 + $0x18] sm:$0xff]  ;;  %v41682_v14 = vld [vmem:[%s49497_s1 + $0xe0] sm:$0xff] }
  0x10   : > { %v41688_v15 = vpack.c.bf16 %v399_v4, %v396_v3  ;;  %v1040_v16 = vand.u32 4294901760, %v41672_v12  ;;  %v1043_v17 = vand.u32 4294901760, %v41677_v13  ;;  %v41695_v18 = vld [vmem:[%s49497_s1 + $0xe8] sm:$0xff]  ;;  %v408_v19 = vand.u32 4294901760, %v41682_v14  ;;  %v41701_v20 = vld [vmem:[%s49497_s1 + $0x20] sm:$0xff]  ;;  %v41725_v26 = vld [vmem:[%s49497_s1 + $0xf0] sm:$0xff] }
  0x11   : > { %v41706_v21 = vld [vmem:[%s49497_s1 + $0x28] sm:$0xff]  ;;  %v41712_v22 = vpack.c.bf16 %v1037_v9, %v1034_v6  ;;  %v41718_v23 = vpack.c.bf16 %v405_v11, %v402_v10  ;;  %v411_v24 = vand.u32 4294901760, %v41695_v18  ;;  %v49523_v25 = vand.u32 4294901760, %v41701_v20  ;;  %v41730_v27 = vld [vmem:[%s49497_s1 + $0xf8] sm:$0xff]  ;;  %v41735_v28 = vld [vmem:[%s49497_s1 + $0x30] sm:$0xff]  ;;  %s50388_s10 = smov (!%p41644_p3, %s27287_s10), 1 }
  0x12   : > { %36568 = vmatprep.subr.bf16.mxu1 %v41688_v15  ;;  %v41748_v29 = vpack.c.bf16 %v1043_v17, %v1040_v16  ;;  %v49522_v30 = vand.u32 4294901760, %v41706_v21  ;;  %v49519_v31 = vand.u32 4294901760, %v41725_v26  ;;  %v49518_v32 = vand.u32 4294901760, %v41730_v27  ;;  %v41756_v33 = vld [vmem:[%s49497_s1 + $0x38] sm:$0xff]  ;;  %v41761_v34 = vld [vmem:[%s49497_s1 + $0x100] sm:$0xff]  ;;  %v41766_v35 = vld [vmem:[%s49497_s1 + $0x108] sm:$0xff]  ;;  %s328_s12 = scalar_lea.vmem %s49505_s9, %s50388_s10 }
  0x13   : > { %49852 = vst [vmem:[#allocation4_spill] sm:$0xff] %v41712_v22  ;;  %36712 = vmatprep.subr.bf16.mxu0 %v41712_v22  ;;  %36570 = vmatpush3.bf16.msra.mxu1 %v41688_v15  ;;  %v41774_v36 = vpack.c.bf16 %v411_v24, %v408_v19  ;;  %v49517_v37 = vand.u32 4294901760, %v41735_v28  ;;  %v49516_v38 = vand.u32 4294901760, %v41756_v33  ;;  %v49513_v39 = vand.u32 4294901760, %v41761_v34  ;;  %v41782_v40 = vld [vmem:[%s49497_s1 + $0x40] sm:$0xff]  ;;  %v41787_v41 = vld [vmem:[%s49497_s1 + $0x48] sm:$0xff] }
  0x14   : > { %49853 = vst [vmem:[#allocation5_spill] sm:$0xff] %v41748_v29  ;;  %v41792_v42 = vld [vmem:[%s49497_s1 + $0x110] sm:$0xff]  ;;  %36714 = vmatpush3.bf16.msra.mxu0 %v41712_v22  ;;  %36572 = vmatprep.subr.bf16.mxu1 %v41718_v23  ;;  %v41800_v43 = vpack.c.bf16 %v49522_v30, %v49523_v25  ;;  %v41806_v44 = vpack.c.bf16 %v49518_v32, %v49519_v31  ;;  %v49512_v45 = vand.u32 4294901760, %v41766_v35  ;;  %v49509_v46 = vand.u32 4294901760, %v41782_v40  ;;  %v41813_v47 = vld [vmem:[%s49497_s1 + $0x118] sm:$0xff]  ;;  %s27512_s23 = sshll.u32 %s50388_s10, 5 }
  0x15   : > { %v41818_v48 = vld [vmem:[%s49497_s1 + $0x50] sm:$0xff]  ;;  %v41823_v49 = vld [vmem:[%s49497_s1 + $0x58] sm:$0xff]  ;;  %36716 = vmatprep.subr.bf16.mxu0 %v41748_v29  ;;  %v41831_v50 = vpack.c.bf16 %v49516_v38, %v49517_v37  ;;  %v49508_v51 = vand.u32 4294901760, %v41787_v41  ;;  %v49507_v52 = vand.u32 4294901760, %v41792_v42  ;;  %v49506_v53 = vand.u32 4294901760, %v41813_v47  ;;  %s41839_s17 = scalar_lea.vmem %s49496_s0, %s27512_s23 }
  0x16   : > { %49854 = vst [vmem:[#allocation6_spill] sm:$0xff] %v41800_v43  ;;  %v41845_v54 = vpack.c.bf16 %v49512_v45, %v49513_v39  ;;  %v49511_v55 = vand.u32 4294901760, %v41818_v48  ;;  %v49510_v56 = vand.u32 4294901760, %v41823_v49  ;;  %v27307_v57 = vld [vmem:[%s41839_s17 + $0x1] ss:$2 sm:$0xff]  ;;  %v41853_v58 = vsub.f32 %v41630_v0, %v396_v3 }
  0x17   : > { %49855 = vst [vmem:[#allocation7_spill] sm:$0xff] %v41831_v50  ;;  %v355_v59 = vld [vmem:[%s41839_s17] ss:$2 sm:$0xff]  ;;  %36574 = vmatpush3.bf16.msra.mxu1 %v41718_v23  ;;  %v41861_v60 = vpack.c.bf16 %v49508_v51, %v49509_v46  ;;  %v41867_v61 = vpack.c.bf16 %v49506_v53, %v49507_v52  ;;  %v390_v62 = vsel %vm388_vm0, %v27307_v57, 0  ;;  %v41873_v63 = vsub.f32 %v41635_v1, %v399_v4 }
  0x18   : > { %v27308_v0 = vld [vmem:[%s41839_s17 + $0x11] ss:$2 sm:$0x3f]  ;;  %36718 = vmatpush3.bf16.msra.mxu0 %v41748_v29  ;;  %36576 = vmatprep.subr.bf16.mxu1 %v41774_v36  ;;  %v41882_v3 = vpack.c.bf16 %v49510_v56, %v49511_v55  ;;  %v41884_v53 = vand.u32 4294901760, %v390_v62  ;;  %v49514_v57 = vand.u32 4294901760, %v41853_v58  ;;  %v1028_v52 = vsel %vm388_vm0, %v355_v59, 0 }
  0x19   : > { %49856 = vst [vmem:[#allocation8_spill] sm:$0xff] %v41861_v60  ;;  %49857 = vst [vmem:[#allocation9_spill] sm:$0xff] %v41867_v61  ;;  %v27306_v51 = vld [vmem:[%s41839_s17 + $0x10] ss:$2 sm:$0x3f]  ;;  %36720 = vmatprep.subr.bf16.mxu0 %v41800_v43  ;;  %v49515_v1 = vand.u32 4294901760, %v41873_v63  ;;  %v41896_v46 = vsub.f32 %v41640_v2, %v1034_v6  ;;  %v41901_v56 = vsub.f32 %v41653_v5, %v1037_v9 }
  0x1a   : > { %49858 = vst [vmem:[#allocation10_spill] sm:$0xff] %v41882_v3  ;;  %49859 = vst [vmem:[#allocation11_spill] sm:$0xff] %v41884_v53  ;;  %v41891_v4 = vand.u32 4294901760, %v1028_v52  ;;  %v41904_v55 = vsub.f32 %v390_v62, %v41884_v53  ;;  %v496_v59 = vsub.f32 %v41853_v58, %v49514_v57  ;;  %v393_v45 = vsel %vm388_vm0, %v27308_v0, 0 }
  0x1b   : > { %v1031_v39 = vsel %vm388_vm0, %v27306_v51, 0  ;;  %36578 = vmatpush3.bf16.msra.mxu1 %v41774_v36  ;;  %v503_v2 = vsub.f32 %v41873_v63, %v49515_v1  ;;  %v49520_v6 = vand.u32 4294901760, %v41896_v46  ;;  %v49521_v9 = vand.u32 4294901760, %v41901_v56 }
  0x1c   : > { %49860 = vst [vmem:[#allocation12_spill] sm:$0xff] %v41891_v4  ;;  %49861 = vst [vmem:[#allocation13_spill] sm:$0xff] %v41904_v55  ;;  %v41916_v5 = vsub.f32 %v1028_v52, %v41891_v4  ;;  %36722 = vmatpush3.bf16.msra.mxu0 %v41800_v43  ;;  %36580 = vmatprep.subr.bf16.mxu1 %v41806_v44  ;;  %v41923_v62 = vand.u32 4294901760, %v41904_v55  ;;  %v497_v51 = vand.u32 4294901760, %v496_v59  ;;  %v41925_v0 = vand.u32 4294901760, %v393_v45 }
  0x1d   : > { %v41927_v57 = vand.u32 4294901760, %v1031_v39  ;;  %36724 = vmatprep.subr.bf16.mxu0 %v41831_v50  ;;  %v504_v52 = vand.u32 4294901760, %v503_v2  ;;  %v1134_v38 = vsub.f32 %v41896_v46, %v49520_v6  ;;  %v1141_v37 = vsub.f32 %v41901_v56, %v49521_v9 }
  0x1e   : > { %49862 = vst [vmem:[#allocation14_spill] sm:$0xff] %v41916_v5  ;;  %49863 = vst [vmem:[#allocation15_spill] sm:$0xff] %v41923_v62  ;;  %v41931_v1 = vand.u32 4294901760, %v41916_v5  ;;  %v475_v59 = vsub.f32 %v41904_v55, %v41923_v62  ;;  %v41942_v32 = vsub.f32 %v393_v45, %v41925_v0  ;;  %v41950_v2 = vsub.f32 %v41659_v7, %v402_v10 }
  0x1f   : > { %49864 = vst [vmem:[#allocation16_spill] sm:$0xff] %v41925_v0  ;;  %49865 = vst [vmem:[#allocation17_spill] sm:$0xff] %v41927_v57  ;;  %v41945_v31 = vsub.f32 %v1031_v39, %v41927_v57  ;;  %36582 = vmatpush3.bf16.msra.mxu1 %v41806_v44  ;;  %v41953_v6 = vpack.c.bf16 %v504_v52, %v497_v51  ;;  %v1135_v30 = vand.u32 4294901760, %v1134_v38  ;;  %v1142_v25 = vand.u32 4294901760, %v1141_v37 }
  0x20   : > { %49866 = vst [vmem:[#allocation18_spill] sm:$0xff] %v41931_v1  ;;  %49867 = vst [vmem:[#allocation19_spill] sm:$0xff] %v41942_v32  ;;  %v1113_v9 = vsub.f32 %v41916_v5, %v41931_v1  ;;  %36726 = vmatpush3.bf16.msra.mxu0 %v41831_v50  ;;  %36584 = vmatprep.subr.bf16.mxu1 %v41845_v54  ;;  %v41959_v39 = vand.u32 4294901760, %v475_v59  ;;  %v41962_v45 = vand.u32 4294901760, %v41942_v32  ;;  %v49524_v10 = vand.u32 4294901760, %v41950_v2 }
  0x21   : > { %49868 = vst [vmem:[#allocation20_spill] sm:$0xff] %v41945_v31  ;;  %49869 = vst [vmem:[#allocation21_spill] sm:$0xff] %v41953_v6  ;;  %v41965_v7 = vand.u32 4294901760, %v41945_v31  ;;  %36728 = vmatprep.subr.bf16.mxu0 %v41861_v60  ;;  %v41971_v38 = vpack.c.bf16 %v1142_v25, %v1135_v30  ;;  %v41976_v37 = vsub.f32 %v41664_v8, %v405_v11  ;;  %vm13201_vm2 = vcmask 455680  }
  0x22   : > { %49870 = vst [vmem:[#allocation22_spill] sm:$0xff] %v41959_v39  ;;  %49871 = vst [vmem:[#allocation23_spill] sm:$0xff] %v41962_v45  ;;  %v41969_v51 = vand.u32 4294901760, %v1113_v9  ;;  %v41981_v52 = vsub.f32 %v41672_v12, %v1040_v16  ;;  %30543 = vmatprep.mubr.f32.mxu1 %v41959_v39  ;;  %v485_v59 = vsub.f32 %v41942_v32, %v41962_v45  ;;  %v49879_v39 = vand.u32 4294901760, %v41706_v21 }
  0x23   : > { %49872 = vst [vmem:[#allocation24_spill] sm:$0xff] %v41965_v7  ;;  %49874 = vst [vmem:[#allocation26_spill] sm:$0xff] %v41971_v38  ;;  %v1123_v9 = vsub.f32 %v41945_v31, %v41965_v7  ;;  %v510_v25 = vsub.f32 %v41950_v2, %v49524_v10  ;;  %v41994_v8 = vsub.f32 %v41677_v13, %v1043_v17  ;;  %36586 = vmatpush3.bf16.msra.mxu1 %v41845_v54  ;;  %vm13199_vm3 = vcmask 457728  }
  0x24   : > { %49873 = vst [vmem:[#allocation25_spill] sm:$0xff] %v41969_v51  ;;  %30705 = vmatprep.mubr.f32.mxu0 %v41969_v51  ;;  %v49528_v11 = vand.u32 4294901760, %v41976_v37  ;;  %v42003_v16 = vsub.f32 %v41682_v14, %v408_v19  ;;  %v42008_v30 = vsub.f32 %v41695_v18, %v411_v24  ;;  %36730 = vmatpush3.bf16.msra.mxu0 %v41861_v60  ;;  %v42012_v13 = vand.u32 4294901760, %v485_v59 }
  0x25   : > { %36588 = vmatprep.subr.bf16.mxu1 %v41867_v61  ;;  %v42014_v17 = vand.u32 4294901760, %v1123_v9  ;;  %v511_v10 = vand.u32 4294901760, %v510_v25  ;;  %v49531_v12 = vand.u32 4294901760, %v41994_v8  ;;  %36732 = vmatprep.subr.bf16.mxu0 %v41882_v3  ;;  %v49877_v18 = vand.u32 4294901760, %v41981_v52 }
  0x26   : > { %49875 = vst [vmem:[#allocation27_spill] sm:$0xff] %v42012_v13  ;;  %v517_v14 = vsub.f32 %v41976_v37, %v49528_v11  ;;  %v49878_v25 = vand.u32 4294901760, %v41701_v20  ;;  %v42037_v11 = vsub.f32 %v41706_v21, %v49879_v39  ;;  %vm23831_vm4 = vcmask 1043456  }
  0x27   : > { %49876 = vst [vmem:[#allocation28_spill] sm:$0xff] %v42014_v17  ;;  %v1148_v19 = vsub.f32 %v41981_v52, %v49877_v18  ;;  %v1155_v9 = vsub.f32 %v41994_v8, %v49531_v12  ;;  %v49880_v18 = vand.u32 4294901760, %v41725_v26  ;;  %36590 = vmatpush3.bf16.msra.mxu1 %v41867_v61  ;;  %v49881_v12 = vand.u32 4294901760, %v42003_v16 }
  0x28   : > { %v42032_v51 = vsub.f32 %v41701_v20, %v49878_v25  ;;  %v518_v59 = vand.u32 4294901760, %v517_v14  ;;  %v49882_v20 = vand.u32 4294901760, %v42008_v30  ;;  %36734 = vmatpush3.bf16.msra.mxu0 %v41882_v3  ;;  %36592 = vmatprep.subr.bf16.mxu1 %v41953_v6  ;;  %v49884_v61 = vand.u32 4294901760, %v41730_v27 }
  0x29   : > { %v42042_v24 = vsub.f32 %v41725_v26, %v49880_v18  ;;  %v1149_v7 = vand.u32 4294901760, %v1148_v19  ;;  %v524_v45 = vsub.f32 %v42003_v16, %v49881_v12  ;;  %v1156_v21 = vand.u32 4294901760, %v1155_v9  ;;  %36736 = vmatprep.subr.bf16.mxu0 %v41971_v38 }
  0x2a   : > { %v531_v25 = vsub.f32 %v42008_v30, %v49882_v20  ;;  %v49536_v26 = vand.u32 4294901760, %v42032_v51  ;;  %v42057_v19 = vpack.c.bf16 %v518_v59, %v511_v10  ;;  %v42062_v20 = vsub.f32 %v41730_v27, %v49884_v61  ;;  %30544 = vmatmul.mubr.f32.vlgmr.msra.gmra.mrb[0].mxu1 %v42012_v13 }
  0x2b   : > { %v525_v12 = vand.u32 4294901760, %v524_v45  ;;  %v42065_v9 = vpack.c.bf16 %v1156_v21, %v1149_v7  ;;  %v49886_v14 = vand.u32 4294901760, %v42037_v11  ;;  %v49887_v45 = vand.u32 4294901760, %v42042_v24  ;;  %36594 = vmatpush3.bf16.msra.mxu1 %v41953_v6  ;;  %30706 = vmatmul.mubr.f32.vlgmr.msra.gmra.mrb[0].mxu0 %v42014_v17 }
  0x2c   : > { %49883 = vst [vmem:[#allocation29_spill] sm:$0xff] %v42057_v19  ;;  %v532_v18 = vand.u32 4294901760, %v531_v25  ;;  %v1162_v39 = vsub.f32 %v42032_v51, %v49536_v26  ;;  %v49889_v7 = vand.u32 4294901760, %v41735_v28  ;;  %v49890_v21 = vand.u32 4294901760, %v41756_v33  ;;  %36738 = vmatpush3.bf16.msra.mxu0 %v41971_v38  ;;  %36596 = vmatprep.subr.bf16.mxu1 %v42057_v19 }
  0x2d   : > { %49885 = vst [vmem:[#allocation30_spill] sm:$0xff] %v42065_v9  ;;  %v1169_v10 = vsub.f32 %v42037_v11, %v49886_v14  ;;  %v538_v59 = vsub.f32 %v42042_v24, %v49887_v45  ;;  %36740 = vmatprep.subr.bf16.mxu0 %v42065_v9  ;;  %v49893_v17 = vand.u32 4294901760, %v41766_v35  ;;  %30570 = vmatprep.mubr.f32.mxu1 %v41884_v53  ;;  %vm23815_vm5 = vcmask 487424  }
  0x2e   : > { %v42078_v27 = vpack.c.bf16 %v532_v18, %v525_v12  ;;  %v42084_v25 = vsub.f32 %v41735_v28, %v49889_v7  ;;  %v42089_v14 = vsub.f32 %v41756_v33, %v49890_v21  ;;  %v1163_v45 = vand.u32 4294901760, %v1162_v39  ;;  %30732 = vmatprep.mubr.f32.mxu0 %v41891_v4 }
  0x2f   : > { %v1170_v26 = vand.u32 4294901760, %v1169_v10  ;;  %v539_v12 = vand.u32 4294901760, %v538_v59  ;;  %v49891_v18 = vand.u32 4294901760, %v41761_v34  ;;  %v49892_v28 = vand.u32 4294901760, %v42062_v20  ;;  %36598 = vmatpush3.bf16.msra.mxu1 %v42057_v19 }
  0x30   : > { %49888 = vst [vmem:[#allocation31_spill] sm:$0xff] %v42078_v27  ;;  %v49538_v33 = vand.u32 4294901760, %v42084_v25  ;;  %v42107_v39 = vsub.f32 %v41766_v35, %v49893_v17  ;;  %v49895_v59 = vand.u32 4294901760, %v41782_v40  ;;  %36742 = vmatpush3.bf16.msra.mxu0 %v42065_v9  ;;  %36600 = vmatprep.subr.bf16.mxu1 %v42078_v27  ;;  %vm23827_vm6 = vcmask 490496  }
  0x31   : > { %v42096_v61 = vsub.f32 %v41761_v34, %v49891_v18  ;;  %v545_v7 = vsub.f32 %v42062_v20, %v49892_v28  ;;  %v42110_v10 = vpack.c.bf16 %v1170_v26, %v1163_v45  ;;  %v49896_v28 = vand.u32 4294901760, %v41787_v41 }
  0x32   : > { %v42116_v18 = vsub.f32 %v41782_v40, %v49895_v59  ;;  %v1176_v17 = vsub.f32 %v42084_v25, %v49538_v33  ;;  %v49897_v26 = vand.u32 4294901760, %v42089_v14  ;;  %v558_v40 = vand.u32 4294901760, %v42107_v39 }
  0x33   : > { %49894 = vst [vmem:[#allocation32_spill] sm:$0xff] %v42110_v10  ;;  %v49547_v34 = vand.u32 4294901760, %v42096_v61  ;;  %v42121_v21 = vsub.f32 %v41787_v41, %v49896_v28  ;;  %v546_v35 = vand.u32 4294901760, %v545_v7  ;;  %v49898_v28 = vand.u32 4294901760, %v41792_v42  ;;  %36744 = vmatprep.subr.bf16.mxu0 %v42110_v10  ;;  %36602 = vmatpush3.bf16.msra.mxu1 %v42078_v27 }
  0x34   : > { %v1183_v45 = vsub.f32 %v42089_v14, %v49897_v26  ;;  %v1189_v7 = vand.u32 4294901760, %v42116_v18  ;;  %v1177_v9 = vand.u32 4294901760, %v1176_v17  ;;  %v559_v19 = vsub.f32 %v42107_v39, %v558_v40  ;;  %36746 = vmatpush3.bf16.msra.mxu0 %v42110_v10 }
  0x35   : > { %v552_v41 = vsub.f32 %v42096_v61, %v49547_v34  ;;  %v1196_v59 = vand.u32 4294901760, %v42121_v21  ;;  %v42142_v33 = vsub.f32 %v41792_v42, %v49898_v28  ;;  %v42145_v26 = vpack.c.bf16 %v546_v35, %v539_v12 }
  0x36   : > { %v1184_v38 = vand.u32 4294901760, %v1183_v45  ;;  %v1190_v34 = vsub.f32 %v42116_v18, %v1189_v7  ;;  %v560_v42 = vand.u32 4294901760, %v559_v19  ;;  %v49901_v28 = vand.u32 4294901760, %v41813_v47 }
  0x37   : > { %49899 = vst [vmem:[#allocation33_spill] sm:$0xff] %v42145_v26  ;;  %v553_v13 = vand.u32 4294901760, %v552_v41  ;;  %v1197_v6 = vsub.f32 %v42121_v21, %v1196_v59  ;;  %v565_v4 = vand.u32 4294901760, %v42142_v33  ;;  %v49902_v35 = vand.u32 4294901760, %v41818_v48  ;;  %36604 = vmatprep.subr.bf16.mxu1 %v42145_v26 }
  0x38   : > { %v42152_v53 = vpack.c.bf16 %v1184_v38, %v1177_v9  ;;  %v42157_v12 = vsub.f32 %v41813_v47, %v49901_v28  ;;  %v1191_v45 = vand.u32 4294901760, %v1190_v34  ;;  %v49903_v19 = vand.u32 4294901760, %v41823_v49  ;;  %36606 = vmatpush3.bf16.msra.mxu1 %v42145_v26 }
  0x39   : > { %v42162_v17 = vsub.f32 %v41818_v48, %v49902_v35  ;;  %v1198_v41 = vand.u32 4294901760, %v1197_v6  ;;  %v566_v38 = vsub.f32 %v42142_v33, %v565_v4  ;;  %v42173_v47 = vpack.c.bf16 %v560_v42, %v553_v13 }
  0x3a   : > { %49900 = vst [vmem:[#allocation34_spill] sm:$0xff] %v42152_v53  ;;  %v42170_v9 = vsub.f32 %v41823_v49, %v49903_v19  ;;  %36748 = vmatprep.subr.bf16.mxu0 %v42152_v53  ;;  %v572_v48 = vand.u32 4294901760, %v42157_v12  ;;  %v42189_v19 = vpack.c.bf16 %v41873_v63, %v41853_v58  ;;  %v49907_v26 = vand.u32 4294901760, %v41853_v58 }
  0x3b   : > { %49904 = vst [vmem:[#allocation35_spill] sm:$0xff] %v42173_v47  ;;  %v1203_v28 = vand.u32 4294901760, %v42162_v17  ;;  %v42177_v35 = vpack.c.bf16 %v1198_v41, %v1191_v45  ;;  %v567_v6 = vand.u32 4294901760, %v566_v38  ;;  %36750 = vmatpush3.bf16.msra.mxu0 %v42152_v53  ;;  %36608 = vmatprep.subr.bf16.mxu1 %v42173_v47  ;;  %v42196_v53 = vpack.c.bf16 %v41901_v56, %v41896_v46 }
  0x3c   : > { %v1210_v34 = vand.u32 4294901760, %v42170_v9  ;;  %v573_v10 = vsub.f32 %v42157_v12, %v572_v48  ;;  %36610 = vmatpush3.bf16.msra.mxu1 %v42173_v47  ;;  %v49908_v27 = vand.u32 4294901760, %v41873_v63  ;;  %v49914_v47 = vand.u32 4294901760, %v41976_v37 }
  0x3d   : > { %49905 = vst [vmem:[#allocation36_spill] sm:$0xff] %v42177_v35  ;;  %v1204_v49 = vsub.f32 %v42162_v17, %v1203_v28  ;;  %36752 = vmatprep.subr.bf16.mxu0 %v42177_v35  ;;  %49906 = vst [vmem:[#allocation37_spill] sm:$0xff] %v42196_v53  ;;  %v49916_v58 = vand.u32 4294901760, %v41981_v52  ;;  %v49917_v63 = vand.u32 4294901760, %v41994_v8  ;;  %vm26606_vm7 = vcmask 982016  }
  0x3e   : > { %v1211_v13 = vsub.f32 %v42170_v9, %v1210_v34  ;;  %v574_v42 = vand.u32 4294901760, %v573_v10  ;;  %v42202_v3 = vpack.c.bf16 %v49908_v27, %v49907_v26  ;;  %v49909_v10 = vand.u32 4294901760, %v41896_v46 }
  0x3f   : > { %v1205_v45 = vand.u32 4294901760, %v1204_v49  ;;  %v49910_v49 = vand.u32 4294901760, %v41901_v56  ;;  %36754 = vmatpush3.bf16.msra.mxu0 %v42177_v35  ;;  %v42223_v27 = vpack.c.bf16 %v49917_v63, %v49916_v58  ;;  %v49919_v46 = vand.u32 4294901760, %v42003_v16 }
  0x40   : > { %v1212_v41 = vand.u32 4294901760, %v1211_v13  ;;  %v42192_v38 = vpack.c.bf16 %v574_v42, %v567_v6  ;;  %v49913_v42 = vand.u32 4294901760, %v41950_v2  ;;  %v49920_v56 = vand.u32 4294901760, %v42008_v30 }
  0x41   : > { %v42208_v13 = vpack.c.bf16 %v49910_v49, %v49909_v10  ;;  %49918 = vst [vmem:[#allocation41_spill] sm:$0xff] %v42223_v27  ;;  %v49925_v10 = vand.u32 4294901760, %v42042_v24  ;;  %v49926_v49 = vand.u32 4294901760, %v42062_v20  ;;  %v49928_v58 = vand.u32 4294901760, %v42084_v25 }
  0x42   : > { %v42211_v6 = vpack.c.bf16 %v1212_v41, %v1205_v45  ;;  %v42217_v60 = vpack.c.bf16 %v49914_v47, %v49913_v42  ;;  %v42229_v26 = vpack.c.bf16 %v49920_v56, %v49919_v46  ;;  %36612 = vmatprep.subr.bf16.mxu1 %v42192_v38  ;;  %v49922_v45 = vand.u32 4294901760, %v42032_v51 }
  0x43   : > { %49911 = vst [vmem:[#allocation38_spill] sm:$0xff] %v42208_v13  ;;  %v49923_v41 = vand.u32 4294901760, %v42037_v11  ;;  %v42242_v42 = vpack.c.bf16 %v49926_v49, %v49925_v10  ;;  %v49929_v63 = vand.u32 4294901760, %v42089_v14  ;;  %v49931_v56 = vand.u32 4294901760, %v42096_v61  ;;  %36614 = vmatpush3.bf16.msra.mxu1 %v42192_v38  ;;  %v42414_v49 = vld [vmem:[%s49497_s1 + $0x140] sm:$0xff] }
  0x44   : > { %49912 = vst [vmem:[#allocation39_spill] sm:$0xff] %v42211_v6  ;;  %49915 = vst [vmem:[#allocation40_spill] sm:$0xff] %v42217_v60  ;;  %36756 = vmatprep.subr.bf16.mxu0 %v42211_v6  ;;  %36616 = vmatprep.subr.bf16.mxu1 %v42189_v19  ;;  %v42266_v10 = vpack.c.bf16 %v41976_v37, %v41950_v2  ;;  %v42285_v2 = vpack.c.bf16 %v42037_v11, %v42032_v51  ;;  %vm27238_vm8 = vcmask 516096  }
  0x45   : > { %49921 = vst [vmem:[#allocation42_spill] sm:$0xff] %v42229_v26  ;;  %v42236_v47 = vpack.c.bf16 %v49923_v41, %v49922_v45  ;;  %49927 = vst [vmem:[#allocation44_spill] sm:$0xff] %v42242_v42  ;;  %v42248_v46 = vpack.c.bf16 %v49929_v63, %v49928_v58  ;;  %v42252_v35 = vpack.c.bf16 %v558_v40, %v49931_v56  ;;  %36758 = vmatpush3.bf16.msra.mxu0 %v42211_v6  ;;  %v42419_v58 = vld [vmem:[%s49497_s1 + $0x148] sm:$0xff] }
  0x46   : > { %v42255_v45 = vpack.c.bf16 %v1196_v59, %v1189_v7  ;;  %v42257_v41 = vpack.c.bf16 %v572_v48, %v565_v4  ;;  %36760 = vmatprep.subr.bf16.mxu0 %v42196_v53  ;;  %v42271_v40 = vpack.c.bf16 %v41994_v8, %v41981_v52  ;;  %30571 = vmatmul.mubr.f32.vlgmr.msra.gmra.mrb[0].mxu1 %v41925_v0 }
  0x47   : > { %49924 = vst [vmem:[#allocation43_spill] sm:$0xff] %v42236_v47  ;;  %49930 = vst [vmem:[#allocation45_spill] sm:$0xff] %v42248_v46  ;;  %v42259_v47 = vpack.c.bf16 %v1210_v34, %v1203_v28  ;;  %36618 = vmatpush3.bf16.msra.mxu1 %v42189_v19  ;;  %v42280_v4 = vpack.c.bf16 %v42008_v30, %v42003_v16  ;;  %30597 = vmatprep.mubr.f32.mxu1 %v41904_v55  ;;  %v49941_v30 = vld [vmem:[#allocation8_spill] sm:$0xff] }
  0x48   : > { %49932 = vst [vmem:[#allocation46_spill] sm:$0xff] %v42252_v35  ;;  %49933 = vst [vmem:[#allocation47_spill] sm:$0xff] %v42255_v45  ;;  %30733 = vmatmul.mubr.f32.vlgmr.msra.gmra.mrb[0].mxu0 %v41927_v57  ;;  %36620 = vmatprep.subr.bf16.mxu1 %v42266_v10  ;;  %v42294_v37 = vpack.c.bf16 %v42062_v20, %v42042_v24  ;;  %v42299_v51 = vpack.c.bf16 %v42089_v14, %v42084_v25  ;;  %v49942_v24 = vld [vmem:[#allocation9_spill] sm:$0xff]  ;;  %v49943_v20 = vld [vmem:[#allocation10_spill] sm:$0xff] }
  0x49   : > { %49934 = vst [vmem:[#allocation48_spill] sm:$0xff] %v42257_v41  ;;  %49935 = vst [vmem:[#allocation49_spill] sm:$0xff] %v42259_v47  ;;  %36762 = vmatpush3.bf16.msra.mxu0 %v42196_v53  ;;  %30759 = vmatprep.mubr.f32.mxu0 %v41916_v5  ;;  %v42306_v52 = vpack.c.bf16 %v42107_v39, %v42096_v61  ;;  %v42311_v8 = vpack.c.bf16 %v42121_v21, %v42116_v18  ;;  %v49944_v61 = vld [vmem:[#allocation23_spill] sm:$0xff]  ;;  %v49945_v25 = vld [vmem:[#allocation24_spill] sm:$0xff] }
  0x4a   : > { %49936 = vst [vmem:[#allocation50_spill] sm:$0xff] %v42271_v40  ;;  %36764 = vmatprep.subr.bf16.mxu0 %v42271_v40  ;;  %49937 = vst [vmem:[#allocation51_spill] sm:$0xff] %v42285_v2  ;;  %v42318_v11 = vpack.c.bf16 %v42157_v12, %v42142_v33  ;;  %v42323_v16 = vpack.c.bf16 %v42170_v9, %v42162_v17  ;;  %v49946_v14 = vld [vmem:[#allocation11_spill] sm:$0xff]  ;;  %v42371_v33 = vld [vmem:[%s49497_s1 + $0x120] sm:$0xff] }
  0x4b   : > { %36622 = vmatpush3.bf16.msra.mxu1 %v42266_v10  ;;  %49938 = vst [vmem:[#allocation52_spill] sm:$0xff] %v42299_v51  ;;  %49939 = vst [vmem:[#allocation53_spill] sm:$0xff] %v42311_v8  ;;  %v42376_v21 = vld [vmem:[%s49497_s1 + $0x128] sm:$0xff]  ;;  %v49947_v39 = vld [vmem:[#allocation12_spill] sm:$0xff]  ;;  %v49572_v18 = vand.u32 4294901760, %v42371_v33 }
  0x4c   : > { %36624 = vmatprep.subr.bf16.mxu1 %v42280_v4  ;;  %49940 = vst [vmem:[#allocation54_spill] sm:$0xff] %v42323_v16  ;;  %v49571_v7 = vand.u32 4294901760, %v42376_v21  ;;  %v42388_v12 = vld [vmem:[%s49497_s1 + $0x130] sm:$0xff]  ;;  %v42393_v17 = vld [vmem:[%s49497_s1 + $0x138] sm:$0xff] }
  0x4d   : > { %36766 = vmatpush3.bf16.msra.mxu0 %v42271_v40  ;;  %v42398_v9 = vsub.f32 %v42371_v33, %v49572_v18  ;;  %v49574_v28 = vand.u32 4294901760, %v42388_v12  ;;  %v49577_v34 = vand.u32 4294901760, %v42393_v17 }
  0x4e   : > { %36768 = vmatprep.subr.bf16.mxu0 %v42285_v2  ;;  %v49948_v59 = vld [vmem:[#allocation43_spill] sm:$0xff]  ;;  %v42403_v48 = vsub.f32 %v42376_v21, %v49571_v7 }
  0x4f   : > { %36626 = vmatpush3.bf16.msra.mxu1 %v42280_v4  ;;  %v42426_v7 = vsub.f32 %v42388_v12, %v49574_v28  ;;  %v42431_v18 = vsub.f32 %v42393_v17, %v49577_v34  ;;  %v42448_v34 = vld [vmem:[%s49497_s1 + $0x150] sm:$0xff] }
  0x50   : > { %36628 = vmatprep.subr.bf16.mxu1 %v42294_v37  ;;  %v49950_v28 = vand.u32 4294901760, %v42403_v48 }
  0x51   : > { %36770 = vmatpush3.bf16.msra.mxu0 %v42285_v2 }
  0x52   : > { %36772 = vmatprep.subr.bf16.mxu0 %v42299_v51 }
  0x53   : > { %36630 = vmatpush3.bf16.msra.mxu1 %v42294_v37 }
  0x54   : > { %36632 = vmatprep.subr.bf16.mxu1 %v42306_v52 }
  0x55   : > { %36774 = vmatpush3.bf16.msra.mxu0 %v42299_v51 }
  0x56   : > { %36776 = vmatprep.subr.bf16.mxu0 %v42311_v8 }
  0x57   : > { %36634 = vmatpush3.bf16.msra.mxu1 %v42306_v52 }
  0x58   : > { %36636 = vmatprep.subr.bf16.mxu1 %v42318_v11 }
  0x59   : > { %36778 = vmatpush3.bf16.msra.mxu0 %v42311_v8 }
  0x5a   : > { %36780 = vmatprep.subr.bf16.mxu0 %v42323_v16 }
  0x5b   : > { %36638 = vmatpush3.bf16.msra.mxu1 %v42318_v11 }
  0x5c   : > { %36640 = vmatprep.subr.bf16.mxu1 %v41688_v15 }
  0x5d   : > { %36782 = vmatpush3.bf16.msra.mxu0 %v42323_v16  ;;  %v49957_v16 = vand.u32 4294901760, %v42448_v34 }
  0x5e   : > { %36784 = vmatprep.subr.bf16.mxu0 %v41712_v22  ;;  %30598 = vmatmul.mubr.f32.vlgmr.msra.gmra.mrb[0].mxu1 %v41942_v32 }
  0x5f   : > { %36642 = vmatpush3.bf16.msra.mxu1 %v41688_v15  ;;  %30624 = vmatprep.mubr.f32.mxu1 %v41923_v62 }
  0x60   : > { %30760 = vmatmul.mubr.f32.vlgmr.msra.gmra.mrb[0].mxu0 %v41945_v31  ;;  %36644 = vmatprep.subr.bf16.mxu1 %v41718_v23 }
  0x61   : > { %36786 = vmatpush3.bf16.msra.mxu0 %v41712_v22  ;;  %30786 = vmatprep.mubr.f32.mxu0 %v41931_v1  ;;  %v49954_v1 = vand.u32 4294901760, %v42426_v7 }
  0x62   : > { %36788 = vmatprep.subr.bf16.mxu0 %v41748_v29 }
  0x63   : > { %36646 = vmatpush3.bf16.msra.mxu1 %v41718_v23 }
  0x64   : > { %36648 = vmatprep.subr.bf16.mxu1 %v41774_v36 }
  0x65   : > { %36790 = vmatpush3.bf16.msra.mxu0 %v41748_v29 }
  0x66   : > { %36792 = vmatprep.subr.bf16.mxu0 %v41800_v43 }
  0x67   : > { %36650 = vmatpush3.bf16.msra.mxu1 %v41774_v36 }
  0x68   : > { %36652 = vmatprep.subr.bf16.mxu1 %v41806_v44 }
  0x69   : > { %36794 = vmatpush3.bf16.msra.mxu0 %v41800_v43 }
  0x6a   : > { %36796 = vmatprep.subr.bf16.mxu0 %v41831_v50 }
  0x6b   : > { %36654 = vmatpush3.bf16.msra.mxu1 %v41806_v44 }
  0x6c   : > { %36656 = vmatprep.subr.bf16.mxu1 %v41845_v54 }
  0x6d   : > { %36798 = vmatpush3.bf16.msra.mxu0 %v41831_v50 }
  0x6e   : > { %36800 = vmatprep.subr.bf16.mxu0 %v49941_v30 }
  0x6f   : > { %36658 = vmatpush3.bf16.msra.mxu1 %v41845_v54 }
  0x70   : > { %36660 = vmatprep.subr.bf16.mxu1 %v49942_v24 }
  0x71   : > { %36802 = vmatpush3.bf16.msra.mxu0 %v49941_v30 }
  0x72   : > { %36804 = vmatprep.subr.bf16.mxu0 %v49943_v20 }
  0x73   : > { %36662 = vmatpush3.bf16.msra.mxu1 %v49942_v24 }
  0x74   : > { %36664 = vmatprep.subr.bf16.mxu1 %v42202_v3 }
  0x75   : > { %36806 = vmatpush3.bf16.msra.mxu0 %v49943_v20 }
  0x76   : > { %36808 = vmatprep.subr.bf16.mxu0 %v42208_v13  ;;  %30625 = vmatmul.mubr.f32.vlgmr.msra.gmra.mrb[0].mxu1 %v49944_v61 }
  0x77   : > { %36666 = vmatpush3.bf16.msra.mxu1 %v42202_v3  ;;  %30651 = vmatprep.mubr.f32.mxu1 %v49946_v14 }
  0x78   : > { %30787 = vmatmul.mubr.f32.vlgmr.msra.gmra.mrb[0].mxu0 %v49945_v25  ;;  %36668 = vmatprep.subr.bf16.mxu1 %v42217_v60  ;;  %v49952_v25 = vand.u32 4294901760, %v42414_v49 }
  0x79   : > { %36810 = vmatpush3.bf16.msra.mxu0 %v42208_v13  ;;  %30813 = vmatprep.mubr.f32.mxu0 %v49947_v39 }
  0x7a   : > { %36812 = vmatprep.subr.bf16.mxu0 %v42223_v27 }
  0x7b   : > { %36670 = vmatpush3.bf16.msra.mxu1 %v42217_v60 }
  0x7c   : > { %36672 = vmatprep.subr.bf16.mxu1 %v42229_v26 }
  0x7d   : > { %36814 = vmatpush3.bf16.msra.mxu0 %v42223_v27 }
  0x7e   : > { %36816 = vmatprep.subr.bf16.mxu0 %v49948_v59 }
  0x7f   : > { %36674 = vmatpush3.bf16.msra.mxu1 %v42229_v26 }
  0x80   : > { %36676 = vmatprep.subr.bf16.mxu1 %v42242_v42 }
  0x81   : > { %36818 = vmatpush3.bf16.msra.mxu0 %v49948_v59  ;;  %v49949_v59 = vand.u32 4294901760, %v42398_v9 }
  0x82   : > { %36820 = vmatprep.subr.bf16.mxu0 %v42248_v46 }
  0x83   : > { %36678 = vmatpush3.bf16.msra.mxu1 %v42242_v42  ;;  %v42442_v27 = vpack.c.bf16 %v49950_v28, %v49949_v59  ;;  %v42460_v59 = vsub.f32 %v42414_v49, %v49952_v25  ;;  %v49953_v28 = vand.u32 4294901760, %v42419_v58  ;;  %v49955_v25 = vand.u32 4294901760, %v42431_v18 }
  0x84   : > { %36680 = vmatprep.subr.bf16.mxu1 %v42252_v35 }
  0x85   : > { %36822 = vmatpush3.bf16.msra.mxu0 %v42248_v46  ;;  %49951 = vst [vmem:[#allocation9_spill] sm:$0xff] %v42442_v27  ;;  %v42453_v46 = vld [vmem:[%s49497_s1 + $0x158] sm:$0xff]  ;;  %v42465_v13 = vsub.f32 %v42419_v58, %v49953_v28  ;;  %v42476_v31 = vpack.c.bf16 %v49955_v25, %v49954_v1  ;;  %v42482_v28 = vld [vmem:[%s49497_s1 + $0x160] sm:$0xff]  ;;  %v42494_v1 = vsub.f32 %v42448_v34, %v49957_v16  ;;  %v49959_v51 = vand.u32 4294901760, %v42460_v59 }
  0x86   : > { %36824 = vmatprep.subr.bf16.mxu0 %v42255_v45  ;;  %v49958_v25 = vand.u32 4294901760, %v42453_v46  ;;  %v49600_v63 = vand.u32 4294901760, %v42482_v28 }
  0x87   : > { %36682 = vmatpush3.bf16.msra.mxu1 %v42252_v35  ;;  %49956 = vst [vmem:[#allocation11_spill] sm:$0xff] %v42476_v31  ;;  %v49960_v16 = vand.u32 4294901760, %v42465_v13  ;;  %v49986_v42 = vand.u32 4294901760, %v42465_v13 }
  0x88   : > { %36684 = vmatprep.subr.bf16.mxu1 %v42257_v41  ;;  %v42499_v8 = vsub.f32 %v42453_v46, %v49958_v25  ;;  %v49604_v25 = vand.u32 4294901760, %v42494_v1  ;;  %v42519_v5 = vsub.f32 %v42482_v28, %v49600_v63 }
  0x89   : > { %36826 = vmatpush3.bf16.msra.mxu0 %v42255_v45  ;;  %v42487_v45 = vld [vmem:[%s49497_s1 + $0x168] sm:$0xff]  ;;  %v42510_v2 = vpack.c.bf16 %v49960_v16, %v49959_v51 }
  0x8a   : > { %36828 = vmatprep.subr.bf16.mxu0 %v42259_v47  ;;  %v49599_v56 = vand.u32 4294901760, %v42487_v45  ;;  %v27333_v51 = vld [vmem:[%s41839_s17 + $0x2] ss:$2 sm:$0xff] }
  0x8b   : > { %36686 = vmatpush3.bf16.msra.mxu1 %v42257_v41  ;;  %49961 = vst [vmem:[#allocation55_spill] sm:$0xff] %v42510_v2  ;;  %v2934_v53 = vsel %vm388_vm0, %v27333_v51, 0  ;;  %v49985_v41 = vand.u32 4294901760, %v42460_v59 }
  0x8c   : > { %36688 = vmatprep.subr.bf16.mxu1 %v41688_v15  ;;  %v42524_v40 = vsub.f32 %v42487_v45, %v49599_v56  ;;  %v49606_v56 = vand.u32 4294901760, %v42519_v5 }
  0x8d   : > { %36830 = vmatpush3.bf16.msra.mxu0 %v42259_v47  ;;  %v49603_v47 = vand.u32 4294901760, %v42499_v8  ;;  %v1794_v35 = vsub.f32 %v42460_v59, %v49985_v41 }
  0x8e   : > { %36832 = vmatprep.subr.bf16.mxu0 %v41712_v22  ;;  %30652 = vmatmul.mubr.f32.vlgmr.msra.gmra.mrb[0].mxu1 %v41925_v0  ;;  %v49605_v63 = vand.u32 4294901760, %v42524_v40 }
  0x8f   : > { %36690 = vmatpush3.bf16.msra.mxu1 %v41688_v15  ;;  %v42535_v16 = vpack.c.bf16 %v49603_v47, %v49604_v25  ;;  %30678 = vmatprep.mubr.f32.mxu1 %v49946_v14  ;;  %v42553_v25 = vand.u32 4294901760, %v2934_v53  ;;  %v1795_v41 = vand.u32 4294901760, %v1794_v35 }
  0x90   : > { %30814 = vmatmul.mubr.f32.vlgmr.msra.gmra.mrb[0].mxu0 %v41927_v57  ;;  %36692 = vmatprep.subr.bf16.mxu1 %v41718_v23  ;;  %v42550_v47 = vpack.c.bf16 %v49605_v63, %v49606_v56  ;;  %v49967_v56 = vand.u32 4294901760, %v42376_v21  ;;  %v27334_v21 = vld [vmem:[%s41839_s17 + $0x12] ss:$2 sm:$0x3f] }
  0x91   : > { %36834 = vmatpush3.bf16.msra.mxu0 %v41712_v22  ;;  %49962 = vst [vmem:[#allocation56_spill] sm:$0xff] %v42535_v16  ;;  %30840 = vmatprep.mubr.f32.mxu0 %v49947_v39  ;;  %v42560_v51 = vsub.f32 %v2934_v53, %v42553_v25  ;;  %v49966_v53 = vand.u32 4294901760, %v42371_v33  ;;  %v1801_v16 = vsub.f32 %v42465_v13, %v49986_v42 }
  0x92   : > { %36836 = vmatprep.subr.bf16.mxu0 %v41748_v29  ;;  %49963 = vst [vmem:[#allocation57_spill] sm:$0xff] %v42550_v47 }
  0x93   : > { %36694 = vmatpush3.bf16.msra.mxu1 %v41718_v23  ;;  %49964 = vst [vmem:[#allocation58_spill] sm:$0xff] %v42560_v51  ;;  %v42567_v63 = vand.u32 4294901760, %v42560_v51  ;;  %v42576_v6 = vpack.c.bf16 %v49967_v56, %v49966_v53 }
  0x94   : > { %36696 = vmatprep.subr.bf16.mxu1 %v41774_v36 }
  0x95   : > { %36838 = vmatpush3.bf16.msra.mxu0 %v41748_v29  ;;  %49965 = vst [vmem:[#allocation59_spill] sm:$0xff] %v42567_v63  ;;  %v3019_v39 = vsub.f32 %v42560_v51, %v42567_v63 }
  0x96   : > { %36840 = vmatprep.subr.bf16.mxu0 %v41800_v43 }
  0x97   : > { %36698 = vmatpush3.bf16.msra.mxu1 %v41774_v36  ;;  %v42593_v56 = vand.u32 4294901760, %v3019_v39  ;;  %v49973_v39 = vld [vmem:[#allocation22_spill] sm:$0xff] }
  0x98   : > { %36700 = vmatprep.subr.bf16.mxu1 %v41806_v44 }
  0x99   : > { %36842 = vmatpush3.bf16.msra.mxu0 %v41800_v43  ;;  %49970 = vst [vmem:[#allocation60_spill] sm:$0xff] %v42593_v56 }
  0x9a   : > { %36844 = vmatprep.subr.bf16.mxu0 %v41831_v50 }
  0x9b   : > { %36702 = vmatpush3.bf16.msra.mxu1 %v41806_v44 }
  0x9c   : > { %36704 = vmatprep.subr.bf16.mxu1 %v41845_v54 }
  0x9d   : > { %36846 = vmatpush3.bf16.msra.mxu0 %v41831_v50  ;;  %v49969_v50 = vand.u32 4294901760, %v42393_v17  ;;  %v2937_v17 = vsel %vm388_vm0, %v27334_v21, 0  ;;  %v27331_v21 = vld [vmem:[%s49497_s1 + $0x170] sm:$0xff] }
  0x9e   : > { %36848 = vmatprep.subr.bf16.mxu0 %v49941_v30  ;;  %v42610_v53 = vand.u32 4294901760, %v2937_v17 }
  0x9f   : > { %36706 = vmatpush3.bf16.msra.mxu1 %v41845_v54 }
  0xa0   : > { %36708 = vmatprep.subr.bf16.mxu1 %v49942_v24  ;;  %49974 = vst [vmem:[#allocation61_spill] sm:$0xff] %v42610_v53 }
  0xa1   : > { %36850 = vmatpush3.bf16.msra.mxu0 %v49941_v30  ;;  %v49968_v30 = vand.u32 4294901760, %v42388_v12  ;;  %v49971_v12 = vand.u32 4294901760, %v42414_v49  ;;  %v49975_v49 = vand.u32 4294901760, %v42448_v34  ;;  %v49979_v34 = vand.u32 4294901760, %v42487_v45 }
  0xa2   : > { %36852 = vmatprep.subr.bf16.mxu0 %v49943_v20  ;;  %v49983_v45 = vand.u32 4294901760, %v42426_v7 }
  0xa3   : > { %36710 = vmatpush3.bf16.msra.mxu1 %v49942_v24  ;;  %v42588_v33 = vpack.c.bf16 %v49969_v50, %v49968_v30  ;;  %v49972_v50 = vand.u32 4294901760, %v42419_v58  ;;  %v49976_v58 = vand.u32 4294901760, %v42453_v46  ;;  %v49978_v46 = vand.u32 4294901760, %v42482_v28 }
  0xa4   : > { %36856 = vmatprep.subr.bf16.mxu1 %v42576_v6  ;;  %v1780_v28 = vsub.f32 %v42426_v7, %v49983_v45 }
  0xa5   : > { %36854 = vmatpush3.bf16.msra.mxu0 %v49943_v20  ;;  %v42603_v30 = vpack.c.bf16 %v49972_v50, %v49971_v12  ;;  %v42618_v12 = vpack.c.bf16 %v49976_v58, %v49975_v49  ;;  %v27332_v50 = vld [vmem:[%s49497_s1 + $0x178] sm:$0xff]  ;;  %v42637_v49 = vpack.c.bf16 %v49979_v34, %v49978_v46  ;;  %v49980_v20 = vand.u32 4294901760, %v42398_v9 }
  0xa6   : > { %37144 = vmatprep.subr.bf16.mxu0 %v41688_v15  ;;  %30679 = vmatmul.mubr.f32.vlgmr.msra.gmra.mrb[0].mxu1 %v41925_v0  ;;  %v1699_v58 = vand.u32 4294901760, %v27332_v50  ;;  %v49984_v46 = vand.u32 4294901760, %v42431_v18 }
  0xa7   : > { %36858 = vmatpush3.bf16.msra.mxu1 %v42576_v6  ;;  %30867 = vmatprep.mubr.f32.mxu1 %v49973_v39  ;;  %v1766_v43 = vsub.f32 %v42398_v9, %v49980_v20  ;;  %v49981_v39 = vand.u32 4294901760, %v42403_v48 }
  0xa8   : > { %30841 = vmatmul.mubr.f32.vlgmr.msra.gmra.mrb[0].mxu0 %v41927_v57  ;;  %36860 = vmatprep.subr.bf16.mxu1 %v42588_v33  ;;  %v42629_v57 = vsub.f32 %v2937_v17, %v42610_v53  ;;  %v1787_v34 = vsub.f32 %v42431_v18, %v49984_v46  ;;  %v1781_v46 = vand.u32 4294901760, %v1780_v28  ;;  %v1802_v28 = vand.u32 4294901760, %v1801_v16 }
  0xa9   : > { %37146 = vmatpush3.bf16.msra.mxu0 %v41688_v15  ;;  %31191 = vmatprep.mubr.f32.mxu0 %v42593_v56  ;;  %v1696_v56 = vand.u32 4294901760, %v27331_v21  ;;  %v1773_v17 = vsub.f32 %v42403_v48, %v49981_v39  ;;  %v1767_v39 = vand.u32 4294901760, %v1766_v43  ;;  %v42690_v2 = vsub.f32 %v27332_v50, %v1699_v58 }
  0xaa   : > { %37148 = vmatprep.subr.bf16.mxu0 %v41718_v23  ;;  %49977 = vst [vmem:[#allocation62_spill] sm:$0xff] %v42629_v57  ;;  %v42648_v29 = vand.u32 4294901760, %v42629_v57  ;;  %v1788_v47 = vand.u32 4294901760, %v1787_v34  ;;  %v49987_v34 = vand.u32 4294901760, %v42494_v1  ;;  %v42696_v16 = vpack.c.bf16 %v1802_v28, %v1795_v41  ;;  %v49993_v41 = vld [vmem:[#allocation29_spill] sm:$0xff] }
  0xab   : > { %36862 = vmatpush3.bf16.msra.mxu1 %v42588_v33  ;;  %v42658_v20 = vpack.c.bf16 %v1699_v58, %v1696_v56  ;;  %v1774_v22 = vand.u32 4294901760, %v1773_v17  ;;  %v42688_v35 = vsub.f32 %v27331_v21, %v1696_v56  ;;  %v49992_v21 = vand.u32 4294901760, %v42524_v40 }
  0xac   : > { %36864 = vmatprep.subr.bf16.mxu1 %v42603_v30  ;;  %49982 = vst [vmem:[#allocation63_spill] sm:$0xff] %v42648_v29  ;;  %v3029_v45 = vsub.f32 %v42629_v57, %v42648_v29  ;;  %v42678_v26 = vpack.c.bf16 %v1788_v47, %v1781_v46  ;;  %v1808_v42 = vsub.f32 %v42494_v1, %v49987_v34  ;;  %v49990_v47 = vld [vmem:[#allocation27_spill] sm:$0xff]  ;;  %v49991_v34 = vand.u32 4294901760, %v42519_v5 }
  0xad   : > { %37150 = vmatpush3.bf16.msra.mxu0 %v41718_v23  ;;  %v42672_v43 = vpack.c.bf16 %v1774_v22, %v1767_v39  ;;  %v49988_v22 = vand.u32 4294901760, %v42499_v8  ;;  %v1829_v50 = vsub.f32 %v42524_v40, %v49992_v21  ;;  %v1835_v58 = vand.u32 4294901760, %v42688_v35  ;;  %v49994_v21 = vld [vmem:[#allocation31_spill] sm:$0xff] }
  0xae   : > { %37152 = vmatprep.subr.bf16.mxu0 %v41774_v36  ;;  %v42676_v17 = vand.u32 4294901760, %v3029_v45  ;;  %v49989_v45 = vld [vmem:[#allocation21_spill] sm:$0xff]  ;;  %v1809_v46 = vand.u32 4294901760, %v1808_v42  ;;  %v1822_v60 = vsub.f32 %v42519_v5, %v49991_v34 }
  0xaf   : > { %36866 = vmatpush3.bf16.msra.mxu1 %v42603_v30  ;;  %v1815_v39 = vsub.f32 %v42499_v8, %v49988_v22  ;;  %v49637_v22 = vand.u32 4294901760, %v42690_v2 }
  0xb0   : > { %36868 = vmatprep.subr.bf16.mxu1 %v42618_v12  ;;  %v1823_v28 = vand.u32 4294901760, %v1822_v60 }
  0xb1   : > { %37154 = vmatpush3.bf16.msra.mxu0 %v41774_v36  ;;  %v1816_v56 = vand.u32 4294901760, %v1815_v39  ;;  %v1830_v39 = vand.u32 4294901760, %v1829_v50  ;;  %v1843_v34 = vsub.f32 %v42690_v2, %v49637_v22  ;;  %v49995_v50 = vld [vmem:[#allocation33_spill] sm:$0xff]  ;;  %v49996_v22 = vld [vmem:[#allocation35_spill] sm:$0xff] }
  0xb2   : > { %37156 = vmatprep.subr.bf16.mxu0 %v41806_v44 }
  0xb3   : > { %36870 = vmatpush3.bf16.msra.mxu1 %v42618_v12  ;;  %v42714_v42 = vpack.c.bf16 %v1816_v56, %v1809_v46  ;;  %v42726_v60 = vpack.c.bf16 %v1830_v39, %v1823_v28  ;;  %v1844_v56 = vand.u32 4294901760, %v1843_v34  ;;  %v42740_v28 = vpack.c.bf16 %v42403_v48, %v42398_v9  ;;  %v27296_v9 = vld [vmem:[%s49497_s1 + $0x70] sm:$0xff]  ;;  %v27297_v48 = vld [vmem:[%s49497_s1 + $0x78] sm:$0xff] }
  0xb4   : > { %36872 = vmatprep.subr.bf16.mxu1 %v42637_v49  ;;  %v42748_v39 = vpack.c.bf16 %v42431_v18, %v42426_v7  ;;  %v50011_v18 = vld [vmem:[#allocation46_spill] sm:$0xff]  ;;  %v50012_v7 = vld [vmem:[#allocation48_spill] sm:$0xff] }
  0xb5   : > { %37158 = vmatpush3.bf16.msra.mxu0 %v41806_v44  ;;  %49997 = vst [vmem:[#allocation21_spill] sm:$0xff] %v42740_v28  ;;  %v50013_v34 = vld [vmem:[#allocation4_spill] sm:$0xff] }
  0xb6   : > { %37160 = vmatprep.subr.bf16.mxu0 %v41845_v54  ;;  %49998 = vst [vmem:[#allocation27_spill] sm:$0xff] %v42748_v39 }
  0xb7   : > { %36874 = vmatpush3.bf16.msra.mxu1 %v42637_v49 }
  0xb8   : > { %36876 = vmatprep.subr.bf16.mxu1 %v42658_v20 }
  0xb9   : > { %37162 = vmatpush3.bf16.msra.mxu0 %v41845_v54 }
  0xba   : > { %37164 = vmatprep.subr.bf16.mxu0 %v49942_v24 }
  0xbb   : > { %36878 = vmatpush3.bf16.msra.mxu1 %v42658_v20 }
  0xbc   : > { %36880 = vmatprep.subr.bf16.mxu1 %v42672_v43 }
  0xbd   : > { %37166 = vmatpush3.bf16.msra.mxu0 %v49942_v24 }
  0xbe   : > { %37168 = vmatprep.subr.bf16.mxu0 %v49989_v45  ;;  %30868 = vmatmul.mubr.f32.vlgmr.msra.gmra.mrb[2].mxu1 %v49990_v47 }
  0xbf   : > { %36882 = vmatpush3.bf16.msra.mxu1 %v42672_v43  ;;  %30894 = vmatprep.mubr.f32.mxu1 %v49946_v14 }
  0xc0   : > { %31192 = vmatmul.mubr.f32.vlgmr.msra.gmra.mrb[2].mxu0 %v42676_v17  ;;  %36884 = vmatprep.subr.bf16.mxu1 %v42678_v26 }
  0xc1   : > { %37170 = vmatpush3.bf16.msra.mxu0 %v49989_v45  ;;  %31218 = vmatprep.mubr.f32.mxu0 %v42553_v25  ;;  %v1836_v45 = vsub.f32 %v42688_v35, %v1835_v58 }
  0xc2   : > { %37172 = vmatprep.subr.bf16.mxu0 %v49993_v41 }
  0xc3   : > { %36886 = vmatpush3.bf16.msra.mxu1 %v42678_v26  ;;  %v1837_v46 = vand.u32 4294901760, %v1836_v45 }
  0xc4   : > { %36888 = vmatprep.subr.bf16.mxu1 %v42696_v16 }
  0xc5   : > { %37174 = vmatpush3.bf16.msra.mxu0 %v49993_v41  ;;  %v42732_v41 = vpack.c.bf16 %v1844_v56, %v1837_v46  ;;  %v27301_v46 = vld [vmem:[%s49497_s1 + $0x98] sm:$0xff] }
  0xc6   : > { %37176 = vmatprep.subr.bf16.mxu0 %v49994_v21 }
  0xc7   : > { %36890 = vmatpush3.bf16.msra.mxu1 %v42696_v16 }
  0xc8   : > { %36892 = vmatprep.subr.bf16.mxu1 %v42714_v42 }
  0xc9   : > { %37178 = vmatpush3.bf16.msra.mxu0 %v49994_v21  ;;  %v27300_v21 = vld [vmem:[%s49497_s1 + $0x90] sm:$0xff] }
  0xca   : > { %37180 = vmatprep.subr.bf16.mxu0 %v49995_v50  ;;  %v2316_v56 = vand.u32 4294901760, %v27300_v21 }
  0xcb   : > { %36894 = vmatpush3.bf16.msra.mxu1 %v42714_v42 }
  0xcc   : > { %36896 = vmatprep.subr.bf16.mxu1 %v42726_v60 }
  0xcd   : > { %37182 = vmatpush3.bf16.msra.mxu0 %v49995_v50  ;;  %v2319_v50 = vand.u32 4294901760, %v27301_v46 }
  0xce   : > { %37184 = vmatprep.subr.bf16.mxu0 %v49996_v22 }
  0xcf   : > { %36898 = vmatpush3.bf16.msra.mxu1 %v42726_v60 }
  0xd0   : > { %36900 = vmatprep.subr.bf16.mxu1 %v42732_v41 }
  0xd1   : > { %37186 = vmatpush3.bf16.msra.mxu0 %v49996_v22 }
  0xd2   : > { %37188 = vmatprep.subr.bf16.mxu0 %v42192_v38 }
  0xd3   : > { %36902 = vmatpush3.bf16.msra.mxu1 %v42732_v41 }
  0xd4   : > { %36904 = vmatprep.subr.bf16.mxu1 %v42740_v28 }
  0xd5   : > { %37190 = vmatpush3.bf16.msra.mxu0 %v42192_v38  ;;  %v42758_v38 = vpack.c.bf16 %v42465_v13, %v42460_v59  ;;  %v42776_v13 = vpack.c.bf16 %v42524_v40, %v42519_v5  ;;  %v50003_v5 = vld [vmem:[#allocation40_spill] sm:$0xff]  ;;  %v50004_v40 = vld [vmem:[#allocation55_spill] sm:$0xff]  ;;  %v2304_v59 = vand.u32 4294901760, %v27296_v9 }
  0xd6   : > { %37192 = vmatprep.subr.bf16.mxu0 %v42189_v19  ;;  %30895 = vmatmul.mubr.f32.vlgmr.msra.gmra.mrb[2].mxu1 %v41925_v0 }
  0xd7   : > { %36906 = vmatpush3.bf16.msra.mxu1 %v42740_v28  ;;  %49999 = vst [vmem:[#allocation29_spill] sm:$0xff] %v42758_v38  ;;  %30921 = vmatprep.mubr.f32.mxu1 %v41904_v55  ;;  %50001 = vst [vmem:[#allocation33_spill] sm:$0xff] %v42776_v13 }
  0xd8   : > { %31219 = vmatmul.mubr.f32.vlgmr.msra.gmra.mrb[2].mxu0 %v42610_v53  ;;  %36908 = vmatprep.subr.bf16.mxu1 %v42748_v39 }
  0xd9   : > { %37194 = vmatpush3.bf16.msra.mxu0 %v42189_v19  ;;  %31245 = vmatprep.mubr.f32.mxu0 %v42560_v51  ;;  %v42768_v19 = vpack.c.bf16 %v42499_v8, %v42494_v1  ;;  %v50009_v8 = vand.u32 4294901760, %v42690_v2  ;;  %v2307_v1 = vand.u32 4294901760, %v27297_v48  ;;  %v50023_v51 = vld [vmem:[#allocation8_spill] sm:$0xff] }
  0xda   : > { %37196 = vmatprep.subr.bf16.mxu0 %v42266_v10 }
  0xdb   : > { %36910 = vmatpush3.bf16.msra.mxu1 %v42748_v39  ;;  %50000 = vst [vmem:[#allocation31_spill] sm:$0xff] %v42768_v19  ;;  %v42904_v45 = vpack.c.bf16 %v2307_v1, %v2304_v59 }
  0xdc   : > { %36912 = vmatprep.subr.bf16.mxu1 %v42758_v38 }
  0xdd   : > { %37198 = vmatpush3.bf16.msra.mxu0 %v42266_v10  ;;  %v42784_v10 = vpack.c.bf16 %v42690_v2, %v42688_v35  ;;  %v27298_v35 = vld [vmem:[%s49497_s1 + $0x80] sm:$0xff] }
  0xde   : > { %37200 = vmatprep.subr.bf16.mxu0 %v42280_v4  ;;  %v2310_v22 = vand.u32 4294901760, %v27298_v35 }
  0xdf   : > { %36914 = vmatpush3.bf16.msra.mxu1 %v42758_v38  ;;  %50002 = vst [vmem:[#allocation35_spill] sm:$0xff] %v42784_v10 }
  0xe0   : > { %36916 = vmatprep.subr.bf16.mxu1 %v42768_v19 }
  0xe1   : > { %37202 = vmatpush3.bf16.msra.mxu0 %v42280_v4  ;;  %v50005_v4 = vld [vmem:[#allocation42_spill] sm:$0xff] }
  0xe2   : > { %37204 = vmatprep.subr.bf16.mxu0 %v42294_v37 }
  0xe3   : > { %36918 = vmatpush3.bf16.msra.mxu1 %v42768_v19  ;;  %v42980_v19 = vsub.f32 %v27301_v46, %v2319_v50 }
  0xe4   : > { %36920 = vmatprep.subr.bf16.mxu1 %v42776_v13 }
  0xe5   : > { %37206 = vmatpush3.bf16.msra.mxu0 %v42294_v37  ;;  %v50007_v37 = vld [vmem:[#allocation44_spill] sm:$0xff]  ;;  %v50026_v28 = vand.u32 4294901760, %v42980_v19 }
  0xe6   : > { %37208 = vmatprep.subr.bf16.mxu0 %v42306_v52 }
  0xe7   : > { %36922 = vmatpush3.bf16.msra.mxu1 %v42776_v13  ;;  %v42978_v13 = vsub.f32 %v27300_v21, %v2316_v56 }
  0xe8   : > { %36924 = vmatprep.subr.bf16.mxu1 %v42784_v10 }
  0xe9   : > { %37210 = vmatpush3.bf16.msra.mxu0 %v42306_v52  ;;  %v50008_v52 = vld [vmem:[#allocation57_spill] sm:$0xff] }
  0xea   : > { %37212 = vmatprep.subr.bf16.mxu0 %v42318_v11 }
  0xeb   : > { %36926 = vmatpush3.bf16.msra.mxu1 %v42784_v10 }
  0xec   : > { %36928 = vmatprep.subr.bf16.mxu1 %v42576_v6 }
  0xed   : > { %37214 = vmatpush3.bf16.msra.mxu0 %v42318_v11  ;;  %v42846_v11 = vpack.c.bf16 %v50009_v8, %v1835_v58  ;;  %v27299_v58 = vld [vmem:[%s49497_s1 + $0x88] sm:$0xff] }
  0xee   : > { %37216 = vmatprep.subr.bf16.mxu0 %v41688_v15  ;;  %30922 = vmatmul.mubr.f32.vlgmr.msra.gmra.mrb[2].mxu1 %v41942_v32 }
  0xef   : > { %36930 = vmatpush3.bf16.msra.mxu1 %v42576_v6  ;;  %30948 = vmatprep.mubr.f32.mxu1 %v41923_v62  ;;  %50010 = vst [vmem:[#allocation40_spill] sm:$0xff] %v42846_v11 }
  0xf0   : > { %31246 = vmatmul.mubr.f32.vlgmr.msra.gmra.mrb[2].mxu0 %v42629_v57  ;;  %36932 = vmatprep.subr.bf16.mxu1 %v42588_v33  ;;  %v50020_v57 = vld [vmem:[#allocation7_spill] sm:$0xff] }
  0xf1   : > { %37218 = vmatpush3.bf16.msra.mxu0 %v41688_v15  ;;  %31272 = vmatprep.mubr.f32.mxu0 %v42567_v63 }
  0xf2   : > { %37220 = vmatprep.subr.bf16.mxu0 %v41718_v23 }
  0xf3   : > { %36934 = vmatpush3.bf16.msra.mxu1 %v42588_v33 }
  0xf4   : > { %36936 = vmatprep.subr.bf16.mxu1 %v42603_v30 }
  0xf5   : > { %37222 = vmatpush3.bf16.msra.mxu0 %v41718_v23 }
  0xf6   : > { %37224 = vmatprep.subr.bf16.mxu0 %v41774_v36 }
  0xf7   : > { %36938 = vmatpush3.bf16.msra.mxu1 %v42603_v30 }
  0xf8   : > { %36940 = vmatprep.subr.bf16.mxu1 %v42618_v12 }
  0xf9   : > { %37226 = vmatpush3.bf16.msra.mxu0 %v41774_v36 }
  0xfa   : > { %37228 = vmatprep.subr.bf16.mxu0 %v41806_v44 }
  0xfb   : > { %36942 = vmatpush3.bf16.msra.mxu1 %v42618_v12 }
  0xfc   : > { %36944 = vmatprep.subr.bf16.mxu1 %v42637_v49 }
  0xfd   : > { %37230 = vmatpush3.bf16.msra.mxu0 %v41806_v44 }
  0xfe   : > { %37232 = vmatprep.subr.bf16.mxu0 %v41845_v54 }
  0xff   : > { %36946 = vmatpush3.bf16.msra.mxu1 %v42637_v49 }
 0x100   : > { %36948 = vmatprep.subr.bf16.mxu1 %v42658_v20 }
 0x101   : > { %37234 = vmatpush3.bf16.msra.mxu0 %v41845_v54 }
 0x102   : > { %37236 = vmatprep.subr.bf16.mxu0 %v49942_v24 }
 0x103   : > { %36950 = vmatpush3.bf16.msra.mxu1 %v42658_v20 }
 0x104   : > { %36952 = vmatprep.subr.bf16.mxu1 %v42442_v27 }
 0x105   : > { %37238 = vmatpush3.bf16.msra.mxu0 %v49942_v24 }
 0x106   : > { %37240 = vmatprep.subr.bf16.mxu0 %v42202_v3  ;;  %30949 = vmatmul.mubr.f32.vlgmr.msra.gmra.mrb[2].mxu1 %v49944_v61 }
 0x107   : > { %36954 = vmatpush3.bf16.msra.mxu1 %v42442_v27  ;;  %30975 = vmatprep.mubr.f32.mxu1 %v49946_v14 }
 0x108   : > { %31273 = vmatmul.mubr.f32.vlgmr.msra.gmra.mrb[2].mxu0 %v42648_v29  ;;  %36956 = vmatprep.subr.bf16.mxu1 %v42476_v31 }
 0x109   : > { %37242 = vmatpush3.bf16.msra.mxu0 %v42202_v3  ;;  %31299 = vmatprep.mubr.f32.mxu0 %v42553_v25  ;;  %v50006_v3 = vld [vmem:[#allocation56_spill] sm:$0xff] }
 0x10a   : > { %37244 = vmatprep.subr.bf16.mxu0 %v50003_v5 }
 0x10b   : > { %36958 = vmatpush3.bf16.msra.mxu1 %v42476_v31 }
 0x10c   : > { %36960 = vmatprep.subr.bf16.mxu1 %v50004_v40 }
 0x10d   : > { %37246 = vmatpush3.bf16.msra.mxu0 %v50003_v5  ;;  %v27302_v5 = vld [vmem:[%s49497_s1 + $0xa0] sm:$0xff] }
 0x10e   : > { %37248 = vmatprep.subr.bf16.mxu0 %v50005_v4 }
 0x10f   : > { %36962 = vmatpush3.bf16.msra.mxu1 %v50004_v40  ;;  %v2322_v40 = vand.u32 4294901760, %v27302_v5 }
 0x110   : > { %36964 = vmatprep.subr.bf16.mxu1 %v50006_v3 }
 0x111   : > { %37250 = vmatpush3.bf16.msra.mxu0 %v50005_v4  ;;  %v27303_v4 = vld [vmem:[%s49497_s1 + $0xa8] sm:$0xff] }
 0x112   : > { %37252 = vmatprep.subr.bf16.mxu0 %v50007_v37  ;;  %v2325_v31 = vand.u32 4294901760, %v27303_v4 }
 0x113   : > { %36966 = vmatpush3.bf16.msra.mxu1 %v50006_v3  ;;  %v42935_v3 = vsub.f32 %v27297_v48, %v2307_v1  ;;  %v27305_v48 = vld [vmem:[%s49497_s1 + $0xb8] sm:$0xff] }
 0x114   : > { %36968 = vmatprep.subr.bf16.mxu1 %v50008_v52  ;;  %v2331_v29 = vand.u32 4294901760, %v27305_v48 }
 0x115   : > { %37254 = vmatpush3.bf16.msra.mxu0 %v50007_v37 }
 0x116   : > { %37256 = vmatprep.subr.bf16.mxu0 %v50011_v18 }
 0x117   : > { %36970 = vmatpush3.bf16.msra.mxu1 %v50008_v52  ;;  %v42933_v52 = vsub.f32 %v27296_v9, %v2304_v59  ;;  %v27304_v9 = vld [vmem:[%s49497_s1 + $0xb0] sm:$0xff] }
 0x118   : > { %36972 = vmatprep.subr.bf16.mxu1 %v42846_v11 }
 0x119   : > { %37258 = vmatpush3.bf16.msra.mxu0 %v50011_v18  ;;  %v50014_v18 = vld [vmem:[#allocation5_spill] sm:$0xff] }
 0x11a   : > { %37260 = vmatprep.subr.bf16.mxu0 %v50012_v7 }
 0x11b   : > { %36974 = vmatpush3.bf16.msra.mxu1 %v42846_v11  ;;  %v50016_v11 = vld [vmem:[#allocation22_spill] sm:$0xff] }
 0x11c   : > { %36976 = vmatprep.subr.bf16.mxu1 %v42576_v6 }
 0x11d   : > { %37262 = vmatpush3.bf16.msra.mxu0 %v50012_v7  ;;  %v50015_v7 = vld [vmem:[#allocation25_spill] sm:$0xff] }
 0x11e   : > { %37264 = vmatprep.subr.bf16.mxu0 %v41688_v15  ;;  %30976 = vmatmul.mubr.f32.vlgmr.msra.gmra.mrb[2].mxu1 %v41925_v0 }
 0x11f   : > { %36978 = vmatpush3.bf16.msra.mxu1 %v42576_v6  ;;  %31002 = vmatprep.mubr.f32.mxu1 %v49946_v14 }
 0x120   : > { %31300 = vmatmul.mubr.f32.vlgmr.msra.gmra.mrb[2].mxu0 %v42610_v53  ;;  %36980 = vmatprep.subr.bf16.mxu1 %v42588_v33 }
 0x121   : > { %37266 = vmatpush3.bf16.msra.mxu0 %v41688_v15  ;;  %31326 = vmatprep.mubr.f32.mxu0 %v42553_v25  ;;  %v27294_v15 = vld [vmem:[%s49497_s1 + $0x60] sm:$0xff] }
 0x122   : > { %37268 = vmatprep.subr.bf16.mxu0 %v41718_v23  ;;  %v2298_v2 = vand.u32 4294901760, %v27294_v15 }
 0x123   : > { %36982 = vmatpush3.bf16.msra.mxu1 %v42588_v33 }
 0x124   : > { %36984 = vmatprep.subr.bf16.mxu1 %v42603_v30  ;;  %v42926_v37 = vsub.f32 %v27294_v15, %v2298_v2  ;;  %v42940_v15 = vpack.c.bf16 %v2319_v50, %v2316_v56  ;;  %v50025_v50 = vand.u32 4294901760, %v42978_v13 }
 0x125   : > { %37270 = vmatpush3.bf16.msra.mxu0 %v41718_v23  ;;  %v27295_v23 = vld [vmem:[%s49497_s1 + $0x68] sm:$0xff] }
 0x126   : > { %37272 = vmatprep.subr.bf16.mxu0 %v41774_v36  ;;  %v50018_v27 = vand.u32 4294901760, %v42926_v37 }
 0x127   : > { %36986 = vmatpush3.bf16.msra.mxu1 %v42603_v30 }
 0x128   : > { %36988 = vmatprep.subr.bf16.mxu1 %v42618_v12  ;;  %v2398_v59 = vsub.f32 %v42926_v37, %v50018_v27 }
 0x129   : > { %37274 = vmatpush3.bf16.msra.mxu0 %v41774_v36  ;;  %v2301_v36 = vand.u32 4294901760, %v27295_v23 }
 0x12a   : > { %37276 = vmatprep.subr.bf16.mxu0 %v41806_v44 }
 0x12b   : > { %36990 = vmatpush3.bf16.msra.mxu1 %v42618_v12  ;;  %v42928_v8 = vsub.f32 %v27295_v23, %v2301_v36  ;;  %v42956_v23 = vsub.f32 %v27298_v35, %v2310_v22  ;;  %v50021_v35 = vand.u32 4294901760, %v42933_v52 }
 0x12c   : > { %36992 = vmatprep.subr.bf16.mxu1 %v42637_v49 }
 0x12d   : > { %37278 = vmatpush3.bf16.msra.mxu0 %v41806_v44  ;;  %v42892_v44 = vpack.c.bf16 %v2301_v36, %v2298_v2  ;;  %v50017_v36 = vld [vmem:[#allocation6_spill] sm:$0xff]  ;;  %v50019_v1 = vand.u32 4294901760, %v42928_v8  ;;  %v49665_v10 = vand.u32 4294901760, %v42956_v23 }
 0x12e   : > { %37280 = vmatprep.subr.bf16.mxu0 %v41845_v54 }
 0x12f   : > { %36994 = vmatpush3.bf16.msra.mxu1 %v42637_v49  ;;  %v2405_v63 = vsub.f32 %v42928_v8, %v50019_v1  ;;  %v2426_v21 = vsub.f32 %v42956_v23, %v49665_v10 }
 0x130   : > { %36996 = vmatprep.subr.bf16.mxu1 %v42658_v20 }
 0x131   : > { %37282 = vmatpush3.bf16.msra.mxu0 %v41845_v54  ;;  %v2313_v54 = vand.u32 4294901760, %v27299_v58  ;;  %v2406_v38 = vand.u32 4294901760, %v2405_v63 }
 0x132   : > { %37284 = vmatprep.subr.bf16.mxu0 %v49942_v24 }
 0x133   : > { %36998 = vmatpush3.bf16.msra.mxu1 %v42658_v20  ;;  %v42958_v2 = vsub.f32 %v27299_v58, %v2313_v54  ;;  %v2412_v58 = vsub.f32 %v42933_v52, %v50021_v35  ;;  %v2399_v35 = vand.u32 4294901760, %v2398_v59  ;;  %v43000_v59 = vsub.f32 %v27302_v5, %v2322_v40 }
 0x134   : > { %37000 = vmatprep.subr.bf16.mxu1 %v42892_v44  ;;  %v43020_v5 = vsub.f32 %v27305_v48, %v2331_v29 }
 0x135   : > { %37286 = vmatpush3.bf16.msra.mxu0 %v49942_v24  ;;  %v42916_v24 = vpack.c.bf16 %v2313_v54, %v2310_v22  ;;  %v50022_v22 = vand.u32 4294901760, %v42935_v3  ;;  %v49666_v27 = vand.u32 4294901760, %v42958_v2  ;;  %v42998_v63 = vpack.c.bf16 %v2406_v38, %v2399_v35  ;;  %v50028_v35 = vld [vmem:[#allocation28_spill] sm:$0xff] }
 0x136   : > { %37288 = vmatprep.subr.bf16.mxu0 %v50013_v34  ;;  %31003 = vmatmul.mubr.f32.vlgmr.msra.gmra.mrb[2].mxu1 %v41925_v0  ;;  %v2447_v38 = vsub.f32 %v42980_v19, %v50026_v28  ;;  %v49671_v48 = vand.u32 4294901760, %v43020_v5 }
 0x137   : > { %37002 = vmatpush3.bf16.msra.mxu1 %v42892_v44  ;;  %31029 = vmatprep.mubr.f32.mxu1 %v50015_v7  ;;  %v42954_v7 = vpack.c.bf16 %v2325_v31, %v2322_v40  ;;  %v2419_v54 = vsub.f32 %v42935_v3, %v50022_v22  ;;  %v2413_v22 = vand.u32 4294901760, %v2412_v58  ;;  %v2433_v46 = vsub.f32 %v42958_v2, %v49666_v27 }
 0x138   : > { %31327 = vmatmul.mubr.f32.vlgmr.msra.gmra.mrb[2].mxu0 %v42610_v53  ;;  %37004 = vmatprep.subr.bf16.mxu1 %v42904_v45  ;;  %v43002_v58 = vsub.f32 %v27303_v4, %v2325_v31  ;;  %v2427_v27 = vand.u32 4294901760, %v2426_v21  ;;  %v2440_v53 = vsub.f32 %v42978_v13, %v50025_v50  ;;  %v49674_v31 = vand.u32 4294901760, %v43000_v59  ;;  %v50027_v4 = vld [vmem:[#allocation26_spill] sm:$0xff] }
 0x139   : > { %37290 = vmatpush3.bf16.msra.mxu0 %v50013_v34  ;;  %31353 = vmatprep.mubr.f32.mxu0 %v50016_v11  ;;  %v2328_v11 = vand.u32 4294901760, %v27304_v9  ;;  %v2420_v39 = vand.u32 4294901760, %v2419_v54  ;;  %v50024_v54 = vld [vmem:[#allocation10_spill] sm:$0xff]  ;;  %v2434_v56 = vand.u32 4294901760, %v2433_v46  ;;  %v2448_v21 = vand.u32 4294901760, %v2447_v38 }
 0x13a   : > { %37292 = vmatprep.subr.bf16.mxu0 %v50014_v18 }
 0x13b   : > { %37006 = vmatpush3.bf16.msra.mxu1 %v42904_v45  ;;  %v42984_v1 = vpack.c.bf16 %v2331_v29, %v2328_v11  ;;  %v43005_v10 = vpack.c.bf16 %v2420_v39, %v2413_v22  ;;  %v49673_v39 = vand.u32 4294901760, %v43002_v58  ;;  %v43018_v40 = vsub.f32 %v27304_v9, %v2328_v11 }
 0x13c   : > { %37008 = vmatprep.subr.bf16.mxu1 %v42916_v24  ;;  %v43026_v28 = vpack.c.bf16 %v2434_v56, %v2427_v27  ;;  %v2441_v22 = vand.u32 4294901760, %v2440_v53  ;;  %v2454_v29 = vsub.f32 %v43000_v59, %v49674_v31  ;;  %v50029_v27 = vld [vmem:[#allocation30_spill] sm:$0xff]  ;;  %v50030_v53 = vld [vmem:[#allocation12_spill] sm:$0xff] }
 0x13d   : > { %37294 = vmatpush3.bf16.msra.mxu0 %v50014_v18  ;;  %v2461_v11 = vsub.f32 %v43002_v58, %v49673_v39  ;;  %v49672_v9 = vand.u32 4294901760, %v43018_v40  ;;  %v50049_v39 = vld [vmem:[#allocation54_spill] sm:$0xff] }
 0x13e   : > { %37296 = vmatprep.subr.bf16.mxu0 %v50017_v36  ;;  %v43042_v46 = vpack.c.bf16 %v2448_v21, %v2441_v22  ;;  %v2455_v56 = vand.u32 4294901760, %v2454_v29 }
 0x13f   : > { %37010 = vmatpush3.bf16.msra.mxu1 %v42916_v24  ;;  %v2462_v50 = vand.u32 4294901760, %v2461_v11  ;;  %v2468_v38 = vsub.f32 %v43018_v40, %v49672_v9  ;;  %v50032_v11 = vld [vmem:[#allocation34_spill] sm:$0xff]  ;;  %v50047_v9 = vld [vmem:[#allocation53_spill] sm:$0xff] }
 0x140   : > { %37012 = vmatprep.subr.bf16.mxu1 %v42940_v15 }
 0x141   : > { %37298 = vmatpush3.bf16.msra.mxu0 %v50017_v36  ;;  %v43056_v22 = vpack.c.bf16 %v2462_v50, %v2455_v56  ;;  %v2469_v21 = vand.u32 4294901760, %v2468_v38  ;;  %v43070_v56 = vpack.c.bf16 %v42928_v8, %v42926_v37  ;;  %v50035_v50 = vld [vmem:[#allocation39_spill] sm:$0xff]  ;;  %v43078_v38 = vpack.c.bf16 %v42935_v3, %v42933_v52 }
 0x142   : > { %37300 = vmatprep.subr.bf16.mxu0 %v50020_v57 }
 0x143   : > { %37014 = vmatpush3.bf16.msra.mxu1 %v42940_v15  ;;  %50034 = vst [vmem:[#allocation42_spill] sm:$0xff] %v43070_v56  ;;  %50036 = vst [vmem:[#allocation44_spill] sm:$0xff] %v43078_v38 }
 0x144   : > { %37016 = vmatprep.subr.bf16.mxu1 %v42954_v7 }
 0x145   : > { %37302 = vmatpush3.bf16.msra.mxu0 %v50020_v57 }
 0x146   : > { %37304 = vmatprep.subr.bf16.mxu0 %v50023_v51 }
 0x147   : > { %37018 = vmatpush3.bf16.msra.mxu1 %v42954_v7 }
 0x148   : > { %37020 = vmatprep.subr.bf16.mxu1 %v42984_v1 }
 0x149   : > { %37306 = vmatpush3.bf16.msra.mxu0 %v50023_v51 }
 0x14a   : > { %37308 = vmatprep.subr.bf16.mxu0 %v50024_v54 }
 0x14b   : > { %37022 = vmatpush3.bf16.msra.mxu1 %v42984_v1 }
 0x14c   : > { %37024 = vmatprep.subr.bf16.mxu1 %v42998_v63 }
 0x14d   : > { %37310 = vmatpush3.bf16.msra.mxu0 %v50024_v54 }
 0x14e   : > { %37312 = vmatprep.subr.bf16.mxu0 %v50027_v4  ;;  %31030 = vmatmul.mubr.f32.vlgmr.msra.gmra.mrb[2].mxu1 %v50028_v35  ;;  %v50031_v35 = vld [vmem:[#allocation32_spill] sm:$0xff] }
 0x14f   : > { %37026 = vmatpush3.bf16.msra.mxu1 %v42998_v63  ;;  %31056 = vmatprep.mubr.f32.mxu1 %v50030_v53 }
 0x150   : > { %31354 = vmatmul.mubr.f32.vlgmr.msra.gmra.mrb[2].mxu0 %v49990_v47  ;;  %37028 = vmatprep.subr.bf16.mxu1 %v43005_v10 }
 0x151   : > { %37314 = vmatpush3.bf16.msra.mxu0 %v50027_v4  ;;  %31380 = vmatprep.mubr.f32.mxu0 %v49946_v14  ;;  %v2475_v4 = vsub.f32 %v43020_v5, %v49671_v48  ;;  %v50033_v48 = vld [vmem:[#allocation36_spill] sm:$0xff] }
 0x152   : > { %37316 = vmatprep.subr.bf16.mxu0 %v50029_v27 }
 0x153   : > { %37030 = vmatpush3.bf16.msra.mxu1 %v43005_v10  ;;  %v2476_v29 = vand.u32 4294901760, %v2475_v4  ;;  %v50037_v4 = vld [vmem:[#allocation37_spill] sm:$0xff] }
 0x154   : > { %37032 = vmatprep.subr.bf16.mxu1 %v43026_v28 }
 0x155   : > { %37318 = vmatpush3.bf16.msra.mxu0 %v50029_v27  ;;  %v43062_v27 = vpack.c.bf16 %v2476_v29, %v2469_v21  ;;  %v50040_v21 = vld [vmem:[#allocation50_spill] sm:$0xff] }
 0x156   : > { %37320 = vmatprep.subr.bf16.mxu0 %v50031_v35  ;;  %v50041_v29 = vld [vmem:[#allocation14_spill] sm:$0xff] }
 0x157   : > { %37034 = vmatpush3.bf16.msra.mxu1 %v43026_v28 }
 0x158   : > { %37036 = vmatprep.subr.bf16.mxu1 %v43042_v46 }
 0x159   : > { %37322 = vmatpush3.bf16.msra.mxu0 %v50031_v35  ;;  %v43088_v35 = vpack.c.bf16 %v42958_v2, %v42956_v23 }
 0x15a   : > { %37324 = vmatprep.subr.bf16.mxu0 %v50032_v11 }
 0x15b   : > { %37038 = vmatpush3.bf16.msra.mxu1 %v43042_v46  ;;  %50039 = vst [vmem:[#allocation46_spill] sm:$0xff] %v43088_v35 }
 0x15c   : > { %37040 = vmatprep.subr.bf16.mxu1 %v43056_v22 }
 0x15d   : > { %37326 = vmatpush3.bf16.msra.mxu0 %v50032_v11  ;;  %v43098_v11 = vpack.c.bf16 %v42980_v19, %v42978_v13 }
 0x15e   : > { %37328 = vmatprep.subr.bf16.mxu0 %v50033_v48 }
 0x15f   : > { %37042 = vmatpush3.bf16.msra.mxu1 %v43056_v22  ;;  %50042 = vst [vmem:[#allocation48_spill] sm:$0xff] %v43098_v11 }
 0x160   : > { %37044 = vmatprep.subr.bf16.mxu1 %v43062_v27 }
 0x161   : > { %37330 = vmatpush3.bf16.msra.mxu0 %v50033_v48  ;;  %v50038_v48 = vld [vmem:[#allocation17_spill] sm:$0xff] }
 0x162   : > { %37332 = vmatprep.subr.bf16.mxu0 %v50035_v50 }
 0x163   : > { %37046 = vmatpush3.bf16.msra.mxu1 %v43062_v27 }
 0x164   : > { %37048 = vmatprep.subr.bf16.mxu1 %v43070_v56 }
 0x165   : > { %37334 = vmatpush3.bf16.msra.mxu0 %v50035_v50  ;;  %v50043_v50 = vld [vmem:[#allocation51_spill] sm:$0xff] }
 0x166   : > { %37336 = vmatprep.subr.bf16.mxu0 %v50037_v4  ;;  %31057 = vmatmul.mubr.f32.vlgmr.msra.gmra.mrb[2].mxu1 %v50038_v48 }
 0x167   : > { %37050 = vmatpush3.bf16.msra.mxu1 %v43070_v56  ;;  %31083 = vmatprep.mubr.f32.mxu1 %v50041_v29  ;;  %v50045_v29 = vld [vmem:[#allocation52_spill] sm:$0xff] }
 0x168   : > { %31381 = vmatmul.mubr.f32.vlgmr.msra.gmra.mrb[2].mxu0 %v41925_v0  ;;  %37052 = vmatprep.subr.bf16.mxu1 %v43078_v38 }
 0x169   : > { %37338 = vmatpush3.bf16.msra.mxu0 %v50037_v4  ;;  %31407 = vmatprep.mubr.f32.mxu0 %v41904_v55  ;;  %v43106_v4 = vpack.c.bf16 %v43002_v58, %v43000_v59 }
 0x16a   : > { %37340 = vmatprep.subr.bf16.mxu0 %v50040_v21 }
 0x16b   : > { %37054 = vmatpush3.bf16.msra.mxu1 %v43078_v38  ;;  %50044 = vst [vmem:[#allocation4_spill] sm:$0xff] %v43106_v4 }
 0x16c   : > { %37056 = vmatprep.subr.bf16.mxu1 %v43088_v35 }
 0x16d   : > { %37342 = vmatpush3.bf16.msra.mxu0 %v50040_v21  ;;  %v43114_v21 = vpack.c.bf16 %v43020_v5, %v43018_v40 }
 0x16e   : > { %37344 = vmatprep.subr.bf16.mxu0 %v50043_v50 }
 0x16f   : > { %37058 = vmatpush3.bf16.msra.mxu1 %v43088_v35  ;;  %50046 = vst [vmem:[#allocation5_spill] sm:$0xff] %v43114_v21 }
 0x170   : > { %37060 = vmatprep.subr.bf16.mxu1 %v43098_v11 }
 0x171   : > { %37346 = vmatpush3.bf16.msra.mxu0 %v50043_v50 }
 0x172   : > { %37348 = vmatprep.subr.bf16.mxu0 %v50045_v29 }
 0x173   : > { %37062 = vmatpush3.bf16.msra.mxu1 %v43098_v11 }
 0x174   : > { %37064 = vmatprep.subr.bf16.mxu1 %v43106_v4 }
 0x175   : > { %37350 = vmatpush3.bf16.msra.mxu0 %v50045_v29  ;;  %v50051_v29 = vld [vmem:[#allocation20_spill] sm:$0xff] }
 0x176   : > { %37352 = vmatprep.subr.bf16.mxu0 %v50047_v9 }
 0x177   : > { %37066 = vmatpush3.bf16.msra.mxu1 %v43106_v4 }
 0x178   : > { %37068 = vmatprep.subr.bf16.mxu1 %v43114_v21 }
 0x179   : > { %37354 = vmatpush3.bf16.msra.mxu0 %v50047_v9  ;;  %v43120_v50 = vpop.f32.mrb[0].mxu1  ;;  %v50052_v9 = vld [vmem:[#allocation18_spill] sm:$0xff] }
 0x17a   : > { %50048 = vst [vmem:[#allocation25_spill] sm:$0xff] %v43120_v50  ;;  %37356 = vmatprep.subr.bf16.mxu0 %v50049_v39  ;;  %v43123_v31 = vpop.f32.mrb[1].mxu1  ;;  %v50057_v50 = vand.u32 4294901760, %v42935_v3  ;;  %v50064_v3 = vld [vmem:[#allocation41_spill] sm:$0xff] }
 0x17b   : > { %50050 = vst [vmem:[#allocation6_spill] sm:$0xff] %v43123_v31  ;;  %37070 = vmatpush3.bf16.msra.mxu1 %v43114_v21  ;;  %v50056_v31 = vand.u32 4294901760, %v42933_v52  ;;  %v50062_v52 = vand.u32 4294901760, %v42958_v2  ;;  %v50068_v2 = vld [vmem:[#allocation43_spill] sm:$0xff] }
 0x17c   : > { %37072 = vmatprep.subr.bf16.mxu1 %v42892_v44 }
 0x17d   : > { %37358 = vmatpush3.bf16.msra.mxu0 %v50049_v39  ;;  %v50053_v39 = vand.u32 4294901760, %v42926_v37  ;;  %v50060_v37 = vld [vmem:[#allocation24_spill] sm:$0xff] }
 0x17e   : > { %37360 = vmatprep.subr.bf16.mxu0 %v50013_v34  ;;  %31084 = vmatmul.mubr.f32.vlgmr.msra.gmra.mrb[2].mxu1 %v50051_v29  ;;  %v50054_v29 = vand.u32 4294901760, %v42928_v8  ;;  %v50061_v8 = vand.u32 4294901760, %v42956_v23  ;;  %v50066_v23 = vand.u32 4294901760, %v42980_v19  ;;  %v50073_v19 = vand.u32 4294901760, %v43018_v40  ;;  %v27337_v40 = vld [vmem:[%s49497_s1 + $0x190] sm:$0xff] }
 0x17f   : > { %37074 = vmatpush3.bf16.msra.mxu1 %v42892_v44  ;;  %31110 = vmatprep.mubr.f32.mxu1 %v50052_v9 }
 0x180   : > { %31408 = vmatmul.mubr.f32.vlgmr.msra.gmra.mrb[2].mxu0 %v41942_v32  ;;  %37076 = vmatprep.subr.bf16.mxu1 %v42904_v45  ;;  %v43156_v9 = vpack.c.bf16 %v50054_v29, %v50053_v39  ;;  %v50059_v32 = vld [vmem:[#allocation38_spill] sm:$0xff]  ;;  %v43178_v39 = vpack.c.bf16 %v50062_v52, %v50061_v8  ;;  %v50070_v29 = vand.u32 4294901760, %v43002_v58  ;;  %v50072_v8 = vld [vmem:[#allocation45_spill] sm:$0xff] }
 0x181   : > { %37362 = vmatpush3.bf16.msra.mxu0 %v50013_v34  ;;  %31434 = vmatprep.mubr.f32.mxu0 %v41923_v62  ;;  %v43166_v62 = vpack.c.bf16 %v50057_v50, %v50056_v31  ;;  %v50069_v50 = vand.u32 4294901760, %v43000_v59  ;;  %v50077_v59 = vld [vmem:[#allocation49_spill] sm:$0xff] }
 0x182   : > { %37364 = vmatprep.subr.bf16.mxu0 %v50014_v18  ;;  %50055 = vst [vmem:[#allocation7_spill] sm:$0xff] %v43156_v9  ;;  %50063 = vst [vmem:[#allocation10_spill] sm:$0xff] %v43178_v39 }
 0x183   : > { %37078 = vmatpush3.bf16.msra.mxu1 %v42904_v45  ;;  %50058 = vst [vmem:[#allocation8_spill] sm:$0xff] %v43166_v62 }
 0x184   : > { %37080 = vmatprep.subr.bf16.mxu1 %v42916_v24 }
 0x185   : > { %37366 = vmatpush3.bf16.msra.mxu0 %v50014_v18 }
 0x186   : > { %37368 = vmatprep.subr.bf16.mxu0 %v50017_v36 }
 0x187   : > { %37082 = vmatpush3.bf16.msra.mxu1 %v42916_v24 }
 0x188   : > { %37084 = vmatprep.subr.bf16.mxu1 %v42940_v15 }
 0x189   : > { %37370 = vmatpush3.bf16.msra.mxu0 %v50017_v36 }
 0x18a   : > { %37372 = vmatprep.subr.bf16.mxu0 %v50020_v57 }
 0x18b   : > { %37086 = vmatpush3.bf16.msra.mxu1 %v42940_v15 }
 0x18c   : > { %37088 = vmatprep.subr.bf16.mxu1 %v42954_v7 }
 0x18d   : > { %37374 = vmatpush3.bf16.msra.mxu0 %v50020_v57 }
 0x18e   : > { %37376 = vmatprep.subr.bf16.mxu0 %v50023_v51 }
 0x18f   : > { %37090 = vmatpush3.bf16.msra.mxu1 %v42954_v7 }
 0x190   : > { %37092 = vmatprep.subr.bf16.mxu1 %v42984_v1 }
 0x191   : > { %37378 = vmatpush3.bf16.msra.mxu0 %v50023_v51 }
 0x192   : > { %37380 = vmatprep.subr.bf16.mxu0 %v50024_v54 }
 0x193   : > { %37094 = vmatpush3.bf16.msra.mxu1 %v42984_v1 }
 0x194   : > { %37096 = vmatprep.subr.bf16.mxu1 %v43156_v9 }
 0x195   : > { %37382 = vmatpush3.bf16.msra.mxu0 %v50024_v54 }
 0x196   : > { %37384 = vmatprep.subr.bf16.mxu0 %v50059_v32  ;;  %31111 = vmatmul.mubr.f32.vlgmr.msra.gmra.mrb[2].mxu1 %v50060_v37  ;;  %v43200_v37 = vpack.c.bf16 %v50070_v29, %v50069_v50 }
 0x197   : > { %37098 = vmatpush3.bf16.msra.mxu1 %v43156_v9  ;;  %31137 = vmatprep.mubr.f32.mxu1 %v50030_v53 }
 0x198   : > { %31435 = vmatmul.mubr.f32.vlgmr.msra.gmra.mrb[2].mxu0 %v49944_v61  ;;  %37100 = vmatprep.subr.bf16.mxu1 %v43166_v62  ;;  %50071 = vst [vmem:[#allocation28_spill] sm:$0xff] %v43200_v37 }
 0x199   : > { %37386 = vmatpush3.bf16.msra.mxu0 %v50059_v32  ;;  %31461 = vmatprep.mubr.f32.mxu0 %v49946_v14  ;;  %v50065_v32 = vand.u32 4294901760, %v42978_v13  ;;  %v50074_v13 = vand.u32 4294901760, %v43020_v5  ;;  %v27338_v5 = vld [vmem:[%s49497_s1 + $0x198] sm:$0xff] }
 0x19a   : > { %37388 = vmatprep.subr.bf16.mxu0 %v50064_v3 }
 0x19b   : > { %37102 = vmatpush3.bf16.msra.mxu1 %v43166_v62  ;;  %v43190_v31 = vpack.c.bf16 %v50066_v23, %v50065_v32  ;;  %v43210_v52 = vpack.c.bf16 %v50074_v13, %v50073_v19  ;;  %v5503_v32 = vand.u32 4294901760, %v27338_v5  ;;  %v27339_v23 = vld [vmem:[%s49497_s1 + $0x1a0] sm:$0xff]  ;;  %v27342_v19 = vld [vmem:[%s49497_s1 + $0x1b8] sm:$0xff] }
 0x19c   : > { %37104 = vmatprep.subr.bf16.mxu1 %v43178_v39  ;;  %v5515_v13 = vand.u32 4294901760, %v27342_v19 }
 0x19d   : > { %37390 = vmatpush3.bf16.msra.mxu0 %v50064_v3  ;;  %50067 = vst [vmem:[#allocation26_spill] sm:$0xff] %v43190_v31  ;;  %50075 = vst [vmem:[#allocation30_spill] sm:$0xff] %v43210_v52  ;;  %v50076_v3 = vld [vmem:[#allocation47_spill] sm:$0xff]  ;;  %v43300_v62 = vsub.f32 %v27338_v5, %v5503_v32 }
 0x19e   : > { %37392 = vmatprep.subr.bf16.mxu0 %v50068_v2 }
 0x19f   : > { %37106 = vmatpush3.bf16.msra.mxu1 %v43178_v39 }
 0x1a0   : > { %37108 = vmatprep.subr.bf16.mxu1 %v43190_v31 }
 0x1a1   : > { %37394 = vmatpush3.bf16.msra.mxu0 %v50068_v2  ;;  %v27340_v2 = vld [vmem:[%s49497_s1 + $0x1a8] sm:$0xff] }
 0x1a2   : > { %37396 = vmatprep.subr.bf16.mxu0 %v50072_v8  ;;  %v5509_v50 = vand.u32 4294901760, %v27340_v2 }
 0x1a3   : > { %37110 = vmatpush3.bf16.msra.mxu1 %v43190_v31 }
 0x1a4   : > { %37112 = vmatprep.subr.bf16.mxu1 %v43200_v37 }
 0x1a5   : > { %37398 = vmatpush3.bf16.msra.mxu0 %v50072_v8  ;;  %v27341_v8 = vld [vmem:[%s49497_s1 + $0x1b0] sm:$0xff] }
 0x1a6   : > { %37400 = vmatprep.subr.bf16.mxu0 %v50076_v3 }
 0x1a7   : > { %37114 = vmatpush3.bf16.msra.mxu1 %v43200_v37 }
 0x1a8   : > { %37116 = vmatprep.subr.bf16.mxu1 %v43210_v52 }
 0x1a9   : > { %37402 = vmatpush3.bf16.msra.mxu0 %v50076_v3  ;;  %v27343_v3 = vld [vmem:[%s49497_s1 + $0x1c0] sm:$0xff] }
 0x1aa   : > { %37404 = vmatprep.subr.bf16.mxu0 %v50077_v59  ;;  %v5518_v61 = vand.u32 4294901760, %v27343_v3 }
 0x1ab   : > { %37118 = vmatpush3.bf16.msra.mxu1 %v43210_v52  ;;  %v50078_v52 = vld [vmem:[#allocation60_spill] sm:$0xff] }
 0x1ac   : > { %37120 = vmatprep.subr.bf16.mxu1 %v42892_v44 }
 0x1ad   : > { %37406 = vmatpush3.bf16.msra.mxu0 %v50077_v59  ;;  %v27344_v59 = vld [vmem:[%s49497_s1 + $0x1c8] sm:$0xff] }
 0x1ae   : > { %37408 = vmatprep.subr.bf16.mxu0 %v50013_v34  ;;  %31138 = vmatmul.mubr.f32.vlgmr.msra.gmra.mrb[2].mxu1 %v50038_v48  ;;  %v5521_v9 = vand.u32 4294901760, %v27344_v59 }
 0x1af   : > { %37122 = vmatpush3.bf16.msra.mxu1 %v42892_v44  ;;  %31164 = vmatprep.mubr.f32.mxu1 %v50030_v53  ;;  %v5500_v53 = vand.u32 4294901760, %v27337_v40 }
 0x1b0   : > { %31462 = vmatmul.mubr.f32.vlgmr.msra.gmra.mrb[2].mxu0 %v41925_v0  ;;  %37124 = vmatprep.subr.bf16.mxu1 %v42904_v45 }
 0x1b1   : > { %37410 = vmatpush3.bf16.msra.mxu0 %v50013_v34  ;;  %31488 = vmatprep.mubr.f32.mxu0 %v49946_v14  ;;  %v27335_v34 = vld [vmem:[%s49497_s1 + $0x180] sm:$0xff]  ;;  %v43269_v29 = vpack.c.bf16 %v5503_v32, %v5500_v53  ;;  %v43298_v39 = vsub.f32 %v27337_v40, %v5500_v53  ;;  %v27346_v40 = vld [vmem:[%s49497_s1 + $0x1d8] sm:$0xff]  ;;  %v43320_v32 = vpack.c.bf16 %v5521_v9, %v5518_v61 }
 0x1b2   : > { %37412 = vmatprep.subr.bf16.mxu0 %v50014_v18  ;;  %v5527_v21 = vand.u32 4294901760, %v27346_v40 }
 0x1b3   : > { %37126 = vmatpush3.bf16.msra.mxu1 %v42904_v45  ;;  %v50081_v35 = vand.u32 4294901760, %v43298_v39 }
 0x1b4   : > { %37128 = vmatprep.subr.bf16.mxu1 %v42916_v24 }
 0x1b5   : > { %37414 = vmatpush3.bf16.msra.mxu0 %v50014_v18  ;;  %v27336_v18 = vld [vmem:[%s49497_s1 + $0x188] sm:$0xff] }
 0x1b6   : > { %37416 = vmatprep.subr.bf16.mxu0 %v50017_v36  ;;  %v5497_v58 = vand.u32 4294901760, %v27336_v18 }
 0x1b7   : > { %37130 = vmatpush3.bf16.msra.mxu1 %v42916_v24 }
 0x1b8   : > { %37132 = vmatprep.subr.bf16.mxu1 %v42940_v15  ;;  %v43294_v31 = vsub.f32 %v27336_v18, %v5497_v58  ;;  %v43324_v18 = vsub.f32 %v27340_v2, %v5509_v50  ;;  %v50082_v2 = vand.u32 4294901760, %v43300_v62 }
 0x1b9   : > { %37418 = vmatpush3.bf16.msra.mxu0 %v50017_v36  ;;  %v5494_v36 = vand.u32 4294901760, %v27335_v34 }
 0x1ba   : > { %37420 = vmatprep.subr.bf16.mxu0 %v50020_v57  ;;  %v50080_v53 = vand.u32 4294901760, %v43294_v31 }
 0x1bb   : > { %37134 = vmatpush3.bf16.msra.mxu1 %v42940_v15  ;;  %v43292_v37 = vsub.f32 %v27335_v34, %v5494_v36 }
 0x1bc   : > { %37136 = vmatprep.subr.bf16.mxu1 %v42954_v7  ;;  %v5601_v11 = vsub.f32 %v43294_v31, %v50080_v53  ;;  %v43346_v53 = vsub.f32 %v27342_v19, %v5515_v13 }
 0x1bd   : > { %37422 = vmatpush3.bf16.msra.mxu0 %v50020_v57  ;;  %v43257_v57 = vpack.c.bf16 %v5497_v58, %v5494_v36  ;;  %v27345_v58 = vld [vmem:[%s49497_s1 + $0x1d0] sm:$0xff]  ;;  %v50079_v4 = vand.u32 4294901760, %v43292_v37 }
 0x1be   : > { %37424 = vmatprep.subr.bf16.mxu0 %v50023_v51 }
 0x1bf   : > { %37138 = vmatpush3.bf16.msra.mxu1 %v42954_v7  ;;  %v5594_v5 = vsub.f32 %v43292_v37, %v50079_v4 }
 0x1c0   : > { %37140 = vmatprep.subr.bf16.mxu1 %v42984_v1 }
 0x1c1   : > { %37426 = vmatpush3.bf16.msra.mxu0 %v50023_v51  ;;  %v5506_v51 = vand.u32 4294901760, %v27339_v23 }
 0x1c2   : > { %37428 = vmatprep.subr.bf16.mxu0 %v50024_v54 }
 0x1c3   : > { %37142 = vmatpush3.bf16.msra.mxu1 %v42984_v1  ;;  %v43322_v36 = vsub.f32 %v27339_v23, %v5506_v51  ;;  %v5608_v23 = vsub.f32 %v43298_v39, %v50081_v35  ;;  %v5595_v35 = vand.u32 4294901760, %v5594_v5  ;;  %v43365_v5 = vsub.f32 %v27343_v3, %v5518_v61 }
 0x1c4   : > { %37432 = vmatprep.subr.bf16.mxu1 %v42576_v6 }
 0x1c5   : > { %37430 = vmatpush3.bf16.msra.mxu0 %v50024_v54  ;;  %v43282_v54 = vpack.c.bf16 %v5509_v50, %v5506_v51  ;;  %v5615_v51 = vsub.f32 %v43300_v62, %v50082_v2  ;;  %v49707_v4 = vand.u32 4294901760, %v43322_v36  ;;  %v49706_v50 = vand.u32 4294901760, %v43324_v18 }
 0x1c6   : > { %37720 = vmatprep.subr.bf16.mxu0 %v43257_v57  ;;  %31165 = vmatmul.mubr.f32.vlgmr.msra.gmra.mrb[2].mxu1 %v50038_v48  ;;  %v5512_v48 = vand.u32 4294901760, %v27341_v8  ;;  %v5609_v2 = vand.u32 4294901760, %v5608_v23  ;;  %v43367_v23 = vsub.f32 %v27344_v59, %v5521_v9  ;;  %v49711_v9 = vand.u32 4294901760, %v43365_v5 }
 0x1c7   : > { %37434 = vmatpush3.bf16.msra.mxu1 %v42576_v6  ;;  %31515 = vmatprep.mubr.f32.mxu1 %v50078_v52  ;;  %v5616_v56 = vand.u32 4294901760, %v5615_v51  ;;  %v5629_v19 = vsub.f32 %v43324_v18, %v49706_v50  ;;  %v43385_v59 = vsub.f32 %v27346_v40, %v5527_v21 }
 0x1c8   : > { %31489 = vmatmul.mubr.f32.vlgmr.msra.gmra.mrb[2].mxu0 %v41925_v0  ;;  %37436 = vmatprep.subr.bf16.mxu1 %v42588_v33  ;;  %v43305_v34 = vpack.c.bf16 %v5515_v13, %v5512_v48  ;;  %v43344_v55 = vsub.f32 %v27341_v8, %v5512_v48  ;;  %v5602_v0 = vand.u32 4294901760, %v5601_v11  ;;  %v5622_v8 = vsub.f32 %v43322_v36, %v49707_v4 }
 0x1c9   : > { %37722 = vmatpush3.bf16.msra.mxu0 %v43257_v57  ;;  %31839 = vmatprep.mubr.f32.mxu0 %v50078_v52  ;;  %v5524_v52 = vand.u32 4294901760, %v27345_v58  ;;  %v43370_v51 = vpack.c.bf16 %v5616_v56, %v5609_v2  ;;  %v5630_v4 = vand.u32 4294901760, %v5629_v19  ;;  %v49710_v56 = vand.u32 4294901760, %v43367_v23 }
 0x1ca   : > { %37724 = vmatprep.subr.bf16.mxu0 %v43269_v29  ;;  %v49712_v48 = vand.u32 4294901760, %v43344_v55  ;;  %v43363_v13 = vpack.c.bf16 %v5602_v0, %v5595_v35  ;;  %v5623_v50 = vand.u32 4294901760, %v5622_v8  ;;  %v50083_v0 = vand.u32 4294901760, %v43346_v53 }
 0x1cb   : > { %37438 = vmatpush3.bf16.msra.mxu1 %v42588_v33  ;;  %v43349_v38 = vpack.c.bf16 %v5527_v21, %v5524_v52  ;;  %v43383_v3 = vsub.f32 %v27345_v58, %v5524_v52  ;;  %v5650_v21 = vsub.f32 %v43365_v5, %v49711_v9  ;;  %v49708_v58 = vand.u32 4294901760, %v43385_v59 }
 0x1cc   : > { %37440 = vmatprep.subr.bf16.mxu1 %v42603_v30  ;;  %v5636_v11 = vsub.f32 %v43344_v55, %v49712_v48  ;;  %v5643_v61 = vsub.f32 %v43346_v53, %v50083_v0  ;;  %v43392_v35 = vpack.c.bf16 %v5630_v4, %v5623_v50  ;;  %v50099_v48 = vld [vmem:[#allocation63_spill] sm:$0xff] }
 0x1cd   : > { %37726 = vmatpush3.bf16.msra.mxu0 %v43269_v29  ;;  %v49709_v52 = vand.u32 4294901760, %v43383_v3  ;;  %v5651_v4 = vand.u32 4294901760, %v5650_v21  ;;  %v50086_v21 = vld [vmem:[#allocation27_spill] sm:$0xff] }
 0x1ce   : > { %37728 = vmatprep.subr.bf16.mxu0 %v43282_v54  ;;  %v5637_v2 = vand.u32 4294901760, %v5636_v11  ;;  %v5644_v8 = vand.u32 4294901760, %v5643_v61  ;;  %v5671_v11 = vsub.f32 %v43385_v59, %v49708_v58  ;;  %v50096_v58 = vld [vmem:[#allocation9_spill] sm:$0xff] }
 0x1cf   : > { %37442 = vmatpush3.bf16.msra.mxu1 %v42603_v30  ;;  %v5664_v19 = vsub.f32 %v43383_v3, %v49709_v52  ;;  %v50097_v52 = vand.u32 4294901760, %v43298_v39 }
 0x1d0   : > { %37444 = vmatprep.subr.bf16.mxu1 %v42618_v12  ;;  %v43408_v40 = vpack.c.bf16 %v5644_v8, %v5637_v2  ;;  %v5672_v61 = vand.u32 4294901760, %v5671_v11  ;;  %v50085_v8 = vld [vmem:[#allocation61_spill] sm:$0xff]  ;;  %v43471_v11 = vpack.c.bf16 %v43367_v23, %v43365_v5 }
 0x1d1   : > { %37730 = vmatpush3.bf16.msra.mxu0 %v43282_v54  ;;  %v5665_v0 = vand.u32 4294901760, %v5664_v19  ;;  %v50089_v19 = vld [vmem:[#allocation31_spill] sm:$0xff] }
 0x1d2   : > { %37732 = vmatprep.subr.bf16.mxu0 %v43305_v34 }
 0x1d3   : > { %37446 = vmatpush3.bf16.msra.mxu1 %v42618_v12  ;;  %v43427_v2 = vpack.c.bf16 %v5672_v61, %v5665_v0  ;;  %v50090_v0 = vld [vmem:[#allocation33_spill] sm:$0xff]  ;;  %v43479_v61 = vpack.c.bf16 %v43385_v59, %v43383_v3 }
 0x1d4   : > { %37448 = vmatprep.subr.bf16.mxu1 %v42637_v49 }
 0x1d5   : > { %37734 = vmatpush3.bf16.msra.mxu0 %v43305_v34 }
 0x1d6   : > { %37736 = vmatprep.subr.bf16.mxu0 %v43320_v32 }
 0x1d7   : > { %37450 = vmatpush3.bf16.msra.mxu1 %v42637_v49 }
 0x1d8   : > { %37452 = vmatprep.subr.bf16.mxu1 %v42658_v20 }
 0x1d9   : > { %37738 = vmatpush3.bf16.msra.mxu0 %v43320_v32 }
 0x1da   : > { %37740 = vmatprep.subr.bf16.mxu0 %v43349_v38 }
 0x1db   : > { %37454 = vmatpush3.bf16.msra.mxu1 %v42658_v20 }
 0x1dc   : > { %37456 = vmatprep.subr.bf16.mxu1 %v42672_v43 }
 0x1dd   : > { %37742 = vmatpush3.bf16.msra.mxu0 %v43349_v38 }
 0x1de   : > { %37744 = vmatprep.subr.bf16.mxu0 %v43363_v13  ;;  %31516 = vmatmul.mubr.f32.vlgmr.msra.gmra.mrb[4].mxu1 %v42676_v17 }
 0x1df   : > { %37458 = vmatpush3.bf16.msra.mxu1 %v42672_v43  ;;  %v5657_v43 = vsub.f32 %v43367_v23, %v49710_v56  ;;  %31542 = vmatprep.mubr.f32.mxu1 %v42553_v25  ;;  %v50098_v56 = vand.u32 4294901760, %v43300_v62 }
 0x1e0   : > { %31840 = vmatmul.mubr.f32.vlgmr.msra.gmra.mrb[0].mxu0 %v42676_v17  ;;  %37460 = vmatprep.subr.bf16.mxu1 %v42678_v26 }
 0x1e1   : > { %37746 = vmatpush3.bf16.msra.mxu0 %v43363_v13  ;;  %31866 = vmatprep.mubr.f32.mxu0 %v42553_v25  ;;  %v5658_v50 = vand.u32 4294901760, %v5657_v43  ;;  %v50087_v43 = vld [vmem:[#allocation58_spill] sm:$0xff]  ;;  %v43527_v9 = vpack.c.bf16 %v50098_v56, %v50097_v52  ;;  %v50104_v56 = vand.u32 4294901760, %v43344_v55 }
 0x1e2   : > { %37748 = vmatprep.subr.bf16.mxu0 %v43370_v51 }
 0x1e3   : > { %37462 = vmatpush3.bf16.msra.mxu1 %v42678_v26  ;;  %v43421_v26 = vpack.c.bf16 %v5658_v50, %v5651_v4  ;;  %v50088_v4 = vld [vmem:[#allocation29_spill] sm:$0xff]  ;;  %v43463_v50 = vpack.c.bf16 %v43346_v53, %v43344_v55 }
 0x1e4   : > { %37464 = vmatprep.subr.bf16.mxu1 %v42696_v16  ;;  %v50109_v55 = vld [vmem:[#allocation57_spill] sm:$0xff] }
 0x1e5   : > { %37750 = vmatpush3.bf16.msra.mxu0 %v43370_v51 }
 0x1e6   : > { %37752 = vmatprep.subr.bf16.mxu0 %v43392_v35 }
 0x1e7   : > { %37466 = vmatpush3.bf16.msra.mxu1 %v42696_v16  ;;  %v43435_v16 = vpack.c.bf16 %v43294_v31, %v43292_v37 }
 0x1e8   : > { %37468 = vmatprep.subr.bf16.mxu1 %v42714_v42 }
 0x1e9   : > { %37754 = vmatpush3.bf16.msra.mxu0 %v43392_v35 }
 0x1ea   : > { %37756 = vmatprep.subr.bf16.mxu0 %v43408_v40 }
 0x1eb   : > { %37470 = vmatpush3.bf16.msra.mxu1 %v42714_v42  ;;  %v50084_v42 = vld [vmem:[#allocation21_spill] sm:$0xff] }
 0x1ec   : > { %37472 = vmatprep.subr.bf16.mxu1 %v42726_v60 }
 0x1ed   : > { %37758 = vmatpush3.bf16.msra.mxu0 %v43408_v40 }
 0x1ee   : > { %37760 = vmatprep.subr.bf16.mxu0 %v43421_v26 }
 0x1ef   : > { %37474 = vmatpush3.bf16.msra.mxu1 %v42726_v60  ;;  %v43443_v60 = vpack.c.bf16 %v43300_v62, %v43298_v39  ;;  %v50102_v39 = vand.u32 4294901760, %v43324_v18  ;;  %v50103_v62 = vld [vmem:[#allocation55_spill] sm:$0xff] }
 0x1f0   : > { %37476 = vmatprep.subr.bf16.mxu1 %v42732_v41 }
 0x1f1   : > { %37762 = vmatpush3.bf16.msra.mxu0 %v43421_v26 }
 0x1f2   : > { %37764 = vmatprep.subr.bf16.mxu0 %v43427_v2 }
 0x1f3   : > { %37478 = vmatpush3.bf16.msra.mxu1 %v42732_v41  ;;  %v43453_v41 = vpack.c.bf16 %v43324_v18, %v43322_v36  ;;  %v50106_v18 = vld [vmem:[#allocation56_spill] sm:$0xff] }
 0x1f4   : > { %37480 = vmatprep.subr.bf16.mxu1 %v50084_v42 }
 0x1f5   : > { %37766 = vmatpush3.bf16.msra.mxu0 %v43427_v2 }
 0x1f6   : > { %37768 = vmatprep.subr.bf16.mxu0 %v43435_v16  ;;  %31543 = vmatmul.mubr.f32.vlgmr.msra.gmra.mrb[4].mxu1 %v50085_v8 }
 0x1f7   : > { %37482 = vmatpush3.bf16.msra.mxu1 %v50084_v42  ;;  %31569 = vmatprep.mubr.f32.mxu1 %v50087_v43  ;;  %v50091_v42 = vld [vmem:[#allocation35_spill] sm:$0xff] }
 0x1f8   : > { %31867 = vmatmul.mubr.f32.vlgmr.msra.gmra.mrb[0].mxu0 %v50085_v8  ;;  %37484 = vmatprep.subr.bf16.mxu1 %v50086_v21 }
 0x1f9   : > { %37770 = vmatpush3.bf16.msra.mxu0 %v43435_v16  ;;  %31893 = vmatprep.mubr.f32.mxu0 %v50087_v43 }
 0x1fa   : > { %37772 = vmatprep.subr.bf16.mxu0 %v43443_v60 }
 0x1fb   : > { %37486 = vmatpush3.bf16.msra.mxu1 %v50086_v21  ;;  %v50092_v21 = vld [vmem:[#allocation62_spill] sm:$0xff] }
 0x1fc   : > { %37488 = vmatprep.subr.bf16.mxu1 %v50088_v4 }
 0x1fd   : > { %37774 = vmatpush3.bf16.msra.mxu0 %v43443_v60 }
 0x1fe   : > { %37776 = vmatprep.subr.bf16.mxu0 %v43453_v41 }
 0x1ff   : > { %37490 = vmatpush3.bf16.msra.mxu1 %v50088_v4  ;;  %v50093_v4 = vld [vmem:[#allocation59_spill] sm:$0xff] }
 0x200   : > { %37492 = vmatprep.subr.bf16.mxu1 %v50089_v19 }
 0x201   : > { %37778 = vmatpush3.bf16.msra.mxu0 %v43453_v41 }
 0x202   : > { %37780 = vmatprep.subr.bf16.mxu0 %v43463_v50 }
 0x203   : > { %37494 = vmatpush3.bf16.msra.mxu1 %v50089_v19  ;;  %v50094_v19 = vand.u32 4294901760, %v43292_v37  ;;  %v50101_v37 = vand.u32 4294901760, %v43322_v36  ;;  %v50105_v36 = vand.u32 4294901760, %v43346_v53  ;;  %v50110_v53 = vand.u32 4294901760, %v43383_v3 }
 0x204   : > { %37496 = vmatprep.subr.bf16.mxu1 %v50090_v0 }
 0x205   : > { %37782 = vmatpush3.bf16.msra.mxu0 %v43463_v50  ;;  %v43551_v52 = vpack.c.bf16 %v50105_v36, %v50104_v56 }
 0x206   : > { %37784 = vmatprep.subr.bf16.mxu0 %v43471_v11 }
 0x207   : > { %37498 = vmatpush3.bf16.msra.mxu1 %v50090_v0  ;;  %v50095_v0 = vand.u32 4294901760, %v43294_v31  ;;  %v50100_v31 = vld [vmem:[#allocation11_spill] sm:$0xff] }
 0x208   : > { %37500 = vmatprep.subr.bf16.mxu1 %v50091_v42 }
 0x209   : > { %37786 = vmatpush3.bf16.msra.mxu0 %v43471_v11 }
 0x20a   : > { %37788 = vmatprep.subr.bf16.mxu0 %v43479_v61 }
 0x20b   : > { %37502 = vmatpush3.bf16.msra.mxu1 %v50091_v42  ;;  %v43517_v42 = vpack.c.bf16 %v50095_v0, %v50094_v19  ;;  %v43539_v19 = vpack.c.bf16 %v50102_v39, %v50101_v37  ;;  %v50108_v0 = vand.u32 4294901760, %v43367_v23  ;;  %v50111_v37 = vand.u32 4294901760, %v43385_v59  ;;  %v27359_v23 = vld [vmem:[%s41839_s17 + $0x3] ss:$2 sm:$0xff] }
 0x20c   : > { %37504 = vmatprep.subr.bf16.mxu1 %v42576_v6  ;;  %v6766_v3 = vsel %vm388_vm0, %v27359_v23, 0  ;;  %v27360_v59 = vld [vmem:[%s41839_s17 + $0x13] ss:$2 sm:$0x3f] }
 0x20d   : > { %37790 = vmatpush3.bf16.msra.mxu0 %v43479_v61  ;;  %v43571_v39 = vpack.c.bf16 %v50111_v37, %v50110_v53 }
 0x20e   : > { %37792 = vmatprep.subr.bf16.mxu0 %v43257_v57  ;;  %31570 = vmatmul.mubr.f32.vlgmr.msra.gmra.mrb[4].mxu1 %v50092_v21 }
 0x20f   : > { %37506 = vmatpush3.bf16.msra.mxu1 %v42576_v6  ;;  %31596 = vmatprep.mubr.f32.mxu1 %v50093_v4 }
 0x210   : > { %31894 = vmatmul.mubr.f32.vlgmr.msra.gmra.mrb[0].mxu0 %v50092_v21  ;;  %37508 = vmatprep.subr.bf16.mxu1 %v42588_v33 }
 0x211   : > { %37794 = vmatpush3.bf16.msra.mxu0 %v43257_v57  ;;  %31920 = vmatprep.mubr.f32.mxu0 %v50093_v4 }
 0x212   : > { %37796 = vmatprep.subr.bf16.mxu0 %v43269_v29 }
 0x213   : > { %37510 = vmatpush3.bf16.msra.mxu1 %v42588_v33 }
 0x214   : > { %37512 = vmatprep.subr.bf16.mxu1 %v42603_v30 }
 0x215   : > { %37798 = vmatpush3.bf16.msra.mxu0 %v43269_v29 }
 0x216   : > { %37800 = vmatprep.subr.bf16.mxu0 %v43282_v54 }
 0x217   : > { %37514 = vmatpush3.bf16.msra.mxu1 %v42603_v30 }
 0x218   : > { %37516 = vmatprep.subr.bf16.mxu1 %v42618_v12 }
 0x219   : > { %37802 = vmatpush3.bf16.msra.mxu0 %v43282_v54 }
 0x21a   : > { %37804 = vmatprep.subr.bf16.mxu0 %v43305_v34 }
 0x21b   : > { %37518 = vmatpush3.bf16.msra.mxu1 %v42618_v12 }
 0x21c   : > { %37520 = vmatprep.subr.bf16.mxu1 %v42637_v49 }
 0x21d   : > { %37806 = vmatpush3.bf16.msra.mxu0 %v43305_v34 }
 0x21e   : > { %37808 = vmatprep.subr.bf16.mxu0 %v43320_v32 }
 0x21f   : > { %37522 = vmatpush3.bf16.msra.mxu1 %v42637_v49 }
 0x220   : > { %37524 = vmatprep.subr.bf16.mxu1 %v42658_v20 }
 0x221   : > { %37810 = vmatpush3.bf16.msra.mxu0 %v43320_v32 }
 0x222   : > { %37812 = vmatprep.subr.bf16.mxu0 %v43349_v38 }
 0x223   : > { %37526 = vmatpush3.bf16.msra.mxu1 %v42658_v20 }
 0x224   : > { %37528 = vmatprep.subr.bf16.mxu1 %v50096_v58 }
 0x225   : > { %37814 = vmatpush3.bf16.msra.mxu0 %v43349_v38 }
 0x226   : > { %37816 = vmatprep.subr.bf16.mxu0 %v43517_v42  ;;  %31597 = vmatmul.mubr.f32.vlgmr.msra.gmra.mrb[4].mxu1 %v50099_v48 }
 0x227   : > { %37530 = vmatpush3.bf16.msra.mxu1 %v50096_v58  ;;  %31623 = vmatprep.mubr.f32.mxu1 %v42553_v25  ;;  %v50107_v58 = vand.u32 4294901760, %v43365_v5  ;;  %v50112_v5 = vld [vmem:[#allocation40_spill] sm:$0xff] }
 0x228   : > { %31921 = vmatmul.mubr.f32.vlgmr.msra.gmra.mrb[0].mxu0 %v50099_v48  ;;  %37532 = vmatprep.subr.bf16.mxu1 %v50100_v31 }
 0x229   : > { %37818 = vmatpush3.bf16.msra.mxu0 %v43517_v42  ;;  %31947 = vmatprep.mubr.f32.mxu0 %v42553_v25 }
 0x22a   : > { %37820 = vmatprep.subr.bf16.mxu0 %v43527_v9 }
 0x22b   : > { %37534 = vmatpush3.bf16.msra.mxu1 %v50100_v31  ;;  %v43561_v31 = vpack.c.bf16 %v50108_v0, %v50107_v58 }
 0x22c   : > { %37536 = vmatprep.subr.bf16.mxu1 %v50103_v62 }
 0x22d   : > { %37822 = vmatpush3.bf16.msra.mxu0 %v43527_v9 }
 0x22e   : > { %37824 = vmatprep.subr.bf16.mxu0 %v43539_v19 }
 0x22f   : > { %37538 = vmatpush3.bf16.msra.mxu1 %v50103_v62  ;;  %v50115_v62 = vld [vmem:[#allocation22_spill] sm:$0xff] }
 0x230   : > { %37540 = vmatprep.subr.bf16.mxu1 %v50106_v18 }
 0x231   : > { %37826 = vmatpush3.bf16.msra.mxu0 %v43539_v19 }
 0x232   : > { %37828 = vmatprep.subr.bf16.mxu0 %v43551_v52 }
 0x233   : > { %37542 = vmatpush3.bf16.msra.mxu1 %v50106_v18 }
 0x234   : > { %37544 = vmatprep.subr.bf16.mxu1 %v50109_v55 }
 0x235   : > { %37830 = vmatpush3.bf16.msra.mxu0 %v43551_v52 }
 0x236   : > { %37832 = vmatprep.subr.bf16.mxu0 %v43561_v31 }
 0x237   : > { %37546 = vmatpush3.bf16.msra.mxu1 %v50109_v55  ;;  %v43856_v55 = vld [vmem:[%s49497_s1 + $0x210] sm:$0xff] }
 0x238   : > { %37548 = vmatprep.subr.bf16.mxu1 %v50112_v5 }
 0x239   : > { %37834 = vmatpush3.bf16.msra.mxu0 %v43561_v31 }
 0x23a   : > { %37836 = vmatprep.subr.bf16.mxu0 %v43571_v39 }
 0x23b   : > { %37550 = vmatpush3.bf16.msra.mxu1 %v50112_v5  ;;  %v43870_v5 = vld [vmem:[%s49497_s1 + $0x270] sm:$0xff] }
 0x23c   : > { %37552 = vmatprep.subr.bf16.mxu1 %v42576_v6 }
 0x23d   : > { %37838 = vmatpush3.bf16.msra.mxu0 %v43571_v39 }
 0x23e   : > { %37840 = vmatprep.subr.bf16.mxu0 %v43257_v57  ;;  %31624 = vmatmul.mubr.f32.vlgmr.msra.gmra.mrb[4].mxu1 %v50085_v8 }
 0x23f   : > { %37554 = vmatpush3.bf16.msra.mxu1 %v42576_v6  ;;  %31650 = vmatprep.mubr.f32.mxu1 %v42553_v25  ;;  %v43595_v6 = vand.u32 4294901760, %v6766_v3 }
 0x240   : > { %31948 = vmatmul.mubr.f32.vlgmr.msra.gmra.mrb[0].mxu0 %v50085_v8  ;;  %37556 = vmatprep.subr.bf16.mxu1 %v42588_v33 }
 0x241   : > { %37842 = vmatpush3.bf16.msra.mxu0 %v43257_v57  ;;  %31974 = vmatprep.mubr.f32.mxu0 %v42553_v25 }
 0x242   : > { %37844 = vmatprep.subr.bf16.mxu0 %v43269_v29 }
 0x243   : > { %37558 = vmatpush3.bf16.msra.mxu1 %v42588_v33  ;;  %v43602_v33 = vsub.f32 %v6766_v3, %v43595_v6 }
 0x244   : > { %37560 = vmatprep.subr.bf16.mxu1 %v42603_v30 }
 0x245   : > { %37846 = vmatpush3.bf16.msra.mxu0 %v43269_v29 }
 0x246   : > { %37848 = vmatprep.subr.bf16.mxu0 %v43282_v54 }
 0x247   : > { %37562 = vmatpush3.bf16.msra.mxu1 %v42603_v30  ;;  %v43609_v30 = vand.u32 4294901760, %v43602_v33 }
 0x248   : > { %37564 = vmatprep.subr.bf16.mxu1 %v42618_v12 }
 0x249   : > { %37850 = vmatpush3.bf16.msra.mxu0 %v43282_v54  ;;  %50113 = vst [vmem:[#allocation12_spill] sm:$0xff] %v43609_v30 }
 0x24a   : > { %37852 = vmatprep.subr.bf16.mxu0 %v43305_v34 }
 0x24b   : > { %37566 = vmatpush3.bf16.msra.mxu1 %v42618_v12  ;;  %v6851_v12 = vsub.f32 %v43602_v33, %v43609_v30 }
 0x24c   : > { %37568 = vmatprep.subr.bf16.mxu1 %v42637_v49 }
 0x24d   : > { %37854 = vmatpush3.bf16.msra.mxu0 %v43305_v34 }
 0x24e   : > { %37856 = vmatprep.subr.bf16.mxu0 %v43320_v32 }
 0x24f   : > { %37570 = vmatpush3.bf16.msra.mxu1 %v42637_v49  ;;  %v43623_v49 = vand.u32 4294901760, %v6851_v12 }
 0x250   : > { %37572 = vmatprep.subr.bf16.mxu1 %v42658_v20 }
 0x251   : > { %37858 = vmatpush3.bf16.msra.mxu0 %v43320_v32  ;;  %50114 = vst [vmem:[#allocation32_spill] sm:$0xff] %v43623_v49 }
 0x252   : > { %37860 = vmatprep.subr.bf16.mxu0 %v43349_v38 }
 0x253   : > { %37574 = vmatpush3.bf16.msra.mxu1 %v42658_v20  ;;  %v6769_v20 = vsel %vm388_vm0, %v27360_v59, 0 }
 0x254   : > { %37576 = vmatprep.subr.bf16.mxu1 %v42892_v44  ;;  %v43634_v56 = vand.u32 4294901760, %v6769_v20 }
 0x255   : > { %37862 = vmatpush3.bf16.msra.mxu0 %v43349_v38 }
 0x256   : > { %38008 = vmatprep.subr.bf16.mxu0 %v43257_v57  ;;  %31651 = vmatmul.mubr.f32.vlgmr.msra.gmra.mrb[4].mxu1 %v50085_v8  ;;  %v43641_v36 = vsub.f32 %v6769_v20, %v43634_v56 }
 0x257   : > { %37578 = vmatpush3.bf16.msra.mxu1 %v42892_v44  ;;  %31677 = vmatprep.mubr.f32.mxu1 %v50115_v62 }
 0x258   : > { %31975 = vmatmul.mubr.f32.vlgmr.msra.gmra.mrb[0].mxu0 %v50085_v8  ;;  %37580 = vmatprep.subr.bf16.mxu1 %v42904_v45  ;;  %50116 = vst [vmem:[#allocation34_spill] sm:$0xff] %v43641_v36  ;;  %v43648_v18 = vand.u32 4294901760, %v43641_v36 }
 0x259   : > { %38010 = vmatpush3.bf16.msra.mxu0 %v43257_v57  ;;  %32163 = vmatprep.mubr.f32.mxu0 %v43623_v49 }
 0x25a   : > { %38012 = vmatprep.subr.bf16.mxu0 %v43269_v29  ;;  %50117 = vst [vmem:[#allocation36_spill] sm:$0xff] %v43648_v18  ;;  %v6861_v58 = vsub.f32 %v43641_v36, %v43648_v18 }
 0x25b   : > { %37582 = vmatpush3.bf16.msra.mxu1 %v42904_v45 }
 0x25c   : > { %37584 = vmatprep.subr.bf16.mxu1 %v42916_v24  ;;  %v43660_v0 = vand.u32 4294901760, %v6861_v58 }
 0x25d   : > { %38014 = vmatpush3.bf16.msra.mxu0 %v43269_v29 }
 0x25e   : > { %38016 = vmatprep.subr.bf16.mxu0 %v43282_v54 }
 0x25f   : > { %37586 = vmatpush3.bf16.msra.mxu1 %v42916_v24 }
 0x260   : > { %37588 = vmatprep.subr.bf16.mxu1 %v42940_v15 }
 0x261   : > { %38018 = vmatpush3.bf16.msra.mxu0 %v43282_v54 }
 0x262   : > { %38020 = vmatprep.subr.bf16.mxu0 %v43305_v34 }
 0x263   : > { %37590 = vmatpush3.bf16.msra.mxu1 %v42940_v15 }
 0x264   : > { %37592 = vmatprep.subr.bf16.mxu1 %v42954_v7 }
 0x265   : > { %38022 = vmatpush3.bf16.msra.mxu0 %v43305_v34 }
 0x266   : > { %38024 = vmatprep.subr.bf16.mxu0 %v43320_v32 }
 0x267   : > { %37594 = vmatpush3.bf16.msra.mxu1 %v42954_v7 }
 0x268   : > { %37596 = vmatprep.subr.bf16.mxu1 %v42984_v1 }
 0x269   : > { %38026 = vmatpush3.bf16.msra.mxu0 %v43320_v32 }
 0x26a   : > { %38028 = vmatprep.subr.bf16.mxu0 %v43349_v38 }
 0x26b   : > { %37598 = vmatpush3.bf16.msra.mxu1 %v42984_v1 }
 0x26c   : > { %37600 = vmatprep.subr.bf16.mxu1 %v42998_v63 }
 0x26d   : > { %38030 = vmatpush3.bf16.msra.mxu0 %v43349_v38 }
 0x26e   : > { %38032 = vmatprep.subr.bf16.mxu0 %v43363_v13  ;;  %31678 = vmatmul.mubr.f32.vlgmr.msra.gmra.mrb[4].mxu1 %v49990_v47  ;;  %v50118_v47 = vld [vmem:[#allocation42_spill] sm:$0xff] }
 0x26f   : > { %37602 = vmatpush3.bf16.msra.mxu1 %v42998_v63  ;;  %31704 = vmatprep.mubr.f32.mxu1 %v49946_v14  ;;  %v50120_v63 = vld [vmem:[#allocation44_spill] sm:$0xff] }
 0x270   : > { %32164 = vmatmul.mubr.f32.vlgmr.msra.gmra.mrb[2].mxu0 %v43660_v0  ;;  %37604 = vmatprep.subr.bf16.mxu1 %v43005_v10 }
 0x271   : > { %38034 = vmatpush3.bf16.msra.mxu0 %v43363_v13  ;;  %32190 = vmatprep.mubr.f32.mxu0 %v43595_v6  ;;  %v50125_v13 = vld [vmem:[#allocation5_spill] sm:$0xff] }
 0x272   : > { %38036 = vmatprep.subr.bf16.mxu0 %v43370_v51 }
 0x273   : > { %37606 = vmatpush3.bf16.msra.mxu1 %v43005_v10  ;;  %v50119_v10 = vld [vmem:[#allocation16_spill] sm:$0xff] }
 0x274   : > { %37608 = vmatprep.subr.bf16.mxu1 %v43026_v28 }
 0x275   : > { %38038 = vmatpush3.bf16.msra.mxu0 %v43370_v51  ;;  %v50126_v51 = vld [vmem:[#allocation19_spill] sm:$0xff] }
 0x276   : > { %38040 = vmatprep.subr.bf16.mxu0 %v43392_v35 }
 0x277   : > { %37610 = vmatpush3.bf16.msra.mxu1 %v43026_v28  ;;  %v50121_v28 = vld [vmem:[#allocation13_spill] sm:$0xff] }
 0x278   : > { %37612 = vmatprep.subr.bf16.mxu1 %v43042_v46 }
 0x279   : > { %38042 = vmatpush3.bf16.msra.mxu0 %v43392_v35  ;;  %v50127_v35 = vld [vmem:[#allocation15_spill] sm:$0xff] }
 0x27a   : > { %38044 = vmatprep.subr.bf16.mxu0 %v43408_v40 }
 0x27b   : > { %37614 = vmatpush3.bf16.msra.mxu1 %v43042_v46  ;;  %v50122_v46 = vld [vmem:[#allocation46_spill] sm:$0xff] }
 0x27c   : > { %37616 = vmatprep.subr.bf16.mxu1 %v43056_v22 }
 0x27d   : > { %38046 = vmatpush3.bf16.msra.mxu0 %v43408_v40  ;;  %v50128_v40 = vld [vmem:[#allocation7_spill] sm:$0xff] }
 0x27e   : > { %38048 = vmatprep.subr.bf16.mxu0 %v43421_v26 }
 0x27f   : > { %37618 = vmatpush3.bf16.msra.mxu1 %v43056_v22  ;;  %v50123_v22 = vld [vmem:[#allocation48_spill] sm:$0xff] }
 0x280   : > { %37620 = vmatprep.subr.bf16.mxu1 %v43062_v27 }
 0x281   : > { %38050 = vmatpush3.bf16.msra.mxu0 %v43421_v26  ;;  %v50129_v26 = vld [vmem:[#allocation23_spill] sm:$0xff] }
 0x282   : > { %38052 = vmatprep.subr.bf16.mxu0 %v43427_v2 }
 0x283   : > { %37622 = vmatpush3.bf16.msra.mxu1 %v43062_v27  ;;  %v50124_v27 = vld [vmem:[#allocation4_spill] sm:$0xff] }
 0x284   : > { %37624 = vmatprep.subr.bf16.mxu1 %v50118_v47 }
 0x285   : > { %38054 = vmatpush3.bf16.msra.mxu0 %v43427_v2  ;;  %v50130_v2 = vld [vmem:[#allocation8_spill] sm:$0xff] }
 0x286   : > { %38056 = vmatprep.subr.bf16.mxu0 %v43435_v16  ;;  %31705 = vmatmul.mubr.f32.vlgmr.msra.gmra.mrb[4].mxu1 %v50119_v10 }
 0x287   : > { %37626 = vmatpush3.bf16.msra.mxu1 %v50118_v47  ;;  %31731 = vmatprep.mubr.f32.mxu1 %v50121_v28  ;;  %v49716_v47 = vand.u32 4294901760, %v43856_v55  ;;  %v49714_v28 = vand.u32 4294901760, %v43870_v5 }
 0x288   : > { %32191 = vmatmul.mubr.f32.vlgmr.msra.gmra.mrb[2].mxu0 %v43634_v56  ;;  %37628 = vmatprep.subr.bf16.mxu1 %v50120_v63 }
 0x289   : > { %38058 = vmatpush3.bf16.msra.mxu0 %v43435_v16  ;;  %32217 = vmatprep.mubr.f32.mxu0 %v43602_v33  ;;  %v50131_v16 = vld [vmem:[#allocation10_spill] sm:$0xff] }
 0x28a   : > { %38060 = vmatprep.subr.bf16.mxu0 %v43443_v60 }
 0x28b   : > { %37630 = vmatpush3.bf16.msra.mxu1 %v50120_v63 }
 0x28c   : > { %37632 = vmatprep.subr.bf16.mxu1 %v50122_v46 }
 0x28d   : > { %38062 = vmatpush3.bf16.msra.mxu0 %v43443_v60  ;;  %v50132_v60 = vld [vmem:[#allocation26_spill] sm:$0xff] }
 0x28e   : > { %38064 = vmatprep.subr.bf16.mxu0 %v43453_v41 }
 0x28f   : > { %37634 = vmatpush3.bf16.msra.mxu1 %v50122_v46 }
 0x290   : > { %37636 = vmatprep.subr.bf16.mxu1 %v50123_v22 }
 0x291   : > { %38066 = vmatpush3.bf16.msra.mxu0 %v43453_v41  ;;  %v50133_v41 = vld [vmem:[#allocation28_spill] sm:$0xff] }
 0x292   : > { %38068 = vmatprep.subr.bf16.mxu0 %v43463_v50 }
 0x293   : > { %37638 = vmatpush3.bf16.msra.mxu1 %v50123_v22 }
 0x294   : > { %37640 = vmatprep.subr.bf16.mxu1 %v50124_v27 }
 0x295   : > { %38070 = vmatpush3.bf16.msra.mxu0 %v43463_v50 }
 0x296   : > { %38072 = vmatprep.subr.bf16.mxu0 %v43471_v11 }
 0x297   : > { %37642 = vmatpush3.bf16.msra.mxu1 %v50124_v27  ;;  %v43897_v27 = vld [vmem:[%s49497_s1 + $0x220] sm:$0xff] }
 0x298   : > { %37644 = vmatprep.subr.bf16.mxu1 %v50125_v13 }
 0x299   : > { %38074 = vmatpush3.bf16.msra.mxu0 %v43471_v11  ;;  %v27349_v11 = vld [vmem:[%s49497_s1 + $0x1f0] sm:$0xff] }
 0x29a   : > { %38076 = vmatprep.subr.bf16.mxu0 %v43479_v61  ;;  %v6134_v53 = vand.u32 4294901760, %v27349_v11 }
 0x29b   : > { %37646 = vmatpush3.bf16.msra.mxu1 %v50125_v13  ;;  %v43905_v13 = vld [vmem:[%s49497_s1 + $0x228] sm:$0xff] }
 0x29c   : > { %37648 = vmatprep.subr.bf16.mxu1 %v42892_v44 }
 0x29d   : > { %38078 = vmatpush3.bf16.msra.mxu0 %v43479_v61  ;;  %v43830_v61 = vld [vmem:[%s49497_s1 + $0x258] sm:$0xff] }
 0x29e   : > { %38080 = vmatprep.subr.bf16.mxu0 %v43257_v57  ;;  %31732 = vmatmul.mubr.f32.vlgmr.msra.gmra.mrb[4].mxu1 %v50126_v51  ;;  %v8075_v12 = vand.u32 4294901760, %v43830_v61 }
 0x29f   : > { %37650 = vmatpush3.bf16.msra.mxu1 %v42892_v44  ;;  %31758 = vmatprep.mubr.f32.mxu1 %v50127_v35 }
 0x2a0   : > { %32218 = vmatmul.mubr.f32.vlgmr.msra.gmra.mrb[2].mxu0 %v43641_v36  ;;  %37652 = vmatprep.subr.bf16.mxu1 %v42904_v45 }
 0x2a1   : > { %38082 = vmatpush3.bf16.msra.mxu0 %v43257_v57  ;;  %32244 = vmatprep.mubr.f32.mxu0 %v43609_v30 }
 0x2a2   : > { %38084 = vmatprep.subr.bf16.mxu0 %v43269_v29 }
 0x2a3   : > { %37654 = vmatpush3.bf16.msra.mxu1 %v42904_v45 }
 0x2a4   : > { %37656 = vmatprep.subr.bf16.mxu1 %v42916_v24 }
 0x2a5   : > { %38086 = vmatpush3.bf16.msra.mxu0 %v43269_v29 }
 0x2a6   : > { %38088 = vmatprep.subr.bf16.mxu0 %v43282_v54 }
 0x2a7   : > { %37658 = vmatpush3.bf16.msra.mxu1 %v42916_v24 }
 0x2a8   : > { %37660 = vmatprep.subr.bf16.mxu1 %v42940_v15 }
 0x2a9   : > { %38090 = vmatpush3.bf16.msra.mxu0 %v43282_v54 }
 0x2aa   : > { %38092 = vmatprep.subr.bf16.mxu0 %v43305_v34 }
 0x2ab   : > { %37662 = vmatpush3.bf16.msra.mxu1 %v42940_v15 }
 0x2ac   : > { %37664 = vmatprep.subr.bf16.mxu1 %v42954_v7 }
 0x2ad   : > { %38094 = vmatpush3.bf16.msra.mxu0 %v43305_v34 }
 0x2ae   : > { %38096 = vmatprep.subr.bf16.mxu0 %v43320_v32 }
 0x2af   : > { %37666 = vmatpush3.bf16.msra.mxu1 %v42954_v7 }
 0x2b0   : > { %37668 = vmatprep.subr.bf16.mxu1 %v42984_v1 }
 0x2b1   : > { %38098 = vmatpush3.bf16.msra.mxu0 %v43320_v32 }
 0x2b2   : > { %38100 = vmatprep.subr.bf16.mxu0 %v43349_v38 }
 0x2b3   : > { %37670 = vmatpush3.bf16.msra.mxu1 %v42984_v1 }
 0x2b4   : > { %37672 = vmatprep.subr.bf16.mxu1 %v50128_v40 }
 0x2b5   : > { %38102 = vmatpush3.bf16.msra.mxu0 %v43349_v38 }
 0x2b6   : > { %38104 = vmatprep.subr.bf16.mxu0 %v43517_v42  ;;  %31759 = vmatmul.mubr.f32.vlgmr.msra.gmra.mrb[4].mxu1 %v50129_v26  ;;  %v43936_v26 = vld [vmem:[%s49497_s1 + $0x280] sm:$0xff] }
 0x2b7   : > { %37674 = vmatpush3.bf16.msra.mxu1 %v50128_v40  ;;  %31785 = vmatprep.mubr.f32.mxu1 %v49946_v14  ;;  %v49720_v40 = vand.u32 4294901760, %v43897_v27 }
 0x2b8   : > { %32245 = vmatmul.mubr.f32.vlgmr.msra.gmra.mrb[2].mxu0 %v43648_v18  ;;  %37676 = vmatprep.subr.bf16.mxu1 %v50130_v2 }
 0x2b9   : > { %38106 = vmatpush3.bf16.msra.mxu0 %v43517_v42  ;;  %32271 = vmatprep.mubr.f32.mxu0 %v43595_v6  ;;  %v43835_v42 = vld [vmem:[%s49497_s1 + $0x200] sm:$0xff] }
 0x2ba   : > { %38108 = vmatprep.subr.bf16.mxu0 %v43527_v9  ;;  %v6140_v59 = vand.u32 4294901760, %v43835_v42 }
 0x2bb   : > { %37678 = vmatpush3.bf16.msra.mxu1 %v50130_v2  ;;  %v43941_v2 = vld [vmem:[%s49497_s1 + $0x288] sm:$0xff] }
 0x2bc   : > { %37680 = vmatprep.subr.bf16.mxu1 %v50131_v16 }
 0x2bd   : > { %38110 = vmatpush3.bf16.msra.mxu0 %v43527_v9  ;;  %v50134_v9 = vld [vmem:[#allocation30_spill] sm:$0xff] }
 0x2be   : > { %38112 = vmatprep.subr.bf16.mxu0 %v43539_v19 }
 0x2bf   : > { %37682 = vmatpush3.bf16.msra.mxu1 %v50131_v16  ;;  %v43946_v16 = vld [vmem:[%s49497_s1 + $0x230] sm:$0xff] }
 0x2c0   : > { %37684 = vmatprep.subr.bf16.mxu1 %v50132_v60 }
 0x2c1   : > { %38114 = vmatpush3.bf16.msra.mxu0 %v43539_v19  ;;  %v43840_v19 = vld [vmem:[%s49497_s1 + $0x208] sm:$0xff] }
 0x2c2   : > { %38116 = vmatprep.subr.bf16.mxu0 %v43551_v52  ;;  %v49719_v20 = vand.u32 4294901760, %v43840_v19 }
 0x2c3   : > { %37686 = vmatpush3.bf16.msra.mxu1 %v50132_v60 }
 0x2c4   : > { %37688 = vmatprep.subr.bf16.mxu1 %v50133_v41 }
 0x2c5   : > { %38118 = vmatpush3.bf16.msra.mxu0 %v43551_v52  ;;  %v43846_v52 = vld [vmem:[%s49497_s1 + $0x260] sm:$0xff] }
 0x2c6   : > { %38120 = vmatprep.subr.bf16.mxu0 %v43561_v31  ;;  %v49718_v62 = vand.u32 4294901760, %v43846_v52 }
 0x2c7   : > { %37690 = vmatpush3.bf16.msra.mxu1 %v50133_v41  ;;  %v49727_v41 = vand.u32 4294901760, %v43936_v26 }
 0x2c8   : > { %37692 = vmatprep.subr.bf16.mxu1 %v50134_v9 }
 0x2c9   : > { %38122 = vmatpush3.bf16.msra.mxu0 %v43561_v31  ;;  %v43851_v31 = vld [vmem:[%s49497_s1 + $0x268] sm:$0xff] }
 0x2ca   : > { %38124 = vmatprep.subr.bf16.mxu0 %v43571_v39  ;;  %v49717_v58 = vand.u32 4294901760, %v43851_v31 }
 0x2cb   : > { %37694 = vmatpush3.bf16.msra.mxu1 %v50134_v9  ;;  %v43956_v9 = vld [vmem:[%s49497_s1 + $0x238] sm:$0xff] }
 0x2cc   : > { %37696 = vmatprep.subr.bf16.mxu1 %v42892_v44  ;;  %v43916_v51 = vpack.c.bf16 %v49717_v58, %v49718_v62  ;;  %v43979_v58 = vsub.f32 %v27349_v11, %v6134_v53  ;;  %v44013_v11 = vsub.f32 %v43835_v42, %v6140_v59 }
 0x2cd   : > { %38126 = vmatpush3.bf16.msra.mxu0 %v43571_v39  ;;  %v43865_v39 = vld [vmem:[%s49497_s1 + $0x218] sm:$0xff] }
 0x2ce   : > { %38128 = vmatprep.subr.bf16.mxu0 %v43257_v57  ;;  %31786 = vmatmul.mubr.f32.vlgmr.msra.gmra.mrb[4].mxu1 %v50119_v10  ;;  %v49715_v63 = vand.u32 4294901760, %v43865_v39  ;;  %50136 = vst [vmem:[#allocation37_spill] sm:$0xff] %v43916_v51 }
 0x2cf   : > { %37698 = vmatpush3.bf16.msra.mxu1 %v42892_v44  ;;  %31812 = vmatprep.mubr.f32.mxu1 %v49946_v14  ;;  %v27347_v14 = vld [vmem:[%s49497_s1 + $0x1e0] sm:$0xff]  ;;  %v43799_v44 = vld [vmem:[%s49497_s1 + $0x1e8] sm:$0xff] }
 0x2d0   : > { %32272 = vmatmul.mubr.f32.vlgmr.msra.gmra.mrb[2].mxu0 %v43634_v56  ;;  %37700 = vmatprep.subr.bf16.mxu1 %v42904_v45  ;;  %v43924_v35 = vpack.c.bf16 %v49715_v63, %v49716_v47  ;;  %v50139_v47 = vld [vmem:[#allocation60_spill] sm:$0xff] }
 0x2d1   : > { %38130 = vmatpush3.bf16.msra.mxu0 %v43257_v57  ;;  %32298 = vmatprep.mubr.f32.mxu0 %v43595_v6  ;;  %v6128_v57 = vand.u32 4294901760, %v27347_v14 }
 0x2d2   : > { %38132 = vmatprep.subr.bf16.mxu0 %v43269_v29  ;;  %50137 = vst [vmem:[#allocation17_spill] sm:$0xff] %v43924_v35 }
 0x2d3   : > { %37702 = vmatpush3.bf16.msra.mxu1 %v42904_v45  ;;  %v43804_v45 = vld [vmem:[%s49497_s1 + $0x240] sm:$0xff]  ;;  %v43948_v60 = vsub.f32 %v27347_v14, %v6128_v57  ;;  %v43966_v14 = vld [vmem:[%s49497_s1 + $0x298] sm:$0xff] }
 0x2d4   : > { %37704 = vmatprep.subr.bf16.mxu1 %v42916_v24 }
 0x2d5   : > { %38134 = vmatpush3.bf16.msra.mxu0 %v43269_v29  ;;  %v6131_v29 = vand.u32 4294901760, %v43799_v44 }
 0x2d6   : > { %38136 = vmatprep.subr.bf16.mxu0 %v43282_v54 }
 0x2d7   : > { %37706 = vmatpush3.bf16.msra.mxu1 %v42916_v24  ;;  %v43809_v24 = vld [vmem:[%s49497_s1 + $0x248] sm:$0xff] }
 0x2d8   : > { %37708 = vmatprep.subr.bf16.mxu1 %v42940_v15  ;;  %v8069_v50 = vand.u32 4294901760, %v43809_v24 }
 0x2d9   : > { %38138 = vmatpush3.bf16.msra.mxu0 %v43282_v54  ;;  %v8066_v54 = vand.u32 4294901760, %v43804_v45 }
 0x2da   : > { %38140 = vmatprep.subr.bf16.mxu0 %v43305_v34  ;;  %v43975_v63 = vsub.f32 %v43809_v24, %v8069_v50  ;;  %v43990_v24 = vsub.f32 %v43830_v61, %v8075_v12 }
 0x2db   : > { %37710 = vmatpush3.bf16.msra.mxu1 %v42940_v15  ;;  %v27350_v15 = vld [vmem:[%s49497_s1 + $0x1f8] sm:$0xff]  ;;  %v43878_v23 = vpack.c.bf16 %v8069_v50, %v8066_v54  ;;  %v49722_v50 = vand.u32 4294901760, %v43966_v14 }
 0x2dc   : > { %37712 = vmatprep.subr.bf16.mxu1 %v42954_v7  ;;  %v6137_v37 = vand.u32 4294901760, %v27350_v15 }
 0x2dd   : > { %38142 = vmatpush3.bf16.msra.mxu0 %v43305_v34  ;;  %v27363_v34 = vld [vmem:[%s49497_s1 + $0x250] sm:$0xff] }
 0x2de   : > { %38144 = vmatprep.subr.bf16.mxu0 %v43320_v32  ;;  %v8072_v3 = vand.u32 4294901760, %v27363_v34  ;;  %v43892_v22 = vpack.c.bf16 %v6137_v37, %v6134_v53  ;;  %v43981_v62 = vsub.f32 %v27350_v15, %v6137_v37  ;;  %v50140_v15 = vand.u32 4294901760, %v43905_v13 }
 0x2df   : > { %37714 = vmatpush3.bf16.msra.mxu1 %v42954_v7  ;;  %v43860_v7 = vpack.c.bf16 %v6131_v29, %v6128_v57  ;;  %v43969_v57 = vsub.f32 %v43799_v44, %v6131_v29  ;;  %v49725_v44 = vand.u32 4294901760, %v43941_v2  ;;  %v49721_v29 = vand.u32 4294901760, %v43956_v9 }
 0x2e0   : > { %37716 = vmatprep.subr.bf16.mxu1 %v42984_v1  ;;  %v50142_v37 = vand.u32 4294901760, %v43840_v19 }
 0x2e1   : > { %38146 = vmatpush3.bf16.msra.mxu0 %v43320_v32  ;;  %v43875_v32 = vld [vmem:[%s49497_s1 + $0x278] sm:$0xff]  ;;  %v49726_v61 = vand.u32 4294901760, %v43969_v57 }
 0x2e2   : > { %38148 = vmatprep.subr.bf16.mxu0 %v43349_v38  ;;  %v49713_v46 = vand.u32 4294901760, %v43875_v32  ;;  %v44025_v53 = vsub.f32 %v43840_v19, %v50142_v37  ;;  %v50144_v19 = vand.u32 4294901760, %v43948_v60 }
 0x2e3   : > { %37718 = vmatpush3.bf16.msra.mxu1 %v42984_v1  ;;  %v43900_v1 = vpack.c.bf16 %v8075_v12, %v8072_v3  ;;  %v50143_v12 = vand.u32 4294901760, %v43846_v52 }
 0x2e4   : > { %37864 = vmatprep.subr.bf16.mxu1 %v43860_v7  ;;  %v6228_v37 = vsub.f32 %v43948_v60, %v50144_v19 }
 0x2e5   : > { %38150 = vmatpush3.bf16.msra.mxu0 %v43349_v38  ;;  %v43910_v38 = vpack.c.bf16 %v49719_v20, %v6140_v59  ;;  %v43983_v20 = vsub.f32 %v27363_v34, %v8072_v3  ;;  %v44003_v34 = vpack.c.bf16 %v50140_v15, %v49720_v40  ;;  %v49732_v3 = vand.u32 4294901760, %v43979_v58 }
 0x2e6   : > { %38296 = vmatprep.subr.bf16.mxu0 %v43878_v23  ;;  %31813 = vmatmul.mubr.f32.vlgmr.msra.gmra.mrb[4].mxu1 %v50119_v10  ;;  %v43930_v10 = vpack.c.bf16 %v49713_v46, %v49714_v28  ;;  %v43961_v46 = vld [vmem:[%s49497_s1 + $0x290] sm:$0xff]  ;;  %v43972_v28 = vsub.f32 %v43804_v45, %v8066_v54  ;;  %v49724_v45 = vand.u32 4294901760, %v43946_v16  ;;  %v44019_v15 = vpack.c.bf16 %v49725_v44, %v49727_v41 }
 0x2e7   : > { %50135 = vst [vmem:[#allocation39_spill] sm:$0xff] %v43910_v38  ;;  %37866 = vmatpush3.bf16.msra.mxu1 %v43860_v7  ;;  %32001 = vmatprep.mubr.f32.mxu1 %v50139_v47  ;;  %v49723_v54 = vand.u32 4294901760, %v43961_v46  ;;  %v49736_v40 = vand.u32 4294901760, %v43990_v24  ;;  %v44030_v47 = vsub.f32 %v43846_v52, %v50143_v12  ;;  %v50145_v52 = vand.u32 4294901760, %v43851_v31 }
 0x2e8   : > { %32299 = vmatmul.mubr.f32.vlgmr.msra.gmra.mrb[2].mxu0 %v43634_v56  ;;  %50138 = vst [vmem:[#allocation50_spill] sm:$0xff] %v43930_v10  ;;  %37868 = vmatprep.subr.bf16.mxu1 %v43892_v22  ;;  %50141 = vst [vmem:[#allocation14_spill] sm:$0xff] %v44019_v15  ;;  %v44037_v42 = vpack.c.bf16 %v49721_v29, %v49724_v45  ;;  %v6235_v29 = vsub.f32 %v43969_v57, %v49726_v61  ;;  %v50147_v45 = vand.u32 4294901760, %v43975_v63 }
 0x2e9   : > { %38298 = vmatpush3.bf16.msra.mxu0 %v43878_v23  ;;  %32487 = vmatprep.mubr.f32.mxu0 %v43623_v49  ;;  %v44043_v59 = vpack.c.bf16 %v49722_v50, %v49723_v54  ;;  %v44051_v12 = vsub.f32 %v43851_v31, %v50145_v52  ;;  %v50146_v50 = vand.u32 4294901760, %v43972_v28  ;;  %v6242_v31 = vsub.f32 %v43979_v58, %v49732_v3 }
 0x2ea   : > { %38300 = vmatprep.subr.bf16.mxu0 %v43900_v1  ;;  %v8173_v19 = vsub.f32 %v43975_v63, %v50147_v45  ;;  %v50148_v52 = vand.u32 4294901760, %v43981_v62  ;;  %v50149_v61 = vand.u32 4294901760, %v43983_v20  ;;  %v8187_v45 = vsub.f32 %v43990_v24, %v49736_v40 }
 0x2eb   : > { %37870 = vmatpush3.bf16.msra.mxu1 %v43892_v22  ;;  %v8166_v54 = vsub.f32 %v43972_v28, %v50146_v50  ;;  %v50150_v3 = vand.u32 4294901760, %v43856_v55  ;;  %v50151_v50 = vand.u32 4294901760, %v43865_v39  ;;  %v50152_v40 = vand.u32 4294901760, %v43870_v5 }
 0x2ec   : > { %37872 = vmatprep.subr.bf16.mxu1 %v43910_v38  ;;  %v6249_v44 = vsub.f32 %v43981_v62, %v50148_v52  ;;  %v8180_v41 = vsub.f32 %v43983_v20, %v50149_v61  ;;  %v6229_v52 = vand.u32 4294901760, %v6228_v37  ;;  %v8174_v18 = vand.u32 4294901760, %v8173_v19 }
 0x2ed   : > { %38302 = vmatpush3.bf16.msra.mxu0 %v43900_v1  ;;  %v44083_v48 = vsub.f32 %v43856_v55, %v50150_v3  ;;  %v44095_v49 = vsub.f32 %v43870_v5, %v50152_v40  ;;  %v6236_v55 = vand.u32 4294901760, %v6235_v29  ;;  %v8167_v3 = vand.u32 4294901760, %v8166_v54 }
 0x2ee   : > { %38304 = vmatprep.subr.bf16.mxu0 %v43916_v51  ;;  %v50153_v37 = vand.u32 4294901760, %v43875_v32  ;;  %v50154_v5 = vand.u32 4294901760, %v44013_v11  ;;  %v50156_v54 = vand.u32 4294901760, %v44030_v47 }
 0x2ef   : > { %37874 = vmatpush3.bf16.msra.mxu1 %v43910_v38  ;;  %v50155_v38 = vand.u32 4294901760, %v44025_v53 }
 0x2f0   : > { %37876 = vmatprep.subr.bf16.mxu1 %v43924_v35  ;;  %v44102_v61 = vsub.f32 %v43875_v32, %v50153_v37  ;;  %v6256_v40 = vsub.f32 %v44013_v11, %v50154_v5  ;;  %v8194_v19 = vsub.f32 %v44030_v47, %v50156_v54  ;;  %v50158_v37 = vand.u32 4294901760, %v43897_v27 }
 0x2f1   : > { %38306 = vmatpush3.bf16.msra.mxu0 %v43916_v51  ;;  %v44090_v51 = vsub.f32 %v43865_v39, %v50151_v50  ;;  %v6243_v39 = vand.u32 4294901760, %v6242_v31  ;;  %v6250_v50 = vand.u32 4294901760, %v6249_v44  ;;  %v6263_v29 = vsub.f32 %v44025_v53, %v50155_v38 }
 0x2f2   : > { %38308 = vmatprep.subr.bf16.mxu0 %v43930_v10  ;;  %v50157_v44 = vand.u32 4294901760, %v44051_v12  ;;  %v44124_v38 = vsub.f32 %v43897_v27, %v50158_v37  ;;  %v44128_v5 = vpack.c.bf16 %v6236_v55, %v6229_v52  ;;  %v44130_v54 = vpack.c.bf16 %v8174_v18, %v8167_v3 }
 0x2f3   : > { %37878 = vmatpush3.bf16.msra.mxu1 %v43924_v35  ;;  %v8181_v35 = vand.u32 4294901760, %v8180_v41  ;;  %v49745_v32 = vand.u32 4294901760, %v44102_v61  ;;  %v6257_v27 = vand.u32 4294901760, %v6256_v40  ;;  %v50160_v37 = vand.u32 4294901760, %v43936_v26 }
 0x2f4   : > { %37880 = vmatprep.subr.bf16.mxu1 %v44003_v34  ;;  %v8201_v41 = vsub.f32 %v44051_v12, %v50157_v44  ;;  %v50159_v44 = vand.u32 4294901760, %v43905_v13  ;;  %v50161_v18 = vand.u32 4294901760, %v43941_v2  ;;  %v6264_v3 = vand.u32 4294901760, %v6263_v29 }
 0x2f5   : > { %38310 = vmatpush3.bf16.msra.mxu0 %v43930_v10  ;;  %v8188_v10 = vand.u32 4294901760, %v8187_v45  ;;  %v44139_v45 = vpack.c.bf16 %v6250_v50, %v6243_v39  ;;  %v50164_v40 = vand.u32 4294901760, %v44090_v51 }
 0x2f6   : > { %38312 = vmatprep.subr.bf16.mxu0 %v44019_v15  ;;  %v44136_v31 = vsub.f32 %v43905_v13, %v50159_v44  ;;  %v44149_v52 = vsub.f32 %v43941_v2, %v50161_v18  ;;  %v8195_v13 = vand.u32 4294901760, %v8194_v19  ;;  %v50163_v44 = vand.u32 4294901760, %v44083_v48 }
 0x2f7   : > { %37882 = vmatpush3.bf16.msra.mxu1 %v44003_v34  ;;  %v44151_v55 = vpack.c.bf16 %v8188_v10, %v8181_v35  ;;  %v8202_v50 = vand.u32 4294901760, %v8201_v41  ;;  %v8215_v10 = vsub.f32 %v44102_v61, %v49745_v32  ;;  %v50166_v19 = vand.u32 4294901760, %v43946_v16 }
 0x2f8   : > { %37884 = vmatprep.subr.bf16.mxu1 %v44037_v42  ;;  %v6270_v39 = vsub.f32 %v44083_v48, %v50163_v44  ;;  %v50167_v18 = vand.u32 4294901760, %v43956_v9  ;;  %v50168_v32 = vand.u32 4294901760, %v43961_v46  ;;  %v50169_v35 = vand.u32 4294901760, %v43966_v14 }
 0x2f9   : > { %38314 = vmatpush3.bf16.msra.mxu0 %v44019_v15  ;;  %v44144_v15 = vsub.f32 %v43936_v26, %v50160_v37  ;;  %50162 = vst [vmem:[#allocation51_spill] sm:$0xff] %v44151_v55  ;;  %v6277_v26 = vsub.f32 %v44090_v51, %v50164_v40  ;;  %v50165_v37 = vand.u32 4294901760, %v44095_v49  ;;  %v44173_v41 = vsub.f32 %v43946_v16, %v50166_v19 }
 0x2fa   : > { %38316 = vmatprep.subr.bf16.mxu0 %v44043_v59  ;;  %v44178_v44 = vsub.f32 %v43956_v9, %v50167_v18  ;;  %v44186_v29 = vsub.f32 %v43961_v46, %v50168_v32  ;;  %v44191_v16 = vsub.f32 %v43966_v14, %v50169_v35  ;;  %v44194_v9 = vpack.c.bf16 %v6264_v3, %v6257_v27 }
 0x2fb   : > { %37886 = vmatpush3.bf16.msra.mxu1 %v44037_v42  ;;  %v8208_v2 = vsub.f32 %v44095_v49, %v50165_v37  ;;  %v6271_v19 = vand.u32 4294901760, %v6270_v39  ;;  %v44198_v18 = vpack.c.bf16 %v8202_v50, %v8195_v13  ;;  %v6278_v37 = vand.u32 4294901760, %v6277_v26 }
 0x2fc   : > { %37888 = vmatprep.subr.bf16.mxu1 %v44128_v5  ;;  %v50170_v46 = vand.u32 4294901760, %v44124_v38  ;;  %v50171_v14 = vand.u32 4294901760, %v44136_v31  ;;  %v49749_v3 = vand.u32 4294901760, %v44173_v41  ;;  %v49748_v13 = vand.u32 4294901760, %v44178_v44 }
 0x2fd   : > { %38318 = vmatpush3.bf16.msra.mxu0 %v44043_v59  ;;  %v8209_v40 = vand.u32 4294901760, %v8208_v2  ;;  %v50172_v39 = vand.u32 4294901760, %v44144_v15  ;;  %v50173_v26 = vand.u32 4294901760, %v44149_v52 }
 0x2fe   : > { %38320 = vmatprep.subr.bf16.mxu0 %v44130_v54  ;;  %32002 = vmatmul.mubr.f32.vlgmr.msra.gmra.mrb[2].mxu1 %v42676_v17  ;;  %v6284_v32 = vsub.f32 %v44124_v38, %v50170_v46  ;;  %v8216_v17 = vand.u32 4294901760, %v8215_v10  ;;  %v6291_v27 = vsub.f32 %v44136_v31, %v50171_v14  ;;  %v44222_v46 = vpack.c.bf16 %v6278_v37, %v6271_v19 }
 0x2ff   : > { %37890 = vmatpush3.bf16.msra.mxu1 %v44128_v5  ;;  %v8222_v50 = vsub.f32 %v44144_v15, %v50172_v39  ;;  %v8229_v2 = vsub.f32 %v44149_v52, %v50173_v26  ;;  %32028 = vmatprep.mubr.f32.mxu1 %v42553_v25  ;;  %v6298_v10 = vsub.f32 %v44173_v41, %v49749_v3 }
 0x300   : > { %32488 = vmatmul.mubr.f32.vlgmr.msra.gmra.mrb[0].mxu0 %v43660_v0  ;;  %37892 = vmatprep.subr.bf16.mxu1 %v44139_v45  ;;  %v6285_v14 = vand.u32 4294901760, %v6284_v32  ;;  %v44226_v39 = vpack.c.bf16 %v8216_v17, %v8209_v40  ;;  %v6292_v26 = vand.u32 4294901760, %v6291_v27  ;;  %v6305_v35 = vsub.f32 %v44178_v44, %v49748_v13 }
 0x301   : > { %38322 = vmatpush3.bf16.msra.mxu0 %v44130_v54  ;;  %32514 = vmatprep.mubr.f32.mxu0 %v43595_v6  ;;  %v8223_v37 = vand.u32 4294901760, %v8222_v50  ;;  %v8230_v19 = vand.u32 4294901760, %v8229_v2  ;;  %v50174_v32 = vand.u32 4294901760, %v44186_v29  ;;  %v50175_v40 = vand.u32 4294901760, %v44191_v16 }
 0x302   : > { %38324 = vmatprep.subr.bf16.mxu0 %v44151_v55  ;;  %v44244_v27 = vpack.c.bf16 %v6292_v26, %v6285_v14  ;;  %v6299_v13 = vand.u32 4294901760, %v6298_v10  ;;  %v6306_v3 = vand.u32 4294901760, %v6305_v35  ;;  %v44279_v35 = vpack.c.bf16 %v43990_v24, %v43983_v20 }
 0x303   : > { %37894 = vmatpush3.bf16.msra.mxu1 %v44139_v45  ;;  %v8243_v17 = vsub.f32 %v44191_v16, %v50175_v40  ;;  %v44247_v50 = vpack.c.bf16 %v8230_v19, %v8223_v37  ;;  %v44288_v10 = vpack.c.bf16 %v44025_v53, %v44013_v11  ;;  %v44293_v26 = vpack.c.bf16 %v44051_v12, %v44030_v47 }
 0x304   : > { %37896 = vmatprep.subr.bf16.mxu1 %v44194_v9  ;;  %v44252_v40 = vpack.c.bf16 %v6306_v3, %v6299_v13  ;;  %v44267_v3 = vpack.c.bf16 %v43975_v63, %v43972_v28  ;;  %v44274_v13 = vpack.c.bf16 %v43981_v62, %v43979_v58  ;;  %v44302_v37 = vpack.c.bf16 %v44090_v51, %v44083_v48 }
 0x305   : > { %38326 = vmatpush3.bf16.msra.mxu0 %v44151_v55  ;;  %v8236_v55 = vsub.f32 %v44186_v29, %v50174_v32  ;;  %v8244_v32 = vand.u32 4294901760, %v8243_v17  ;;  %50176 = vst [vmem:[#allocation52_spill] sm:$0xff] %v44293_v26  ;;  %v44307_v19 = vpack.c.bf16 %v44102_v61, %v44095_v49  ;;  %v44319_v17 = vpack.c.bf16 %v44149_v52, %v44144_v15 }
 0x306   : > { %38328 = vmatprep.subr.bf16.mxu0 %v44198_v18  ;;  %50177 = vst [vmem:[#allocation53_spill] sm:$0xff] %v44302_v37 }
 0x307   : > { %37898 = vmatpush3.bf16.msra.mxu1 %v44194_v9  ;;  %v8237_v2 = vand.u32 4294901760, %v8236_v55  ;;  %v44262_v55 = vpack.c.bf16 %v43969_v57, %v43948_v60  ;;  %50178 = vst [vmem:[#allocation54_spill] sm:$0xff] %v44307_v19  ;;  %50180 = vst [vmem:[#allocation18_spill] sm:$0xff] %v44319_v17 }
 0x308   : > { %37900 = vmatprep.subr.bf16.mxu1 %v44222_v46 }
 0x309   : > { %38330 = vmatpush3.bf16.msra.mxu0 %v44198_v18  ;;  %v44255_v14 = vpack.c.bf16 %v8244_v32, %v8237_v2  ;;  %v44326_v2 = vpack.c.bf16 %v44178_v44, %v44173_v41  ;;  %v44331_v32 = vpack.c.bf16 %v44191_v16, %v44186_v29 }
 0x30a   : > { %38332 = vmatprep.subr.bf16.mxu0 %v44226_v39 }
 0x30b   : > { %37902 = vmatpush3.bf16.msra.mxu1 %v44222_v46  ;;  %50181 = vst [vmem:[#allocation38_spill] sm:$0xff] %v44326_v2  ;;  %50182 = vst [vmem:[#allocation24_spill] sm:$0xff] %v44331_v32 }
 0x30c   : > { %37904 = vmatprep.subr.bf16.mxu1 %v44244_v27 }
 0x30d   : > { %38334 = vmatpush3.bf16.msra.mxu0 %v44226_v39 }
 0x30e   : > { %38336 = vmatprep.subr.bf16.mxu0 %v44247_v50 }
 0x30f   : > { %37906 = vmatpush3.bf16.msra.mxu1 %v44244_v27 }
 0x310   : > { %37908 = vmatprep.subr.bf16.mxu1 %v44252_v40 }
 0x311   : > { %38338 = vmatpush3.bf16.msra.mxu0 %v44247_v50 }
 0x312   : > { %38340 = vmatprep.subr.bf16.mxu0 %v44255_v14 }
 0x313   : > { %37910 = vmatpush3.bf16.msra.mxu1 %v44252_v40 }
 0x314   : > { %37912 = vmatprep.subr.bf16.mxu1 %v44262_v55 }
 0x315   : > { %38342 = vmatpush3.bf16.msra.mxu0 %v44255_v14 }
 0x316   : > { %38344 = vmatprep.subr.bf16.mxu0 %v44267_v3  ;;  %32029 = vmatmul.mubr.f32.vlgmr.msra.gmra.mrb[2].mxu1 %v50085_v8 }
 0x317   : > { %37914 = vmatpush3.bf16.msra.mxu1 %v44262_v55  ;;  %32055 = vmatprep.mubr.f32.mxu1 %v50087_v43  ;;  %v44314_v43 = vpack.c.bf16 %v44136_v31, %v44124_v38 }
 0x318   : > { %32515 = vmatmul.mubr.f32.vlgmr.msra.gmra.mrb[0].mxu0 %v43634_v56  ;;  %37916 = vmatprep.subr.bf16.mxu1 %v44274_v13 }
 0x319   : > { %38346 = vmatpush3.bf16.msra.mxu0 %v44267_v3  ;;  %32541 = vmatprep.mubr.f32.mxu0 %v43602_v33  ;;  %50179 = vst [vmem:[#allocation20_spill] sm:$0xff] %v44314_v43 }
 0x31a   : > { %38348 = vmatprep.subr.bf16.mxu0 %v44279_v35 }
 0x31b   : > { %37918 = vmatpush3.bf16.msra.mxu1 %v44274_v13 }
 0x31c   : > { %37920 = vmatprep.subr.bf16.mxu1 %v44288_v10 }
 0x31d   : > { %38350 = vmatpush3.bf16.msra.mxu0 %v44279_v35 }
 0x31e   : > { %38352 = vmatprep.subr.bf16.mxu0 %v44293_v26 }
 0x31f   : > { %37922 = vmatpush3.bf16.msra.mxu1 %v44288_v10 }
 0x320   : > { %37924 = vmatprep.subr.bf16.mxu1 %v44302_v37 }
 0x321   : > { %38354 = vmatpush3.bf16.msra.mxu0 %v44293_v26 }
 0x322   : > { %38356 = vmatprep.subr.bf16.mxu0 %v44307_v19 }
 0x323   : > { %37926 = vmatpush3.bf16.msra.mxu1 %v44302_v37  ;;  %v50191_v37 = vand.u32 4294901760, %v43975_v63  ;;  %v50195_v63 = vand.u32 4294901760, %v43990_v24  ;;  %v50201_v24 = vand.u32 4294901760, %v44051_v12  ;;  %v50205_v12 = vand.u32 4294901760, %v44102_v61 }
 0x324   : > { %37928 = vmatprep.subr.bf16.mxu1 %v44314_v43  ;;  %v50209_v61 = vand.u32 4294901760, %v44149_v52  ;;  %v50213_v52 = vand.u32 4294901760, %v44191_v16 }
 0x325   : > { %38358 = vmatpush3.bf16.msra.mxu0 %v44307_v19  ;;  %v50190_v19 = vand.u32 4294901760, %v43972_v28  ;;  %v50194_v28 = vand.u32 4294901760, %v43983_v20  ;;  %v50200_v20 = vand.u32 4294901760, %v44030_v47  ;;  %v50204_v47 = vand.u32 4294901760, %v44095_v49 }
 0x326   : > { %38360 = vmatprep.subr.bf16.mxu0 %v44319_v17  ;;  %v50208_v49 = vand.u32 4294901760, %v44144_v15  ;;  %v50212_v15 = vand.u32 4294901760, %v44186_v29  ;;  %v27385_v29 = vld [vmem:[%s41839_s17 + $0x4] ss:$2 sm:$0xff] }
 0x327   : > { %37930 = vmatpush3.bf16.msra.mxu1 %v44314_v43  ;;  %v44375_v26 = vpack.c.bf16 %v50191_v37, %v50190_v19  ;;  %v44391_v37 = vpack.c.bf16 %v50195_v63, %v50194_v28  ;;  %v50196_v19 = vld [vmem:[#allocation63_spill] sm:$0xff]  ;;  %v44427_v63 = vpack.c.bf16 %v50205_v12, %v50204_v47  ;;  %v50216_v12 = vld [vmem:[#allocation32_spill] sm:$0xff] }
 0x328   : > { %37932 = vmatprep.subr.bf16.mxu1 %v44326_v2 }
 0x329   : > { %38362 = vmatpush3.bf16.msra.mxu0 %v44319_v17  ;;  %v50189_v17 = vand.u32 4294901760, %v43969_v57  ;;  %v50193_v57 = vand.u32 4294901760, %v43981_v62  ;;  %v50198_v62 = vand.u32 4294901760, %v44013_v11  ;;  %v50202_v11 = vand.u32 4294901760, %v44083_v48 }
 0x32a   : > { %38364 = vmatprep.subr.bf16.mxu0 %v44331_v32  ;;  %v50206_v48 = vand.u32 4294901760, %v44124_v38  ;;  %v50210_v38 = vand.u32 4294901760, %v44173_v41  ;;  %v9338_v41 = vsel %vm388_vm0, %v27385_v29, 0 }
 0x32b   : > { %37934 = vmatpush3.bf16.msra.mxu1 %v44326_v2  ;;  %v50186_v2 = vld [vmem:[#allocation50_spill] sm:$0xff] }
 0x32c   : > { %37936 = vmatprep.subr.bf16.mxu1 %v43860_v7 }
 0x32d   : > { %38366 = vmatpush3.bf16.msra.mxu0 %v44331_v32  ;;  %v50183_v32 = vld [vmem:[#allocation39_spill] sm:$0xff] }
 0x32e   : > { %38368 = vmatprep.subr.bf16.mxu0 %v43878_v23  ;;  %32056 = vmatmul.mubr.f32.vlgmr.msra.gmra.mrb[2].mxu1 %v50092_v21  ;;  %v50184_v21 = vld [vmem:[#allocation37_spill] sm:$0xff] }
 0x32f   : > { %37938 = vmatpush3.bf16.msra.mxu1 %v43860_v7  ;;  %32082 = vmatprep.mubr.f32.mxu1 %v50093_v4  ;;  %v50187_v4 = vld [vmem:[#allocation14_spill] sm:$0xff] }
 0x330   : > { %32542 = vmatmul.mubr.f32.vlgmr.msra.gmra.mrb[0].mxu0 %v43641_v36  ;;  %37940 = vmatprep.subr.bf16.mxu1 %v43892_v22  ;;  %v50185_v36 = vld [vmem:[#allocation17_spill] sm:$0xff] }
 0x331   : > { %38370 = vmatpush3.bf16.msra.mxu0 %v43878_v23  ;;  %32568 = vmatprep.mubr.f32.mxu0 %v43609_v30  ;;  %v50188_v30 = vand.u32 4294901760, %v43948_v60  ;;  %v50192_v60 = vand.u32 4294901760, %v43979_v58  ;;  %v50199_v58 = vand.u32 4294901760, %v44025_v53  ;;  %v50203_v53 = vand.u32 4294901760, %v44090_v51 }
 0x332   : > { %38372 = vmatprep.subr.bf16.mxu0 %v43900_v1  ;;  %v50207_v51 = vand.u32 4294901760, %v44136_v31  ;;  %v50211_v31 = vand.u32 4294901760, %v44178_v44  ;;  %v44483_v44 = vand.u32 4294901760, %v9338_v41 }
 0x333   : > { %37942 = vmatpush3.bf16.msra.mxu1 %v43892_v22  ;;  %v44368_v43 = vpack.c.bf16 %v50189_v17, %v50188_v30  ;;  %v44384_v30 = vpack.c.bf16 %v50193_v57, %v50192_v60  ;;  %v50197_v17 = vld [vmem:[#allocation36_spill] sm:$0xff]  ;;  %v44402_v60 = vpack.c.bf16 %v50199_v58, %v50198_v62  ;;  %v44409_v57 = vpack.c.bf16 %v50201_v24, %v50200_v20 }
 0x334   : > { %37944 = vmatprep.subr.bf16.mxu1 %v50183_v32  ;;  %v44420_v28 = vpack.c.bf16 %v50203_v53, %v50202_v11  ;;  %v44443_v62 = vpack.c.bf16 %v50209_v61, %v50208_v49  ;;  %v44452_v58 = vpack.c.bf16 %v50211_v31, %v50210_v38  ;;  %v44459_v20 = vpack.c.bf16 %v50213_v52, %v50212_v15  ;;  %v27386_v11 = vld [vmem:[%s41839_s17 + $0x14] ss:$2 sm:$0x3f] }
 0x335   : > { %38374 = vmatpush3.bf16.msra.mxu0 %v43900_v1  ;;  %v9341_v47 = vsel %vm388_vm0, %v27386_v11, 0  ;;  %v50219_v38 = vld [vmem:[#allocation51_spill] sm:$0xff]  ;;  %v44785_v11 = vld [vmem:[%s49497_s1 + $0x2e0] sm:$0xff] }
 0x336   : > { %38376 = vmatprep.subr.bf16.mxu0 %v50184_v21 }
 0x337   : > { %37946 = vmatpush3.bf16.msra.mxu1 %v50183_v32 }
 0x338   : > { %37948 = vmatprep.subr.bf16.mxu1 %v50185_v36 }
 0x339   : > { %38378 = vmatpush3.bf16.msra.mxu0 %v50184_v21 }
 0x33a   : > { %38380 = vmatprep.subr.bf16.mxu0 %v50186_v2 }
 0x33b   : > { %37950 = vmatpush3.bf16.msra.mxu1 %v50185_v36 }
 0x33c   : > { %37952 = vmatprep.subr.bf16.mxu1 %v44003_v34 }
 0x33d   : > { %38382 = vmatpush3.bf16.msra.mxu0 %v50186_v2 }
 0x33e   : > { %38384 = vmatprep.subr.bf16.mxu0 %v50187_v4 }
 0x33f   : > { %37954 = vmatpush3.bf16.msra.mxu1 %v44003_v34 }
 0x340   : > { %37956 = vmatprep.subr.bf16.mxu1 %v44037_v42 }
 0x341   : > { %38386 = vmatpush3.bf16.msra.mxu0 %v50187_v4 }
 0x342   : > { %38388 = vmatprep.subr.bf16.mxu0 %v44043_v59 }
 0x343   : > { %37958 = vmatpush3.bf16.msra.mxu1 %v44037_v42 }
 0x344   : > { %37960 = vmatprep.subr.bf16.mxu1 %v44368_v43 }
 0x345   : > { %38390 = vmatpush3.bf16.msra.mxu0 %v44043_v59 }
 0x346   : > { %38392 = vmatprep.subr.bf16.mxu0 %v44375_v26  ;;  %32083 = vmatmul.mubr.f32.vlgmr.msra.gmra.mrb[2].mxu1 %v50196_v19  ;;  %v44436_v19 = vpack.c.bf16 %v50207_v51, %v50206_v48 }
 0x347   : > { %37962 = vmatpush3.bf16.msra.mxu1 %v44368_v43  ;;  %32109 = vmatprep.mubr.f32.mxu1 %v42553_v25 }
 0x348   : > { %32569 = vmatmul.mubr.f32.vlgmr.msra.gmra.mrb[0].mxu0 %v50197_v17  ;;  %37964 = vmatprep.subr.bf16.mxu1 %v44384_v30 }
 0x349   : > { %38394 = vmatpush3.bf16.msra.mxu0 %v44375_v26  ;;  %32595 = vmatprep.mubr.f32.mxu0 %v43595_v6 }
 0x34a   : > { %38396 = vmatprep.subr.bf16.mxu0 %v44391_v37 }
 0x34b   : > { %37966 = vmatpush3.bf16.msra.mxu1 %v44384_v30 }
 0x34c   : > { %37968 = vmatprep.subr.bf16.mxu1 %v44402_v60 }
 0x34d   : > { %38398 = vmatpush3.bf16.msra.mxu0 %v44391_v37 }
 0x34e   : > { %38400 = vmatprep.subr.bf16.mxu0 %v44409_v57 }
 0x34f   : > { %37970 = vmatpush3.bf16.msra.mxu1 %v44402_v60 }
 0x350   : > { %37972 = vmatprep.subr.bf16.mxu1 %v44420_v28 }
 0x351   : > { %38402 = vmatpush3.bf16.msra.mxu0 %v44409_v57 }
 0x352   : > { %38404 = vmatprep.subr.bf16.mxu0 %v44427_v63 }
 0x353   : > { %37974 = vmatpush3.bf16.msra.mxu1 %v44420_v28 }
 0x354   : > { %37976 = vmatprep.subr.bf16.mxu1 %v44436_v19 }
 0x355   : > { %38406 = vmatpush3.bf16.msra.mxu0 %v44427_v63 }
 0x356   : > { %38408 = vmatprep.subr.bf16.mxu0 %v44443_v62 }
 0x357   : > { %37978 = vmatpush3.bf16.msra.mxu1 %v44436_v19 }
 0x358   : > { %37980 = vmatprep.subr.bf16.mxu1 %v44452_v58 }
 0x359   : > { %38410 = vmatpush3.bf16.msra.mxu0 %v44443_v62 }
 0x35a   : > { %38412 = vmatprep.subr.bf16.mxu0 %v44459_v20 }
 0x35b   : > { %37982 = vmatpush3.bf16.msra.mxu1 %v44452_v58 }
 0x35c   : > { %37984 = vmatprep.subr.bf16.mxu1 %v43860_v7 }
 0x35d   : > { %38414 = vmatpush3.bf16.msra.mxu0 %v44459_v20 }
 0x35e   : > { %38416 = vmatprep.subr.bf16.mxu0 %v43878_v23  ;;  %32110 = vmatmul.mubr.f32.vlgmr.msra.gmra.mrb[2].mxu1 %v50085_v8 }
 0x35f   : > { %37986 = vmatpush3.bf16.msra.mxu1 %v43860_v7  ;;  %32136 = vmatprep.mubr.f32.mxu1 %v42553_v25  ;;  %v44490_v25 = vsub.f32 %v9338_v41, %v44483_v44 }
 0x360   : > { %32596 = vmatmul.mubr.f32.vlgmr.msra.gmra.mrb[0].mxu0 %v43634_v56  ;;  %37988 = vmatprep.subr.bf16.mxu1 %v43892_v22 }
 0x361   : > { %38418 = vmatpush3.bf16.msra.mxu0 %v43878_v23  ;;  %32622 = vmatprep.mubr.f32.mxu0 %v43595_v6  ;;  %v44497_v16 = vand.u32 4294901760, %v44490_v25 }
 0x362   : > { %38420 = vmatprep.subr.bf16.mxu0 %v43900_v1 }
 0x363   : > { %37990 = vmatpush3.bf16.msra.mxu1 %v43892_v22  ;;  %50214 = vst [vmem:[#allocation41_spill] sm:$0xff] %v44497_v16  ;;  %v9423_v24 = vsub.f32 %v44490_v25, %v44497_v16 }
 0x364   : > { %37992 = vmatprep.subr.bf16.mxu1 %v50183_v32 }
 0x365   : > { %38422 = vmatpush3.bf16.msra.mxu0 %v43900_v1  ;;  %v44511_v53 = vand.u32 4294901760, %v9423_v24 }
 0x366   : > { %38424 = vmatprep.subr.bf16.mxu0 %v50184_v21 }
 0x367   : > { %37994 = vmatpush3.bf16.msra.mxu1 %v50183_v32  ;;  %50215 = vst [vmem:[#allocation43_spill] sm:$0xff] %v44511_v53 }
 0x368   : > { %37996 = vmatprep.subr.bf16.mxu1 %v50185_v36 }
 0x369   : > { %38426 = vmatpush3.bf16.msra.mxu0 %v50184_v21 }
 0x36a   : > { %38428 = vmatprep.subr.bf16.mxu0 %v50186_v2 }
 0x36b   : > { %37998 = vmatpush3.bf16.msra.mxu1 %v50185_v36 }
 0x36c   : > { %38000 = vmatprep.subr.bf16.mxu1 %v44003_v34 }
 0x36d   : > { %38430 = vmatpush3.bf16.msra.mxu0 %v50186_v2 }
 0x36e   : > { %38432 = vmatprep.subr.bf16.mxu0 %v50187_v4 }
 0x36f   : > { %38002 = vmatpush3.bf16.msra.mxu1 %v44003_v34 }
 0x370   : > { %38004 = vmatprep.subr.bf16.mxu1 %v44037_v42 }
 0x371   : > { %38434 = vmatpush3.bf16.msra.mxu0 %v50187_v4 }
 0x372   : > { %38436 = vmatprep.subr.bf16.mxu0 %v44043_v59 }
 0x373   : > { %38006 = vmatpush3.bf16.msra.mxu1 %v44037_v42 }
 0x374   : > { %38152 = vmatprep.subr.bf16.mxu1 %v43860_v7 }
 0x375   : > { %38438 = vmatpush3.bf16.msra.mxu0 %v44043_v59 }
 0x376   : > { %38584 = vmatprep.subr.bf16.mxu0 %v43878_v23  ;;  %32137 = vmatmul.mubr.f32.vlgmr.msra.gmra.mrb[2].mxu1 %v50085_v8  ;;  %v44522_v8 = vand.u32 4294901760, %v9341_v47 }
 0x377   : > { %38154 = vmatpush3.bf16.msra.mxu1 %v43860_v7  ;;  %32325 = vmatprep.mubr.f32.mxu1 %v50216_v12 }
 0x378   : > { %32623 = vmatmul.mubr.f32.vlgmr.msra.gmra.mrb[0].mxu0 %v43634_v56  ;;  %38156 = vmatprep.subr.bf16.mxu1 %v43892_v22  ;;  %v44529_v48 = vsub.f32 %v9341_v47, %v44522_v8  ;;  %v44793_v47 = vld [vmem:[%s49497_s1 + $0x2e8] sm:$0xff] }
 0x379   : > { %38586 = vmatpush3.bf16.msra.mxu0 %v43878_v23  ;;  %32811 = vmatprep.mubr.f32.mxu0 %v44511_v53 }
 0x37a   : > { %38588 = vmatprep.subr.bf16.mxu0 %v43900_v1  ;;  %50217 = vst [vmem:[#allocation45_spill] sm:$0xff] %v44529_v48  ;;  %v44536_v51 = vand.u32 4294901760, %v44529_v48 }
 0x37b   : > { %38158 = vmatpush3.bf16.msra.mxu1 %v43892_v22 }
 0x37c   : > { %38160 = vmatprep.subr.bf16.mxu1 %v50183_v32  ;;  %50218 = vst [vmem:[#allocation47_spill] sm:$0xff] %v44536_v51  ;;  %v9433_v49 = vsub.f32 %v44529_v48, %v44536_v51 }
 0x37d   : > { %38590 = vmatpush3.bf16.msra.mxu0 %v43900_v1 }
 0x37e   : > { %38592 = vmatprep.subr.bf16.mxu0 %v50184_v21  ;;  %v44548_v61 = vand.u32 4294901760, %v9433_v49 }
 0x37f   : > { %38162 = vmatpush3.bf16.msra.mxu1 %v50183_v32 }
 0x380   : > { %38164 = vmatprep.subr.bf16.mxu1 %v50185_v36 }
 0x381   : > { %38594 = vmatpush3.bf16.msra.mxu0 %v50184_v21 }
 0x382   : > { %38596 = vmatprep.subr.bf16.mxu0 %v50186_v2 }
 0x383   : > { %38166 = vmatpush3.bf16.msra.mxu1 %v50185_v36 }
 0x384   : > { %38168 = vmatprep.subr.bf16.mxu1 %v44003_v34 }
 0x385   : > { %38598 = vmatpush3.bf16.msra.mxu0 %v50186_v2 }
 0x386   : > { %38600 = vmatprep.subr.bf16.mxu0 %v50187_v4 }
 0x387   : > { %38170 = vmatpush3.bf16.msra.mxu1 %v44003_v34 }
 0x388   : > { %38172 = vmatprep.subr.bf16.mxu1 %v44037_v42 }
 0x389   : > { %38602 = vmatpush3.bf16.msra.mxu0 %v50187_v4 }
 0x38a   : > { %38604 = vmatprep.subr.bf16.mxu0 %v44043_v59 }
 0x38b   : > { %38174 = vmatpush3.bf16.msra.mxu1 %v44037_v42 }
 0x38c   : > { %38176 = vmatprep.subr.bf16.mxu1 %v44128_v5 }
 0x38d   : > { %38606 = vmatpush3.bf16.msra.mxu0 %v44043_v59 }
 0x38e   : > { %38608 = vmatprep.subr.bf16.mxu0 %v44130_v54  ;;  %32326 = vmatmul.mubr.f32.vlgmr.msra.gmra.mrb[4].mxu1 %v43660_v0 }
 0x38f   : > { %38178 = vmatpush3.bf16.msra.mxu1 %v44128_v5  ;;  %32352 = vmatprep.mubr.f32.mxu1 %v43595_v6  ;;  %v50221_v5 = vld [vmem:[#allocation53_spill] sm:$0xff] }
 0x390   : > { %32812 = vmatmul.mubr.f32.vlgmr.msra.gmra.mrb[2].mxu0 %v44548_v61  ;;  %38180 = vmatprep.subr.bf16.mxu1 %v44139_v45 }
 0x391   : > { %38610 = vmatpush3.bf16.msra.mxu0 %v44130_v54  ;;  %32838 = vmatprep.mubr.f32.mxu0 %v44483_v44  ;;  %v50222_v54 = vld [vmem:[#allocation54_spill] sm:$0xff] }
 0x392   : > { %38612 = vmatprep.subr.bf16.mxu0 %v50219_v38 }
 0x393   : > { %38182 = vmatpush3.bf16.msra.mxu1 %v44139_v45  ;;  %v50220_v45 = vld [vmem:[#allocation52_spill] sm:$0xff] }
 0x394   : > { %38184 = vmatprep.subr.bf16.mxu1 %v44194_v9 }
 0x395   : > { %38614 = vmatpush3.bf16.msra.mxu0 %v50219_v38 }
 0x396   : > { %38616 = vmatprep.subr.bf16.mxu0 %v44198_v18 }
 0x397   : > { %38186 = vmatpush3.bf16.msra.mxu1 %v44194_v9  ;;  %v50223_v9 = vld [vmem:[#allocation20_spill] sm:$0xff] }
 0x398   : > { %38188 = vmatprep.subr.bf16.mxu1 %v44222_v46 }
 0x399   : > { %38618 = vmatpush3.bf16.msra.mxu0 %v44198_v18  ;;  %v50224_v18 = vld [vmem:[#allocation18_spill] sm:$0xff] }
 0x39a   : > { %38620 = vmatprep.subr.bf16.mxu0 %v44226_v39 }
 0x39b   : > { %38190 = vmatpush3.bf16.msra.mxu1 %v44222_v46  ;;  %v50225_v46 = vld [vmem:[#allocation38_spill] sm:$0xff] }
 0x39c   : > { %38192 = vmatprep.subr.bf16.mxu1 %v44244_v27 }
 0x39d   : > { %38622 = vmatpush3.bf16.msra.mxu0 %v44226_v39  ;;  %v50226_v39 = vld [vmem:[#allocation24_spill] sm:$0xff] }
 0x39e   : > { %38624 = vmatprep.subr.bf16.mxu0 %v44247_v50 }
 0x39f   : > { %38194 = vmatpush3.bf16.msra.mxu1 %v44244_v27  ;;  %v50227_v27 = vld [vmem:[#allocation34_spill] sm:$0xff] }
 0x3a0   : > { %38196 = vmatprep.subr.bf16.mxu1 %v44252_v40 }
 0x3a1   : > { %38626 = vmatpush3.bf16.msra.mxu0 %v44247_v50  ;;  %v50228_v50 = vld [vmem:[#allocation12_spill] sm:$0xff] }
 0x3a2   : > { %38628 = vmatprep.subr.bf16.mxu0 %v44255_v14 }
 0x3a3   : > { %38198 = vmatpush3.bf16.msra.mxu1 %v44252_v40 }
 0x3a4   : > { %38200 = vmatprep.subr.bf16.mxu1 %v44262_v55 }
 0x3a5   : > { %38630 = vmatpush3.bf16.msra.mxu0 %v44255_v14 }
 0x3a6   : > { %38632 = vmatprep.subr.bf16.mxu0 %v44267_v3  ;;  %32353 = vmatmul.mubr.f32.vlgmr.msra.gmra.mrb[4].mxu1 %v43634_v56 }
 0x3a7   : > { %38202 = vmatpush3.bf16.msra.mxu1 %v44262_v55  ;;  %32379 = vmatprep.mubr.f32.mxu1 %v43602_v33 }
 0x3a8   : > { %32839 = vmatmul.mubr.f32.vlgmr.msra.gmra.mrb[2].mxu0 %v44522_v8  ;;  %38204 = vmatprep.subr.bf16.mxu1 %v44274_v13 }
 0x3a9   : > { %38634 = vmatpush3.bf16.msra.mxu0 %v44267_v3  ;;  %32865 = vmatprep.mubr.f32.mxu0 %v44490_v25 }
 0x3aa   : > { %38636 = vmatprep.subr.bf16.mxu0 %v44279_v35 }
 0x3ab   : > { %38206 = vmatpush3.bf16.msra.mxu1 %v44274_v13  ;;  %v27375_v13 = vld [vmem:[%s49497_s1 + $0x2b0] sm:$0xff] }
 0x3ac   : > { %38208 = vmatprep.subr.bf16.mxu1 %v44288_v10 }
 0x3ad   : > { %38638 = vmatpush3.bf16.msra.mxu0 %v44279_v35  ;;  %v27389_v35 = vld [vmem:[%s49497_s1 + $0x310] sm:$0xff] }
 0x3ae   : > { %38640 = vmatprep.subr.bf16.mxu0 %v50220_v45 }
 0x3af   : > { %38210 = vmatpush3.bf16.msra.mxu1 %v44288_v10  ;;  %v44718_v10 = vld [vmem:[%s49497_s1 + $0x318] sm:$0xff] }
 0x3b0   : > { %38212 = vmatprep.subr.bf16.mxu1 %v50221_v5 }
 0x3b1   : > { %38642 = vmatpush3.bf16.msra.mxu0 %v50220_v45 }
 0x3b2   : > { %38644 = vmatprep.subr.bf16.mxu0 %v50222_v54 }
 0x3b3   : > { %38214 = vmatpush3.bf16.msra.mxu1 %v50221_v5  ;;  %v49775_v5 = vand.u32 4294901760, %v44785_v11 }
 0x3b4   : > { %38216 = vmatprep.subr.bf16.mxu1 %v50223_v9 }
 0x3b5   : > { %38646 = vmatpush3.bf16.msra.mxu0 %v50222_v54  ;;  %v44824_v54 = vld [vmem:[%s49497_s1 + $0x340] sm:$0xff] }
 0x3b6   : > { %38648 = vmatprep.subr.bf16.mxu0 %v50224_v18 }
 0x3b7   : > { %38218 = vmatpush3.bf16.msra.mxu1 %v50223_v9  ;;  %v44829_v9 = vld [vmem:[%s49497_s1 + $0x348] sm:$0xff] }
 0x3b8   : > { %38220 = vmatprep.subr.bf16.mxu1 %v50225_v46 }
 0x3b9   : > { %38650 = vmatpush3.bf16.msra.mxu0 %v50224_v18  ;;  %v44834_v18 = vld [vmem:[%s49497_s1 + $0x2f0] sm:$0xff] }
 0x3ba   : > { %38652 = vmatprep.subr.bf16.mxu0 %v50226_v39 }
 0x3bb   : > { %38222 = vmatpush3.bf16.msra.mxu1 %v50225_v46 }
 0x3bc   : > { %38224 = vmatprep.subr.bf16.mxu1 %v43860_v7 }
 0x3bd   : > { %38654 = vmatpush3.bf16.msra.mxu0 %v50226_v39  ;;  %v49782_v39 = vand.u32 4294901760, %v44824_v54 }
 0x3be   : > { %38656 = vmatprep.subr.bf16.mxu0 %v43878_v23  ;;  %32380 = vmatmul.mubr.f32.vlgmr.msra.gmra.mrb[4].mxu1 %v50227_v27 }
 0x3bf   : > { %38226 = vmatpush3.bf16.msra.mxu1 %v43860_v7  ;;  %32406 = vmatprep.mubr.f32.mxu1 %v50228_v50 }
 0x3c0   : > { %32866 = vmatmul.mubr.f32.vlgmr.msra.gmra.mrb[2].mxu0 %v44529_v48  ;;  %38228 = vmatprep.subr.bf16.mxu1 %v43892_v22 }
 0x3c1   : > { %38658 = vmatpush3.bf16.msra.mxu0 %v43878_v23  ;;  %32892 = vmatprep.mubr.f32.mxu0 %v44497_v16 }
 0x3c2   : > { %38660 = vmatprep.subr.bf16.mxu0 %v43900_v1 }
 0x3c3   : > { %38230 = vmatpush3.bf16.msra.mxu1 %v43892_v22 }
 0x3c4   : > { %38232 = vmatprep.subr.bf16.mxu1 %v50183_v32 }
 0x3c5   : > { %38662 = vmatpush3.bf16.msra.mxu0 %v43900_v1 }
 0x3c6   : > { %38664 = vmatprep.subr.bf16.mxu0 %v50184_v21 }
 0x3c7   : > { %38234 = vmatpush3.bf16.msra.mxu1 %v50183_v32 }
 0x3c8   : > { %38236 = vmatprep.subr.bf16.mxu1 %v50185_v36 }
 0x3c9   : > { %38666 = vmatpush3.bf16.msra.mxu0 %v50184_v21 }
 0x3ca   : > { %38668 = vmatprep.subr.bf16.mxu0 %v50186_v2 }
 0x3cb   : > { %38238 = vmatpush3.bf16.msra.mxu1 %v50185_v36 }
 0x3cc   : > { %38240 = vmatprep.subr.bf16.mxu1 %v44003_v34 }
 0x3cd   : > { %38670 = vmatpush3.bf16.msra.mxu0 %v50186_v2 }
 0x3ce   : > { %38672 = vmatprep.subr.bf16.mxu0 %v50187_v4 }
 0x3cf   : > { %38242 = vmatpush3.bf16.msra.mxu1 %v44003_v34 }
 0x3d0   : > { %38244 = vmatprep.subr.bf16.mxu1 %v44037_v42 }
 0x3d1   : > { %38674 = vmatpush3.bf16.msra.mxu0 %v50187_v4 }
 0x3d2   : > { %38676 = vmatprep.subr.bf16.mxu0 %v44043_v59 }
 0x3d3   : > { %38246 = vmatpush3.bf16.msra.mxu1 %v44037_v42 }
 0x3d4   : > { %38248 = vmatprep.subr.bf16.mxu1 %v44368_v43 }
 0x3d5   : > { %38678 = vmatpush3.bf16.msra.mxu0 %v44043_v59 }
 0x3d6   : > { %38680 = vmatprep.subr.bf16.mxu0 %v44375_v26  ;;  %32407 = vmatmul.mubr.f32.vlgmr.msra.gmra.mrb[4].mxu1 %v50197_v17 }
 0x3d7   : > { %38250 = vmatpush3.bf16.msra.mxu1 %v44368_v43  ;;  %32433 = vmatprep.mubr.f32.mxu1 %v43595_v6  ;;  %v44728_v43 = vld [vmem:[%s49497_s1 + $0x2c8] sm:$0xff] }
 0x3d8   : > { %32893 = vmatmul.mubr.f32.vlgmr.msra.gmra.mrb[2].mxu0 %v44536_v51  ;;  %38252 = vmatprep.subr.bf16.mxu1 %v44384_v30  ;;  %v49774_v31 = vand.u32 4294901760, %v44728_v43 }
 0x3d9   : > { %38682 = vmatpush3.bf16.msra.mxu0 %v44375_v26  ;;  %32919 = vmatprep.mubr.f32.mxu0 %v44483_v44  ;;  %v44723_v26 = vld [vmem:[%s49497_s1 + $0x2c0] sm:$0xff] }
 0x3da   : > { %38684 = vmatprep.subr.bf16.mxu0 %v44391_v37 }
 0x3db   : > { %38254 = vmatpush3.bf16.msra.mxu1 %v44384_v30  ;;  %v8706_v30 = vand.u32 4294901760, %v27375_v13 }
 0x3dc   : > { %38256 = vmatprep.subr.bf16.mxu1 %v44402_v60 }
 0x3dd   : > { %38686 = vmatpush3.bf16.msra.mxu0 %v44391_v37 }
 0x3de   : > { %38688 = vmatprep.subr.bf16.mxu0 %v44409_v57 }
 0x3df   : > { %38258 = vmatpush3.bf16.msra.mxu1 %v44402_v60  ;;  %v44753_v60 = vld [vmem:[%s49497_s1 + $0x2d8] sm:$0xff] }
 0x3e0   : > { %38260 = vmatprep.subr.bf16.mxu1 %v44420_v28 }
 0x3e1   : > { %38690 = vmatpush3.bf16.msra.mxu0 %v44409_v57  ;;  %v44758_v57 = vld [vmem:[%s49497_s1 + $0x330] sm:$0xff] }
 0x3e2   : > { %38692 = vmatprep.subr.bf16.mxu0 %v44427_v63  ;;  %v49769_v29 = vand.u32 4294901760, %v44758_v57 }
 0x3e3   : > { %38262 = vmatpush3.bf16.msra.mxu1 %v44420_v28 }
 0x3e4   : > { %38264 = vmatprep.subr.bf16.mxu1 %v44436_v19 }
 0x3e5   : > { %38694 = vmatpush3.bf16.msra.mxu0 %v44427_v63  ;;  %v10644_v63 = vand.u32 4294901760, %v27389_v35 }
 0x3e6   : > { %38696 = vmatprep.subr.bf16.mxu0 %v44443_v62 }
 0x3e7   : > { %38266 = vmatpush3.bf16.msra.mxu1 %v44436_v19  ;;  %v10647_v19 = vand.u32 4294901760, %v44718_v10 }
 0x3e8   : > { %38268 = vmatprep.subr.bf16.mxu1 %v44452_v58 }
 0x3e9   : > { %38698 = vmatpush3.bf16.msra.mxu0 %v44443_v62  ;;  %v8712_v62 = vand.u32 4294901760, %v44723_v26 }
 0x3ea   : > { %38700 = vmatprep.subr.bf16.mxu0 %v44459_v20 }
 0x3eb   : > { %38270 = vmatpush3.bf16.msra.mxu1 %v44452_v58 }
 0x3ec   : > { %38272 = vmatprep.subr.bf16.mxu1 %v43860_v7 }
 0x3ed   : > { %38702 = vmatpush3.bf16.msra.mxu0 %v44459_v20  ;;  %v49770_v20 = vand.u32 4294901760, %v44753_v60 }
 0x3ee   : > { %38704 = vmatprep.subr.bf16.mxu0 %v43878_v23  ;;  %32434 = vmatmul.mubr.f32.vlgmr.msra.gmra.mrb[4].mxu1 %v43634_v56 }
 0x3ef   : > { %38274 = vmatpush3.bf16.msra.mxu1 %v43860_v7  ;;  %32460 = vmatprep.mubr.f32.mxu1 %v43595_v6  ;;  %v27373_v7 = vld [vmem:[%s49497_s1 + $0x2a0] sm:$0xff] }
 0x3f0   : > { %32920 = vmatmul.mubr.f32.vlgmr.msra.gmra.mrb[2].mxu0 %v44522_v8  ;;  %38276 = vmatprep.subr.bf16.mxu1 %v43892_v22  ;;  %v8700_v40 = vand.u32 4294901760, %v27373_v7 }
 0x3f1   : > { %38706 = vmatpush3.bf16.msra.mxu0 %v43878_v23  ;;  %32946 = vmatprep.mubr.f32.mxu0 %v44483_v44  ;;  %v44687_v23 = vld [vmem:[%s49497_s1 + $0x2a8] sm:$0xff] }
 0x3f2   : > { %38708 = vmatprep.subr.bf16.mxu0 %v43900_v1  ;;  %v8703_v14 = vand.u32 4294901760, %v44687_v23  ;;  %v44836_v46 = vsub.f32 %v27373_v7, %v8700_v40  ;;  %v44854_v7 = vld [vmem:[%s49497_s1 + $0x358] sm:$0xff] }
 0x3f3   : > { %38278 = vmatpush3.bf16.msra.mxu1 %v43892_v22  ;;  %v44692_v22 = vld [vmem:[%s49497_s1 + $0x300] sm:$0xff] }
 0x3f4   : > { %38280 = vmatprep.subr.bf16.mxu1 %v50183_v32  ;;  %v10638_v55 = vand.u32 4294901760, %v44692_v22 }
 0x3f5   : > { %38710 = vmatpush3.bf16.msra.mxu0 %v43900_v1  ;;  %v44697_v1 = vld [vmem:[%s49497_s1 + $0x308] sm:$0xff] }
 0x3f6   : > { %38712 = vmatprep.subr.bf16.mxu0 %v50184_v21  ;;  %v10641_v3 = vand.u32 4294901760, %v44697_v1 }
 0x3f7   : > { %38282 = vmatpush3.bf16.msra.mxu1 %v50183_v32  ;;  %v44739_v32 = vld [vmem:[%s49497_s1 + $0x328] sm:$0xff] }
 0x3f8   : > { %38284 = vmatprep.subr.bf16.mxu1 %v50185_v36  ;;  %v44766_v28 = vpack.c.bf16 %v10641_v3, %v10638_v55  ;;  %v49772_v15 = vand.u32 4294901760, %v44739_v32 }
 0x3f9   : > { %38714 = vmatpush3.bf16.msra.mxu0 %v50184_v21  ;;  %v44744_v21 = vld [vmem:[%s49497_s1 + $0x2d0] sm:$0xff] }
 0x3fa   : > { %38716 = vmatprep.subr.bf16.mxu0 %v50186_v2  ;;  %v49771_v52 = vand.u32 4294901760, %v44744_v21 }
 0x3fb   : > { %38286 = vmatpush3.bf16.msra.mxu1 %v50185_v36  ;;  %v27376_v36 = vld [vmem:[%s49497_s1 + $0x2b8] sm:$0xff] }
 0x3fc   : > { %38288 = vmatprep.subr.bf16.mxu1 %v44003_v34  ;;  %v8709_v37 = vand.u32 4294901760, %v27376_v36  ;;  %v44812_v38 = vpack.c.bf16 %v49770_v20, %v49771_v52  ;;  %v44860_v20 = vsub.f32 %v44692_v22, %v10638_v55  ;;  %v44863_v52 = vsub.f32 %v44697_v1, %v10641_v3 }
 0x3fd   : > { %38718 = vmatpush3.bf16.msra.mxu0 %v50186_v2  ;;  %v44734_v2 = vld [vmem:[%s49497_s1 + $0x320] sm:$0xff]  ;;  %v49779_v22 = vand.u32 4294901760, %v44834_v18  ;;  %v44878_v1 = vsub.f32 %v44718_v10, %v10647_v19  ;;  %v49777_v55 = vand.u32 4294901760, %v44854_v7  ;;  %v44901_v3 = vsub.f32 %v44723_v26, %v8712_v62 }
 0x3fe   : > { %38720 = vmatprep.subr.bf16.mxu0 %v50187_v4  ;;  %v49773_v58 = vand.u32 4294901760, %v44734_v2  ;;  %v44780_v24 = vpack.c.bf16 %v8709_v37, %v8706_v30  ;;  %50231 = vst [vmem:[#allocation61_spill] sm:$0xff] %v44812_v38 }
 0x3ff   : > { %38290 = vmatpush3.bf16.msra.mxu1 %v44003_v34  ;;  %v44748_v34 = vpack.c.bf16 %v8703_v14, %v8700_v40  ;;  %v44857_v40 = vsub.f32 %v44687_v23, %v8703_v14  ;;  %v49780_v23 = vand.u32 4294901760, %v44829_v9 }
 0x400   : > { %38292 = vmatprep.subr.bf16.mxu1 %v44037_v42  ;;  %v44804_v49 = vpack.c.bf16 %v49772_v15, %v49773_v58  ;;  %v44867_v15 = vsub.f32 %v27375_v13, %v8706_v30  ;;  %v44869_v58 = vsub.f32 %v27376_v36, %v8709_v37  ;;  %v50233_v13 = vand.u32 4294901760, %v44793_v47 }
 0x401   : > { %38722 = vmatpush3.bf16.msra.mxu0 %v50187_v4  ;;  %v44763_v4 = vld [vmem:[%s49497_s1 + $0x338] sm:$0xff]  ;;  %v50235_v30 = vand.u32 4294901760, %v44728_v43 }
 0x402   : > { %38724 = vmatprep.subr.bf16.mxu0 %v44043_v59  ;;  %v49768_v41 = vand.u32 4294901760, %v44763_v4  ;;  %50230 = vst [vmem:[#allocation21_spill] sm:$0xff] %v44804_v49  ;;  %v44891_v36 = vpack.c.bf16 %v50233_v13, %v49775_v5  ;;  %v49787_v37 = vand.u32 4294901760, %v44867_v15  ;;  %v44907_v13 = vpack.c.bf16 %v49780_v23, %v49782_v39 }
 0x403   : > { %38294 = vmatpush3.bf16.msra.mxu1 %v44037_v42  ;;  %v44788_v42 = vpack.c.bf16 %v10647_v19, %v10644_v63  ;;  %v49791_v5 = vand.u32 4294901760, %v44878_v1  ;;  %v44913_v10 = vsub.f32 %v44728_v43, %v50235_v30  ;;  %v50237_v43 = vand.u32 4294901760, %v44836_v46 }
 0x404   : > { %38440 = vmatprep.subr.bf16.mxu1 %v44748_v34  ;;  %v44818_v45 = vpack.c.bf16 %v49768_v41, %v49769_v29  ;;  %v44844_v41 = vld [vmem:[%s49497_s1 + $0x2f8] sm:$0xff]  ;;  %v44849_v29 = vld [vmem:[%s49497_s1 + $0x350] sm:$0xff]  ;;  %50234 = vst [vmem:[#allocation58_spill] sm:$0xff] %v44907_v13 }
 0x405   : > { %38726 = vmatpush3.bf16.msra.mxu0 %v44043_v59  ;;  %v44798_v59 = vpack.c.bf16 %v49774_v31, %v8712_v62  ;;  %v44871_v31 = vsub.f32 %v27389_v35, %v10644_v63  ;;  %v49778_v14 = vand.u32 4294901760, %v44849_v29  ;;  %v49781_v35 = vand.u32 4294901760, %v44857_v40 }
 0x406   : > { %38872 = vmatprep.subr.bf16.mxu0 %v44766_v28  ;;  %32461 = vmatmul.mubr.f32.vlgmr.msra.gmra.mrb[4].mxu1 %v43634_v56  ;;  %50232 = vst [vmem:[#allocation27_spill] sm:$0xff] %v44818_v45  ;;  %v50236_v63 = vand.u32 4294901760, %v44734_v2  ;;  %v8800_v30 = vsub.f32 %v44836_v46, %v50237_v43 }
 0x407   : > { %50229 = vst [vmem:[#allocation49_spill] sm:$0xff] %v44798_v59  ;;  %38442 = vmatpush3.bf16.msra.mxu1 %v44748_v34  ;;  %32649 = vmatprep.mubr.f32.mxu1 %v50216_v12  ;;  %v49776_v12 = vand.u32 4294901760, %v44844_v41  ;;  %v44931_v62 = vpack.c.bf16 %v49777_v55, %v49778_v14  ;;  %v50239_v55 = vand.u32 4294901760, %v44860_v20 }
 0x408   : > { %32947 = vmatmul.mubr.f32.vlgmr.msra.gmra.mrb[2].mxu0 %v44522_v8  ;;  %38444 = vmatprep.subr.bf16.mxu1 %v44780_v24  ;;  %v44918_v19 = vsub.f32 %v44734_v2, %v50236_v63  ;;  %v50238_v2 = vand.u32 4294901760, %v44739_v32 }
 0x409   : > { %38874 = vmatpush3.bf16.msra.mxu0 %v44766_v28  ;;  %33135 = vmatprep.mubr.f32.mxu0 %v44511_v53  ;;  %v44925_v26 = vpack.c.bf16 %v49776_v12, %v49779_v22  ;;  %v8807_v12 = vsub.f32 %v44857_v40, %v49781_v35  ;;  %v10738_v14 = vsub.f32 %v44860_v20, %v50239_v55  ;;  %v50240_v22 = vand.u32 4294901760, %v44863_v52 }
 0x40a   : > { %38876 = vmatprep.subr.bf16.mxu0 %v44788_v42  ;;  %v44939_v63 = vsub.f32 %v44739_v32, %v50238_v2  ;;  %v8814_v32 = vsub.f32 %v44867_v15, %v49787_v37  ;;  %v50241_v2 = vand.u32 4294901760, %v44869_v58  ;;  %v50242_v35 = vand.u32 4294901760, %v44871_v31 }
 0x40b   : > { %38446 = vmatpush3.bf16.msra.mxu1 %v44780_v24  ;;  %v10745_v43 = vsub.f32 %v44863_v52, %v50240_v22  ;;  %v10759_v22 = vsub.f32 %v44878_v1, %v49791_v5  ;;  %v50243_v37 = vand.u32 4294901760, %v44744_v21  ;;  %v50244_v55 = vand.u32 4294901760, %v44753_v60 }
 0x40c   : > { %38448 = vmatprep.subr.bf16.mxu1 %v44798_v59  ;;  %v8821_v23 = vsub.f32 %v44869_v58, %v50241_v2  ;;  %v10752_v39 = vsub.f32 %v44871_v31, %v50242_v35  ;;  %v8801_v2 = vand.u32 4294901760, %v8800_v30  ;;  %v50245_v5 = vand.u32 4294901760, %v44758_v57 }
 0x40d   : > { %38878 = vmatpush3.bf16.msra.mxu0 %v44788_v42  ;;  %v44971_v17 = vsub.f32 %v44744_v21, %v50243_v37  ;;  %v8808_v21 = vand.u32 4294901760, %v8807_v12  ;;  %v10739_v37 = vand.u32 4294901760, %v10738_v14  ;;  %v10746_v51 = vand.u32 4294901760, %v10745_v43 }
 0x40e   : > { %38880 = vmatprep.subr.bf16.mxu0 %v44804_v49  ;;  %v44983_v53 = vsub.f32 %v44758_v57, %v50245_v5  ;;  %v50246_v30 = vand.u32 4294901760, %v44763_v4  ;;  %v50247_v57 = vand.u32 4294901760, %v44901_v3  ;;  %v50249_v14 = vand.u32 4294901760, %v44918_v19 }
 0x40f   : > { %38450 = vmatpush3.bf16.msra.mxu1 %v44798_v59  ;;  %v50248_v59 = vand.u32 4294901760, %v44913_v10 }
 0x410   : > { %38452 = vmatprep.subr.bf16.mxu1 %v44812_v38  ;;  %v44990_v35 = vsub.f32 %v44763_v4, %v50246_v30  ;;  %v8828_v5 = vsub.f32 %v44901_v3, %v50247_v57  ;;  %v10766_v43 = vsub.f32 %v44918_v19, %v50249_v14  ;;  %v50251_v30 = vand.u32 4294901760, %v44785_v11 }
 0x411   : > { %38882 = vmatpush3.bf16.msra.mxu0 %v44804_v49  ;;  %v44978_v49 = vsub.f32 %v44753_v60, %v50244_v55  ;;  %v8815_v60 = vand.u32 4294901760, %v8814_v32  ;;  %v8822_v55 = vand.u32 4294901760, %v8821_v23  ;;  %v8835_v12 = vsub.f32 %v44913_v10, %v50248_v59 }
 0x412   : > { %38884 = vmatprep.subr.bf16.mxu0 %v44818_v45  ;;  %v50250_v23 = vand.u32 4294901760, %v44939_v63  ;;  %v45012_v59 = vsub.f32 %v44785_v11, %v50251_v30  ;;  %v45016_v57 = vpack.c.bf16 %v8808_v21, %v8801_v2  ;;  %v45018_v14 = vpack.c.bf16 %v10746_v51, %v10739_v37 }
 0x413   : > { %38454 = vmatpush3.bf16.msra.mxu1 %v44812_v38  ;;  %v10753_v38 = vand.u32 4294901760, %v10752_v39  ;;  %v49800_v4 = vand.u32 4294901760, %v44990_v35  ;;  %v8829_v11 = vand.u32 4294901760, %v8828_v5  ;;  %v50253_v30 = vand.u32 4294901760, %v44824_v54 }
 0x414   : > { %38456 = vmatprep.subr.bf16.mxu1 %v44891_v36  ;;  %v10773_v39 = vsub.f32 %v44939_v63, %v50250_v23  ;;  %v50252_v23 = vand.u32 4294901760, %v44793_v47  ;;  %v50254_v51 = vand.u32 4294901760, %v44829_v9  ;;  %v8836_v37 = vand.u32 4294901760, %v8835_v12 }
 0x415   : > { %38886 = vmatpush3.bf16.msra.mxu0 %v44818_v45  ;;  %v10760_v45 = vand.u32 4294901760, %v10759_v22  ;;  %v45027_v22 = vpack.c.bf16 %v8822_v55, %v8815_v60  ;;  %v50257_v5 = vand.u32 4294901760, %v44978_v49 }
 0x416   : > { %38888 = vmatprep.subr.bf16.mxu0 %v44907_v13  ;;  %v45024_v32 = vsub.f32 %v44793_v47, %v50252_v23  ;;  %v45037_v2 = vsub.f32 %v44829_v9, %v50254_v51  ;;  %v10767_v47 = vand.u32 4294901760, %v10766_v43  ;;  %v50256_v23 = vand.u32 4294901760, %v44971_v17 }
 0x417   : > { %38458 = vmatpush3.bf16.msra.mxu1 %v44891_v36  ;;  %v45039_v21 = vpack.c.bf16 %v10760_v45, %v10753_v38  ;;  %v10774_v55 = vand.u32 4294901760, %v10773_v39  ;;  %v10787_v45 = vsub.f32 %v44990_v35, %v49800_v4  ;;  %v50259_v43 = vand.u32 4294901760, %v44834_v18 }
 0x418   : > { %38460 = vmatprep.subr.bf16.mxu1 %v44925_v26  ;;  %v8842_v60 = vsub.f32 %v44971_v17, %v50256_v23  ;;  %v50260_v51 = vand.u32 4294901760, %v44844_v41  ;;  %v50261_v4 = vand.u32 4294901760, %v44849_v29  ;;  %v50262_v38 = vand.u32 4294901760, %v44854_v7 }
 0x419   : > { %38890 = vmatpush3.bf16.msra.mxu0 %v44907_v13  ;;  %v45032_v13 = vsub.f32 %v44824_v54, %v50253_v30  ;;  %50255 = vst [vmem:[#allocation29_spill] sm:$0xff] %v45039_v21  ;;  %v8849_v54 = vsub.f32 %v44978_v49, %v50257_v5  ;;  %v50258_v30 = vand.u32 4294901760, %v44983_v53  ;;  %v45061_v39 = vsub.f32 %v44834_v18, %v50259_v43 }
 0x41a   : > { %38892 = vmatprep.subr.bf16.mxu0 %v44931_v62  ;;  %v45066_v23 = vsub.f32 %v44844_v41, %v50260_v51  ;;  %v45074_v12 = vsub.f32 %v44849_v29, %v50261_v4  ;;  %v45079_v18 = vsub.f32 %v44854_v7, %v50262_v38  ;;  %v45082_v41 = vpack.c.bf16 %v8836_v37, %v8829_v11 }
 0x41b   : > { %38462 = vmatpush3.bf16.msra.mxu1 %v44925_v26  ;;  %v10780_v9 = vsub.f32 %v44983_v53, %v50258_v30  ;;  %v8843_v43 = vand.u32 4294901760, %v8842_v60  ;;  %v45086_v51 = vpack.c.bf16 %v10774_v55, %v10767_v47  ;;  %v8850_v30 = vand.u32 4294901760, %v8849_v54 }
 0x41c   : > { %38464 = vmatprep.subr.bf16.mxu1 %v45016_v57  ;;  %v50263_v29 = vand.u32 4294901760, %v45012_v59  ;;  %v50264_v7 = vand.u32 4294901760, %v45024_v32  ;;  %v49804_v37 = vand.u32 4294901760, %v45061_v39  ;;  %v49803_v47 = vand.u32 4294901760, %v45066_v23 }
 0x41d   : > { %38894 = vmatpush3.bf16.msra.mxu0 %v44931_v62  ;;  %v10781_v5 = vand.u32 4294901760, %v10780_v9  ;;  %v50265_v60 = vand.u32 4294901760, %v45032_v13  ;;  %v50266_v54 = vand.u32 4294901760, %v45037_v2 }
 0x41e   : > { %38896 = vmatprep.subr.bf16.mxu0 %v45018_v14  ;;  %32650 = vmatmul.mubr.f32.vlgmr.msra.gmra.mrb[2].mxu1 %v43660_v0  ;;  %v8856_v4 = vsub.f32 %v45012_v59, %v50263_v29  ;;  %v10788_v0 = vand.u32 4294901760, %v10787_v45  ;;  %v8863_v11 = vsub.f32 %v45024_v32, %v50264_v7  ;;  %v45110_v29 = vpack.c.bf16 %v8850_v30, %v8843_v43 }
 0x41f   : > { %38466 = vmatpush3.bf16.msra.mxu1 %v45016_v57  ;;  %v10794_v55 = vsub.f32 %v45032_v13, %v50265_v60  ;;  %v10801_v9 = vsub.f32 %v45037_v2, %v50266_v54  ;;  %32676 = vmatprep.mubr.f32.mxu1 %v43595_v6  ;;  %v8870_v45 = vsub.f32 %v45061_v39, %v49804_v37 }
 0x420   : > { %33136 = vmatmul.mubr.f32.vlgmr.msra.gmra.mrb[0].mxu0 %v44548_v61  ;;  %38468 = vmatprep.subr.bf16.mxu1 %v45027_v22  ;;  %v8857_v7 = vand.u32 4294901760, %v8856_v4  ;;  %v45114_v60 = vpack.c.bf16 %v10788_v0, %v10781_v5  ;;  %v8864_v54 = vand.u32 4294901760, %v8863_v11  ;;  %v8877_v38 = vsub.f32 %v45066_v23, %v49803_v47 }
 0x421   : > { %38898 = vmatpush3.bf16.msra.mxu0 %v45018_v14  ;;  %33162 = vmatprep.mubr.f32.mxu0 %v44483_v44  ;;  %v10795_v30 = vand.u32 4294901760, %v10794_v55  ;;  %v10802_v43 = vand.u32 4294901760, %v10801_v9  ;;  %v50267_v4 = vand.u32 4294901760, %v45074_v12  ;;  %v50268_v5 = vand.u32 4294901760, %v45079_v18 }
 0x422   : > { %38900 = vmatprep.subr.bf16.mxu0 %v45039_v21  ;;  %v45132_v11 = vpack.c.bf16 %v8864_v54, %v8857_v7  ;;  %v8871_v47 = vand.u32 4294901760, %v8870_v45  ;;  %v8878_v37 = vand.u32 4294901760, %v8877_v38  ;;  %v45167_v38 = vpack.c.bf16 %v44878_v1, %v44871_v31 }
 0x423   : > { %38470 = vmatpush3.bf16.msra.mxu1 %v45027_v22  ;;  %v10815_v0 = vsub.f32 %v45079_v18, %v50268_v5  ;;  %v45135_v55 = vpack.c.bf16 %v10802_v43, %v10795_v30  ;;  %v45176_v45 = vpack.c.bf16 %v44913_v10, %v44901_v3  ;;  %v45181_v54 = vpack.c.bf16 %v44939_v63, %v44918_v19 }
 0x424   : > { %38472 = vmatprep.subr.bf16.mxu1 %v45082_v41  ;;  %v45140_v5 = vpack.c.bf16 %v8878_v37, %v8871_v47  ;;  %v45155_v37 = vpack.c.bf16 %v44863_v52, %v44860_v20  ;;  %v45162_v47 = vpack.c.bf16 %v44869_v58, %v44867_v15  ;;  %v45190_v30 = vpack.c.bf16 %v44978_v49, %v44971_v17 }
 0x425   : > { %38902 = vmatpush3.bf16.msra.mxu0 %v45039_v21  ;;  %v10808_v21 = vsub.f32 %v45074_v12, %v50267_v4  ;;  %v10816_v4 = vand.u32 4294901760, %v10815_v0  ;;  %50269 = vst [vmem:[#allocation31_spill] sm:$0xff] %v45181_v54  ;;  %v45195_v43 = vpack.c.bf16 %v44990_v35, %v44983_v53  ;;  %v45207_v0 = vpack.c.bf16 %v45037_v2, %v45032_v13 }
 0x426   : > { %38904 = vmatprep.subr.bf16.mxu0 %v45086_v51  ;;  %50270 = vst [vmem:[#allocation33_spill] sm:$0xff] %v45190_v30 }
 0x427   : > { %38474 = vmatpush3.bf16.msra.mxu1 %v45082_v41  ;;  %v10809_v9 = vand.u32 4294901760, %v10808_v21  ;;  %v45150_v21 = vpack.c.bf16 %v44857_v40, %v44836_v46  ;;  %50271 = vst [vmem:[#allocation35_spill] sm:$0xff] %v45195_v43  ;;  %50273 = vst [vmem:[#allocation59_spill] sm:$0xff] %v45207_v0 }
 0x428   : > { %38476 = vmatprep.subr.bf16.mxu1 %v45110_v29 }
 0x429   : > { %38906 = vmatpush3.bf16.msra.mxu0 %v45086_v51  ;;  %v45143_v7 = vpack.c.bf16 %v10816_v4, %v10809_v9  ;;  %v45214_v9 = vpack.c.bf16 %v45066_v23, %v45061_v39  ;;  %v45219_v4 = vpack.c.bf16 %v45079_v18, %v45074_v12 }
 0x42a   : > { %38908 = vmatprep.subr.bf16.mxu0 %v45114_v60 }
 0x42b   : > { %38478 = vmatpush3.bf16.msra.mxu1 %v45110_v29  ;;  %50274 = vst [vmem:[#allocation9_spill] sm:$0xff] %v45214_v9  ;;  %50275 = vst [vmem:[#allocation11_spill] sm:$0xff] %v45219_v4 }
 0x42c   : > { %38480 = vmatprep.subr.bf16.mxu1 %v45132_v11 }
 0x42d   : > { %38910 = vmatpush3.bf16.msra.mxu0 %v45114_v60 }
 0x42e   : > { %38912 = vmatprep.subr.bf16.mxu0 %v45135_v55 }
 0x42f   : > { %38482 = vmatpush3.bf16.msra.mxu1 %v45132_v11 }
 0x430   : > { %38484 = vmatprep.subr.bf16.mxu1 %v45140_v5 }
 0x431   : > { %38914 = vmatpush3.bf16.msra.mxu0 %v45135_v55 }
 0x432   : > { %38916 = vmatprep.subr.bf16.mxu0 %v45143_v7 }
 0x433   : > { %38486 = vmatpush3.bf16.msra.mxu1 %v45140_v5 }
 0x434   : > { %38488 = vmatprep.subr.bf16.mxu1 %v45150_v21 }
 0x435   : > { %38918 = vmatpush3.bf16.msra.mxu0 %v45143_v7 }
 0x436   : > { %38920 = vmatprep.subr.bf16.mxu0 %v45155_v37  ;;  %32677 = vmatmul.mubr.f32.vlgmr.msra.gmra.mrb[2].mxu1 %v43634_v56 }
 0x437   : > { %38490 = vmatpush3.bf16.msra.mxu1 %v45150_v21  ;;  %32703 = vmatprep.mubr.f32.mxu1 %v43602_v33  ;;  %v45202_v33 = vpack.c.bf16 %v45024_v32, %v45012_v59 }
 0x438   : > { %33163 = vmatmul.mubr.f32.vlgmr.msra.gmra.mrb[0].mxu0 %v44522_v8  ;;  %38492 = vmatprep.subr.bf16.mxu1 %v45162_v47 }
 0x439   : > { %38922 = vmatpush3.bf16.msra.mxu0 %v45155_v37  ;;  %33189 = vmatprep.mubr.f32.mxu0 %v44490_v25  ;;  %50272 = vst [vmem:[#allocation62_spill] sm:$0xff] %v45202_v33 }
 0x43a   : > { %38924 = vmatprep.subr.bf16.mxu0 %v45167_v38 }
 0x43b   : > { %38494 = vmatpush3.bf16.msra.mxu1 %v45162_v47 }
 0x43c   : > { %38496 = vmatprep.subr.bf16.mxu1 %v45176_v45 }
 0x43d   : > { %38926 = vmatpush3.bf16.msra.mxu0 %v45167_v38 }
 0x43e   : > { %38928 = vmatprep.subr.bf16.mxu0 %v45181_v54 }
 0x43f   : > { %38498 = vmatpush3.bf16.msra.mxu1 %v45176_v45 }
 0x440   : > { %38500 = vmatprep.subr.bf16.mxu1 %v45190_v30 }
 0x441   : > { %38930 = vmatpush3.bf16.msra.mxu0 %v45181_v54 }
 0x442   : > { %38932 = vmatprep.subr.bf16.mxu0 %v45195_v43 }
 0x443   : > { %38502 = vmatpush3.bf16.msra.mxu1 %v45190_v30  ;;  %v50284_v30 = vand.u32 4294901760, %v44863_v52  ;;  %v50288_v52 = vand.u32 4294901760, %v44878_v1  ;;  %v50294_v1 = vand.u32 4294901760, %v44939_v63  ;;  %v50298_v63 = vand.u32 4294901760, %v44990_v35 }
 0x444   : > { %38504 = vmatprep.subr.bf16.mxu1 %v45202_v33  ;;  %v50302_v35 = vand.u32 4294901760, %v45037_v2  ;;  %v50306_v2 = vand.u32 4294901760, %v45079_v18 }
 0x445   : > { %38934 = vmatpush3.bf16.msra.mxu0 %v45195_v43  ;;  %v50283_v43 = vand.u32 4294901760, %v44860_v20  ;;  %v50287_v20 = vand.u32 4294901760, %v44871_v31  ;;  %v50293_v31 = vand.u32 4294901760, %v44918_v19  ;;  %v50297_v19 = vand.u32 4294901760, %v44983_v53 }
 0x446   : > { %38936 = vmatprep.subr.bf16.mxu0 %v45207_v0  ;;  %v50301_v53 = vand.u32 4294901760, %v45032_v13  ;;  %v50305_v13 = vand.u32 4294901760, %v45074_v12  ;;  %v27411_v12 = vld [vmem:[%s41839_s17 + $0x5] ss:$2 sm:$0xff] }
 0x447   : > { %38506 = vmatpush3.bf16.msra.mxu1 %v45202_v33  ;;  %v45263_v54 = vpack.c.bf16 %v50284_v30, %v50283_v43  ;;  %v45279_v30 = vpack.c.bf16 %v50288_v52, %v50287_v20  ;;  %v50289_v43 = vld [vmem:[#allocation36_spill] sm:$0xff]  ;;  %v45315_v52 = vpack.c.bf16 %v50298_v63, %v50297_v19  ;;  %v50307_v63 = vld [vmem:[#allocation43_spill] sm:$0xff] }
 0x448   : > { %38508 = vmatprep.subr.bf16.mxu1 %v45214_v9 }
 0x449   : > { %38938 = vmatpush3.bf16.msra.mxu0 %v45207_v0  ;;  %v50282_v0 = vand.u32 4294901760, %v44857_v40  ;;  %v50286_v40 = vand.u32 4294901760, %v44869_v58  ;;  %v50291_v58 = vand.u32 4294901760, %v44901_v3  ;;  %v50295_v3 = vand.u32 4294901760, %v44971_v17 }
 0x44a   : > { %38940 = vmatprep.subr.bf16.mxu0 %v45219_v4  ;;  %v50299_v17 = vand.u32 4294901760, %v45012_v59  ;;  %v50303_v59 = vand.u32 4294901760, %v45061_v39  ;;  %v11910_v39 = vsel %vm388_vm0, %v27411_v12, 0 }
 0x44b   : > { %38510 = vmatpush3.bf16.msra.mxu1 %v45214_v9  ;;  %v50279_v9 = vld [vmem:[#allocation27_spill] sm:$0xff] }
 0x44c   : > { %38512 = vmatprep.subr.bf16.mxu1 %v44748_v34 }
 0x44d   : > { %38942 = vmatpush3.bf16.msra.mxu0 %v45219_v4  ;;  %v50276_v4 = vld [vmem:[#allocation49_spill] sm:$0xff] }
 0x44e   : > { %38944 = vmatprep.subr.bf16.mxu0 %v44766_v28  ;;  %32704 = vmatmul.mubr.f32.vlgmr.msra.gmra.mrb[2].mxu1 %v50227_v27  ;;  %v50277_v27 = vld [vmem:[#allocation21_spill] sm:$0xff] }
 0x44f   : > { %38514 = vmatpush3.bf16.msra.mxu1 %v44748_v34  ;;  %32730 = vmatprep.mubr.f32.mxu1 %v50228_v50  ;;  %v50280_v50 = vld [vmem:[#allocation58_spill] sm:$0xff] }
 0x450   : > { %33190 = vmatmul.mubr.f32.vlgmr.msra.gmra.mrb[0].mxu0 %v44529_v48  ;;  %38516 = vmatprep.subr.bf16.mxu1 %v44780_v24  ;;  %v50278_v48 = vld [vmem:[#allocation61_spill] sm:$0xff] }
 0x451   : > { %38946 = vmatpush3.bf16.msra.mxu0 %v44766_v28  ;;  %33216 = vmatprep.mubr.f32.mxu0 %v44497_v16  ;;  %v50281_v16 = vand.u32 4294901760, %v44836_v46  ;;  %v50285_v46 = vand.u32 4294901760, %v44867_v15  ;;  %v50292_v15 = vand.u32 4294901760, %v44913_v10  ;;  %v50296_v10 = vand.u32 4294901760, %v44978_v49 }
 0x452   : > { %38948 = vmatprep.subr.bf16.mxu0 %v44788_v42  ;;  %v50300_v49 = vand.u32 4294901760, %v45024_v32  ;;  %v50304_v32 = vand.u32 4294901760, %v45066_v23  ;;  %v45371_v23 = vand.u32 4294901760, %v11910_v39 }
 0x453   : > { %38518 = vmatpush3.bf16.msra.mxu1 %v44780_v24  ;;  %v45256_v33 = vpack.c.bf16 %v50282_v0, %v50281_v16  ;;  %v45272_v16 = vpack.c.bf16 %v50286_v40, %v50285_v46  ;;  %v50290_v0 = vld [vmem:[#allocation47_spill] sm:$0xff]  ;;  %v45290_v46 = vpack.c.bf16 %v50292_v15, %v50291_v58  ;;  %v45297_v40 = vpack.c.bf16 %v50294_v1, %v50293_v31 }
 0x454   : > { %38520 = vmatprep.subr.bf16.mxu1 %v50276_v4  ;;  %v45308_v20 = vpack.c.bf16 %v50296_v10, %v50295_v3  ;;  %v45331_v58 = vpack.c.bf16 %v50302_v35, %v50301_v53  ;;  %v45340_v15 = vpack.c.bf16 %v50304_v32, %v50303_v59  ;;  %v45347_v31 = vpack.c.bf16 %v50306_v2, %v50305_v13  ;;  %v27412_v3 = vld [vmem:[%s41839_s17 + $0x15] ss:$2 sm:$0x3f]  ;;  %v50308_v59 = vld [vmem:[#allocation29_spill] sm:$0xff] }
 0x455   : > { %38950 = vmatpush3.bf16.msra.mxu0 %v44788_v42  ;;  %v11913_v19 = vsel %vm388_vm0, %v27412_v3, 0  ;;  %v27410_v13 = vld [vmem:[%s49497_s1 + $0x3b8] sm:$0xff] }
 0x456   : > { %38952 = vmatprep.subr.bf16.mxu0 %v50277_v27 }
 0x457   : > { %38522 = vmatpush3.bf16.msra.mxu1 %v50276_v4 }
 0x458   : > { %38524 = vmatprep.subr.bf16.mxu1 %v50278_v48 }
 0x459   : > { %38954 = vmatpush3.bf16.msra.mxu0 %v50277_v27 }
 0x45a   : > { %38956 = vmatprep.subr.bf16.mxu0 %v50279_v9 }
 0x45b   : > { %38526 = vmatpush3.bf16.msra.mxu1 %v50278_v48 }
 0x45c   : > { %38528 = vmatprep.subr.bf16.mxu1 %v44891_v36 }
 0x45d   : > { %38958 = vmatpush3.bf16.msra.mxu0 %v50279_v9 }
 0x45e   : > { %38960 = vmatprep.subr.bf16.mxu0 %v50280_v50 }
 0x45f   : > { %38530 = vmatpush3.bf16.msra.mxu1 %v44891_v36 }
 0x460   : > { %38532 = vmatprep.subr.bf16.mxu1 %v44925_v26 }
 0x461   : > { %38962 = vmatpush3.bf16.msra.mxu0 %v50280_v50 }
 0x462   : > { %38964 = vmatprep.subr.bf16.mxu0 %v44931_v62 }
 0x463   : > { %38534 = vmatpush3.bf16.msra.mxu1 %v44925_v26 }
 0x464   : > { %38536 = vmatprep.subr.bf16.mxu1 %v45256_v33 }
 0x465   : > { %38966 = vmatpush3.bf16.msra.mxu0 %v44931_v62 }
 0x466   : > { %38968 = vmatprep.subr.bf16.mxu0 %v45263_v54  ;;  %32731 = vmatmul.mubr.f32.vlgmr.msra.gmra.mrb[2].mxu1 %v50289_v43  ;;  %v45324_v43 = vpack.c.bf16 %v50300_v49, %v50299_v17 }
 0x467   : > { %38538 = vmatpush3.bf16.msra.mxu1 %v45256_v33  ;;  %32757 = vmatprep.mubr.f32.mxu1 %v43595_v6 }
 0x468   : > { %33217 = vmatmul.mubr.f32.vlgmr.msra.gmra.mrb[0].mxu0 %v50290_v0  ;;  %38540 = vmatprep.subr.bf16.mxu1 %v45272_v16 }
 0x469   : > { %38970 = vmatpush3.bf16.msra.mxu0 %v45263_v54  ;;  %33243 = vmatprep.mubr.f32.mxu0 %v44483_v44 }
 0x46a   : > { %38972 = vmatprep.subr.bf16.mxu0 %v45279_v30 }
 0x46b   : > { %38542 = vmatpush3.bf16.msra.mxu1 %v45272_v16 }
 0x46c   : > { %38544 = vmatprep.subr.bf16.mxu1 %v45290_v46 }
 0x46d   : > { %38974 = vmatpush3.bf16.msra.mxu0 %v45279_v30 }
 0x46e   : > { %38976 = vmatprep.subr.bf16.mxu0 %v45297_v40 }
 0x46f   : > { %38546 = vmatpush3.bf16.msra.mxu1 %v45290_v46 }
 0x470   : > { %38548 = vmatprep.subr.bf16.mxu1 %v45308_v20 }
 0x471   : > { %38978 = vmatpush3.bf16.msra.mxu0 %v45297_v40 }
 0x472   : > { %38980 = vmatprep.subr.bf16.mxu0 %v45315_v52 }
 0x473   : > { %38550 = vmatpush3.bf16.msra.mxu1 %v45308_v20 }
 0x474   : > { %38552 = vmatprep.subr.bf16.mxu1 %v45324_v43 }
 0x475   : > { %38982 = vmatpush3.bf16.msra.mxu0 %v45315_v52 }
 0x476   : > { %38984 = vmatprep.subr.bf16.mxu0 %v45331_v58 }
 0x477   : > { %38554 = vmatpush3.bf16.msra.mxu1 %v45324_v43 }
 0x478   : > { %38556 = vmatprep.subr.bf16.mxu1 %v45340_v15 }
 0x479   : > { %38986 = vmatpush3.bf16.msra.mxu0 %v45331_v58 }
 0x47a   : > { %38988 = vmatprep.subr.bf16.mxu0 %v45347_v31 }
 0x47b   : > { %38558 = vmatpush3.bf16.msra.mxu1 %v45340_v15 }
 0x47c   : > { %38560 = vmatprep.subr.bf16.mxu1 %v44748_v34 }
 0x47d   : > { %38990 = vmatpush3.bf16.msra.mxu0 %v45347_v31 }
 0x47e   : > { %38992 = vmatprep.subr.bf16.mxu0 %v44766_v28  ;;  %32758 = vmatmul.mubr.f32.vlgmr.msra.gmra.mrb[2].mxu1 %v43634_v56 }
 0x47f   : > { %38562 = vmatpush3.bf16.msra.mxu1 %v44748_v34  ;;  %32784 = vmatprep.mubr.f32.mxu1 %v43595_v6  ;;  %v45378_v6 = vsub.f32 %v11910_v39, %v45371_v23 }
 0x480   : > { %33244 = vmatmul.mubr.f32.vlgmr.msra.gmra.mrb[0].mxu0 %v44522_v8  ;;  %38564 = vmatprep.subr.bf16.mxu1 %v44780_v24 }
 0x481   : > { %38994 = vmatpush3.bf16.msra.mxu0 %v44766_v28  ;;  %33270 = vmatprep.mubr.f32.mxu0 %v44483_v44  ;;  %v45385_v18 = vand.u32 4294901760, %v45378_v6 }
 0x482   : > { %38996 = vmatprep.subr.bf16.mxu0 %v44788_v42 }
 0x483   : > { %38566 = vmatpush3.bf16.msra.mxu1 %v44780_v24  ;;  %v11995_v1 = vsub.f32 %v45378_v6, %v45385_v18 }
 0x484   : > { %38568 = vmatprep.subr.bf16.mxu1 %v50276_v4 }
 0x485   : > { %38998 = vmatpush3.bf16.msra.mxu0 %v44788_v42  ;;  %v45399_v10 = vand.u32 4294901760, %v11995_v1 }
 0x486   : > { %39000 = vmatprep.subr.bf16.mxu0 %v50277_v27 }
 0x487   : > { %38570 = vmatpush3.bf16.msra.mxu1 %v50276_v4 }
 0x488   : > { %38572 = vmatprep.subr.bf16.mxu1 %v50278_v48 }
 0x489   : > { %39002 = vmatpush3.bf16.msra.mxu0 %v50277_v27 }
 0x48a   : > { %39004 = vmatprep.subr.bf16.mxu0 %v50279_v9 }
 0x48b   : > { %38574 = vmatpush3.bf16.msra.mxu1 %v50278_v48 }
 0x48c   : > { %38576 = vmatprep.subr.bf16.mxu1 %v44891_v36 }
 0x48d   : > { %39006 = vmatpush3.bf16.msra.mxu0 %v50279_v9 }
 0x48e   : > { %39008 = vmatprep.subr.bf16.mxu0 %v50280_v50 }
 0x48f   : > { %38578 = vmatpush3.bf16.msra.mxu1 %v44891_v36 }
 0x490   : > { %38580 = vmatprep.subr.bf16.mxu1 %v44925_v26 }
 0x491   : > { %39010 = vmatpush3.bf16.msra.mxu0 %v50280_v50 }
 0x492   : > { %39012 = vmatprep.subr.bf16.mxu0 %v44931_v62 }
 0x493   : > { %38582 = vmatpush3.bf16.msra.mxu1 %v44925_v26 }
 0x494   : > { %38728 = vmatprep.subr.bf16.mxu1 %v44748_v34 }
 0x495   : > { %39014 = vmatpush3.bf16.msra.mxu0 %v44931_v62 }
 0x496   : > { %39160 = vmatprep.subr.bf16.mxu0 %v44766_v28  ;;  %32785 = vmatmul.mubr.f32.vlgmr.msra.gmra.mrb[2].mxu1 %v43634_v56  ;;  %v45410_v56 = vand.u32 4294901760, %v11913_v19 }
 0x497   : > { %38730 = vmatpush3.bf16.msra.mxu1 %v44748_v34  ;;  %32973 = vmatprep.mubr.f32.mxu1 %v50307_v63 }
 0x498   : > { %33271 = vmatmul.mubr.f32.vlgmr.msra.gmra.mrb[0].mxu0 %v44522_v8  ;;  %38732 = vmatprep.subr.bf16.mxu1 %v44780_v24  ;;  %v45417_v17 = vsub.f32 %v11913_v19, %v45410_v56  ;;  %v11305_v19 = vand.u32 4294901760, %v27410_v13 }
 0x499   : > { %39162 = vmatpush3.bf16.msra.mxu0 %v44766_v28  ;;  %33459 = vmatprep.mubr.f32.mxu0 %v45399_v10 }
 0x49a   : > { %39164 = vmatprep.subr.bf16.mxu0 %v44788_v42  ;;  %v45424_v49 = vand.u32 4294901760, %v45417_v17 }
 0x49b   : > { %38734 = vmatpush3.bf16.msra.mxu1 %v44780_v24 }
 0x49c   : > { %38736 = vmatprep.subr.bf16.mxu1 %v50276_v4  ;;  %v12005_v53 = vsub.f32 %v45417_v17, %v45424_v49 }
 0x49d   : > { %39166 = vmatpush3.bf16.msra.mxu0 %v44788_v42 }
 0x49e   : > { %39168 = vmatprep.subr.bf16.mxu0 %v50277_v27  ;;  %v45436_v35 = vand.u32 4294901760, %v12005_v53 }
 0x49f   : > { %38738 = vmatpush3.bf16.msra.mxu1 %v50276_v4 }
 0x4a0   : > { %38740 = vmatprep.subr.bf16.mxu1 %v50278_v48 }
 0x4a1   : > { %39170 = vmatpush3.bf16.msra.mxu0 %v50277_v27 }
 0x4a2   : > { %39172 = vmatprep.subr.bf16.mxu0 %v50279_v9 }
 0x4a3   : > { %38742 = vmatpush3.bf16.msra.mxu1 %v50278_v48 }
 0x4a4   : > { %38744 = vmatprep.subr.bf16.mxu1 %v44891_v36 }
 0x4a5   : > { %39174 = vmatpush3.bf16.msra.mxu0 %v50279_v9 }
 0x4a6   : > { %39176 = vmatprep.subr.bf16.mxu0 %v50280_v50 }
 0x4a7   : > { %38746 = vmatpush3.bf16.msra.mxu1 %v44891_v36 }
 0x4a8   : > { %38748 = vmatprep.subr.bf16.mxu1 %v44925_v26 }
 0x4a9   : > { %39178 = vmatpush3.bf16.msra.mxu0 %v50280_v50 }
 0x4aa   : > { %39180 = vmatprep.subr.bf16.mxu0 %v44931_v62 }
 0x4ab   : > { %38750 = vmatpush3.bf16.msra.mxu1 %v44925_v26 }
 0x4ac   : > { %38752 = vmatprep.subr.bf16.mxu1 %v45016_v57 }
 0x4ad   : > { %39182 = vmatpush3.bf16.msra.mxu0 %v44931_v62 }
 0x4ae   : > { %39184 = vmatprep.subr.bf16.mxu0 %v45018_v14  ;;  %32974 = vmatmul.mubr.f32.vlgmr.msra.gmra.mrb[4].mxu1 %v44548_v61 }
 0x4af   : > { %38754 = vmatpush3.bf16.msra.mxu1 %v45016_v57  ;;  %33000 = vmatprep.mubr.f32.mxu1 %v44483_v44  ;;  %v50310_v57 = vld [vmem:[#allocation33_spill] sm:$0xff] }
 0x4b0   : > { %33460 = vmatmul.mubr.f32.vlgmr.msra.gmra.mrb[2].mxu0 %v45436_v35  ;;  %38756 = vmatprep.subr.bf16.mxu1 %v45027_v22 }
 0x4b1   : > { %39186 = vmatpush3.bf16.msra.mxu0 %v45018_v14  ;;  %33486 = vmatprep.mubr.f32.mxu0 %v45371_v23  ;;  %v50311_v14 = vld [vmem:[#allocation35_spill] sm:$0xff] }
 0x4b2   : > { %39188 = vmatprep.subr.bf16.mxu0 %v50308_v59 }
 0x4b3   : > { %38758 = vmatpush3.bf16.msra.mxu1 %v45027_v22  ;;  %v50309_v22 = vld [vmem:[#allocation31_spill] sm:$0xff] }
 0x4b4   : > { %38760 = vmatprep.subr.bf16.mxu1 %v45082_v41 }
 0x4b5   : > { %39190 = vmatpush3.bf16.msra.mxu0 %v50308_v59 }
 0x4b6   : > { %39192 = vmatprep.subr.bf16.mxu0 %v45086_v51 }
 0x4b7   : > { %38762 = vmatpush3.bf16.msra.mxu1 %v45082_v41  ;;  %v50312_v41 = vld [vmem:[#allocation62_spill] sm:$0xff] }
 0x4b8   : > { %38764 = vmatprep.subr.bf16.mxu1 %v45110_v29 }
 0x4b9   : > { %39194 = vmatpush3.bf16.msra.mxu0 %v45086_v51  ;;  %v50313_v51 = vld [vmem:[#allocation59_spill] sm:$0xff] }
 0x4ba   : > { %39196 = vmatprep.subr.bf16.mxu0 %v45114_v60 }
 0x4bb   : > { %38766 = vmatpush3.bf16.msra.mxu1 %v45110_v29  ;;  %v50314_v29 = vld [vmem:[#allocation9_spill] sm:$0xff] }
 0x4bc   : > { %38768 = vmatprep.subr.bf16.mxu1 %v45132_v11 }
 0x4bd   : > { %39198 = vmatpush3.bf16.msra.mxu0 %v45114_v60  ;;  %v50315_v60 = vld [vmem:[#allocation11_spill] sm:$0xff] }
 0x4be   : > { %39200 = vmatprep.subr.bf16.mxu0 %v45135_v55 }
 0x4bf   : > { %38770 = vmatpush3.bf16.msra.mxu1 %v45132_v11  ;;  %v50316_v11 = vld [vmem:[#allocation45_spill] sm:$0xff] }
 0x4c0   : > { %38772 = vmatprep.subr.bf16.mxu1 %v45140_v5 }
 0x4c1   : > { %39202 = vmatpush3.bf16.msra.mxu0 %v45135_v55  ;;  %v50317_v55 = vld [vmem:[#allocation41_spill] sm:$0xff] }
 0x4c2   : > { %39204 = vmatprep.subr.bf16.mxu0 %v45143_v7 }
 0x4c3   : > { %38774 = vmatpush3.bf16.msra.mxu1 %v45140_v5  ;;  %v27401_v5 = vld [vmem:[%s49497_s1 + $0x370] sm:$0xff] }
 0x4c4   : > { %38776 = vmatprep.subr.bf16.mxu1 %v45150_v21 }
 0x4c5   : > { %39206 = vmatpush3.bf16.msra.mxu0 %v45143_v7  ;;  %v27402_v7 = vld [vmem:[%s49497_s1 + $0x378] sm:$0xff] }
 0x4c6   : > { %39208 = vmatprep.subr.bf16.mxu0 %v45155_v37  ;;  %33001 = vmatmul.mubr.f32.vlgmr.msra.gmra.mrb[4].mxu1 %v44522_v8 }
 0x4c7   : > { %38778 = vmatpush3.bf16.msra.mxu1 %v45150_v21  ;;  %33027 = vmatprep.mubr.f32.mxu1 %v44490_v25  ;;  %v11278_v21 = vand.u32 4294901760, %v27401_v5 }
 0x4c8   : > { %33487 = vmatmul.mubr.f32.vlgmr.msra.gmra.mrb[2].mxu0 %v45410_v56  ;;  %38780 = vmatprep.subr.bf16.mxu1 %v45162_v47 }
 0x4c9   : > { %39210 = vmatpush3.bf16.msra.mxu0 %v45155_v37  ;;  %33513 = vmatprep.mubr.f32.mxu0 %v45378_v6  ;;  %v11281_v37 = vand.u32 4294901760, %v27402_v7 }
 0x4ca   : > { %39212 = vmatprep.subr.bf16.mxu0 %v45167_v38 }
 0x4cb   : > { %38782 = vmatpush3.bf16.msra.mxu1 %v45162_v47  ;;  %v27403_v47 = vld [vmem:[%s49497_s1 + $0x380] sm:$0xff] }
 0x4cc   : > { %38784 = vmatprep.subr.bf16.mxu1 %v45176_v45 }
 0x4cd   : > { %39214 = vmatpush3.bf16.msra.mxu0 %v45167_v38  ;;  %v27404_v38 = vld [vmem:[%s49497_s1 + $0x388] sm:$0xff] }
 0x4ce   : > { %39216 = vmatprep.subr.bf16.mxu0 %v50309_v22 }
 0x4cf   : > { %38786 = vmatpush3.bf16.msra.mxu1 %v45176_v45  ;;  %v11287_v45 = vand.u32 4294901760, %v27404_v38 }
 0x4d0   : > { %38788 = vmatprep.subr.bf16.mxu1 %v50310_v57 }
 0x4d1   : > { %39218 = vmatpush3.bf16.msra.mxu0 %v50309_v22  ;;  %v45648_v1 = vsub.f32 %v27404_v38, %v11287_v45 }
 0x4d2   : > { %39220 = vmatprep.subr.bf16.mxu0 %v50311_v14 }
 0x4d3   : > { %38790 = vmatpush3.bf16.msra.mxu1 %v50310_v57 }
 0x4d4   : > { %38792 = vmatprep.subr.bf16.mxu1 %v50312_v41 }
 0x4d5   : > { %39222 = vmatpush3.bf16.msra.mxu0 %v50311_v14  ;;  %v11406_v14 = vand.u32 4294901760, %v45648_v1 }
 0x4d6   : > { %39224 = vmatprep.subr.bf16.mxu0 %v50313_v51 }
 0x4d7   : > { %38794 = vmatpush3.bf16.msra.mxu1 %v50312_v41 }
 0x4d8   : > { %38796 = vmatprep.subr.bf16.mxu1 %v50314_v29 }
 0x4d9   : > { %39226 = vmatpush3.bf16.msra.mxu0 %v50313_v51 }
 0x4da   : > { %39228 = vmatprep.subr.bf16.mxu0 %v50315_v60 }
 0x4db   : > { %38798 = vmatpush3.bf16.msra.mxu1 %v50314_v29 }
 0x4dc   : > { %38800 = vmatprep.subr.bf16.mxu1 %v44748_v34 }
 0x4dd   : > { %39230 = vmatpush3.bf16.msra.mxu0 %v50315_v60 }
 0x4de   : > { %39232 = vmatprep.subr.bf16.mxu0 %v44766_v28  ;;  %33028 = vmatmul.mubr.f32.vlgmr.msra.gmra.mrb[4].mxu1 %v50316_v11 }
 0x4df   : > { %38802 = vmatpush3.bf16.msra.mxu1 %v44748_v34  ;;  %33054 = vmatprep.mubr.f32.mxu1 %v50317_v55 }
 0x4e0   : > { %33514 = vmatmul.mubr.f32.vlgmr.msra.gmra.mrb[2].mxu0 %v45417_v17  ;;  %38804 = vmatprep.subr.bf16.mxu1 %v44780_v24 }
 0x4e1   : > { %39234 = vmatpush3.bf16.msra.mxu0 %v44766_v28  ;;  %33540 = vmatprep.mubr.f32.mxu0 %v45385_v18 }
 0x4e2   : > { %39236 = vmatprep.subr.bf16.mxu0 %v44788_v42 }
 0x4e3   : > { %38806 = vmatpush3.bf16.msra.mxu1 %v44780_v24 }
 0x4e4   : > { %38808 = vmatprep.subr.bf16.mxu1 %v50276_v4 }
 0x4e5   : > { %39238 = vmatpush3.bf16.msra.mxu0 %v44788_v42 }
 0x4e6   : > { %39240 = vmatprep.subr.bf16.mxu0 %v50277_v27 }
 0x4e7   : > { %38810 = vmatpush3.bf16.msra.mxu1 %v50276_v4 }
 0x4e8   : > { %38812 = vmatprep.subr.bf16.mxu1 %v50278_v48 }
 0x4e9   : > { %39242 = vmatpush3.bf16.msra.mxu0 %v50277_v27 }
 0x4ea   : > { %39244 = vmatprep.subr.bf16.mxu0 %v50279_v9 }
 0x4eb   : > { %38814 = vmatpush3.bf16.msra.mxu1 %v50278_v48 }
 0x4ec   : > { %38816 = vmatprep.subr.bf16.mxu1 %v44891_v36 }
 0x4ed   : > { %39246 = vmatpush3.bf16.msra.mxu0 %v50279_v9 }
 0x4ee   : > { %39248 = vmatprep.subr.bf16.mxu0 %v50280_v50 }
 0x4ef   : > { %38818 = vmatpush3.bf16.msra.mxu1 %v44891_v36 }
 0x4f0   : > { %38820 = vmatprep.subr.bf16.mxu1 %v44925_v26 }
 0x4f1   : > { %39250 = vmatpush3.bf16.msra.mxu0 %v50280_v50 }
 0x4f2   : > { %39252 = vmatprep.subr.bf16.mxu0 %v44931_v62 }
 0x4f3   : > { %38822 = vmatpush3.bf16.msra.mxu1 %v44925_v26 }
 0x4f4   : > { %38824 = vmatprep.subr.bf16.mxu1 %v45256_v33 }
 0x4f5   : > { %39254 = vmatpush3.bf16.msra.mxu0 %v44931_v62 }
 0x4f6   : > { %39256 = vmatprep.subr.bf16.mxu0 %v45263_v54  ;;  %33055 = vmatmul.mubr.f32.vlgmr.msra.gmra.mrb[4].mxu1 %v50290_v0 }
 0x4f7   : > { %38826 = vmatpush3.bf16.msra.mxu1 %v45256_v33  ;;  %33081 = vmatprep.mubr.f32.mxu1 %v44483_v44  ;;  %v27405_v33 = vld [vmem:[%s49497_s1 + $0x390] sm:$0xff] }
 0x4f8   : > { %33541 = vmatmul.mubr.f32.vlgmr.msra.gmra.mrb[2].mxu0 %v45424_v49  ;;  %38828 = vmatprep.subr.bf16.mxu1 %v45272_v16 }
 0x4f9   : > { %39258 = vmatpush3.bf16.msra.mxu0 %v45263_v54  ;;  %33567 = vmatprep.mubr.f32.mxu0 %v45371_v23  ;;  %v45600_v54 = vpack.c.bf16 %v11281_v37, %v11278_v21 }
 0x4fa   : > { %39260 = vmatprep.subr.bf16.mxu0 %v45279_v30 }
 0x4fb   : > { %38830 = vmatpush3.bf16.msra.mxu1 %v45272_v16 }
 0x4fc   : > { %38832 = vmatprep.subr.bf16.mxu1 %v45290_v46 }
 0x4fd   : > { %39262 = vmatpush3.bf16.msra.mxu0 %v45279_v30 }
 0x4fe   : > { %39264 = vmatprep.subr.bf16.mxu0 %v45297_v40 }
 0x4ff   : > { %38834 = vmatpush3.bf16.msra.mxu1 %v45290_v46  ;;  %v45625_v46 = vsub.f32 %v27401_v5, %v11278_v21  ;;  %v11407_v5 = vsub.f32 %v45648_v1, %v11406_v14 }
 0x500   : > { %38836 = vmatprep.subr.bf16.mxu1 %v45308_v20 }
 0x501   : > { %39266 = vmatpush3.bf16.msra.mxu0 %v45297_v40  ;;  %v45627_v40 = vsub.f32 %v27402_v7, %v11281_v37  ;;  %v11385_v2 = vand.u32 4294901760, %v45625_v46 }
 0x502   : > { %39268 = vmatprep.subr.bf16.mxu0 %v45315_v52 }
 0x503   : > { %38838 = vmatpush3.bf16.msra.mxu1 %v45308_v20  ;;  %v11386_v59 = vsub.f32 %v45625_v46, %v11385_v2 }
 0x504   : > { %38840 = vmatprep.subr.bf16.mxu1 %v45324_v43 }
 0x505   : > { %39270 = vmatpush3.bf16.msra.mxu0 %v45315_v52 }
 0x506   : > { %39272 = vmatprep.subr.bf16.mxu0 %v45331_v58 }
 0x507   : > { %38842 = vmatpush3.bf16.msra.mxu1 %v45324_v43 }
 0x508   : > { %38844 = vmatprep.subr.bf16.mxu1 %v45340_v15 }
 0x509   : > { %39274 = vmatpush3.bf16.msra.mxu0 %v45331_v58 }
 0x50a   : > { %39276 = vmatprep.subr.bf16.mxu0 %v45347_v31 }
 0x50b   : > { %38846 = vmatpush3.bf16.msra.mxu1 %v45340_v15  ;;  %v27409_v15 = vld [vmem:[%s49497_s1 + $0x3b0] sm:$0xff] }
 0x50c   : > { %38848 = vmatprep.subr.bf16.mxu1 %v44748_v34  ;;  %v11302_v3 = vand.u32 4294901760, %v27409_v15 }
 0x50d   : > { %39278 = vmatpush3.bf16.msra.mxu0 %v45347_v31  ;;  %v11392_v31 = vand.u32 4294901760, %v45627_v40 }
 0x50e   : > { %39280 = vmatprep.subr.bf16.mxu0 %v44766_v28  ;;  %33082 = vmatmul.mubr.f32.vlgmr.msra.gmra.mrb[4].mxu1 %v44522_v8  ;;  %v45671_v29 = vpack.c.bf16 %v11305_v19, %v11302_v3 }
 0x50f   : > { %38850 = vmatpush3.bf16.msra.mxu1 %v44748_v34  ;;  %33108 = vmatprep.mubr.f32.mxu1 %v44483_v44  ;;  %v27399_v34 = vld [vmem:[%s49497_s1 + $0x360] sm:$0xff]  ;;  %v11393_v22 = vsub.f32 %v45627_v40, %v11392_v31 }
 0x510   : > { %33568 = vmatmul.mubr.f32.vlgmr.msra.gmra.mrb[2].mxu0 %v45410_v56  ;;  %38852 = vmatprep.subr.bf16.mxu1 %v44780_v24 }
 0x511   : > { %39282 = vmatpush3.bf16.msra.mxu0 %v44766_v28  ;;  %33594 = vmatprep.mubr.f32.mxu0 %v45371_v23  ;;  %v27400_v28 = vld [vmem:[%s49497_s1 + $0x368] sm:$0xff] }
 0x512   : > { %39284 = vmatprep.subr.bf16.mxu0 %v44788_v42 }
 0x513   : > { %38854 = vmatpush3.bf16.msra.mxu1 %v44780_v24  ;;  %v11272_v24 = vand.u32 4294901760, %v27399_v34 }
 0x514   : > { %38856 = vmatprep.subr.bf16.mxu1 %v50276_v4 }
 0x515   : > { %39286 = vmatpush3.bf16.msra.mxu0 %v44788_v42  ;;  %v11275_v42 = vand.u32 4294901760, %v27400_v28  ;;  %v45621_v16 = vsub.f32 %v27399_v34, %v11272_v24 }
 0x516   : > { %39288 = vmatprep.subr.bf16.mxu0 %v50277_v27 }
 0x517   : > { %38858 = vmatpush3.bf16.msra.mxu1 %v50276_v4  ;;  %v45623_v30 = vsub.f32 %v27400_v28, %v11275_v42  ;;  %v11371_v58 = vand.u32 4294901760, %v45621_v16  ;;  %v11387_v28 = vand.u32 4294901760, %v11386_v59 }
 0x518   : > { %38860 = vmatprep.subr.bf16.mxu1 %v50278_v48 }
 0x519   : > { %39290 = vmatpush3.bf16.msra.mxu0 %v50277_v27  ;;  %v27407_v27 = vld [vmem:[%s49497_s1 + $0x3a0] sm:$0xff]  ;;  %v11378_v32 = vand.u32 4294901760, %v45623_v30 }
 0x51a   : > { %39292 = vmatprep.subr.bf16.mxu0 %v50279_v9  ;;  %v11296_v20 = vand.u32 4294901760, %v27407_v27 }
 0x51b   : > { %38862 = vmatpush3.bf16.msra.mxu1 %v50278_v48  ;;  %v45588_v48 = vpack.c.bf16 %v11275_v42, %v11272_v24  ;;  %v11379_v53 = vsub.f32 %v45623_v30, %v11378_v32  ;;  %v11394_v24 = vand.u32 4294901760, %v11393_v22 }
 0x51c   : > { %38864 = vmatprep.subr.bf16.mxu1 %v44891_v36 }
 0x51d   : > { %39294 = vmatpush3.bf16.msra.mxu0 %v50279_v9  ;;  %v27406_v9 = vld [vmem:[%s49497_s1 + $0x398] sm:$0xff]  ;;  %v11380_v34 = vand.u32 4294901760, %v11379_v53 }
 0x51e   : > { %39296 = vmatprep.subr.bf16.mxu0 %v50280_v50  ;;  %v11293_v4 = vand.u32 4294901760, %v27406_v9 }
 0x51f   : > { %38866 = vmatpush3.bf16.msra.mxu1 %v44891_v36  ;;  %v11284_v36 = vand.u32 4294901760, %v27403_v47 }
 0x520   : > { %38868 = vmatprep.subr.bf16.mxu1 %v44925_v26  ;;  %v45668_v51 = vsub.f32 %v27406_v9, %v11293_v4 }
 0x521   : > { %39298 = vmatpush3.bf16.msra.mxu0 %v50280_v50  ;;  %v27408_v50 = vld [vmem:[%s49497_s1 + $0x3a8] sm:$0xff]  ;;  %v45646_v39 = vsub.f32 %v27403_v47, %v11284_v36  ;;  %v45685_v47 = vsub.f32 %v27407_v27, %v11296_v20 }
 0x522   : > { %39300 = vmatprep.subr.bf16.mxu0 %v44931_v62  ;;  %v11299_v52 = vand.u32 4294901760, %v27408_v50  ;;  %v11420_v21 = vand.u32 4294901760, %v45668_v51 }
 0x523   : > { %38870 = vmatpush3.bf16.msra.mxu1 %v44925_v26  ;;  %v45611_v26 = vpack.c.bf16 %v11287_v45, %v11284_v36  ;;  %v11399_v57 = vand.u32 4294901760, %v45646_v39  ;;  %v45689_v36 = vpack.c.bf16 %v11394_v24, %v11387_v28 }
 0x524   : > { %39016 = vmatprep.subr.bf16.mxu1 %v45588_v48  ;;  %v45644_v12 = vpack.c.bf16 %v11299_v52, %v11296_v20  ;;  %v45687_v38 = vsub.f32 %v27408_v50, %v11299_v52  ;;  %v45701_v50 = vsub.f32 %v27409_v15, %v11302_v3  ;;  %v45703_v20 = vsub.f32 %v27410_v13, %v11305_v19 }
 0x525   : > { %39302 = vmatpush3.bf16.msra.mxu0 %v44931_v62  ;;  %v11290_v62 = vand.u32 4294901760, %v27405_v33  ;;  %v11400_v42 = vsub.f32 %v45646_v39, %v11399_v57 }
 0x526   : > { %33109 = vmatmul.mubr.f32.vlgmr.msra.gmra.mrb[4].mxu1 %v44522_v8  ;;  %v11434_v27 = vand.u32 4294901760, %v45687_v38  ;;  %v11448_v13 = vand.u32 4294901760, %v45703_v20 }
 0x527   : > { %39018 = vmatpush3.bf16.msra.mxu1 %v45588_v48  ;;  %33297 = vmatprep.mubr.f32.mxu1 %v50307_v63  ;;  %v45631_v43 = vpack.c.bf16 %v11293_v4, %v11290_v62  ;;  %v11372_v63 = vsub.f32 %v45621_v16, %v11371_v58  ;;  %v45666_v41 = vsub.f32 %v27405_v33, %v11290_v62  ;;  %v11401_v45 = vand.u32 4294901760, %v11400_v42 }
 0x528   : > { %33595 = vmatmul.mubr.f32.vlgmr.msra.gmra.mrb[2].mxu0 %v45410_v56  ;;  %39020 = vmatprep.subr.bf16.mxu1 %v45600_v54  ;;  %v11408_v33 = vand.u32 4294901760, %v11407_v5  ;;  %v11421_v62 = vsub.f32 %v45668_v51, %v11420_v21  ;;  %v11427_v4 = vand.u32 4294901760, %v45685_v47  ;;  %v11435_v15 = vsub.f32 %v45687_v38, %v11434_v27 }
 0x529   : > { %v11373_v60 = vand.u32 4294901760, %v11372_v63  ;;  %v11413_v7 = vand.u32 4294901760, %v45666_v41 }
 0x52a   : > { %v45707_v52 = vpack.c.bf16 %v11408_v33, %v11401_v45  ;;  %v11422_v53 = vand.u32 4294901760, %v11421_v62  ;;  %v11428_v59 = vsub.f32 %v45685_v47, %v11427_v4  ;;  %v11436_v22 = vand.u32 4294901760, %v11435_v15 }
 0x52b   : > { %39022 = vmatpush3.bf16.msra.mxu1 %v45600_v54  ;;  %v45683_v37 = vpack.c.bf16 %v11380_v34, %v11373_v60  ;;  %v11414_v9 = vsub.f32 %v45666_v41, %v11413_v7  ;;  %v11449_v34 = vsub.f32 %v45703_v20, %v11448_v13  ;;  %v45741_v45 = vpack.c.bf16 %v45623_v30, %v45621_v16 }
 0x52c   : > { %39024 = vmatprep.subr.bf16.mxu1 %v45611_v26  ;;  %v11429_v19 = vand.u32 4294901760, %v11428_v59  ;;  %v45747_v33 = vpack.c.bf16 %v45627_v40, %v45625_v46  ;;  %v45761_v62 = vpack.c.bf16 %v45668_v51, %v45666_v41  ;;  %v50318_v59 = vld [vmem:[#allocation25_spill] sm:$0xff]  ;;  %v45819_v16 = vpack.c.bf16 %v11406_v14, %v11399_v57 }
 0x52d   : > { %v11415_v63 = vand.u32 4294901760, %v11414_v9  ;;  %v11450_v42 = vand.u32 4294901760, %v11449_v34  ;;  %v45755_v9 = vpack.c.bf16 %v45648_v1, %v45646_v39  ;;  %v45835_v30 = vpack.c.bf16 %v11434_v27, %v11427_v4  ;;  %v27431_v39 = vld [vmem:[%s49499_s3 + $0xc0] sm:$0xff]  ;;  %v45988_v1 = vld [vmem:[%s49499_s3 + $0x90] sm:$0xff] }
 0x52e   : > { %v45731_v28 = vpack.c.bf16 %v11436_v22, %v11429_v19  ;;  %v50319_v22 = vld [vmem:[#allocation6_spill] sm:$0xff]  ;;  %v49823_v57 = vmov 0.0   ;;  %v14302_v51 = vand.u32 4294901760, %v27431_v39 }
 0x52f   : > { %39026 = vmatpush3.bf16.msra.mxu1 %v45611_v26  ;;  %v45720_v3 = vpack.c.bf16 %v11422_v53, %v11415_v63  ;;  %v45773_v63 = vpack.c.bf16 %v45703_v20, %v45701_v50  ;;  %33773 = vmatprep.mubr.msk.f32.mxu0 %vm41567_vm1, %v49823_v57 }
 0x530   : > { %39028 = vmatprep.subr.bf16.mxu1 %v45631_v43 }
 0x533   : > { %39030 = vmatpush3.bf16.msra.mxu1 %v45631_v43 }
 0x534   : > { %39032 = vmatprep.subr.bf16.mxu1 %v45644_v12 }
 0x537   : > { %39034 = vmatpush3.bf16.msra.mxu1 %v45644_v12 }
 0x538   : > { %39036 = vmatprep.subr.bf16.mxu1 %v45671_v29 }
 0x53b   : > { %39038 = vmatpush3.bf16.msra.mxu1 %v45671_v29 }
 0x53c   : > { %39040 = vmatprep.subr.bf16.mxu1 %v45683_v37 }
 0x53e   : > { %33298 = vmatmul.mubr.f32.vlgmr.msra.gmra.mrb[2].mxu1 %v44548_v61  ;;  %v11441_v61 = vand.u32 4294901760, %v45701_v50 }
 0x53f   : > { %39042 = vmatpush3.bf16.msra.mxu1 %v45683_v37  ;;  %33324 = vmatprep.mubr.f32.mxu1 %v44483_v44 }
 0x540   : > { %39044 = vmatprep.subr.bf16.mxu1 %v45689_v36  ;;  %v11442_v60 = vsub.f32 %v45701_v50, %v11441_v61  ;;  %v45843_v46 = vpack.c.bf16 %v11448_v13, %v11441_v61  ;;  %v46032_v61 = vld [vmem:[%s49499_s3 + $0xa0] sm:$0xff] }
 0x542   : > { %v11443_v24 = vand.u32 4294901760, %v11442_v60 }
 0x543   : > { %39046 = vmatpush3.bf16.msra.mxu1 %v45689_v36 }
 0x544   : > { %39048 = vmatprep.subr.bf16.mxu1 %v45707_v52  ;;  %v45735_v5 = vpack.c.bf16 %v11450_v42, %v11443_v24 }
 0x547   : > { %39050 = vmatpush3.bf16.msra.mxu1 %v45707_v52 }
 0x548   : > { %39052 = vmatprep.subr.bf16.mxu1 %v45720_v3 }
 0x54b   : > { %39054 = vmatpush3.bf16.msra.mxu1 %v45720_v3 }
 0x54c   : > { %39056 = vmatprep.subr.bf16.mxu1 %v45731_v28 }
 0x54f   : > { %39058 = vmatpush3.bf16.msra.mxu1 %v45731_v28 }
 0x550   : > { %39060 = vmatprep.subr.bf16.mxu1 %v45735_v5 }
 0x553   : > { %39062 = vmatpush3.bf16.msra.mxu1 %v45735_v5 }
 0x554   : > { %39064 = vmatprep.subr.bf16.mxu1 %v45741_v45 }
 0x556   : > { %33325 = vmatmul.mubr.f32.vlgmr.msra.gmra.mrb[2].mxu1 %v44522_v8 }
 0x557   : > { %39066 = vmatpush3.bf16.msra.mxu1 %v45741_v45  ;;  %33351 = vmatprep.mubr.f32.mxu1 %v44490_v25  ;;  %v45767_v25 = vpack.c.bf16 %v45687_v38, %v45685_v47  ;;  %v13254_v47 = vand.u32 4294901760, %v45988_v1 }
 0x558   : > { %39068 = vmatprep.subr.bf16.mxu1 %v45747_v33 }
 0x55b   : > { %39070 = vmatpush3.bf16.msra.mxu1 %v45747_v33 }
 0x55c   : > { %39072 = vmatprep.subr.bf16.mxu1 %v45755_v9 }
 0x55f   : > { %39074 = vmatpush3.bf16.msra.mxu1 %v45755_v9 }
 0x560   : > { %39076 = vmatprep.subr.bf16.mxu1 %v45761_v62 }
 0x563   : > { %39078 = vmatpush3.bf16.msra.mxu1 %v45761_v62 }
 0x564   : > { %39080 = vmatprep.subr.bf16.mxu1 %v45767_v25 }
 0x567   : > { %39082 = vmatpush3.bf16.msra.mxu1 %v45767_v25 }
 0x568   : > { %39084 = vmatprep.subr.bf16.mxu1 %v45773_v63 }
 0x56b   : > { %v33272_v53 = vpop.f32.mrb[0].mxu0  ;;  %39086 = vmatpush3.bf16.msra.mxu1 %v45773_v63 }
 0x56c   : > { %v45778_v15 = vadd.f32 %v33272_v53, %v50318_v59  ;;  %v11259_v19 = vpop.f32.mrb[1].mxu0  ;;  %39088 = vmatprep.subr.bf16.mxu1 %v45588_v48 }
 0x56d   : > { %v45782_v60 = vadd.f32 %v11259_v19, %v50319_v22 }
 0x56e   : > { %33352 = vmatmul.mubr.f32.vlgmr.msra.gmra.mrb[2].mxu1 %v50316_v11  ;;  %v45801_v11 = vpack.c.bf16 %v11378_v32, %v11371_v58  ;;  %v27424_v58 = vld [vmem:[%s49499_s3 + $0x88] sm:$0xff] }
 0x56f   : > { %39090 = vmatpush3.bf16.msra.mxu1 %v45588_v48  ;;  %33378 = vmatprep.mubr.f32.mxu1 %v50317_v55  ;;  %v45809_v55 = vpack.c.bf16 %v11392_v31, %v11385_v2  ;;  %v13251_v31 = vand.u32 4294901760, %v27424_v58 }
 0x570   : > { %39092 = vmatprep.subr.bf16.mxu1 %v45600_v54 }
 0x571   : > { %v13346_v22 = vsub.f32 %v27424_v58, %v13251_v31 }
 0x573   : > { %39094 = vmatpush3.bf16.msra.mxu1 %v45600_v54 }
 0x574   : > { %39096 = vmatprep.subr.bf16.mxu1 %v45611_v26 }
 0x577   : > { %39098 = vmatpush3.bf16.msra.mxu1 %v45611_v26 }
 0x578   : > { %39100 = vmatprep.subr.bf16.mxu1 %v45631_v43 }
 0x57b   : > { %39102 = vmatpush3.bf16.msra.mxu1 %v45631_v43 }
 0x57c   : > { %39104 = vmatprep.subr.bf16.mxu1 %v45644_v12 }
 0x57f   : > { %39106 = vmatpush3.bf16.msra.mxu1 %v45644_v12 }
 0x580   : > { %39108 = vmatprep.subr.bf16.mxu1 %v45671_v29 }
 0x583   : > { %39110 = vmatpush3.bf16.msra.mxu1 %v45671_v29 }
 0x584   : > { %39112 = vmatprep.subr.bf16.mxu1 %v45801_v11 }
 0x586   : > { %33379 = vmatmul.mubr.f32.vlgmr.msra.gmra.mrb[2].mxu1 %v50290_v0  ;;  %v45827_v0 = vpack.c.bf16 %v11420_v21, %v11413_v7  ;;  %v46002_v7 = vld [vmem:[%s49499_s3 + $0xc8] sm:$0xff]  ;;  %v46007_v21 = vld [vmem:[%s49499_s3 + $0xd0] sm:$0xff] }
 0x587   : > { %39114 = vmatpush3.bf16.msra.mxu1 %v45801_v11  ;;  %33405 = vmatprep.mubr.f32.mxu1 %v44483_v44  ;;  %v14305_v4 = vand.u32 4294901760, %v46002_v7  ;;  %v14308_v27 = vand.u32 4294901760, %v46007_v21 }
 0x588   : > { %39116 = vmatprep.subr.bf16.mxu1 %v45809_v55 }
 0x58b   : > { %39118 = vmatpush3.bf16.msra.mxu1 %v45809_v55 }
 0x58c   : > { %39120 = vmatprep.subr.bf16.mxu1 %v45819_v16 }
 0x58f   : > { %39122 = vmatpush3.bf16.msra.mxu1 %v45819_v16 }
 0x590   : > { %39124 = vmatprep.subr.bf16.mxu1 %v45827_v0 }
 0x593   : > { %39126 = vmatpush3.bf16.msra.mxu1 %v45827_v0 }
 0x594   : > { %39128 = vmatprep.subr.bf16.mxu1 %v45835_v30 }
 0x597   : > { %39130 = vmatpush3.bf16.msra.mxu1 %v45835_v30 }
 0x598   : > { %39132 = vmatprep.subr.bf16.mxu1 %v45843_v46 }
 0x59b   : > { %39134 = vmatpush3.bf16.msra.mxu1 %v45843_v46 }
 0x59c   : > { %39136 = vmatprep.subr.bf16.mxu1 %v45588_v48 }
 0x59e   : > { %33406 = vmatmul.mubr.f32.vlgmr.msra.gmra.mrb[2].mxu1 %v44522_v8 }
 0x59f   : > { %39138 = vmatpush3.bf16.msra.mxu1 %v45588_v48  ;;  %33432 = vmatprep.mubr.f32.mxu1 %v44483_v44 }
 0x5a0   : > { %39140 = vmatprep.subr.bf16.mxu1 %v45600_v54 }
 0x5a3   : > { %39142 = vmatpush3.bf16.msra.mxu1 %v45600_v54 }
 0x5a4   : > { %39144 = vmatprep.subr.bf16.mxu1 %v45611_v26 }
 0x5a7   : > { %39146 = vmatpush3.bf16.msra.mxu1 %v45611_v26 }
 0x5a8   : > { %39148 = vmatprep.subr.bf16.mxu1 %v45631_v43 }
 0x5ab   : > { %39150 = vmatpush3.bf16.msra.mxu1 %v45631_v43 }
 0x5ac   : > { %39152 = vmatprep.subr.bf16.mxu1 %v45644_v12 }
 0x5af   : > { %39154 = vmatpush3.bf16.msra.mxu1 %v45644_v12 }
 0x5b0   : > { %39156 = vmatprep.subr.bf16.mxu1 %v45671_v29 }
 0x5b3   : > { %39158 = vmatpush3.bf16.msra.mxu1 %v45671_v29 }
 0x5b4   : > { %39304 = vmatprep.subr.bf16.mxu1 %v45588_v48 }
 0x5b6   : > { %33433 = vmatmul.mubr.f32.vlgmr.msra.gmra.mrb[2].mxu1 %v44522_v8 }
 0x5b7   : > { %39306 = vmatpush3.bf16.msra.mxu1 %v45588_v48  ;;  %33621 = vmatprep.mubr.f32.mxu1 %v45399_v10 }
 0x5b8   : > { %39308 = vmatprep.subr.bf16.mxu1 %v45600_v54 }
 0x5bb   : > { %39310 = vmatpush3.bf16.msra.mxu1 %v45600_v54 }
 0x5bc   : > { %39312 = vmatprep.subr.bf16.mxu1 %v45611_v26 }
 0x5bf   : > { %39314 = vmatpush3.bf16.msra.mxu1 %v45611_v26 }
 0x5c0   : > { %39316 = vmatprep.subr.bf16.mxu1 %v45631_v43 }
 0x5c3   : > { %39318 = vmatpush3.bf16.msra.mxu1 %v45631_v43 }
 0x5c4   : > { %39320 = vmatprep.subr.bf16.mxu1 %v45644_v12 }
 0x5c7   : > { %39322 = vmatpush3.bf16.msra.mxu1 %v45644_v12 }
 0x5c8   : > { %39324 = vmatprep.subr.bf16.mxu1 %v45671_v29 }
 0x5cb   : > { %39326 = vmatpush3.bf16.msra.mxu1 %v45671_v29 }
 0x5cc   : > { %39328 = vmatprep.subr.bf16.mxu1 %v45683_v37 }
 0x5ce   : > { %33622 = vmatmul.mubr.f32.vlgmr.msra.gmra.mrb[4].mxu1 %v45436_v35  ;;  %v49825_v35 = vmov 0.0|0.0  }
 0x5cf   : > { %39330 = vmatpush3.bf16.msra.mxu1 %v45683_v37  ;;  %33648 = vmatprep.mubr.f32.mxu1 %v45371_v23 }
 0x5d0   : > { %39332 = vmatprep.subr.bf16.mxu1 %v45689_v36  ;;  %39447 = vmatprep.subr.bf16.mxu0 %v49825_v35 }
 0x5d3   : > { %39334 = vmatpush3.bf16.msra.mxu1 %v45689_v36 }
 0x5d4   : > { %39336 = vmatprep.subr.bf16.mxu1 %v45707_v52 }
 0x5d7   : > { %39338 = vmatpush3.bf16.msra.mxu1 %v45707_v52  ;;  %v46025_v52 = vpack.c.bf16 %v14308_v27, %v14305_v4 }
 0x5d8   : > { %39340 = vmatprep.subr.bf16.mxu1 %v45720_v3 }
 0x5db   : > { %39342 = vmatpush3.bf16.msra.mxu1 %v45720_v3 }
 0x5dc   : > { %39344 = vmatprep.subr.bf16.mxu1 %v45731_v28 }
 0x5df   : > { %39346 = vmatpush3.bf16.msra.mxu1 %v45731_v28  ;;  %v46044_v28 = vld [vmem:[%s49499_s3 + $0xd8] sm:$0xff] }
 0x5e0   : > { %39348 = vmatprep.subr.bf16.mxu1 %v45735_v5 }
 0x5e3   : > { %39350 = vmatpush3.bf16.msra.mxu1 %v45735_v5 }
 0x5e4   : > { %39352 = vmatprep.subr.bf16.mxu1 %v45741_v45 }
 0x5e6   : > { %33649 = vmatmul.mubr.f32.vlgmr.msra.gmra.mrb[4].mxu1 %v45410_v56 }
 0x5e7   : > { %39354 = vmatpush3.bf16.msra.mxu1 %v45741_v45  ;;  %33675 = vmatprep.mubr.f32.mxu1 %v45378_v6 }
 0x5e8   : > { %39356 = vmatprep.subr.bf16.mxu1 %v45747_v33 }
 0x5eb   : > { %39358 = vmatpush3.bf16.msra.mxu1 %v45747_v33  ;;  %v46053_v33 = vand.u32 4294901760, %v46032_v61 }
 0x5ec   : > { %39360 = vmatprep.subr.bf16.mxu1 %v45755_v9 }
 0x5ef   : > { %39362 = vmatpush3.bf16.msra.mxu1 %v45755_v9 }
 0x5f0   : > { %39364 = vmatprep.subr.bf16.mxu1 %v45761_v62 }
 0x5f3   : > { %39366 = vmatpush3.bf16.msra.mxu1 %v45761_v62  ;;  %v46059_v62 = vand.u32 4294901760, %v46044_v28 }
 0x5f4   : > { %39368 = vmatprep.subr.bf16.mxu1 %v45767_v25 }
 0x5f7   : > { %39370 = vmatpush3.bf16.msra.mxu1 %v45767_v25 }
 0x5f8   : > { %39372 = vmatprep.subr.bf16.mxu1 %v45773_v63 }
 0x5fb   : > { %v45903_v44 = vpop.f32.mrb[2].mxu0  ;;  %39374 = vmatpush3.bf16.msra.mxu1 %v45773_v63 }
 0x5fc   : > { %v45905_v8 = vpop.f32.mrb[3].mxu0  ;;  %39376 = vmatprep.subr.bf16.mxu1 %v45588_v48 }
 0x5fe   : > { %33676 = vmatmul.mubr.f32.vlgmr.msra.gmra.mrb[4].mxu1 %v45417_v17  ;;  %v27421_v17 = vld [vmem:[%s49499_s3 + $0x70] sm:$0xff] }
 0x5ff   : > { %39378 = vmatpush3.bf16.msra.mxu1 %v45588_v48  ;;  %33702 = vmatprep.mubr.f32.mxu1 %v45385_v18 }
 0x600   : > { %39380 = vmatprep.subr.bf16.mxu1 %v45600_v54 }
 0x603   : > { %39382 = vmatpush3.bf16.msra.mxu1 %v45600_v54 }
 0x604   : > { %39384 = vmatprep.subr.bf16.mxu1 %v45611_v26 }
 0x607   : > { %39386 = vmatpush3.bf16.msra.mxu1 %v45611_v26 }
 0x608   : > { %39388 = vmatprep.subr.bf16.mxu1 %v45631_v43 }
 0x60b   : > { %39390 = vmatpush3.bf16.msra.mxu1 %v45631_v43 }
 0x60c   : > { %39392 = vmatprep.subr.bf16.mxu1 %v45644_v12 }
 0x60f   : > { %39394 = vmatpush3.bf16.msra.mxu1 %v45644_v12 }
 0x610   : > { %39396 = vmatprep.subr.bf16.mxu1 %v45671_v29 }
 0x613   : > { %39398 = vmatpush3.bf16.msra.mxu1 %v45671_v29 }
 0x614   : > { %39400 = vmatprep.subr.bf16.mxu1 %v45801_v11 }
 0x616   : > { %33703 = vmatmul.mubr.f32.vlgmr.msra.gmra.mrb[4].mxu1 %v45424_v49  ;;  %v27422_v49 = vld [vmem:[%s49499_s3 + $0x78] sm:$0xff] }
 0x617   : > { %39402 = vmatpush3.bf16.msra.mxu1 %v45801_v11  ;;  %33729 = vmatprep.mubr.f32.mxu1 %v45371_v23 }
 0x618   : > { %39404 = vmatprep.subr.bf16.mxu1 %v45809_v55 }
 0x61b   : > { %39406 = vmatpush3.bf16.msra.mxu1 %v45809_v55 }
 0x61c   : > { %39408 = vmatprep.subr.bf16.mxu1 %v45819_v16 }
 0x61f   : > { %39410 = vmatpush3.bf16.msra.mxu1 %v45819_v16 }
 0x620   : > { %39412 = vmatprep.subr.bf16.mxu1 %v45827_v0 }
 0x623   : > { %39414 = vmatpush3.bf16.msra.mxu1 %v45827_v0 }
 0x624   : > { %39416 = vmatprep.subr.bf16.mxu1 %v45835_v30 }
 0x627   : > { %39418 = vmatpush3.bf16.msra.mxu1 %v45835_v30  ;;  %v14397_v30 = vsub.f32 %v27431_v39, %v14302_v51 }
 0x628   : > { %39420 = vmatprep.subr.bf16.mxu1 %v45843_v46 }
 0x62b   : > { %39422 = vmatpush3.bf16.msra.mxu1 %v45843_v46 }
 0x62c   : > { %39424 = vmatprep.subr.bf16.mxu1 %v45588_v48 }
 0x62e   : > { %33730 = vmatmul.mubr.f32.vlgmr.msra.gmra.mrb[4].mxu1 %v45410_v56 }
 0x62f   : > { %39426 = vmatpush3.bf16.msra.mxu1 %v45588_v48  ;;  %33756 = vmatprep.mubr.f32.mxu1 %v45371_v23  ;;  %v13242_v48 = vand.u32 4294901760, %v27421_v17 }
 0x630   : > { %39428 = vmatprep.subr.bf16.mxu1 %v45600_v54 }
 0x631   : > { %v46034_v13 = vsub.f32 %v27421_v17, %v13242_v48 }
 0x633   : > { %39430 = vmatpush3.bf16.msra.mxu1 %v45600_v54  ;;  %v13245_v54 = vand.u32 4294901760, %v27422_v49  ;;  %v13326_v42 = vand.u32 4294901760, %v46034_v13 }
 0x634   : > { %39432 = vmatprep.subr.bf16.mxu1 %v45611_v26 }
 0x635   : > { %v45994_v14 = vpack.c.bf16 %v13245_v54, %v13242_v48  ;;  %v46036_v3 = vsub.f32 %v27422_v49, %v13245_v54  ;;  %v13327_v25 = vsub.f32 %v46034_v13, %v13326_v42  ;;  %v13347_v49 = vand.u32 4294901760, %v13346_v22 }
 0x636   : > { %v14398_v54 = vand.u32 4294901760, %v14397_v30 }
 0x637   : > { %39434 = vmatpush3.bf16.msra.mxu1 %v45611_v26  ;;  %v27429_v26 = vld [vmem:[%s49499_s3 + $0xb0] sm:$0xff]  ;;  %39449 = vmatpush3.bf16.msra.mxu0 %v45994_v14  ;;  %v13333_v5 = vand.u32 4294901760, %v46036_v3  ;;  %v13328_v55 = vand.u32 4294901760, %v13327_v25 }
 0x638   : > { %39436 = vmatprep.subr.bf16.mxu1 %v45631_v43  ;;  %v14296_v32 = vand.u32 4294901760, %v27429_v26  ;;  %39450 = vmatprep.subr.bf16.mxu0 %v49825_v35 }
 0x639   : > { %v13334_v63 = vsub.f32 %v46036_v3, %v13333_v5 }
 0x63a   : > { %v46046_v24 = vsub.f32 %v27429_v26, %v14296_v32  ;;  %v13353_v26 = vsub.f32 %v45988_v1, %v13254_v47 }
 0x63b   : > { %39438 = vmatpush3.bf16.msra.mxu1 %v45631_v43  ;;  %v27423_v43 = vld [vmem:[%s49499_s3 + $0x80] sm:$0xff]  ;;  %v13335_v16 = vand.u32 4294901760, %v13334_v63 }
 0x63c   : > { %39440 = vmatprep.subr.bf16.mxu1 %v45644_v12  ;;  %v13248_v2 = vand.u32 4294901760, %v27423_v43  ;;  %v14384_v9 = vand.u32 4294901760, %v46046_v24 }
 0x63d   : > { %v46075_v48 = vpack.c.bf16 %v13335_v16, %v13328_v55 }
 0x63e   : > { %v46013_v38 = vpack.c.bf16 %v13251_v31, %v13248_v2  ;;  %v14385_v59 = vsub.f32 %v46046_v24, %v14384_v9  ;;  %v13339_v19 = vsub.f32 %v27423_v43, %v13248_v2  ;;  %v14399_v31 = vsub.f32 %v14397_v30, %v14398_v54 }
 0x63f   : > { %39442 = vmatpush3.bf16.msra.mxu1 %v45644_v12  ;;  %v27430_v12 = vld [vmem:[%s49499_s3 + $0xb8] sm:$0xff] }
 0x640   : > { %39444 = vmatprep.subr.bf16.mxu1 %v45671_v29  ;;  %v14299_v41 = vand.u32 4294901760, %v27430_v12  ;;  %39452 = vmatpush3.bf16.msra.mxu0 %v46013_v38  ;;  %v14386_v46 = vand.u32 4294901760, %v14385_v59  ;;  %v13340_v17 = vand.u32 4294901760, %v13339_v19  ;;  %v14400_v59 = vand.u32 4294901760, %v14399_v31 }
 0x641   : > { %39453 = vmatprep.subr.bf16.mxu0 %v49825_v35 }
 0x642   : > { %v46019_v50 = vpack.c.bf16 %v14302_v51, %v14299_v41  ;;  %v14390_v11 = vsub.f32 %v27430_v12, %v14299_v41  ;;  %v13341_v58 = vsub.f32 %v13339_v19, %v13340_v17  ;;  %v13354_v12 = vand.u32 4294901760, %v13353_v26 }
 0x643   : > { %39446 = vmatpush3.bf16.msra.mxu1 %v45671_v29  ;;  %v27426_v29 = vld [vmem:[%s49499_s3 + $0x98] sm:$0xff]  ;;  %v14404_v41 = vsub.f32 %v46002_v7, %v14305_v4 }
 0x644   : > { %39555 = vmatprep.subr.bf16.mxu1 %v49825_v35  ;;  %v13257_v36 = vand.u32 4294901760, %v27426_v29  ;;  %v13342_v51 = vand.u32 4294901760, %v13341_v58  ;;  %v13355_v1 = vsub.f32 %v13353_v26, %v13354_v12 }
 0x646   : > { %33757 = vmatmul.mubr.f32.vlgmr.msra.gmra.mrb[4].mxu1 %v45410_v56  ;;  %v27428_v56 = vld [vmem:[%s49499_s3 + $0xa8] sm:$0xff]  ;;  %v46023_v20 = vpack.c.bf16 %v13257_v36, %v13254_v47  ;;  %v14405_v47 = vand.u32 4294901760, %v14404_v41 }
 0x647   : > { %v14293_v40 = vand.u32 4294901760, %v27428_v56  ;;  %33977 = vmatprep.mubr.msk.f32.mxu1 %vm41567_vm1, %v49823_v57 }
 0x648   : > { %39455 = vmatpush3.bf16.msra.mxu0 %v46023_v20 }
 0x649   : > { %v46009_v37 = vpack.c.bf16 %v14296_v32, %v14293_v40  ;;  %v46038_v34 = vsub.f32 %v27428_v56, %v14293_v40  ;;  %33771 = vmatprep.subr.mxu0 %v49823_v57  ;;  %v14391_v56 = vand.u32 4294901760, %v14390_v11  ;;  %v13360_v40 = vsub.f32 %v27426_v29, %v13257_v36 }
 0x64a   : > { %v13348_v32 = vsub.f32 %v13346_v22, %v13347_v49 }
 0x64b   : > { %39557 = vmatpush3.bf16.msra.mxu1 %v46009_v37  ;;  %v14377_v45 = vand.u32 4294901760, %v46038_v34  ;;  %v14392_v2 = vsub.f32 %v14390_v11, %v14391_v56  ;;  %v13361_v39 = vand.u32 4294901760, %v13360_v40  ;;  %v46103_v31 = vpack.c.bf16 %v13360_v40, %v13353_v26 }
 0x64c   : > { %39558 = vmatprep.subr.bf16.mxu1 %v49825_v35  ;;  %33772 = vmatpush3.msra.mxu0 %v46053_v33  ;;  %v13349_v25 = vand.u32 4294901760, %v13348_v32  ;;  %v46099_v32 = vpack.c.bf16 %v13346_v22, %v13339_v19  ;;  %v46119_v19 = vpack.c.bf16 %v14398_v54, %v14391_v56 }
 0x64d   : > { %v14378_v53 = vsub.f32 %v46038_v34, %v14377_v45  ;;  %39456 = vmatprep.subr.bf16.mxu0 %v49825_v35  ;;  %v14393_v63 = vand.u32 4294901760, %v14392_v2  ;;  %v13362_v29 = vsub.f32 %v13360_v40, %v13361_v39  ;;  %v46101_v2 = vpack.c.bf16 %v14397_v30, %v14390_v11  ;;  %50323 = vst [vmem:[#allocation40_spill] sm:$0xff] %v46103_v31 }
 0x64e   : > { %v46083_v36 = vpack.c.bf16 %v13349_v25, %v13342_v51  ;;  %50321 = vst [vmem:[#allocation56_spill] sm:$0xff] %v46099_v32  ;;  %50328 = vst [vmem:[#allocation13_spill] sm:$0xff] %v46119_v19  ;;  %v46121_v22 = vpack.c.bf16 %v13361_v39, %v13354_v12  ;;  %v50340_v39 = vmov 0.0|0.0  }
 0x64f   : > { %39560 = vmatpush3.bf16.msra.mxu1 %v46019_v50  ;;  %v14379_v0 = vand.u32 4294901760, %v14378_v53  ;;  %v14411_v53 = vsub.f32 %v46007_v21, %v14308_v27  ;;  %v46085_v16 = vpack.c.bf16 %v14400_v59, %v14393_v63  ;;  %v46093_v21 = vpack.c.bf16 %v46036_v3, %v46034_v13  ;;  %50322 = vst [vmem:[#allocation57_spill] sm:$0xff] %v46101_v2  ;;  %v27413_v3 = vld [vmem:[%s49498_s2] ss:$0 sm:$0xff] }
 0x650   : > { %39561 = vmatprep.subr.bf16.mxu1 %v49825_v35  ;;  %v46097_v27 = vpack.c.bf16 %v46046_v24, %v46038_v34  ;;  %v46117_v24 = vpack.c.bf16 %v13347_v49, %v13340_v17  ;;  %50329 = vst [vmem:[#allocation46_spill] sm:$0xff] %v46121_v22  ;;  %v13204_v59 = vld [vmem:[%s49499_s3] sm:$0xff] }
 0x651   : > { %v46079_v43 = vpack.c.bf16 %v14386_v46, %v14379_v0  ;;  %v14412_v55 = vand.u32 4294901760, %v14411_v53  ;;  %v13356_v0 = vand.u32 4294901760, %v13355_v1  ;;  %v13363_v46 = vand.u32 4294901760, %v13362_v29  ;;  %v13205_v1 = vld [vmem:[%s49499_s3 + $0x8] sm:$0xff]  ;;  %v27414_v29 = vld [vmem:[%s49499_s3 + $0x38] sm:$0xff] }
 0x652   : > { %50320 = vst [vmem:[#allocation55_spill] sm:$0xff] %v46097_v27  ;;  %v46105_v51 = vpack.c.bf16 %v14411_v53, %v14404_v41  ;;  %50327 = vst [vmem:[#allocation44_spill] sm:$0xff] %v46117_v24 }
 0x653   : > { %39563 = vmatpush3.bf16.msra.mxu1 %v46025_v52  ;;  %v46087_v10 = vpack.c.bf16 %v13363_v46, %v13356_v0  ;;  %v46123_v11 = vpack.c.bf16 %v14412_v55, %v14405_v47  ;;  %v13769_v0 = vand.u32 4294901760, %v13204_v59  ;;  %v13772_v46 = vand.u32 4294901760, %v13205_v1 }
 0x654   : > { %33975 = vmatprep.subr.mxu1 %v49823_v57  ;;  %v14406_v57 = vsub.f32 %v14404_v41, %v14405_v47  ;;  %50324 = vst [vmem:[#allocation22_spill] sm:$0xff] %v46105_v51  ;;  %v27415_v47 = vld [vmem:[%s49499_s3 + $0x40] sm:$0xff] }
 0x655   : > { %50330 = vst [vmem:[#allocation48_spill] sm:$0xff] %v46123_v11 }
 0x656   : > { %v14407_v7 = vand.u32 4294901760, %v14406_v57  ;;  %v46115_v57 = vpack.c.bf16 %v14384_v9, %v14377_v45 }
 0x657   : > { %33976 = vmatpush3.msra.mxu1 %v46059_v62 }
 0x658   : > { %39564 = vmatprep.subr.bf16.mxu1 %v49825_v35  ;;  %v14413_v35 = vsub.f32 %v14411_v53, %v14412_v55  ;;  %50326 = vst [vmem:[#allocation16_spill] sm:$0xff] %v46115_v57 }
 0x65a   : > { %v14414_v4 = vand.u32 4294901760, %v14413_v35  ;;  %v46111_v35 = vpack.c.bf16 %v13333_v5, %v13326_v42 }
 0x65c   : > { %v46089_v58 = vpack.c.bf16 %v14414_v4, %v14407_v7  ;;  %50325 = vst [vmem:[#allocation42_spill] sm:$0xff] %v46111_v35  ;;  %v14817_v7 = vand.u32 4294901760, %v27414_v29  ;;  %v13206_v4 = vld [vmem:[%s49499_s3 + $0x10] sm:$0xff] }
 0x689   : > { %v45951_v23 = vpop.f32.mrb[2].mxu1 }
 0x68a   : > { %v13184_v6 = vmax.f32 %v45778_v15, %v45951_v23  ;;  %v45955_v18 = vpop.f32.mrb[3].mxu1 }
 0x68b   : > { %v50331_v5 = vmax.f32 %v45782_v60, %v45955_v18  ;;  %v46154_v18 = vsub.f32 %v46044_v28, %v46059_v62  ;;  %v50341_v28 = vmov 0.0  }
 0x68d   : > { %50336 = vst [vmem:[#allocation7_spill] sm:$0xff] %v46154_v18 }
 0x719   : > { %v33758_v30 = vpop.f32.mrb[4].mxu1 }
 0x71a   : > { %v13186_v26 = vmax.f32 %v45903_v44, %v33758_v30  ;;  %v13171_v13 = vpop.f32.mrb[5].mxu1  ;;  %v13207_v30 = vld [vmem:[%s49499_s3 + $0x18] sm:$0xff] }
 0x71b   : > { %v13185_v34 = vmax.f32 %v45905_v8, %v13171_v13  ;;  %v27416_v13 = vld [vmem:[%s49499_s3 + $0x48] sm:$0xff] }
 0x71c   : > { %v13188_v42 = vmax.f32 %v13184_v6, %v13186_v26  ;;  %v46150_v6 = vsub.f32 %v46032_v61, %v46053_v33  ;;  %v46166_v61 = vand.u32 4294901760, %v46154_v18  ;;  %v14820_v26 = vand.u32 4294901760, %v27415_v47 }
 0x71d   : > { %v13187_v45 = vmax.f32 %v50331_v5, %v13185_v34  ;;  %v46301_v5 = vsub.f32 %v13205_v1, %v13772_v46  ;;  %v27418_v1 = vld [vmem:[%s49499_s3 + $0x58] sm:$0xff] }
 0x71e   : > { %v13196_v9 = vadd.f32 %v27413_v3, %v13188_v42  ;;  %50335 = vst [vmem:[#allocation15_spill] sm:$0xff] %v46150_v6  ;;  %v46163_v12 = vand.u32 4294901760, %v46150_v6  ;;  %50339 = vst [vmem:[#allocation10_spill] sm:$0xff] %v46166_v61  ;;  %v14420_v25 = vsub.f32 %v46154_v18, %v46166_v61  ;;  %v46299_v42 = vsub.f32 %v13204_v59, %v13769_v0  ;;  %v13209_v59 = vld [vmem:[%s49499_s3 + $0x28] sm:$0xff] }
 0x71f   : > { %v13195_v17 = vadd.f32 %v27413_v3, %v13187_v45  ;;  %v27417_v3 = vld [vmem:[%s49499_s3 + $0x50] sm:$0xff]  ;;  %v46303_v45 = vsub.f32 %v27414_v29, %v14817_v7 }
 0x720   : > { %v13198_v49 = vmax.f32 %v13196_v9, 0.0  ;;  %50338 = vst [vmem:[#allocation8_spill] sm:$0xff] %v46163_v12  ;;  %v13369_v41 = vsub.f32 %v46150_v6, %v46163_v12  ;;  %v46186_v53 = vand.u32 4294901760, %v14420_v25  ;;  %v13775_v9 = vand.u32 4294901760, %v13206_v4  ;;  %v13208_v25 = vld [vmem:[%s49499_s3 + $0x20] sm:$0xff] }
 0x721   : > { %v13197_v44 = vmax.f32 %v13195_v17, 0.0  ;;  %v13778_v17 = vand.u32 4294901760, %v13207_v30 }
 0x722   : > { %13202 = vst.msk [vmem:[#allocation2 + $0x8] sm:$0x3f] %vm13201_vm2, %v13198_v49  ;;  %v46184_v63 = vand.u32 4294901760, %v13369_v41  ;;  %v46307_v49 = vsub.f32 %v27415_v47, %v14820_v26  ;;  %v46315_v41 = vpack.c.bf16 %v14820_v26, %v14817_v7  ;;  %v46337_v26 = vsub.f32 %v13206_v4, %v13775_v9 }
 0x723   : > { %13200 = vst.msk [vmem:[#allocation2] sm:$0xff] %vm13199_vm3, %v13197_v44  ;;  %v14823_v44 = vand.u32 4294901760, %v27416_v13  ;;  %v13784_v7 = vand.u32 4294901760, %v13209_v59  ;;  %v14829_v4 = vand.u32 4294901760, %v27418_v1 }
 0x725   : > { %v46345_v47 = vsub.f32 %v27416_v13, %v14823_v44  ;;  %v50342_v13 = vand.u32 4294901760, %v46299_v42 }
 0x72a   : > { %v13221_v56 = vld [vmem:[#allocation2 + $0x1] ss:$2 sm:$0x1f]  ;;  %v13219_v55 = vld [vmem:[#allocation2] ss:$2 sm:$0x1f] }
 0x72b   : > { %v13239_v8 = vsel %vm13199_vm3, %v13221_v56, 0  ;;  %v13766_v34 = vsel %vm13199_vm3, %v13219_v55, 0  ;;  %v14826_v56 = vand.u32 4294901760, %v27417_v3 }
 0x72c   : > { %v46138_v54 = vand.u32 4294901760, %v13239_v8 }
 0x72d   : > { %v46343_v55 = vpack.c.bf16 %v14826_v56, %v14823_v44  ;;  %v46347_v29 = vsub.f32 %v27417_v3, %v14826_v56  ;;  %v13854_v3 = vsub.f32 %v46299_v42, %v50342_v13  ;;  %v50344_v56 = vand.u32 4294901760, %v46303_v45 }
 0x72e   : > { %50332 = vst [vmem:[#allocation4_spill] sm:$0xff] %v46138_v54  ;;  %v46141_v15 = vsub.f32 %v13239_v8, %v46138_v54  ;;  %v46311_v8 = vpack.c.bf16 %v13772_v46, %v13769_v0  ;;  %v46331_v0 = vpack.c.bf16 %v13778_v17, %v13775_v9  ;;  %v27419_v46 = vld [vmem:[%s49499_s3 + $0x60] sm:$0xff] }
 0x72f   : > { %v14832_v9 = vand.u32 4294901760, %v27419_v46 }
 0x730   : > { %50333 = vst [vmem:[#allocation5_spill] sm:$0xff] %v46141_v15  ;;  %v46144_v60 = vand.u32 4294901760, %v46141_v15 }
 0x732   : > { %50334 = vst [vmem:[#allocation19_spill] sm:$0xff] %v46144_v60  ;;  %v13316_v23 = vsub.f32 %v46141_v15, %v46144_v60 }
 0x734   : > { %v46156_v40 = vand.u32 4294901760, %v13316_v23  ;;  %v46313_v23 = vand.u32 4294901760, %v13766_v34 }
 0x736   : > { %50337 = vst [vmem:[#allocation23_spill] sm:$0xff] %v46156_v40  ;;  %33774 = vmatmul.mubr.f32.vlgmr.msra.gmra.mrb[4].mxu0 %v46156_v40  ;;  %33978 = vmatmul.mubr.f32.vlgmr.msra.gmra.mrb[6].mxu1 %v46156_v40 }
 0x737   : > { %39458 = vmatpush3.bf16.msra.mxu0 %v46075_v48  ;;  %39566 = vmatpush3.bf16.msra.mxu1 %v46079_v43 }
 0x738   : > { %39459 = vmatprep.subr.bf16.mxu0 %v50340_v39  ;;  %39567 = vmatprep.subr.bf16.mxu1 %v50340_v39 }
 0x739   : > { %33790 = vmatprep.mubr.msk.f32.mxu0 %vm41567_vm1, %v50341_v28  ;;  %33994 = vmatprep.mubr.msk.f32.mxu1 %vm41567_vm1, %v50341_v28 }
 0x73b   : > { %39461 = vmatpush3.bf16.msra.mxu0 %v46083_v36  ;;  %39569 = vmatpush3.bf16.msra.mxu1 %v46085_v16 }
 0x73c   : > { %39462 = vmatprep.subr.bf16.mxu0 %v50340_v39  ;;  %39570 = vmatprep.subr.bf16.mxu1 %v50340_v39 }
 0x73f   : > { %39464 = vmatpush3.bf16.msra.mxu0 %v46087_v10  ;;  %39572 = vmatpush3.bf16.msra.mxu1 %v46089_v58 }
 0x740   : > { %33788 = vmatprep.subr.mxu0 %v50341_v28  ;;  %33992 = vmatprep.subr.mxu1 %v50341_v28 }
 0x743   : > { %33789 = vmatpush3.msra.mxu0 %v46184_v63  ;;  %33993 = vmatpush3.msra.mxu1 %v46186_v53 }
 0x744   : > { %33791 = vmatmul.mubr.f32.vlgmr.msra.gmra.mrb[4].mxu0 %v46138_v54  ;;  %39465 = vmatprep.subr.bf16.mxu0 %v50340_v39 }
 0x745   : > { %33995 = vmatmul.mubr.f32.vlgmr.msra.gmra.mrb[6].mxu1 %v46138_v54  ;;  %39573 = vmatprep.subr.bf16.mxu1 %v50340_v39 }
 0x746   : > { %39467 = vmatpush3.bf16.msra.mxu0 %v46093_v21  ;;  %39575 = vmatpush3.bf16.msra.mxu1 %v46097_v27 }
 0x747   : > { %39468 = vmatprep.subr.bf16.mxu0 %v50340_v39  ;;  %39576 = vmatprep.subr.bf16.mxu1 %v50340_v39 }
 0x748   : > { %33807 = vmatprep.mubr.msk.f32.mxu0 %vm41567_vm1, %v50341_v28  ;;  %34011 = vmatprep.mubr.msk.f32.mxu1 %vm41567_vm1, %v50341_v28 }
 0x74a   : > { %39470 = vmatpush3.bf16.msra.mxu0 %v46099_v32  ;;  %39578 = vmatpush3.bf16.msra.mxu1 %v46101_v2 }
 0x74b   : > { %39471 = vmatprep.subr.bf16.mxu0 %v50340_v39  ;;  %39579 = vmatprep.subr.bf16.mxu1 %v50340_v39 }
 0x74e   : > { %39473 = vmatpush3.bf16.msra.mxu0 %v46103_v31  ;;  %39581 = vmatpush3.bf16.msra.mxu1 %v46105_v51 }
 0x74f   : > { %33805 = vmatprep.subr.mxu0 %v50341_v28  ;;  %34009 = vmatprep.subr.mxu1 %v50341_v28 }
 0x752   : > { %33806 = vmatpush3.msra.mxu0 %v46150_v6  ;;  %34010 = vmatpush3.msra.mxu1 %v46154_v18 }
 0x753   : > { %33808 = vmatmul.mubr.f32.vlgmr.msra.gmra.mrb[4].mxu0 %v46141_v15  ;;  %39474 = vmatprep.subr.bf16.mxu0 %v50340_v39 }
 0x754   : > { %34012 = vmatmul.mubr.f32.vlgmr.msra.gmra.mrb[6].mxu1 %v46141_v15  ;;  %39582 = vmatprep.subr.bf16.mxu1 %v50340_v39  ;;  %v13781_v15 = vand.u32 4294901760, %v13208_v25 }
 0x755   : > { %39476 = vmatpush3.bf16.msra.mxu0 %v45994_v14  ;;  %39584 = vmatpush3.bf16.msra.mxu1 %v46009_v37 }
 0x756   : > { %39477 = vmatprep.subr.bf16.mxu0 %v50340_v39  ;;  %39585 = vmatprep.subr.bf16.mxu1 %v50340_v39 }
 0x757   : > { %33824 = vmatprep.mubr.msk.f32.mxu0 %vm41567_vm1, %v50341_v28  ;;  %34028 = vmatprep.mubr.msk.f32.mxu1 %vm41567_vm1, %v50341_v28 }
 0x759   : > { %39479 = vmatpush3.bf16.msra.mxu0 %v46013_v38  ;;  %39587 = vmatpush3.bf16.msra.mxu1 %v46019_v50 }
 0x75a   : > { %39480 = vmatprep.subr.bf16.mxu0 %v50340_v39  ;;  %39588 = vmatprep.subr.bf16.mxu1 %v50340_v39 }
 0x75d   : > { %39482 = vmatpush3.bf16.msra.mxu0 %v46023_v20  ;;  %39590 = vmatpush3.bf16.msra.mxu1 %v46025_v52 }
 0x75e   : > { %33822 = vmatprep.subr.mxu0 %v50341_v28  ;;  %34026 = vmatprep.subr.mxu1 %v50341_v28 }
 0x761   : > { %33823 = vmatpush3.msra.mxu0 %v46053_v33  ;;  %34027 = vmatpush3.msra.mxu1 %v46059_v62 }
 0x762   : > { %33825 = vmatmul.mubr.f32.vlgmr.msra.gmra.mrb[4].mxu0 %v46144_v60  ;;  %39483 = vmatprep.subr.bf16.mxu0 %v50340_v39 }
 0x763   : > { %34029 = vmatmul.mubr.f32.vlgmr.msra.gmra.mrb[6].mxu1 %v46144_v60  ;;  %39591 = vmatprep.subr.bf16.mxu1 %v50340_v39  ;;  %v46339_v60 = vsub.f32 %v13207_v30, %v13778_v17  ;;  %v46352_v30 = vsub.f32 %v13766_v34, %v46313_v23  ;;  %v50343_v17 = vand.u32 4294901760, %v46301_v5  ;;  %v50345_v34 = vand.u32 4294901760, %v46307_v49 }
 0x764   : > { %39485 = vmatpush3.bf16.msra.mxu0 %v46111_v35  ;;  %39593 = vmatpush3.bf16.msra.mxu1 %v46115_v57 }
 0x765   : > { %39486 = vmatprep.subr.bf16.mxu0 %v50340_v39  ;;  %39594 = vmatprep.subr.bf16.mxu1 %v50340_v39  ;;  %v13861_v44 = vsub.f32 %v46301_v5, %v50343_v17  ;;  %v14909_v40 = vsub.f32 %v46307_v49, %v50345_v34  ;;  %v46384_v34 = vpack.c.bf16 %v13784_v7, %v13781_v15  ;;  %v46387_v13 = vand.u32 4294901760, %v46352_v30 }
 0x766   : > { %33841 = vmatprep.mubr.msk.f32.mxu0 %vm41567_vm1, %v50341_v28  ;;  %34045 = vmatprep.mubr.msk.f32.mxu1 %vm41567_vm1, %v50341_v28  ;;  %v13855_v17 = vand.u32 4294901760, %v13854_v3  ;;  %v50348_v3 = vand.u32 4294901760, %v46345_v47 }
 0x768   : > { %39488 = vmatpush3.bf16.msra.mxu0 %v46117_v24  ;;  %39596 = vmatpush3.bf16.msra.mxu1 %v46119_v19  ;;  %v13862_v19 = vand.u32 4294901760, %v13861_v44  ;;  %v14916_v44 = vsub.f32 %v46345_v47, %v50348_v3  ;;  %v50349_v24 = vand.u32 4294901760, %v46347_v29 }
 0x769   : > { %39489 = vmatprep.subr.bf16.mxu0 %v50340_v39  ;;  %39597 = vmatprep.subr.bf16.mxu1 %v50340_v39 }
 0x76a   : > { %v14923_v57 = vsub.f32 %v46347_v29, %v50349_v24  ;;  %v14917_v51 = vand.u32 4294901760, %v14916_v44 }
 0x76c   : > { %39491 = vmatpush3.bf16.msra.mxu0 %v46121_v22  ;;  %39599 = vmatpush3.bf16.msra.mxu1 %v46123_v11  ;;  %v46380_v11 = vsub.f32 %v13209_v59, %v13784_v7  ;;  %v46382_v22 = vsub.f32 %v27418_v1, %v14829_v4  ;;  %v27420_v59 = vld [vmem:[%s49499_s3 + $0x68] sm:$0xff]  ;;  %v14910_v1 = vand.u32 4294901760, %v14909_v40  ;;  %v14924_v31 = vand.u32 4294901760, %v14923_v57 }
 0x76d   : > { %33839 = vmatprep.subr.mxu0 %v50341_v28  ;;  %34043 = vmatprep.subr.mxu1 %v50341_v28  ;;  %v46425_v3 = vand.u32 4294901760, %v27420_v59 }
 0x76e   : > { %v50351_v2 = vand.u32 4294901760, %v46380_v11  ;;  %v46457_v57 = vpack.c.bf16 %v14924_v31, %v14917_v51 }
 0x770   : > { %33840 = vmatpush3.msra.mxu0 %v46163_v12  ;;  %34044 = vmatpush3.msra.mxu1 %v46166_v61  ;;  %v46372_v12 = vsub.f32 %v13208_v25, %v13781_v15  ;;  %v46389_v25 = vsub.f32 %v27419_v46, %v14832_v9  ;;  %v46393_v61 = vpack.c.bf16 %v14832_v9, %v14829_v4  ;;  %v13210_v15 = vld [vmem:[%s49499_s3 + $0x30] sm:$0xff]  ;;  %v50346_v46 = vand.u32 4294901760, %v46337_v26 }
 0x771   : > { %33842 = vmatmul.mubr.f32.vlgmr.msra.gmra.mrb[4].mxu0 %v46138_v54  ;;  %39492 = vmatprep.subr.bf16.mxu0 %v50340_v39  ;;  %v50347_v4 = vand.u32 4294901760, %v46339_v60  ;;  %v46427_v9 = vpack.c.bf16 %v13862_v19, %v13855_v17  ;;  %v13889_v32 = vsub.f32 %v46380_v11, %v50351_v2  ;;  %v50352_v19 = vand.u32 4294901760, %v46382_v22 }
 0x772   : > { %34046 = vmatmul.mubr.f32.vlgmr.msra.gmra.mrb[6].mxu1 %v46138_v54  ;;  %39600 = vmatprep.subr.bf16.mxu1 %v50340_v39  ;;  %v13868_v7 = vsub.f32 %v46337_v26, %v50346_v46  ;;  %v13843_v46 = vsub.f32 %v46352_v30, %v46387_v13  ;;  %v50350_v18 = vand.u32 4294901760, %v46372_v12 }
 0x773   : > { %39494 = vmatpush3.bf16.msra.mxu0 %v45994_v14  ;;  %39602 = vmatpush3.bf16.msra.mxu1 %v46009_v37  ;;  %v14930_v17 = vsub.f32 %v46382_v22, %v50352_v19 }
 0x774   : > { %39495 = vmatprep.subr.bf16.mxu0 %v50340_v39  ;;  %39603 = vmatprep.subr.bf16.mxu1 %v50340_v39  ;;  %v13869_v35 = vand.u32 4294901760, %v13868_v7  ;;  %v13882_v6 = vsub.f32 %v46372_v12, %v50350_v18  ;;  %v13844_v27 = vand.u32 4294901760, %v13843_v46  ;;  %v46449_v18 = vsub.f32 %v27420_v59, %v46425_v3 }
 0x775   : > { %33858 = vmatprep.mubr.msk.f32.mxu0 %vm41567_vm1, %v50341_v28  ;;  %34062 = vmatprep.mubr.msk.f32.mxu1 %vm41567_vm1, %v50341_v28  ;;  %v14931_v59 = vand.u32 4294901760, %v14930_v17  ;;  %v46499_v17 = vpack.c.bf16 %v46307_v49, %v46303_v45 }
 0x776   : > { %50354 = vst [vmem:[#allocation26_spill] sm:$0xff] %v46449_v18  ;;  %v46465_v19 = vand.u32 4294901760, %v46449_v18 }
 0x777   : > { %39497 = vmatpush3.bf16.msra.mxu0 %v46013_v38  ;;  %39605 = vmatpush3.bf16.msra.mxu1 %v46019_v50 }
 0x778   : > { %39498 = vmatprep.subr.bf16.mxu0 %v50340_v39  ;;  %39606 = vmatprep.subr.bf16.mxu1 %v50340_v39  ;;  %v14944_v51 = vsub.f32 %v46449_v18, %v46465_v19 }
 0x77b   : > { %39500 = vmatpush3.bf16.msra.mxu0 %v46023_v20  ;;  %39608 = vmatpush3.bf16.msra.mxu1 %v46025_v52 }
 0x77c   : > { %33856 = vmatprep.subr.mxu0 %v50341_v28  ;;  %34060 = vmatprep.subr.mxu1 %v50341_v28 }
 0x77f   : > { %33857 = vmatpush3.msra.mxu0 %v46053_v33  ;;  %34061 = vmatpush3.msra.mxu1 %v46059_v62 }
 0x780   : > { %33859 = vmatmul.mubr.f32.vlgmr.msra.gmra.mrb[4].mxu0 %v46138_v54  ;;  %39501 = vmatprep.subr.bf16.mxu0 %v50340_v39 }
 0x781   : > { %34063 = vmatmul.mubr.f32.vlgmr.msra.gmra.mrb[6].mxu1 %v46138_v54  ;;  %39609 = vmatprep.subr.bf16.mxu1 %v50340_v39  ;;  %v14902_v54 = vsub.f32 %v46303_v45, %v50344_v56 }
 0x782   : > { %39503 = vmatpush3.bf16.msra.mxu0 %v46311_v8  ;;  %39611 = vmatpush3.bf16.msra.mxu1 %v46315_v41 }
 0x783   : > { %39504 = vmatprep.subr.bf16.mxu0 %v50340_v39  ;;  %39612 = vmatprep.subr.bf16.mxu1 %v50340_v39  ;;  %v14903_v56 = vand.u32 4294901760, %v14902_v54  ;;  %v13875_v54 = vsub.f32 %v46339_v60, %v50347_v4  ;;  %v46423_v4 = vand.u32 4294901760, %v13210_v15 }
 0x784   : > { %33875 = vmatprep.mubr.msk.f32.mxu0 %vm41567_vm1, %v50341_v28  ;;  %34079 = vmatprep.mubr.msk.f32.mxu1 %vm41567_vm1, %v50341_v28 }
 0x785   : > { %v46431_v24 = vpack.c.bf16 %v14910_v1, %v14903_v56  ;;  %v13876_v40 = vand.u32 4294901760, %v13875_v54  ;;  %v50353_v56 = vand.u32 4294901760, %v46389_v25  ;;  %v46446_v7 = vsub.f32 %v13210_v15, %v46423_v4 }
 0x786   : > { %39506 = vmatpush3.bf16.msra.mxu0 %v46331_v0  ;;  %39614 = vmatpush3.bf16.msra.mxu1 %v46343_v55  ;;  %v13883_v54 = vand.u32 4294901760, %v13882_v6  ;;  %v13890_v15 = vand.u32 4294901760, %v13889_v32  ;;  %v46489_v6 = vand.u32 4294901760, %v14944_v51  ;;  %v50358_v51 = vand.u32 4294901760, %v46307_v49 }
 0x787   : > { %39507 = vmatprep.subr.bf16.mxu0 %v50340_v39  ;;  %39615 = vmatprep.subr.bf16.mxu1 %v50340_v39  ;;  %v14937_v1 = vsub.f32 %v46389_v25, %v50353_v56  ;;  %v46455_v2 = vpack.c.bf16 %v13876_v40, %v13869_v35  ;;  %v46462_v46 = vand.u32 4294901760, %v46446_v7  ;;  %v46495_v40 = vpack.c.bf16 %v46301_v5, %v46299_v42 }
 0x788   : > { %v46511_v56 = vpack.c.bf16 %v46339_v60, %v46337_v26  ;;  %v50361_v49 = vand.u32 4294901760, %v46345_v47 }
 0x789   : > { %v14938_v44 = vand.u32 4294901760, %v14937_v1  ;;  %v13896_v31 = vsub.f32 %v46446_v7, %v46462_v46  ;;  %v46515_v1 = vpack.c.bf16 %v46347_v29, %v46345_v47 }
 0x78a   : > { %39509 = vmatpush3.bf16.msra.mxu0 %v46384_v34  ;;  %39617 = vmatpush3.bf16.msra.mxu1 %v46393_v61 }
 0x78b   : > { %33873 = vmatprep.subr.mxu0 %v50341_v28  ;;  %34077 = vmatprep.subr.mxu1 %v50341_v28  ;;  %v46477_v32 = vpack.c.bf16 %v14938_v44, %v14931_v59  ;;  %v46487_v35 = vand.u32 4294901760, %v13896_v31  ;;  %v50356_v59 = vand.u32 4294901760, %v46301_v5  ;;  %v50357_v31 = vand.u32 4294901760, %v46303_v45 }
 0x78c   : > { %v50360_v5 = vand.u32 4294901760, %v46339_v60  ;;  %v50363_v60 = vand.u32 4294901760, %v46372_v12 }
 0x78e   : > { %33874 = vmatpush3.msra.mxu0 %v46423_v4  ;;  %34078 = vmatpush3.msra.mxu1 %v46425_v3 }
 0x78f   : > { %33876 = vmatmul.mubr.f32.vlgmr.msra.gmra.mrb[4].mxu0 %v13844_v27  ;;  %39510 = vmatprep.subr.bf16.mxu0 %v50340_v39 }
 0x790   : > { %34080 = vmatmul.mubr.f32.vlgmr.msra.gmra.mrb[6].mxu1 %v13844_v27  ;;  %39618 = vmatprep.subr.bf16.mxu1 %v50340_v39  ;;  %v46473_v27 = vpack.c.bf16 %v13890_v15, %v13883_v54  ;;  %v46527_v54 = vpack.c.bf16 %v46380_v11, %v46372_v12  ;;  %v46531_v15 = vpack.c.bf16 %v46389_v25, %v46382_v22 }
 0x791   : > { %39512 = vmatpush3.bf16.msra.mxu0 %v46427_v9  ;;  %39620 = vmatpush3.bf16.msra.mxu1 %v46431_v24 }
 0x792   : > { %39513 = vmatprep.subr.bf16.mxu0 %v50340_v39  ;;  %39621 = vmatprep.subr.bf16.mxu1 %v50340_v39 }
 0x793   : > { %33892 = vmatprep.mubr.msk.f32.mxu0 %vm41567_vm1, %v50341_v28  ;;  %34096 = vmatprep.mubr.msk.f32.mxu1 %vm41567_vm1, %v50341_v28 }
 0x795   : > { %39515 = vmatpush3.bf16.msra.mxu0 %v46455_v2  ;;  %39623 = vmatpush3.bf16.msra.mxu1 %v46457_v57 }
 0x796   : > { %39516 = vmatprep.subr.bf16.mxu0 %v50340_v39  ;;  %39624 = vmatprep.subr.bf16.mxu1 %v50340_v39 }
 0x799   : > { %39518 = vmatpush3.bf16.msra.mxu0 %v46473_v27  ;;  %39626 = vmatpush3.bf16.msra.mxu1 %v46477_v32 }
 0x79a   : > { %33890 = vmatprep.subr.mxu0 %v50341_v28  ;;  %34094 = vmatprep.subr.mxu1 %v50341_v28 }
 0x79d   : > { %33891 = vmatpush3.msra.mxu0 %v46487_v35  ;;  %34095 = vmatpush3.msra.mxu1 %v46489_v6 }
 0x79e   : > { %33893 = vmatmul.mubr.f32.vlgmr.msra.gmra.mrb[4].mxu0 %v46313_v23  ;;  %39519 = vmatprep.subr.bf16.mxu0 %v50340_v39 }
 0x79f   : > { %34097 = vmatmul.mubr.f32.vlgmr.msra.gmra.mrb[6].mxu1 %v46313_v23  ;;  %39627 = vmatprep.subr.bf16.mxu1 %v50340_v39 }
 0x7a0   : > { %39521 = vmatpush3.bf16.msra.mxu0 %v46495_v40  ;;  %39629 = vmatpush3.bf16.msra.mxu1 %v46499_v17 }
 0x7a1   : > { %39522 = vmatprep.subr.bf16.mxu0 %v50340_v39  ;;  %39630 = vmatprep.subr.bf16.mxu1 %v50340_v39 }
 0x7a2   : > { %33909 = vmatprep.mubr.msk.f32.mxu0 %vm41567_vm1, %v50341_v28  ;;  %34113 = vmatprep.mubr.msk.f32.mxu1 %vm41567_vm1, %v50341_v28 }
 0x7a4   : > { %39524 = vmatpush3.bf16.msra.mxu0 %v46511_v56  ;;  %39632 = vmatpush3.bf16.msra.mxu1 %v46515_v1 }
 0x7a5   : > { %39525 = vmatprep.subr.bf16.mxu0 %v50340_v39  ;;  %39633 = vmatprep.subr.bf16.mxu1 %v50340_v39 }
 0x7a8   : > { %39527 = vmatpush3.bf16.msra.mxu0 %v46527_v54  ;;  %39635 = vmatpush3.bf16.msra.mxu1 %v46531_v15 }
 0x7a9   : > { %33907 = vmatprep.subr.mxu0 %v50341_v28  ;;  %34111 = vmatprep.subr.mxu1 %v50341_v28 }
 0x7ac   : > { %33908 = vmatpush3.msra.mxu0 %v46446_v7  ;;  %34112 = vmatpush3.msra.mxu1 %v46449_v18  ;;  %v46571_v18 = vpack.c.bf16 %v50358_v51, %v50357_v31 }
 0x7ad   : > { %33910 = vmatmul.mubr.f32.vlgmr.msra.gmra.mrb[4].mxu0 %v46352_v30  ;;  %39528 = vmatprep.subr.bf16.mxu0 %v50340_v39 }
 0x7ae   : > { %34114 = vmatmul.mubr.f32.vlgmr.msra.gmra.mrb[6].mxu1 %v46352_v30  ;;  %39636 = vmatprep.subr.bf16.mxu1 %v50340_v39  ;;  %v50355_v30 = vand.u32 4294901760, %v46299_v42  ;;  %v50359_v42 = vand.u32 4294901760, %v46337_v26  ;;  %v50365_v26 = vand.u32 4294901760, %v46382_v22  ;;  %v15341_v22 = vld [vmem:[#allocation2 + $0x2] ss:$2 sm:$0x1f] }
 0x7af   : > { %39530 = vmatpush3.bf16.msra.mxu0 %v46311_v8  ;;  %39638 = vmatpush3.bf16.msra.mxu1 %v46315_v41 }
 0x7b0   : > { %39531 = vmatprep.subr.bf16.mxu0 %v50340_v39  ;;  %39639 = vmatprep.subr.bf16.mxu1 %v50340_v39  ;;  %v46565_v44 = vpack.c.bf16 %v50356_v59, %v50355_v30  ;;  %v46585_v45 = vpack.c.bf16 %v50360_v5, %v50359_v42  ;;  %v50362_v30 = vand.u32 4294901760, %v46347_v29  ;;  %v50364_v29 = vand.u32 4294901760, %v46380_v11  ;;  %v50376_v5 = vld [vmem:[#allocation44_spill] sm:$0xff] }
 0x7b1   : > { %33926 = vmatprep.mubr.msk.f32.mxu0 %vm41567_vm1, %v50341_v28  ;;  %34130 = vmatprep.mubr.msk.f32.mxu1 %vm41567_vm1, %v50341_v28  ;;  %v15343_v11 = vsel %vm13199_vm3, %v15341_v22, 0 }
 0x7b2   : > { %v46591_v59 = vpack.c.bf16 %v50362_v30, %v50361_v49  ;;  %v46605_v47 = vpack.c.bf16 %v50364_v29, %v50363_v60  ;;  %v46642_v12 = vand.u32 4294901760, %v15343_v11  ;;  %v50377_v49 = vld [vmem:[#allocation13_spill] sm:$0xff]  ;;  %v50378_v30 = vld [vmem:[#allocation46_spill] sm:$0xff]  ;;  %v50379_v60 = vld [vmem:[#allocation48_spill] sm:$0xff] }
 0x7b3   : > { %39533 = vmatpush3.bf16.msra.mxu0 %v46331_v0  ;;  %39641 = vmatpush3.bf16.msra.mxu1 %v46343_v55  ;;  %v50380_v29 = vld [vmem:[#allocation8_spill] sm:$0xff] }
 0x7b4   : > { %39534 = vmatprep.subr.bf16.mxu0 %v50340_v39  ;;  %39642 = vmatprep.subr.bf16.mxu1 %v50340_v39 }
 0x7b7   : > { %39536 = vmatpush3.bf16.msra.mxu0 %v46384_v34  ;;  %39644 = vmatpush3.bf16.msra.mxu1 %v46393_v61 }
 0x7b8   : > { %33924 = vmatprep.subr.mxu0 %v50341_v28  ;;  %34128 = vmatprep.subr.mxu1 %v50341_v28 }
 0x7bb   : > { %33925 = vmatpush3.msra.mxu0 %v46423_v4  ;;  %34129 = vmatpush3.msra.mxu1 %v46425_v3 }
 0x7bc   : > { %33927 = vmatmul.mubr.f32.vlgmr.msra.gmra.mrb[4].mxu0 %v46387_v13  ;;  %39537 = vmatprep.subr.bf16.mxu0 %v50340_v39 }
 0x7bd   : > { %34131 = vmatmul.mubr.f32.vlgmr.msra.gmra.mrb[6].mxu1 %v46387_v13  ;;  %39645 = vmatprep.subr.bf16.mxu1 %v50340_v39  ;;  %v50366_v13 = vand.u32 4294901760, %v46389_v25  ;;  %v46651_v25 = vsub.f32 %v15343_v11, %v46642_v12 }
 0x7be   : > { %39539 = vmatpush3.bf16.msra.mxu0 %v46565_v44  ;;  %39647 = vmatpush3.bf16.msra.mxu1 %v46571_v18 }
 0x7bf   : > { %39540 = vmatprep.subr.bf16.mxu0 %v50340_v39  ;;  %39648 = vmatprep.subr.bf16.mxu1 %v50340_v39  ;;  %v46611_v31 = vpack.c.bf16 %v50366_v13, %v50365_v26  ;;  %v50381_v26 = vld [vmem:[#allocation10_spill] sm:$0xff] }
 0x7c0   : > { %33943 = vmatprep.mubr.msk.f32.mxu0 %vm41567_vm1, %v50341_v28  ;;  %34147 = vmatprep.mubr.msk.f32.mxu1 %vm41567_vm1, %v50341_v28 }
 0x7c2   : > { %39542 = vmatpush3.bf16.msra.mxu0 %v46585_v45  ;;  %39650 = vmatpush3.bf16.msra.mxu1 %v46591_v59 }
 0x7c3   : > { %39543 = vmatprep.subr.bf16.mxu0 %v50340_v39  ;;  %39651 = vmatprep.subr.bf16.mxu1 %v50340_v39 }
 0x7c6   : > { %39545 = vmatpush3.bf16.msra.mxu0 %v46605_v47  ;;  %39653 = vmatpush3.bf16.msra.mxu1 %v46611_v31 }
 0x7c7   : > { %33941 = vmatprep.subr.mxu0 %v50341_v28  ;;  %34145 = vmatprep.subr.mxu1 %v50341_v28 }
 0x7ca   : > { %33942 = vmatpush3.msra.mxu0 %v46462_v46  ;;  %34146 = vmatpush3.msra.mxu1 %v46465_v19 }
 0x7cb   : > { %33944 = vmatmul.mubr.f32.vlgmr.msra.gmra.mrb[4].mxu0 %v46313_v23  ;;  %39546 = vmatprep.subr.bf16.mxu0 %v50340_v39 }
 0x7cc   : > { %34148 = vmatmul.mubr.f32.vlgmr.msra.gmra.mrb[6].mxu1 %v46313_v23  ;;  %39654 = vmatprep.subr.bf16.mxu1 %v50340_v39 }
 0x7cd   : > { %39548 = vmatpush3.bf16.msra.mxu0 %v46311_v8  ;;  %39656 = vmatpush3.bf16.msra.mxu1 %v46315_v41 }
 0x7ce   : > { %39549 = vmatprep.subr.bf16.mxu0 %v50340_v39  ;;  %39657 = vmatprep.subr.bf16.mxu1 %v50340_v39 }
 0x7cf   : > { %33960 = vmatprep.mubr.msk.f32.mxu0 %vm41567_vm1, %v50341_v28  ;;  %34164 = vmatprep.mubr.msk.f32.mxu1 %vm41567_vm1, %v50341_v28 }
 0x7d1   : > { %39551 = vmatpush3.bf16.msra.mxu0 %v46331_v0  ;;  %39659 = vmatpush3.bf16.msra.mxu1 %v46343_v55 }
 0x7d2   : > { %39552 = vmatprep.subr.bf16.mxu0 %v50340_v39  ;;  %39660 = vmatprep.subr.bf16.mxu1 %v50340_v39 }
 0x7d5   : > { %39554 = vmatpush3.bf16.msra.mxu0 %v46384_v34  ;;  %39662 = vmatpush3.bf16.msra.mxu1 %v46393_v61 }
 0x7d6   : > { %33958 = vmatprep.subr.mxu0 %v50341_v28  ;;  %34162 = vmatprep.subr.mxu1 %v50341_v28 }
 0x7d9   : > { %33959 = vmatpush3.msra.mxu0 %v46423_v4  ;;  %34163 = vmatpush3.msra.mxu1 %v46425_v3 }
 0x7da   : > { %33961 = vmatmul.mubr.f32.vlgmr.msra.gmra.mrb[4].mxu0 %v46313_v23  ;;  %34165 = vmatmul.mubr.f32.vlgmr.msra.gmra.mrb[6].mxu1 %v46313_v23  ;;  %v46662_v23 = vand.u32 4294901760, %v46651_v25 }
 0x7db   : > { %39663 = vmatprep.subr.bf16.mxu0 %v50340_v39  ;;  %39771 = vmatprep.subr.bf16.mxu1 %v50340_v39 }
 0x7dc   : > { %39665 = vmatpush3.bf16.msra.mxu0 %v45994_v14  ;;  %39773 = vmatpush3.bf16.msra.mxu1 %v46009_v37  ;;  %v15420_v51 = vsub.f32 %v46651_v25, %v46662_v23 }
 0x7dd   : > { %39666 = vmatprep.subr.bf16.mxu0 %v50340_v39  ;;  %39774 = vmatprep.subr.bf16.mxu1 %v50340_v39 }
 0x7de   : > { %34181 = vmatprep.mubr.msk.f32.mxu0 %vm41567_vm1, %v50341_v28  ;;  %34385 = vmatprep.mubr.msk.f32.mxu1 %vm41567_vm1, %v50341_v28  ;;  %v46674_v42 = vand.u32 4294901760, %v15420_v51 }
 0x7e0   : > { %39668 = vmatpush3.bf16.msra.mxu0 %v46013_v38  ;;  %39776 = vmatpush3.bf16.msra.mxu1 %v46019_v50 }
 0x7e1   : > { %39669 = vmatprep.subr.bf16.mxu0 %v50340_v39  ;;  %39777 = vmatprep.subr.bf16.mxu1 %v50340_v39 }
 0x7e4   : > { %39671 = vmatpush3.bf16.msra.mxu0 %v46023_v20  ;;  %39779 = vmatpush3.bf16.msra.mxu1 %v46025_v52 }
 0x7e5   : > { %34179 = vmatprep.subr.mxu0 %v50341_v28  ;;  %34383 = vmatprep.subr.mxu1 %v50341_v28 }
 0x7e8   : > { %34180 = vmatpush3.msra.mxu0 %v46053_v33  ;;  %34384 = vmatpush3.msra.mxu1 %v46059_v62 }
 0x7e9   : > { %34182 = vmatmul.mubr.f32.vlgmr.msra.gmra.mrb[6].mxu0 %v46674_v42  ;;  %39672 = vmatprep.subr.bf16.mxu0 %v50340_v39 }
 0x7ea   : > { %34386 = vmatmul.mubr.f32.vlgmr.msra.gmra.mrb[8].mxu1 %v46674_v42  ;;  %39780 = vmatprep.subr.bf16.mxu1 %v50340_v39 }
 0x7eb   : > { %39674 = vmatpush3.bf16.msra.mxu0 %v46075_v48  ;;  %39782 = vmatpush3.bf16.msra.mxu1 %v46079_v43  ;;  %v50368_v48 = vld [vmem:[#allocation56_spill] sm:$0xff]  ;;  %v50369_v43 = vld [vmem:[#allocation57_spill] sm:$0xff] }
 0x7ec   : > { %39675 = vmatprep.subr.bf16.mxu0 %v50340_v39  ;;  %39783 = vmatprep.subr.bf16.mxu1 %v50340_v39 }
 0x7ed   : > { %34198 = vmatprep.mubr.msk.f32.mxu0 %vm41567_vm1, %v50341_v28  ;;  %34402 = vmatprep.mubr.msk.f32.mxu1 %vm41567_vm1, %v50341_v28 }
 0x7ef   : > { %39677 = vmatpush3.bf16.msra.mxu0 %v46083_v36  ;;  %39785 = vmatpush3.bf16.msra.mxu1 %v46085_v16  ;;  %v50370_v36 = vld [vmem:[#allocation40_spill] sm:$0xff]  ;;  %v50371_v16 = vld [vmem:[#allocation22_spill] sm:$0xff] }
 0x7f0   : > { %39678 = vmatprep.subr.bf16.mxu0 %v50340_v39  ;;  %39786 = vmatprep.subr.bf16.mxu1 %v50340_v39 }
 0x7f3   : > { %39680 = vmatpush3.bf16.msra.mxu0 %v46087_v10  ;;  %39788 = vmatpush3.bf16.msra.mxu1 %v46089_v58  ;;  %v50367_v10 = vld [vmem:[#allocation55_spill] sm:$0xff] }
 0x7f4   : > { %34196 = vmatprep.subr.mxu0 %v50341_v28  ;;  %34400 = vmatprep.subr.mxu1 %v50341_v28  ;;  %v50372_v58 = vld [vmem:[#allocation15_spill] sm:$0xff] }
 0x7f7   : > { %34197 = vmatpush3.msra.mxu0 %v46184_v63  ;;  %34401 = vmatpush3.msra.mxu1 %v46186_v53  ;;  %v50374_v63 = vld [vmem:[#allocation42_spill] sm:$0xff]  ;;  %v50375_v53 = vld [vmem:[#allocation16_spill] sm:$0xff] }
 0x7f8   : > { %34199 = vmatmul.mubr.f32.vlgmr.msra.gmra.mrb[6].mxu0 %v46642_v12  ;;  %39681 = vmatprep.subr.bf16.mxu0 %v50340_v39 }
 0x7f9   : > { %34403 = vmatmul.mubr.f32.vlgmr.msra.gmra.mrb[8].mxu1 %v46642_v12  ;;  %39789 = vmatprep.subr.bf16.mxu1 %v50340_v39 }
 0x7fa   : > { %39683 = vmatpush3.bf16.msra.mxu0 %v46093_v21  ;;  %39791 = vmatpush3.bf16.msra.mxu1 %v50367_v10  ;;  %v50373_v21 = vld [vmem:[#allocation7_spill] sm:$0xff] }
 0x7fb   : > { %39684 = vmatprep.subr.bf16.mxu0 %v50340_v39  ;;  %39792 = vmatprep.subr.bf16.mxu1 %v50340_v39 }
 0x7fc   : > { %34215 = vmatprep.mubr.msk.f32.mxu0 %vm41567_vm1, %v50341_v28  ;;  %34419 = vmatprep.mubr.msk.f32.mxu1 %vm41567_vm1, %v50341_v28 }
 0x7fe   : > { %39686 = vmatpush3.bf16.msra.mxu0 %v50368_v48  ;;  %39794 = vmatpush3.bf16.msra.mxu1 %v50369_v43 }
 0x7ff   : > { %39687 = vmatprep.subr.bf16.mxu0 %v50340_v39  ;;  %39795 = vmatprep.subr.bf16.mxu1 %v50340_v39 }
 0x802   : > { %39689 = vmatpush3.bf16.msra.mxu0 %v50370_v36  ;;  %39797 = vmatpush3.bf16.msra.mxu1 %v50371_v16 }
 0x803   : > { %34213 = vmatprep.subr.mxu0 %v50341_v28  ;;  %34417 = vmatprep.subr.mxu1 %v50341_v28 }
 0x806   : > { %34214 = vmatpush3.msra.mxu0 %v50372_v58  ;;  %34418 = vmatpush3.msra.mxu1 %v50373_v21 }
 0x807   : > { %34216 = vmatmul.mubr.f32.vlgmr.msra.gmra.mrb[6].mxu0 %v46651_v25  ;;  %39690 = vmatprep.subr.bf16.mxu0 %v50340_v39 }
 0x808   : > { %34420 = vmatmul.mubr.f32.vlgmr.msra.gmra.mrb[8].mxu1 %v46651_v25  ;;  %39798 = vmatprep.subr.bf16.mxu1 %v50340_v39 }
 0x809   : > { %39692 = vmatpush3.bf16.msra.mxu0 %v45994_v14  ;;  %39800 = vmatpush3.bf16.msra.mxu1 %v46009_v37 }
 0x80a   : > { %39693 = vmatprep.subr.bf16.mxu0 %v50340_v39  ;;  %39801 = vmatprep.subr.bf16.mxu1 %v50340_v39 }
 0x80b   : > { %34232 = vmatprep.mubr.msk.f32.mxu0 %vm41567_vm1, %v50341_v28  ;;  %34436 = vmatprep.mubr.msk.f32.mxu1 %vm41567_vm1, %v50341_v28 }
 0x80d   : > { %39695 = vmatpush3.bf16.msra.mxu0 %v46013_v38  ;;  %39803 = vmatpush3.bf16.msra.mxu1 %v46019_v50 }
 0x80e   : > { %39696 = vmatprep.subr.bf16.mxu0 %v50340_v39  ;;  %39804 = vmatprep.subr.bf16.mxu1 %v50340_v39 }
 0x811   : > { %39698 = vmatpush3.bf16.msra.mxu0 %v46023_v20  ;;  %39806 = vmatpush3.bf16.msra.mxu1 %v46025_v52 }
 0x812   : > { %34230 = vmatprep.subr.mxu0 %v50341_v28  ;;  %34434 = vmatprep.subr.mxu1 %v50341_v28 }
 0x815   : > { %34231 = vmatpush3.msra.mxu0 %v46053_v33  ;;  %34435 = vmatpush3.msra.mxu1 %v46059_v62 }
 0x816   : > { %34233 = vmatmul.mubr.f32.vlgmr.msra.gmra.mrb[6].mxu0 %v46662_v23  ;;  %39699 = vmatprep.subr.bf16.mxu0 %v50340_v39 }
 0x817   : > { %34437 = vmatmul.mubr.f32.vlgmr.msra.gmra.mrb[8].mxu1 %v46662_v23  ;;  %39807 = vmatprep.subr.bf16.mxu1 %v50340_v39 }
 0x818   : > { %39701 = vmatpush3.bf16.msra.mxu0 %v50374_v63  ;;  %39809 = vmatpush3.bf16.msra.mxu1 %v50375_v53 }
 0x819   : > { %39702 = vmatprep.subr.bf16.mxu0 %v50340_v39  ;;  %39810 = vmatprep.subr.bf16.mxu1 %v50340_v39 }
 0x81a   : > { %34249 = vmatprep.mubr.msk.f32.mxu0 %vm41567_vm1, %v50341_v28  ;;  %34453 = vmatprep.mubr.msk.f32.mxu1 %vm41567_vm1, %v50341_v28 }
 0x81c   : > { %39704 = vmatpush3.bf16.msra.mxu0 %v50376_v5  ;;  %39812 = vmatpush3.bf16.msra.mxu1 %v50377_v49 }
 0x81d   : > { %39705 = vmatprep.subr.bf16.mxu0 %v50340_v39  ;;  %39813 = vmatprep.subr.bf16.mxu1 %v50340_v39 }
 0x820   : > { %39707 = vmatpush3.bf16.msra.mxu0 %v50378_v30  ;;  %39815 = vmatpush3.bf16.msra.mxu1 %v50379_v60 }
 0x821   : > { %34247 = vmatprep.subr.mxu0 %v50341_v28  ;;  %34451 = vmatprep.subr.mxu1 %v50341_v28 }
 0x824   : > { %34248 = vmatpush3.msra.mxu0 %v50380_v29  ;;  %34452 = vmatpush3.msra.mxu1 %v50381_v26 }
 0x825   : > { %34250 = vmatmul.mubr.f32.vlgmr.msra.gmra.mrb[6].mxu0 %v46642_v12  ;;  %39708 = vmatprep.subr.bf16.mxu0 %v50340_v39 }
 0x826   : > { %34454 = vmatmul.mubr.f32.vlgmr.msra.gmra.mrb[8].mxu1 %v46642_v12  ;;  %39816 = vmatprep.subr.bf16.mxu1 %v50340_v39 }
 0x827   : > { %39710 = vmatpush3.bf16.msra.mxu0 %v45994_v14  ;;  %39818 = vmatpush3.bf16.msra.mxu1 %v46009_v37  ;;  %v50382_v14 = vld [vmem:[#allocation23_spill] sm:$0xff]  ;;  %v50383_v37 = vld [vmem:[#allocation4_spill] sm:$0xff] }
 0x828   : > { %39711 = vmatprep.subr.bf16.mxu0 %v50340_v39  ;;  %39819 = vmatprep.subr.bf16.mxu1 %v50340_v39 }
 0x829   : > { %34266 = vmatprep.mubr.msk.f32.mxu0 %vm41567_vm1, %v50341_v28  ;;  %34470 = vmatprep.mubr.msk.f32.mxu1 %vm41567_vm1, %v50341_v28 }
 0x82b   : > { %39713 = vmatpush3.bf16.msra.mxu0 %v46013_v38  ;;  %39821 = vmatpush3.bf16.msra.mxu1 %v46019_v50  ;;  %v50384_v38 = vld [vmem:[#allocation26_spill] sm:$0xff]  ;;  %v50385_v50 = vld [vmem:[#allocation5_spill] sm:$0xff] }
 0x82c   : > { %39714 = vmatprep.subr.bf16.mxu0 %v50340_v39  ;;  %39822 = vmatprep.subr.bf16.mxu1 %v50340_v39 }
 0x82f   : > { %39716 = vmatpush3.bf16.msra.mxu0 %v46023_v20  ;;  %39824 = vmatpush3.bf16.msra.mxu1 %v46025_v52  ;;  %v50386_v20 = vld [vmem:[#allocation19_spill] sm:$0xff]  ;;  %v27435_v52 = vld [vmem:[%s49499_s3 + $0xe0] sm:$0xff] }
 0x830   : > { %34264 = vmatprep.subr.mxu0 %v50341_v28  ;;  %34468 = vmatprep.subr.mxu1 %v50341_v28 }
 0x833   : > { %34265 = vmatpush3.msra.mxu0 %v46053_v33  ;;  %34469 = vmatpush3.msra.mxu1 %v46059_v62  ;;  %v27436_v33 = vld [vmem:[%s49499_s3 + $0xe8] sm:$0xff]  ;;  %v27442_v62 = vld [vmem:[%s49499_s3 + $0x118] sm:$0xff] }
 0x834   : > { %34267 = vmatmul.mubr.f32.vlgmr.msra.gmra.mrb[6].mxu0 %v46642_v12  ;;  %39717 = vmatprep.subr.bf16.mxu0 %v50340_v39 }
 0x835   : > { %34471 = vmatmul.mubr.f32.vlgmr.msra.gmra.mrb[8].mxu1 %v46642_v12  ;;  %39825 = vmatprep.subr.bf16.mxu1 %v50340_v39 }
 0x836   : > { %39719 = vmatpush3.bf16.msra.mxu0 %v46311_v8  ;;  %39827 = vmatpush3.bf16.msra.mxu1 %v46315_v41 }
 0x837   : > { %39720 = vmatprep.subr.bf16.mxu0 %v50340_v39  ;;  %39828 = vmatprep.subr.bf16.mxu1 %v50340_v39 }
 0x838   : > { %34283 = vmatprep.mubr.msk.f32.mxu0 %vm41567_vm1, %v50341_v28  ;;  %34487 = vmatprep.mubr.msk.f32.mxu1 %vm41567_vm1, %v50341_v28 }
 0x83a   : > { %39722 = vmatpush3.bf16.msra.mxu0 %v46331_v0  ;;  %39830 = vmatpush3.bf16.msra.mxu1 %v46343_v55 }
 0x83b   : > { %39723 = vmatprep.subr.bf16.mxu0 %v50340_v39  ;;  %39831 = vmatprep.subr.bf16.mxu1 %v50340_v39 }
 0x83e   : > { %39725 = vmatpush3.bf16.msra.mxu0 %v46384_v34  ;;  %39833 = vmatpush3.bf16.msra.mxu1 %v46393_v61 }
 0x83f   : > { %34281 = vmatprep.subr.mxu0 %v50341_v28  ;;  %34485 = vmatprep.subr.mxu1 %v50341_v28 }
 0x842   : > { %34282 = vmatpush3.msra.mxu0 %v46423_v4  ;;  %34486 = vmatpush3.msra.mxu1 %v46425_v3 }
 0x843   : > { %34284 = vmatmul.mubr.f32.vlgmr.msra.gmra.mrb[6].mxu0 %v50382_v14  ;;  %39726 = vmatprep.subr.bf16.mxu0 %v50340_v39 }
 0x844   : > { %34488 = vmatmul.mubr.f32.vlgmr.msra.gmra.mrb[8].mxu1 %v50382_v14  ;;  %39834 = vmatprep.subr.bf16.mxu1 %v50340_v39 }
 0x845   : > { %39728 = vmatpush3.bf16.msra.mxu0 %v46427_v9  ;;  %39836 = vmatpush3.bf16.msra.mxu1 %v46431_v24  ;;  %v17461_v9 = vand.u32 4294901760, %v27436_v33  ;;  %v17983_v24 = vand.u32 4294901760, %v27442_v62 }
 0x846   : > { %39729 = vmatprep.subr.bf16.mxu0 %v50340_v39  ;;  %39837 = vmatprep.subr.bf16.mxu1 %v50340_v39 }
 0x847   : > { %34300 = vmatprep.mubr.msk.f32.mxu0 %vm41567_vm1, %v50341_v28  ;;  %34504 = vmatprep.mubr.msk.f32.mxu1 %vm41567_vm1, %v50341_v28 }
 0x849   : > { %39731 = vmatpush3.bf16.msra.mxu0 %v46455_v2  ;;  %39839 = vmatpush3.bf16.msra.mxu1 %v46457_v57  ;;  %v27438_v2 = vld [vmem:[%s49499_s3 + $0xf8] sm:$0xff] }
 0x84a   : > { %39732 = vmatprep.subr.bf16.mxu0 %v50340_v39  ;;  %39840 = vmatprep.subr.bf16.mxu1 %v50340_v39 }
 0x84d   : > { %39734 = vmatpush3.bf16.msra.mxu0 %v46473_v27  ;;  %39842 = vmatpush3.bf16.msra.mxu1 %v46477_v32 }
 0x84e   : > { %34298 = vmatprep.subr.mxu0 %v50341_v28  ;;  %34502 = vmatprep.subr.mxu1 %v50341_v28 }
 0x851   : > { %34299 = vmatpush3.msra.mxu0 %v46487_v35  ;;  %34503 = vmatpush3.msra.mxu1 %v46489_v6  ;;  %v17467_v35 = vand.u32 4294901760, %v27438_v2 }
 0x852   : > { %34301 = vmatmul.mubr.f32.vlgmr.msra.gmra.mrb[6].mxu0 %v50383_v37  ;;  %39735 = vmatprep.subr.bf16.mxu0 %v50340_v39 }
 0x853   : > { %34505 = vmatmul.mubr.f32.vlgmr.msra.gmra.mrb[8].mxu1 %v50383_v37  ;;  %39843 = vmatprep.subr.bf16.mxu1 %v50340_v39  ;;  %v46974_v13 = vsub.f32 %v27438_v2, %v17467_v35 }
 0x854   : > { %39737 = vmatpush3.bf16.msra.mxu0 %v46495_v40  ;;  %39845 = vmatpush3.bf16.msra.mxu1 %v46499_v17 }
 0x855   : > { %39738 = vmatprep.subr.bf16.mxu0 %v50340_v39  ;;  %39846 = vmatprep.subr.bf16.mxu1 %v50340_v39  ;;  %v17563_v63 = vand.u32 4294901760, %v46974_v13 }
 0x856   : > { %34317 = vmatprep.mubr.msk.f32.mxu0 %vm41567_vm1, %v50341_v28  ;;  %34521 = vmatprep.mubr.msk.f32.mxu1 %vm41567_vm1, %v50341_v28 }
 0x858   : > { %39740 = vmatpush3.bf16.msra.mxu0 %v46511_v56  ;;  %39848 = vmatpush3.bf16.msra.mxu1 %v46515_v1 }
 0x859   : > { %39741 = vmatprep.subr.bf16.mxu0 %v50340_v39  ;;  %39849 = vmatprep.subr.bf16.mxu1 %v50340_v39 }
 0x85c   : > { %39743 = vmatpush3.bf16.msra.mxu0 %v46527_v54  ;;  %39851 = vmatpush3.bf16.msra.mxu1 %v46531_v15  ;;  %v27446_v15 = vld [vmem:[%s49499_s3 + $0x138] sm:$0xff] }
 0x85d   : > { %34315 = vmatprep.subr.mxu0 %v50341_v28  ;;  %34519 = vmatprep.subr.mxu1 %v50341_v28  ;;  %v17995_v10 = vand.u32 4294901760, %v27446_v15 }
 0x85f   : > { %v47016_v60 = vsub.f32 %v27446_v15, %v17995_v10 }
 0x860   : > { %34316 = vmatpush3.msra.mxu0 %v46446_v7  ;;  %34520 = vmatpush3.msra.mxu1 %v50384_v38 }
 0x861   : > { %34318 = vmatmul.mubr.f32.vlgmr.msra.gmra.mrb[6].mxu0 %v50385_v50  ;;  %39744 = vmatprep.subr.bf16.mxu0 %v50340_v39 }
 0x862   : > { %34522 = vmatmul.mubr.f32.vlgmr.msra.gmra.mrb[8].mxu1 %v50385_v50  ;;  %39852 = vmatprep.subr.bf16.mxu1 %v50340_v39  ;;  %v27441_v50 = vld [vmem:[%s49499_s3 + $0x110] sm:$0xff] }
 0x863   : > { %39746 = vmatpush3.bf16.msra.mxu0 %v46311_v8  ;;  %39854 = vmatpush3.bf16.msra.mxu1 %v46315_v41 }
 0x864   : > { %39747 = vmatprep.subr.bf16.mxu0 %v50340_v39  ;;  %39855 = vmatprep.subr.bf16.mxu1 %v50340_v39 }
 0x865   : > { %34334 = vmatprep.mubr.msk.f32.mxu0 %vm41567_vm1, %v50341_v28  ;;  %34538 = vmatprep.mubr.msk.f32.mxu1 %vm41567_vm1, %v50341_v28 }
 0x867   : > { %39749 = vmatpush3.bf16.msra.mxu0 %v46331_v0  ;;  %39857 = vmatpush3.bf16.msra.mxu1 %v46343_v55 }
 0x868   : > { %39750 = vmatprep.subr.bf16.mxu0 %v50340_v39  ;;  %39858 = vmatprep.subr.bf16.mxu1 %v50340_v39 }
 0x86b   : > { %39752 = vmatpush3.bf16.msra.mxu0 %v46384_v34  ;;  %39860 = vmatpush3.bf16.msra.mxu1 %v46393_v61 }
 0x86c   : > { %34332 = vmatprep.subr.mxu0 %v50341_v28  ;;  %34536 = vmatprep.subr.mxu1 %v50341_v28 }
 0x86f   : > { %34333 = vmatpush3.msra.mxu0 %v46423_v4  ;;  %34537 = vmatpush3.msra.mxu1 %v46425_v3 }
 0x870   : > { %34335 = vmatmul.mubr.f32.vlgmr.msra.gmra.mrb[6].mxu0 %v50386_v20  ;;  %39753 = vmatprep.subr.bf16.mxu0 %v50340_v39 }
 0x871   : > { %34539 = vmatmul.mubr.f32.vlgmr.msra.gmra.mrb[8].mxu1 %v50386_v20  ;;  %39861 = vmatprep.subr.bf16.mxu1 %v50340_v39  ;;  %v27448_v20 = vld [vmem:[%s49499_s3 + $0x148] sm:$0xff] }
 0x872   : > { %39755 = vmatpush3.bf16.msra.mxu0 %v46565_v44  ;;  %39863 = vmatpush3.bf16.msra.mxu1 %v46571_v18  ;;  %v27437_v18 = vld [vmem:[%s49499_s3 + $0xf0] sm:$0xff]  ;;  %v27447_v44 = vld [vmem:[%s49499_s3 + $0x140] sm:$0xff] }
 0x873   : > { %39756 = vmatprep.subr.bf16.mxu0 %v50340_v39  ;;  %39864 = vmatprep.subr.bf16.mxu1 %v50340_v39  ;;  %v17464_v32 = vand.u32 4294901760, %v27437_v18  ;;  %v17998_v48 = vand.u32 4294901760, %v27447_v44 }
 0x874   : > { %34351 = vmatprep.mubr.msk.f32.mxu0 %vm41567_vm1, %v50341_v28  ;;  %34555 = vmatprep.mubr.msk.f32.mxu1 %vm41567_vm1, %v50341_v28 }
 0x875   : > { %v47018_v29 = vsub.f32 %v27447_v44, %v17998_v48  ;;  %v47024_v14 = vpack.c.bf16 %v17998_v48, %v17995_v10 }
 0x876   : > { %39758 = vmatpush3.bf16.msra.mxu0 %v46585_v45  ;;  %39866 = vmatpush3.bf16.msra.mxu1 %v46591_v59 }
 0x877   : > { %39759 = vmatprep.subr.bf16.mxu0 %v50340_v39  ;;  %39867 = vmatprep.subr.bf16.mxu1 %v50340_v39  ;;  %v18102_v2 = vand.u32 4294901760, %v47018_v29 }
 0x87a   : > { %39761 = vmatpush3.bf16.msra.mxu0 %v46605_v47  ;;  %39869 = vmatpush3.bf16.msra.mxu1 %v46611_v31  ;;  %v46972_v47 = vsub.f32 %v27437_v18, %v17464_v32  ;;  %v46984_v31 = vpack.c.bf16 %v17467_v35, %v17464_v32  ;;  %v18095_v18 = vand.u32 4294901760, %v47016_v60 }
 0x87b   : > { %34349 = vmatprep.subr.mxu0 %v50341_v28  ;;  %34553 = vmatprep.subr.mxu1 %v50341_v28 }
 0x87c   : > { %v17556_v21 = vand.u32 4294901760, %v46972_v47 }
 0x87e   : > { %34350 = vmatpush3.msra.mxu0 %v46462_v46  ;;  %34554 = vmatpush3.msra.mxu1 %v46465_v19  ;;  %v46940_v46 = vsub.f32 %v27436_v33, %v17461_v9  ;;  %v46944_v19 = vsub.f32 %v27442_v62, %v17983_v24  ;;  %v17557_v62 = vsub.f32 %v46972_v47, %v17556_v21 }
 0x87f   : > { %34352 = vmatmul.mubr.f32.vlgmr.msra.gmra.mrb[6].mxu0 %v50383_v37  ;;  %39762 = vmatprep.subr.bf16.mxu0 %v50340_v39 }
 0x880   : > { %34556 = vmatmul.mubr.f32.vlgmr.msra.gmra.mrb[8].mxu1 %v50383_v37  ;;  %39870 = vmatprep.subr.bf16.mxu1 %v50340_v39  ;;  %v17549_v54 = vand.u32 4294901760, %v46940_v46  ;;  %v18067_v45 = vand.u32 4294901760, %v46944_v19 }
 0x881   : > { %39764 = vmatpush3.bf16.msra.mxu0 %v46311_v8  ;;  %39872 = vmatpush3.bf16.msra.mxu1 %v46315_v41  ;;  %v27443_v8 = vld [vmem:[%s49499_s3 + $0x120] sm:$0xff]  ;;  %v17458_v41 = vand.u32 4294901760, %v27435_v52 }
 0x882   : > { %39765 = vmatprep.subr.bf16.mxu0 %v50340_v39  ;;  %39873 = vmatprep.subr.bf16.mxu1 %v50340_v39  ;;  %v17986_v7 = vand.u32 4294901760, %v27443_v8  ;;  %v17550_v36 = vsub.f32 %v46940_v46, %v17549_v54  ;;  %v18068_v16 = vsub.f32 %v46944_v19, %v18067_v45 }
 0x883   : > { %34368 = vmatprep.mubr.msk.f32.mxu0 %vm41567_vm1, %v50341_v28  ;;  %34572 = vmatprep.mubr.msk.f32.mxu1 %vm41567_vm1, %v50341_v28  ;;  %v46938_v57 = vsub.f32 %v27435_v52, %v17458_v41  ;;  %v46950_v17 = vpack.c.bf16 %v17461_v9, %v17458_v41 }
 0x884   : > { %v46946_v27 = vsub.f32 %v27443_v8, %v17986_v7  ;;  %v46952_v56 = vpack.c.bf16 %v17986_v7, %v17983_v24  ;;  %v17551_v38 = vand.u32 4294901760, %v17550_v36  ;;  %v18069_v52 = vand.u32 4294901760, %v18068_v16 }
 0x885   : > { %39767 = vmatpush3.bf16.msra.mxu0 %v46331_v0  ;;  %39875 = vmatpush3.bf16.msra.mxu1 %v46343_v55  ;;  %v27444_v55 = vld [vmem:[%s49499_s3 + $0x128] sm:$0xff]  ;;  %v27445_v0 = vld [vmem:[%s49499_s3 + $0x130] sm:$0xff]  ;;  %v17542_v1 = vand.u32 4294901760, %v46938_v57  ;;  %v17564_v8 = vsub.f32 %v46974_v13, %v17563_v63 }
 0x886   : > { %39768 = vmatprep.subr.bf16.mxu0 %v50340_v39  ;;  %39876 = vmatprep.subr.bf16.mxu1 %v50340_v39  ;;  %v17989_v6 = vand.u32 4294901760, %v27444_v55  ;;  %v17992_v40 = vand.u32 4294901760, %v27445_v0  ;;  %v18074_v59 = vand.u32 4294901760, %v46946_v27 }
 0x887   : > { %v17543_v43 = vsub.f32 %v46938_v57, %v17542_v1 }
 0x888   : > { %v46986_v22 = vpack.c.bf16 %v17992_v40, %v17989_v6  ;;  %v18075_v58 = vsub.f32 %v46946_v27, %v18074_v59 }
 0x889   : > { %39770 = vmatpush3.bf16.msra.mxu0 %v46384_v34  ;;  %39878 = vmatpush3.bf16.msra.mxu1 %v46393_v61  ;;  %v27439_v61 = vld [vmem:[%s49499_s3 + $0x100] sm:$0xff]  ;;  %v27440_v34 = vld [vmem:[%s49499_s3 + $0x108] sm:$0xff] }
 0x88a   : > { %34366 = vmatprep.subr.mxu0 %v50341_v28  ;;  %34570 = vmatprep.subr.mxu1 %v50341_v28  ;;  %v17470_v11 = vand.u32 4294901760, %v27439_v61  ;;  %v17473_v51 = vand.u32 4294901760, %v27440_v34  ;;  %v18076_v33 = vand.u32 4294901760, %v18075_v58 }
 0x88c   : > { %v47012_v49 = vsub.f32 %v27439_v61, %v17470_v11  ;;  %v47014_v30 = vsub.f32 %v27440_v34, %v17473_v51  ;;  %v47022_v26 = vpack.c.bf16 %v17473_v51, %v17470_v11  ;;  %v47060_v35 = vpack.c.bf16 %v18076_v33, %v18069_v52 }
 0x88d   : > { %34367 = vmatpush3.msra.mxu0 %v46423_v4  ;;  %34571 = vmatpush3.msra.mxu1 %v46425_v3  ;;  %v46978_v4 = vsub.f32 %v27444_v55, %v17989_v6  ;;  %v46980_v3 = vsub.f32 %v27445_v0, %v17992_v40  ;;  %v47052_v55 = vand.u32 4294901760, %v27441_v50  ;;  %v47054_v0 = vand.u32 4294901760, %v27448_v20 }
 0x88e   : > { %34369 = vmatmul.mubr.f32.vlgmr.msra.gmra.mrb[6].mxu0 %v50383_v37  ;;  %34573 = vmatmul.mubr.f32.vlgmr.msra.gmra.mrb[8].mxu1 %v50383_v37  ;;  %v17544_v37 = vand.u32 4294901760, %v17543_v43  ;;  %v17570_v24 = vand.u32 4294901760, %v47012_v49  ;;  %v17577_v7 = vand.u32 4294901760, %v47014_v30  ;;  %v17558_v6 = vand.u32 4294901760, %v17557_v62 }
 0x88f   : > { %39879 = vmatprep.subr.bf16.mxu0 %v50340_v39  ;;  %39933 = vmatprep.subr.bf16.mxu1 %v50340_v39  ;;  %v18081_v53 = vand.u32 4294901760, %v46978_v4  ;;  %v18088_v5 = vand.u32 4294901760, %v46980_v3  ;;  %v17565_v40 = vand.u32 4294901760, %v17564_v8  ;;  %v18096_v11 = vsub.f32 %v47016_v60, %v18095_v18 }
 0x890   : > { %39881 = vmatpush3.bf16.msra.mxu0 %v46950_v17  ;;  %39935 = vmatpush3.bf16.msra.mxu1 %v46952_v56  ;;  %v47058_v32 = vpack.c.bf16 %v17551_v38, %v17544_v37  ;;  %v17571_v15 = vsub.f32 %v47012_v49, %v17570_v24  ;;  %v17578_v44 = vsub.f32 %v47014_v30, %v17577_v7 }
 0x891   : > { %39882 = vmatprep.subr.bf16.mxu0 %v50340_v39  ;;  %39936 = vmatprep.subr.bf16.mxu1 %v50340_v39  ;;  %v18082_v41 = vsub.f32 %v46978_v4, %v18081_v53  ;;  %v18089_v9 = vsub.f32 %v46980_v3, %v18088_v5  ;;  %v18103_v51 = vsub.f32 %v47018_v29, %v18102_v2  ;;  %v18097_v37 = vand.u32 4294901760, %v18096_v11 }
 0x892   : > { %34589 = vmatprep.mubr.msk.f32.mxu0 %vm41567_vm1, %v50341_v28  ;;  %34691 = vmatprep.mubr.msk.f32.mxu1 %vm41567_vm1, %v50341_v28  ;;  %v47075_v10 = vsub.f32 %v27441_v50, %v47052_v55  ;;  %v47078_v48 = vsub.f32 %v27448_v20, %v47054_v0  ;;  %v47086_v43 = vpack.c.bf16 %v17565_v40, %v17558_v6  ;;  %v17572_v16 = vand.u32 4294901760, %v17571_v15 }
 0x893   : > { %v18083_v61 = vand.u32 4294901760, %v18082_v41  ;;  %v18090_v34 = vand.u32 4294901760, %v18089_v9  ;;  %v17579_v58 = vand.u32 4294901760, %v17578_v44  ;;  %v18104_v38 = vand.u32 4294901760, %v18103_v51 }
 0x894   : > { %39884 = vmatpush3.bf16.msra.mxu0 %v46984_v31  ;;  %39938 = vmatpush3.bf16.msra.mxu1 %v46986_v22  ;;  %v47093_v50 = vand.u32 4294901760, %v47075_v10  ;;  %v47096_v20 = vand.u32 4294901760, %v47078_v48  ;;  %v47126_v9 = vpack.c.bf16 %v46940_v46, %v46938_v57  ;;  %v47130_v6 = vpack.c.bf16 %v46946_v27, %v46944_v19  ;;  %v18508_v27 = vld [vmem:[#allocation2 + $0x3] ss:$2 sm:$0x1f] }
 0x895   : > { %39885 = vmatprep.subr.bf16.mxu0 %v50340_v39  ;;  %39939 = vmatprep.subr.bf16.mxu1 %v50340_v39  ;;  %v47088_v36 = vpack.c.bf16 %v18090_v34, %v18083_v61  ;;  %v47108_v52 = vpack.c.bf16 %v18104_v38, %v18097_v37  ;;  %v47142_v40 = vpack.c.bf16 %v46974_v13, %v46972_v47  ;;  %v27449_v13 = vld [vmem:[%s49499_s3 + $0x150] sm:$0xff] }
 0x896   : > { %v17585_v33 = vsub.f32 %v47075_v10, %v47093_v50  ;;  %v18110_v62 = vsub.f32 %v47078_v48, %v47096_v20  ;;  %v47146_v61 = vpack.c.bf16 %v46980_v3, %v46978_v4  ;;  %v47158_v34 = vpack.c.bf16 %v47014_v30, %v47012_v49  ;;  %v27457_v4 = vld [vmem:[%s49499_s3 + $0x190] sm:$0xff]  ;;  %v27452_v49 = vld [vmem:[%s49499_s3 + $0x168] sm:$0xff] }
 0x897   : > { %v47162_v15 = vpack.c.bf16 %v47018_v29, %v47016_v60  ;;  %v47202_v44 = vpack.c.bf16 %v18074_v59, %v18067_v45  ;;  %v47216_v57 = vpack.c.bf16 %v17563_v63, %v17556_v21  ;;  %v47222_v46 = vpack.c.bf16 %v18088_v5, %v18081_v53  ;;  %v27451_v5 = vld [vmem:[%s49499_s3 + $0x160] sm:$0xff] }
 0x898   : > { %39887 = vmatpush3.bf16.msra.mxu0 %v47022_v26  ;;  %39941 = vmatpush3.bf16.msra.mxu1 %v47024_v14  ;;  %v47118_v8 = vand.u32 4294901760, %v17585_v33  ;;  %v47120_v41 = vand.u32 4294901760, %v18110_v62  ;;  %v47242_v19 = vpack.c.bf16 %v18102_v2, %v18095_v18  ;;  %v19579_v3 = vand.u32 4294901760, %v27449_v13 }
 0x899   : > { %34587 = vmatprep.subr.mxu0 %v50341_v28  ;;  %34689 = vmatprep.subr.mxu1 %v50341_v28  ;;  %v20107_v53 = vand.u32 4294901760, %v27457_v4  ;;  %v19588_v18 = vand.u32 4294901760, %v27452_v49 }
 0x89a   : > { %v47437_v30 = vsub.f32 %v27449_v13, %v19579_v3 }
 0x89b   : > { %v47473_v37 = vsub.f32 %v27452_v49, %v19588_v18 }
 0x89c   : > { %34588 = vmatpush3.msra.mxu0 %v47052_v55  ;;  %34690 = vmatpush3.msra.mxu1 %v47054_v0  ;;  %v19663_v51 = vand.u32 4294901760, %v47437_v30 }
 0x89d   : > { %34590 = vmatmul.mubr.f32.vlgmr.msra.gmra.mrb[4].mxu0 %v46674_v42  ;;  %39888 = vmatprep.subr.bf16.mxu0 %v50340_v39 }
 0x89e   : > { %34692 = vmatmul.mubr.f32.vlgmr.msra.gmra.mrb[6].mxu1 %v46674_v42  ;;  %39942 = vmatprep.subr.bf16.mxu1 %v50340_v39  ;;  %v47104_v42 = vpack.c.bf16 %v17579_v58, %v17572_v16  ;;  %v19664_v62 = vsub.f32 %v47437_v30, %v19663_v51 }
 0x89f   : > { %39890 = vmatpush3.bf16.msra.mxu0 %v47058_v32  ;;  %39944 = vmatpush3.bf16.msra.mxu1 %v47060_v35 }
 0x8a0   : > { %39891 = vmatprep.subr.bf16.mxu0 %v50340_v39  ;;  %39945 = vmatprep.subr.bf16.mxu1 %v50340_v39 }
 0x8a1   : > { %34606 = vmatprep.mubr.msk.f32.mxu0 %vm41567_vm1, %v50341_v28  ;;  %34708 = vmatprep.mubr.msk.f32.mxu1 %vm41567_vm1, %v50341_v28 }
 0x8a3   : > { %39893 = vmatpush3.bf16.msra.mxu0 %v47086_v43  ;;  %39947 = vmatpush3.bf16.msra.mxu1 %v47088_v36 }
 0x8a4   : > { %39894 = vmatprep.subr.bf16.mxu0 %v50340_v39  ;;  %39948 = vmatprep.subr.bf16.mxu1 %v50340_v39 }
 0x8a7   : > { %39896 = vmatpush3.bf16.msra.mxu0 %v47104_v42  ;;  %39950 = vmatpush3.bf16.msra.mxu1 %v47108_v52 }
 0x8a8   : > { %34604 = vmatprep.subr.mxu0 %v50341_v28  ;;  %34706 = vmatprep.subr.mxu1 %v50341_v28 }
 0x8ab   : > { %34605 = vmatpush3.msra.mxu0 %v47118_v8  ;;  %34707 = vmatpush3.msra.mxu1 %v47120_v41 }
 0x8ac   : > { %34607 = vmatmul.mubr.f32.vlgmr.msra.gmra.mrb[4].mxu0 %v46642_v12  ;;  %39897 = vmatprep.subr.bf16.mxu0 %v50340_v39 }
 0x8ad   : > { %34709 = vmatmul.mubr.f32.vlgmr.msra.gmra.mrb[6].mxu1 %v46642_v12  ;;  %39951 = vmatprep.subr.bf16.mxu1 %v50340_v39 }
 0x8ae   : > { %39899 = vmatpush3.bf16.msra.mxu0 %v47126_v9  ;;  %39953 = vmatpush3.bf16.msra.mxu1 %v47130_v6 }
 0x8af   : > { %39900 = vmatprep.subr.bf16.mxu0 %v50340_v39  ;;  %39954 = vmatprep.subr.bf16.mxu1 %v50340_v39 }
 0x8b0   : > { %34623 = vmatprep.mubr.msk.f32.mxu0 %vm41567_vm1, %v50341_v28  ;;  %34725 = vmatprep.mubr.msk.f32.mxu1 %vm41567_vm1, %v50341_v28 }
 0x8b2   : > { %39902 = vmatpush3.bf16.msra.mxu0 %v47142_v40  ;;  %39956 = vmatpush3.bf16.msra.mxu1 %v47146_v61 }
 0x8b3   : > { %39903 = vmatprep.subr.bf16.mxu0 %v50340_v39  ;;  %39957 = vmatprep.subr.bf16.mxu1 %v50340_v39 }
 0x8b6   : > { %39905 = vmatpush3.bf16.msra.mxu0 %v47158_v34  ;;  %39959 = vmatpush3.bf16.msra.mxu1 %v47162_v15 }
 0x8b7   : > { %34621 = vmatprep.subr.mxu0 %v50341_v28  ;;  %34723 = vmatprep.subr.mxu1 %v50341_v28 }
 0x8ba   : > { %34622 = vmatpush3.msra.mxu0 %v47075_v10  ;;  %34724 = vmatpush3.msra.mxu1 %v47078_v48 }
 0x8bb   : > { %34624 = vmatmul.mubr.f32.vlgmr.msra.gmra.mrb[4].mxu0 %v46651_v25  ;;  %39906 = vmatprep.subr.bf16.mxu0 %v50340_v39 }
 0x8bc   : > { %34726 = vmatmul.mubr.f32.vlgmr.msra.gmra.mrb[6].mxu1 %v46651_v25  ;;  %39960 = vmatprep.subr.bf16.mxu1 %v50340_v39  ;;  %v47196_v25 = vpack.c.bf16 %v17549_v54, %v17542_v1  ;;  %v18510_v1 = vsel %vm13199_vm3, %v18508_v27, 0 }
 0x8bd   : > { %39908 = vmatpush3.bf16.msra.mxu0 %v46950_v17  ;;  %39962 = vmatpush3.bf16.msra.mxu1 %v46952_v56  ;;  %v47273_v54 = vand.u32 4294901760, %v18510_v1 }
 0x8be   : > { %39909 = vmatprep.subr.bf16.mxu0 %v50340_v39  ;;  %39963 = vmatprep.subr.bf16.mxu1 %v50340_v39 }
 0x8bf   : > { %34640 = vmatprep.mubr.msk.f32.mxu0 %vm41567_vm1, %v50341_v28  ;;  %34742 = vmatprep.mubr.msk.f32.mxu1 %vm41567_vm1, %v50341_v28  ;;  %v47282_v45 = vsub.f32 %v18510_v1, %v47273_v54  ;;  %v27455_v1 = vld [vmem:[%s49499_s3 + $0x180] sm:$0xff] }
 0x8c1   : > { %39911 = vmatpush3.bf16.msra.mxu0 %v46984_v31  ;;  %39965 = vmatpush3.bf16.msra.mxu1 %v46986_v22 }
 0x8c2   : > { %39912 = vmatprep.subr.bf16.mxu0 %v50340_v39  ;;  %39966 = vmatprep.subr.bf16.mxu1 %v50340_v39 }
 0x8c5   : > { %39914 = vmatpush3.bf16.msra.mxu0 %v47022_v26  ;;  %39968 = vmatpush3.bf16.msra.mxu1 %v47024_v14 }
 0x8c6   : > { %34638 = vmatprep.subr.mxu0 %v50341_v28  ;;  %34740 = vmatprep.subr.mxu1 %v50341_v28 }
 0x8c9   : > { %34639 = vmatpush3.msra.mxu0 %v47052_v55  ;;  %34741 = vmatpush3.msra.mxu1 %v47054_v0 }
 0x8ca   : > { %34641 = vmatmul.mubr.f32.vlgmr.msra.gmra.mrb[4].mxu0 %v46662_v23  ;;  %39915 = vmatprep.subr.bf16.mxu0 %v50340_v39 }
 0x8cb   : > { %34743 = vmatmul.mubr.f32.vlgmr.msra.gmra.mrb[6].mxu1 %v46662_v23  ;;  %39969 = vmatprep.subr.bf16.mxu1 %v50340_v39  ;;  %v47236_v23 = vpack.c.bf16 %v17577_v7, %v17570_v24  ;;  %v47445_v24 = vsub.f32 %v27457_v4, %v20107_v53  ;;  %v19585_v7 = vand.u32 4294901760, %v27451_v5 }
 0x8cc   : > { %39917 = vmatpush3.bf16.msra.mxu0 %v47196_v25  ;;  %39971 = vmatpush3.bf16.msra.mxu1 %v47202_v44 }
 0x8cd   : > { %39918 = vmatprep.subr.bf16.mxu0 %v50340_v39  ;;  %39972 = vmatprep.subr.bf16.mxu1 %v50340_v39  ;;  %v20195_v16 = vand.u32 4294901760, %v47445_v24  ;;  %v47471_v58 = vsub.f32 %v27451_v5, %v19585_v7  ;;  %v47483_v38 = vpack.c.bf16 %v19588_v18, %v19585_v7 }
 0x8ce   : > { %34657 = vmatprep.mubr.msk.f32.mxu0 %vm41567_vm1, %v50341_v28  ;;  %34759 = vmatprep.mubr.msk.f32.mxu1 %vm41567_vm1, %v50341_v28 }
 0x8d0   : > { %39920 = vmatpush3.bf16.msra.mxu0 %v47216_v57  ;;  %39974 = vmatpush3.bf16.msra.mxu1 %v47222_v46 }
 0x8d1   : > { %39921 = vmatprep.subr.bf16.mxu0 %v50340_v39  ;;  %39975 = vmatprep.subr.bf16.mxu1 %v50340_v39 }
 0x8d4   : > { %39923 = vmatpush3.bf16.msra.mxu0 %v47236_v23  ;;  %39977 = vmatpush3.bf16.msra.mxu1 %v47242_v19 }
 0x8d5   : > { %34655 = vmatprep.subr.mxu0 %v50341_v28  ;;  %34757 = vmatprep.subr.mxu1 %v50341_v28 }
 0x8d8   : > { %34656 = vmatpush3.msra.mxu0 %v47093_v50  ;;  %34758 = vmatpush3.msra.mxu1 %v47096_v20 }
 0x8d9   : > { %34658 = vmatmul.mubr.f32.vlgmr.msra.gmra.mrb[4].mxu0 %v46642_v12  ;;  %39924 = vmatprep.subr.bf16.mxu0 %v50340_v39 }
 0x8da   : > { %34760 = vmatmul.mubr.f32.vlgmr.msra.gmra.mrb[6].mxu1 %v46642_v12  ;;  %39978 = vmatprep.subr.bf16.mxu1 %v50340_v39 }
 0x8db   : > { %39926 = vmatpush3.bf16.msra.mxu0 %v46950_v17  ;;  %39980 = vmatpush3.bf16.msra.mxu1 %v46952_v56 }
 0x8dc   : > { %39927 = vmatprep.subr.bf16.mxu0 %v50340_v39  ;;  %39981 = vmatprep.subr.bf16.mxu1 %v50340_v39 }
 0x8dd   : > { %34674 = vmatprep.mubr.msk.f32.mxu0 %vm41567_vm1, %v50341_v28  ;;  %34776 = vmatprep.mubr.msk.f32.mxu1 %vm41567_vm1, %v50341_v28 }
 0x8df   : > { %39929 = vmatpush3.bf16.msra.mxu0 %v46984_v31  ;;  %39983 = vmatpush3.bf16.msra.mxu1 %v46986_v22 }
 0x8e0   : > { %39930 = vmatprep.subr.bf16.mxu0 %v50340_v39  ;;  %39984 = vmatprep.subr.bf16.mxu1 %v50340_v39 }
 0x8e3   : > { %39932 = vmatpush3.bf16.msra.mxu0 %v47022_v26  ;;  %39986 = vmatpush3.bf16.msra.mxu1 %v47024_v14 }
 0x8e4   : > { %34672 = vmatprep.subr.mxu0 %v50341_v28  ;;  %34774 = vmatprep.subr.mxu1 %v50341_v28 }
 0x8e7   : > { %34673 = vmatpush3.msra.mxu0 %v47052_v55  ;;  %34775 = vmatpush3.msra.mxu1 %v47054_v0 }
 0x8e8   : > { %34675 = vmatmul.mubr.f32.vlgmr.msra.gmra.mrb[4].mxu0 %v46642_v12  ;;  %34777 = vmatmul.mubr.f32.vlgmr.msra.gmra.mrb[6].mxu1 %v46642_v12  ;;  %v47293_v12 = vand.u32 4294901760, %v47282_v45 }
 0x8e9   : > { %39987 = vmatprep.subr.bf16.mxu0 %v50340_v39  ;;  %40041 = vmatprep.subr.bf16.mxu1 %v50340_v39 }
 0x8ea   : > { %39989 = vmatpush3.bf16.msra.mxu0 %v46950_v17  ;;  %40043 = vmatpush3.bf16.msra.mxu1 %v46952_v56  ;;  %v18587_v59 = vsub.f32 %v47282_v45, %v47293_v12 }
 0x8eb   : > { %39990 = vmatprep.subr.bf16.mxu0 %v50340_v39  ;;  %40044 = vmatprep.subr.bf16.mxu1 %v50340_v39 }
 0x8ec   : > { %34793 = vmatprep.mubr.msk.f32.mxu0 %vm41567_vm1, %v50341_v28  ;;  %34895 = vmatprep.mubr.msk.f32.mxu1 %vm41567_vm1, %v50341_v28  ;;  %v47305_v47 = vand.u32 4294901760, %v18587_v59  ;;  %v27462_v59 = vld [vmem:[%s49499_s3 + $0x1b8] sm:$0xff] }
 0x8ee   : > { %39992 = vmatpush3.bf16.msra.mxu0 %v46984_v31  ;;  %40046 = vmatpush3.bf16.msra.mxu1 %v46986_v22 }
 0x8ef   : > { %39993 = vmatprep.subr.bf16.mxu0 %v50340_v39  ;;  %40047 = vmatprep.subr.bf16.mxu1 %v50340_v39 }
 0x8f2   : > { %39995 = vmatpush3.bf16.msra.mxu0 %v47022_v26  ;;  %40049 = vmatpush3.bf16.msra.mxu1 %v47024_v14 }
 0x8f3   : > { %34791 = vmatprep.subr.mxu0 %v50341_v28  ;;  %34893 = vmatprep.subr.mxu1 %v50341_v28 }
 0x8f6   : > { %34792 = vmatpush3.msra.mxu0 %v47052_v55  ;;  %34894 = vmatpush3.msra.mxu1 %v47054_v0 }
 0x8f7   : > { %34794 = vmatmul.mubr.f32.vlgmr.msra.gmra.mrb[6].mxu0 %v47305_v47  ;;  %39996 = vmatprep.subr.bf16.mxu0 %v50340_v39 }
 0x8f8   : > { %34896 = vmatmul.mubr.f32.vlgmr.msra.gmra.mrb[8].mxu1 %v47305_v47  ;;  %40050 = vmatprep.subr.bf16.mxu1 %v50340_v39 }
 0x8f9   : > { %39998 = vmatpush3.bf16.msra.mxu0 %v47058_v32  ;;  %40052 = vmatpush3.bf16.msra.mxu1 %v47060_v35 }
 0x8fa   : > { %39999 = vmatprep.subr.bf16.mxu0 %v50340_v39  ;;  %40053 = vmatprep.subr.bf16.mxu1 %v50340_v39 }
 0x8fb   : > { %34810 = vmatprep.mubr.msk.f32.mxu0 %vm41567_vm1, %v50341_v28  ;;  %34912 = vmatprep.mubr.msk.f32.mxu1 %vm41567_vm1, %v50341_v28 }
 0x8fd   : > { %40001 = vmatpush3.bf16.msra.mxu0 %v47086_v43  ;;  %40055 = vmatpush3.bf16.msra.mxu1 %v47088_v36  ;;  %v27461_v43 = vld [vmem:[%s49499_s3 + $0x1b0] sm:$0xff] }
 0x8fe   : > { %40002 = vmatprep.subr.bf16.mxu0 %v50340_v39  ;;  %40056 = vmatprep.subr.bf16.mxu1 %v50340_v39  ;;  %v20119_v33 = vand.u32 4294901760, %v27461_v43 }
 0x901   : > { %40004 = vmatpush3.bf16.msra.mxu0 %v47104_v42  ;;  %40058 = vmatpush3.bf16.msra.mxu1 %v47108_v52 }
 0x902   : > { %34808 = vmatprep.subr.mxu0 %v50341_v28  ;;  %34910 = vmatprep.subr.mxu1 %v50341_v28 }
 0x905   : > { %34809 = vmatpush3.msra.mxu0 %v47118_v8  ;;  %34911 = vmatpush3.msra.mxu1 %v47120_v41 }
 0x906   : > { %34811 = vmatmul.mubr.f32.vlgmr.msra.gmra.mrb[6].mxu0 %v47273_v54  ;;  %40005 = vmatprep.subr.bf16.mxu0 %v50340_v39 }
 0x907   : > { %34913 = vmatmul.mubr.f32.vlgmr.msra.gmra.mrb[8].mxu1 %v47273_v54  ;;  %40059 = vmatprep.subr.bf16.mxu1 %v50340_v39 }
 0x908   : > { %40007 = vmatpush3.bf16.msra.mxu0 %v47126_v9  ;;  %40061 = vmatpush3.bf16.msra.mxu1 %v47130_v6  ;;  %v20196_v9 = vsub.f32 %v47445_v24, %v20195_v16  ;;  %v19677_v6 = vand.u32 4294901760, %v47471_v58 }
 0x909   : > { %40008 = vmatprep.subr.bf16.mxu0 %v50340_v39  ;;  %40062 = vmatprep.subr.bf16.mxu1 %v50340_v39 }
 0x90a   : > { %34827 = vmatprep.mubr.msk.f32.mxu0 %vm41567_vm1, %v50341_v28  ;;  %34929 = vmatprep.mubr.msk.f32.mxu1 %vm41567_vm1, %v50341_v28 }
 0x90c   : > { %40010 = vmatpush3.bf16.msra.mxu0 %v47142_v40  ;;  %40064 = vmatpush3.bf16.msra.mxu1 %v47146_v61  ;;  %v19684_v40 = vand.u32 4294901760, %v47473_v37 }
 0x90d   : > { %40011 = vmatprep.subr.bf16.mxu0 %v50340_v39  ;;  %40065 = vmatprep.subr.bf16.mxu1 %v50340_v39 }
 0x90e   : > { %v19685_v4 = vsub.f32 %v47473_v37, %v19684_v40 }
 0x910   : > { %40013 = vmatpush3.bf16.msra.mxu0 %v47158_v34  ;;  %40067 = vmatpush3.bf16.msra.mxu1 %v47162_v15 }
 0x911   : > { %34825 = vmatprep.subr.mxu0 %v50341_v28  ;;  %34927 = vmatprep.subr.mxu1 %v50341_v28 }
 0x914   : > { %34826 = vmatpush3.msra.mxu0 %v47075_v10  ;;  %34928 = vmatpush3.msra.mxu1 %v47078_v48  ;;  %v27460_v48 = vld [vmem:[%s49499_s3 + $0x1a8] sm:$0xff] }
 0x915   : > { %34828 = vmatmul.mubr.f32.vlgmr.msra.gmra.mrb[6].mxu0 %v47282_v45  ;;  %40014 = vmatprep.subr.bf16.mxu0 %v50340_v39  ;;  %v20116_v52 = vand.u32 4294901760, %v27460_v48 }
 0x916   : > { %34930 = vmatmul.mubr.f32.vlgmr.msra.gmra.mrb[8].mxu1 %v47282_v45  ;;  %40068 = vmatprep.subr.bf16.mxu1 %v50340_v39 }
 0x917   : > { %40016 = vmatpush3.bf16.msra.mxu0 %v46950_v17  ;;  %40070 = vmatpush3.bf16.msra.mxu1 %v46952_v56 }
 0x918   : > { %40017 = vmatprep.subr.bf16.mxu0 %v50340_v39  ;;  %40071 = vmatprep.subr.bf16.mxu1 %v50340_v39 }
 0x919   : > { %34844 = vmatprep.mubr.msk.f32.mxu0 %vm41567_vm1, %v50341_v28  ;;  %34946 = vmatprep.mubr.msk.f32.mxu1 %vm41567_vm1, %v50341_v28 }
 0x91b   : > { %40019 = vmatpush3.bf16.msra.mxu0 %v46984_v31  ;;  %40073 = vmatpush3.bf16.msra.mxu1 %v46986_v22 }
 0x91c   : > { %40020 = vmatprep.subr.bf16.mxu0 %v50340_v39  ;;  %40074 = vmatprep.subr.bf16.mxu1 %v50340_v39 }
 0x91f   : > { %40022 = vmatpush3.bf16.msra.mxu0 %v47022_v26  ;;  %40076 = vmatpush3.bf16.msra.mxu1 %v47024_v14 }
 0x920   : > { %34842 = vmatprep.subr.mxu0 %v50341_v28  ;;  %34944 = vmatprep.subr.mxu1 %v50341_v28 }
 0x923   : > { %34843 = vmatpush3.msra.mxu0 %v47052_v55  ;;  %34945 = vmatpush3.msra.mxu1 %v47054_v0 }
 0x924   : > { %34845 = vmatmul.mubr.f32.vlgmr.msra.gmra.mrb[6].mxu0 %v47293_v12  ;;  %40023 = vmatprep.subr.bf16.mxu0 %v50340_v39 }
 0x925   : > { %34947 = vmatmul.mubr.f32.vlgmr.msra.gmra.mrb[8].mxu1 %v47293_v12  ;;  %40077 = vmatprep.subr.bf16.mxu1 %v50340_v39 }
 0x926   : > { %40025 = vmatpush3.bf16.msra.mxu0 %v47196_v25  ;;  %40079 = vmatpush3.bf16.msra.mxu1 %v47202_v44  ;;  %v47515_v44 = vsub.f32 %v27460_v48, %v20116_v52 }
 0x927   : > { %40026 = vmatprep.subr.bf16.mxu0 %v50340_v39  ;;  %40080 = vmatprep.subr.bf16.mxu1 %v50340_v39 }
 0x928   : > { %34861 = vmatprep.mubr.msk.f32.mxu0 %vm41567_vm1, %v50341_v28  ;;  %34963 = vmatprep.mubr.msk.f32.mxu1 %vm41567_vm1, %v50341_v28  ;;  %v20216_v5 = vand.u32 4294901760, %v47515_v44 }
 0x92a   : > { %40028 = vmatpush3.bf16.msra.mxu0 %v47216_v57  ;;  %40082 = vmatpush3.bf16.msra.mxu1 %v47222_v46  ;;  %v47517_v57 = vsub.f32 %v27461_v43, %v20119_v33 }
 0x92b   : > { %40029 = vmatprep.subr.bf16.mxu0 %v50340_v39  ;;  %40083 = vmatprep.subr.bf16.mxu1 %v50340_v39 }
 0x92c   : > { %v20223_v49 = vand.u32 4294901760, %v47517_v57 }
 0x92e   : > { %40031 = vmatpush3.bf16.msra.mxu0 %v47236_v23  ;;  %40085 = vmatpush3.bf16.msra.mxu1 %v47242_v19  ;;  %v47523_v23 = vpack.c.bf16 %v20119_v33, %v20116_v52  ;;  %v19665_v19 = vand.u32 4294901760, %v19664_v62 }
 0x92f   : > { %34859 = vmatprep.subr.mxu0 %v50341_v28  ;;  %34961 = vmatprep.subr.mxu1 %v50341_v28 }
 0x932   : > { %34860 = vmatpush3.msra.mxu0 %v47093_v50  ;;  %34962 = vmatpush3.msra.mxu1 %v47096_v20 }
 0x933   : > { %34862 = vmatmul.mubr.f32.vlgmr.msra.gmra.mrb[6].mxu0 %v47273_v54  ;;  %40032 = vmatprep.subr.bf16.mxu0 %v50340_v39 }
 0x934   : > { %34964 = vmatmul.mubr.f32.vlgmr.msra.gmra.mrb[8].mxu1 %v47273_v54  ;;  %40086 = vmatprep.subr.bf16.mxu1 %v50340_v39 }
 0x935   : > { %40034 = vmatpush3.bf16.msra.mxu0 %v46950_v17  ;;  %40088 = vmatpush3.bf16.msra.mxu1 %v46952_v56  ;;  %v27450_v17 = vld [vmem:[%s49499_s3 + $0x158] sm:$0xff]  ;;  %v27456_v56 = vld [vmem:[%s49499_s3 + $0x188] sm:$0xff] }
 0x936   : > { %40035 = vmatprep.subr.bf16.mxu0 %v50340_v39  ;;  %40089 = vmatprep.subr.bf16.mxu1 %v50340_v39  ;;  %v19582_v21 = vand.u32 4294901760, %v27450_v17  ;;  %v20104_v63 = vand.u32 4294901760, %v27456_v56 }
 0x937   : > { %34878 = vmatprep.mubr.msk.f32.mxu0 %vm41567_vm1, %v50341_v28  ;;  %34980 = vmatprep.mubr.msk.f32.mxu1 %vm41567_vm1, %v50341_v28 }
 0x938   : > { %v47439_v60 = vsub.f32 %v27450_v17, %v19582_v21  ;;  %v47443_v29 = vsub.f32 %v27456_v56, %v20104_v63  ;;  %v47449_v35 = vpack.c.bf16 %v19582_v21, %v19579_v3  ;;  %v47451_v11 = vpack.c.bf16 %v20107_v53, %v20104_v63 }
 0x939   : > { %40037 = vmatpush3.bf16.msra.mxu0 %v46984_v31  ;;  %40091 = vmatpush3.bf16.msra.mxu1 %v46986_v22  ;;  %v27458_v31 = vld [vmem:[%s49499_s3 + $0x198] sm:$0xff]  ;;  %v27459_v22 = vld [vmem:[%s49499_s3 + $0x1a0] sm:$0xff]  ;;  %v20197_v17 = vand.u32 4294901760, %v20196_v9  ;;  %v19678_v56 = vsub.f32 %v47471_v58, %v19677_v6 }
 0x93a   : > { %40038 = vmatprep.subr.bf16.mxu0 %v50340_v39  ;;  %40092 = vmatprep.subr.bf16.mxu1 %v50340_v39  ;;  %v20110_v2 = vand.u32 4294901760, %v27458_v31  ;;  %v20113_v32 = vand.u32 4294901760, %v27459_v22  ;;  %v19670_v10 = vand.u32 4294901760, %v47439_v60  ;;  %v20188_v36 = vand.u32 4294901760, %v47443_v29 }
 0x93c   : > { %v47485_v50 = vpack.c.bf16 %v20113_v32, %v20110_v2  ;;  %v19671_v8 = vsub.f32 %v47439_v60, %v19670_v10  ;;  %v20189_v41 = vsub.f32 %v47443_v29, %v20188_v36 }
 0x93d   : > { %40040 = vmatpush3.bf16.msra.mxu0 %v47022_v26  ;;  %40094 = vmatpush3.bf16.msra.mxu1 %v47024_v14  ;;  %v27453_v26 = vld [vmem:[%s49499_s3 + $0x170] sm:$0xff]  ;;  %v27454_v14 = vld [vmem:[%s49499_s3 + $0x178] sm:$0xff] }
 0x93e   : > { %34876 = vmatprep.subr.mxu0 %v50341_v28  ;;  %34978 = vmatprep.subr.mxu1 %v50341_v28  ;;  %v19591_v20 = vand.u32 4294901760, %v27453_v26  ;;  %v19594_v42 = vand.u32 4294901760, %v27454_v14  ;;  %v19672_v27 = vand.u32 4294901760, %v19671_v8  ;;  %v20190_v13 = vand.u32 4294901760, %v20189_v41 }
 0x940   : > { %v47511_v15 = vsub.f32 %v27453_v26, %v19591_v20  ;;  %v47513_v25 = vsub.f32 %v27454_v14, %v19594_v42  ;;  %v47521_v46 = vpack.c.bf16 %v19594_v42, %v19591_v20  ;;  %v47557_v7 = vpack.c.bf16 %v19672_v27, %v19665_v19 }
 0x941   : > { %34877 = vmatpush3.msra.mxu0 %v47052_v55  ;;  %34979 = vmatpush3.msra.mxu1 %v47054_v0  ;;  %v47477_v55 = vsub.f32 %v27458_v31, %v20110_v2  ;;  %v47479_v0 = vsub.f32 %v27459_v22, %v20113_v32  ;;  %v47551_v31 = vand.u32 4294901760, %v27455_v1  ;;  %v47553_v22 = vand.u32 4294901760, %v27462_v59 }
 0x942   : > { %34879 = vmatmul.mubr.f32.vlgmr.msra.gmra.mrb[6].mxu0 %v47273_v54  ;;  %34981 = vmatmul.mubr.f32.vlgmr.msra.gmra.mrb[8].mxu1 %v47273_v54  ;;  %v19691_v63 = vand.u32 4294901760, %v47511_v15  ;;  %v19698_v53 = vand.u32 4294901760, %v47513_v25  ;;  %v47559_v18 = vpack.c.bf16 %v20197_v17, %v20190_v13  ;;  %v19679_v2 = vand.u32 4294901760, %v19678_v56 }
 0x943   : > { %40095 = vmatprep.subr.bf16.mxu0 %v50340_v39  ;;  %40149 = vmatprep.subr.bf16.mxu1 %v50340_v39  ;;  %v20202_v61 = vand.u32 4294901760, %v47477_v55  ;;  %v20209_v34 = vand.u32 4294901760, %v47479_v0  ;;  %v19686_v32 = vand.u32 4294901760, %v19685_v4  ;;  %v20217_v20 = vsub.f32 %v47515_v44, %v20216_v5 }
 0x944   : > { %40097 = vmatpush3.bf16.msra.mxu0 %v47449_v35  ;;  %40151 = vmatpush3.bf16.msra.mxu1 %v47451_v11  ;;  %v19692_v48 = vsub.f32 %v47511_v15, %v19691_v63  ;;  %v19699_v43 = vsub.f32 %v47513_v25, %v19698_v53  ;;  %v20224_v42 = vsub.f32 %v47517_v57, %v20223_v49 }
 0x945   : > { %40098 = vmatprep.subr.bf16.mxu0 %v50340_v39  ;;  %40152 = vmatprep.subr.bf16.mxu1 %v50340_v39  ;;  %v20203_v3 = vsub.f32 %v47477_v55, %v20202_v61  ;;  %v20210_v21 = vsub.f32 %v47479_v0, %v20209_v34  ;;  %v47574_v52 = vsub.f32 %v27455_v1, %v47551_v31  ;;  %v20218_v19 = vand.u32 4294901760, %v20217_v20 }
 0x946   : > { %34997 = vmatprep.mubr.msk.f32.mxu0 %vm41567_vm1, %v50341_v28  ;;  %35099 = vmatprep.mubr.msk.f32.mxu1 %vm41567_vm1, %v50341_v28  ;;  %v47577_v33 = vsub.f32 %v27462_v59, %v47553_v22  ;;  %v47585_v62 = vpack.c.bf16 %v19686_v32, %v19679_v2  ;;  %v19693_v41 = vand.u32 4294901760, %v19692_v48  ;;  %v19700_v9 = vand.u32 4294901760, %v19699_v43 }
 0x947   : > { %v20204_v26 = vand.u32 4294901760, %v20203_v3  ;;  %v20211_v14 = vand.u32 4294901760, %v20210_v21  ;;  %v20225_v27 = vand.u32 4294901760, %v20224_v42  ;;  %v47592_v1 = vand.u32 4294901760, %v47574_v52 }
 0x948   : > { %40100 = vmatpush3.bf16.msra.mxu0 %v47483_v38  ;;  %40154 = vmatpush3.bf16.msra.mxu1 %v47485_v50  ;;  %v47595_v59 = vand.u32 4294901760, %v47577_v33  ;;  %v47625_v21 = vpack.c.bf16 %v47439_v60, %v47437_v30  ;;  %v47629_v2 = vpack.c.bf16 %v47445_v24, %v47443_v29  ;;  %v47641_v32 = vpack.c.bf16 %v47473_v37, %v47471_v58  ;;  %v20629_v24 = vld [vmem:[#allocation2 + $0x4] ss:$2 sm:$0x1f] }
 0x949   : > { %40101 = vmatprep.subr.bf16.mxu0 %v50340_v39  ;;  %40155 = vmatprep.subr.bf16.mxu1 %v50340_v39  ;;  %v47587_v8 = vpack.c.bf16 %v20211_v14, %v20204_v26  ;;  %v47607_v13 = vpack.c.bf16 %v20225_v27, %v20218_v19  ;;  %v19706_v17 = vsub.f32 %v47574_v52, %v47592_v1  ;;  %v27463_v37 = vld [vmem:[%s49499_s3 + $0x1c0] sm:$0xff] }
 0x94a   : > { %v20231_v56 = vsub.f32 %v47577_v33, %v47595_v59  ;;  %v47645_v26 = vpack.c.bf16 %v47479_v0, %v47477_v55  ;;  %v47657_v14 = vpack.c.bf16 %v47513_v25, %v47511_v15  ;;  %v47661_v48 = vpack.c.bf16 %v47517_v57, %v47515_v44  ;;  %v27471_v55 = vld [vmem:[%s49499_s3 + $0x200] sm:$0xff]  ;;  %v27466_v15 = vld [vmem:[%s49499_s3 + $0x1d8] sm:$0xff] }
 0x94b   : > { %v47617_v4 = vand.u32 4294901760, %v19706_v17  ;;  %v47701_v43 = vpack.c.bf16 %v20195_v16, %v20188_v36  ;;  %v47715_v30 = vpack.c.bf16 %v19684_v40, %v19677_v6  ;;  %v47721_v60 = vpack.c.bf16 %v20209_v34, %v20202_v61  ;;  %v27465_v34 = vld [vmem:[%s49499_s3 + $0x1d0] sm:$0xff] }
 0x94c   : > { %40103 = vmatpush3.bf16.msra.mxu0 %v47521_v46  ;;  %40157 = vmatpush3.bf16.msra.mxu1 %v47523_v23  ;;  %v47619_v3 = vand.u32 4294901760, %v20231_v56  ;;  %v47741_v29 = vpack.c.bf16 %v20223_v49, %v20216_v5  ;;  %v21700_v0 = vand.u32 4294901760, %v27463_v37  ;;  %v22228_v61 = vand.u32 4294901760, %v27471_v55 }
 0x94d   : > { %34995 = vmatprep.subr.mxu0 %v50341_v28  ;;  %35097 = vmatprep.subr.mxu1 %v50341_v28  ;;  %v21709_v5 = vand.u32 4294901760, %v27466_v15 }
 0x94e   : > { %v47936_v25 = vsub.f32 %v27463_v37, %v21700_v0 }
 0x94f   : > { %v47972_v19 = vsub.f32 %v27466_v15, %v21709_v5 }
 0x950   : > { %34996 = vmatpush3.msra.mxu0 %v47551_v31  ;;  %35098 = vmatpush3.msra.mxu1 %v47553_v22  ;;  %v21784_v42 = vand.u32 4294901760, %v47936_v25 }
 0x951   : > { %34998 = vmatmul.mubr.f32.vlgmr.msra.gmra.mrb[4].mxu0 %v47305_v47  ;;  %40104 = vmatprep.subr.bf16.mxu0 %v50340_v39 }
 0x952   : > { %35100 = vmatmul.mubr.f32.vlgmr.msra.gmra.mrb[6].mxu1 %v47305_v47  ;;  %40158 = vmatprep.subr.bf16.mxu1 %v50340_v39  ;;  %v47603_v47 = vpack.c.bf16 %v19700_v9, %v19693_v41  ;;  %v21785_v56 = vsub.f32 %v47936_v25, %v21784_v42 }
 0x953   : > { %40106 = vmatpush3.bf16.msra.mxu0 %v47557_v7  ;;  %40160 = vmatpush3.bf16.msra.mxu1 %v47559_v18 }
 0x954   : > { %40107 = vmatprep.subr.bf16.mxu0 %v50340_v39  ;;  %40161 = vmatprep.subr.bf16.mxu1 %v50340_v39 }
 0x955   : > { %35014 = vmatprep.mubr.msk.f32.mxu0 %vm41567_vm1, %v50341_v28  ;;  %35116 = vmatprep.mubr.msk.f32.mxu1 %vm41567_vm1, %v50341_v28 }
 0x957   : > { %40109 = vmatpush3.bf16.msra.mxu0 %v47585_v62  ;;  %40163 = vmatpush3.bf16.msra.mxu1 %v47587_v8 }
 0x958   : > { %40110 = vmatprep.subr.bf16.mxu0 %v50340_v39  ;;  %40164 = vmatprep.subr.bf16.mxu1 %v50340_v39 }
 0x95b   : > { %40112 = vmatpush3.bf16.msra.mxu0 %v47603_v47  ;;  %40166 = vmatpush3.bf16.msra.mxu1 %v47607_v13 }
 0x95c   : > { %35012 = vmatprep.subr.mxu0 %v50341_v28  ;;  %35114 = vmatprep.subr.mxu1 %v50341_v28 }
 0x95f   : > { %35013 = vmatpush3.msra.mxu0 %v47617_v4  ;;  %35115 = vmatpush3.msra.mxu1 %v47619_v3 }
 0x960   : > { %35015 = vmatmul.mubr.f32.vlgmr.msra.gmra.mrb[4].mxu0 %v47273_v54  ;;  %40113 = vmatprep.subr.bf16.mxu0 %v50340_v39 }
 0x961   : > { %35117 = vmatmul.mubr.f32.vlgmr.msra.gmra.mrb[6].mxu1 %v47273_v54  ;;  %40167 = vmatprep.subr.bf16.mxu1 %v50340_v39 }
 0x962   : > { %40115 = vmatpush3.bf16.msra.mxu0 %v47625_v21  ;;  %40169 = vmatpush3.bf16.msra.mxu1 %v47629_v2 }
 0x963   : > { %40116 = vmatprep.subr.bf16.mxu0 %v50340_v39  ;;  %40170 = vmatprep.subr.bf16.mxu1 %v50340_v39 }
 0x964   : > { %35031 = vmatprep.mubr.msk.f32.mxu0 %vm41567_vm1, %v50341_v28  ;;  %35133 = vmatprep.mubr.msk.f32.mxu1 %vm41567_vm1, %v50341_v28 }
 0x966   : > { %40118 = vmatpush3.bf16.msra.mxu0 %v47641_v32  ;;  %40172 = vmatpush3.bf16.msra.mxu1 %v47645_v26 }
 0x967   : > { %40119 = vmatprep.subr.bf16.mxu0 %v50340_v39  ;;  %40173 = vmatprep.subr.bf16.mxu1 %v50340_v39 }
 0x96a   : > { %40121 = vmatpush3.bf16.msra.mxu0 %v47657_v14  ;;  %40175 = vmatpush3.bf16.msra.mxu1 %v47661_v48 }
 0x96b   : > { %35029 = vmatprep.subr.mxu0 %v50341_v28  ;;  %35131 = vmatprep.subr.mxu1 %v50341_v28 }
 0x96e   : > { %35030 = vmatpush3.msra.mxu0 %v47574_v52  ;;  %35132 = vmatpush3.msra.mxu1 %v47577_v33 }
 0x96f   : > { %35032 = vmatmul.mubr.f32.vlgmr.msra.gmra.mrb[4].mxu0 %v47282_v45  ;;  %40122 = vmatprep.subr.bf16.mxu0 %v50340_v39 }
 0x970   : > { %35134 = vmatmul.mubr.f32.vlgmr.msra.gmra.mrb[6].mxu1 %v47282_v45  ;;  %40176 = vmatprep.subr.bf16.mxu1 %v50340_v39  ;;  %v47695_v45 = vpack.c.bf16 %v19670_v10, %v19663_v51  ;;  %v20631_v51 = vsel %vm13199_vm3, %v20629_v24, 0 }
 0x971   : > { %40124 = vmatpush3.bf16.msra.mxu0 %v47449_v35  ;;  %40178 = vmatpush3.bf16.msra.mxu1 %v47451_v11  ;;  %v47772_v10 = vand.u32 4294901760, %v20631_v51 }
 0x972   : > { %40125 = vmatprep.subr.bf16.mxu0 %v50340_v39  ;;  %40179 = vmatprep.subr.bf16.mxu1 %v50340_v39 }
 0x973   : > { %35048 = vmatprep.mubr.msk.f32.mxu0 %vm41567_vm1, %v50341_v28  ;;  %35150 = vmatprep.mubr.msk.f32.mxu1 %vm41567_vm1, %v50341_v28  ;;  %v47781_v36 = vsub.f32 %v20631_v51, %v47772_v10  ;;  %v27469_v51 = vld [vmem:[%s49499_s3 + $0x1f0] sm:$0xff] }
 0x975   : > { %40127 = vmatpush3.bf16.msra.mxu0 %v47483_v38  ;;  %40181 = vmatpush3.bf16.msra.mxu1 %v47485_v50 }
 0x976   : > { %40128 = vmatprep.subr.bf16.mxu0 %v50340_v39  ;;  %40182 = vmatprep.subr.bf16.mxu1 %v50340_v39 }
 0x979   : > { %40130 = vmatpush3.bf16.msra.mxu0 %v47521_v46  ;;  %40184 = vmatpush3.bf16.msra.mxu1 %v47523_v23 }
 0x97a   : > { %35046 = vmatprep.subr.mxu0 %v50341_v28  ;;  %35148 = vmatprep.subr.mxu1 %v50341_v28 }
 0x97d   : > { %35047 = vmatpush3.msra.mxu0 %v47551_v31  ;;  %35149 = vmatpush3.msra.mxu1 %v47553_v22 }
 0x97e   : > { %35049 = vmatmul.mubr.f32.vlgmr.msra.gmra.mrb[4].mxu0 %v47293_v12  ;;  %40131 = vmatprep.subr.bf16.mxu0 %v50340_v39 }
 0x97f   : > { %35151 = vmatmul.mubr.f32.vlgmr.msra.gmra.mrb[6].mxu1 %v47293_v12  ;;  %40185 = vmatprep.subr.bf16.mxu1 %v50340_v39  ;;  %v47735_v12 = vpack.c.bf16 %v19698_v53, %v19691_v63  ;;  %v47944_v63 = vsub.f32 %v27471_v55, %v22228_v61  ;;  %v21706_v53 = vand.u32 4294901760, %v27465_v34 }
 0x980   : > { %40133 = vmatpush3.bf16.msra.mxu0 %v47695_v45  ;;  %40187 = vmatpush3.bf16.msra.mxu1 %v47701_v43 }
 0x981   : > { %40134 = vmatprep.subr.bf16.mxu0 %v50340_v39  ;;  %40188 = vmatprep.subr.bf16.mxu1 %v50340_v39  ;;  %v22316_v41 = vand.u32 4294901760, %v47944_v63  ;;  %v47970_v9 = vsub.f32 %v27465_v34, %v21706_v53  ;;  %v47982_v27 = vpack.c.bf16 %v21709_v5, %v21706_v53 }
 0x982   : > { %35065 = vmatprep.mubr.msk.f32.mxu0 %vm41567_vm1, %v50341_v28  ;;  %35167 = vmatprep.mubr.msk.f32.mxu1 %vm41567_vm1, %v50341_v28 }
 0x984   : > { %40136 = vmatpush3.bf16.msra.mxu0 %v47715_v30  ;;  %40190 = vmatpush3.bf16.msra.mxu1 %v47721_v60 }
 0x985   : > { %40137 = vmatprep.subr.bf16.mxu0 %v50340_v39  ;;  %40191 = vmatprep.subr.bf16.mxu1 %v50340_v39 }
 0x988   : > { %40139 = vmatpush3.bf16.msra.mxu0 %v47735_v12  ;;  %40193 = vmatpush3.bf16.msra.mxu1 %v47741_v29 }
 0x989   : > { %35063 = vmatprep.subr.mxu0 %v50341_v28  ;;  %35165 = vmatprep.subr.mxu1 %v50341_v28 }
 0x98c   : > { %35064 = vmatpush3.msra.mxu0 %v47592_v1  ;;  %35166 = vmatpush3.msra.mxu1 %v47595_v59 }
 0x98d   : > { %35066 = vmatmul.mubr.f32.vlgmr.msra.gmra.mrb[4].mxu0 %v47273_v54  ;;  %40140 = vmatprep.subr.bf16.mxu0 %v50340_v39 }
 0x98e   : > { %35168 = vmatmul.mubr.f32.vlgmr.msra.gmra.mrb[6].mxu1 %v47273_v54  ;;  %40194 = vmatprep.subr.bf16.mxu1 %v50340_v39 }
 0x98f   : > { %40142 = vmatpush3.bf16.msra.mxu0 %v47449_v35  ;;  %40196 = vmatpush3.bf16.msra.mxu1 %v47451_v11 }
 0x990   : > { %40143 = vmatprep.subr.bf16.mxu0 %v50340_v39  ;;  %40197 = vmatprep.subr.bf16.mxu1 %v50340_v39 }
 0x991   : > { %35082 = vmatprep.mubr.msk.f32.mxu0 %vm41567_vm1, %v50341_v28  ;;  %35184 = vmatprep.mubr.msk.f32.mxu1 %vm41567_vm1, %v50341_v28 }
 0x993   : > { %40145 = vmatpush3.bf16.msra.mxu0 %v47483_v38  ;;  %40199 = vmatpush3.bf16.msra.mxu1 %v47485_v50 }
 0x994   : > { %40146 = vmatprep.subr.bf16.mxu0 %v50340_v39  ;;  %40200 = vmatprep.subr.bf16.mxu1 %v50340_v39 }
 0x997   : > { %40148 = vmatpush3.bf16.msra.mxu0 %v47521_v46  ;;  %40202 = vmatpush3.bf16.msra.mxu1 %v47523_v23 }
 0x998   : > { %35080 = vmatprep.subr.mxu0 %v50341_v28  ;;  %35182 = vmatprep.subr.mxu1 %v50341_v28 }
 0x99b   : > { %35081 = vmatpush3.msra.mxu0 %v47551_v31  ;;  %35183 = vmatpush3.msra.mxu1 %v47553_v22 }
 0x99c   : > { %35083 = vmatmul.mubr.f32.vlgmr.msra.gmra.mrb[4].mxu0 %v47273_v54  ;;  %35185 = vmatmul.mubr.f32.vlgmr.msra.gmra.mrb[6].mxu1 %v47273_v54  ;;  %v47792_v54 = vand.u32 4294901760, %v47781_v36 }
 0x99d   : > { %40203 = vmatprep.subr.bf16.mxu0 %v50340_v39  ;;  %40257 = vmatprep.subr.bf16.mxu1 %v50340_v39 }
 0x99e   : > { %40205 = vmatpush3.bf16.msra.mxu0 %v47449_v35  ;;  %40259 = vmatpush3.bf16.msra.mxu1 %v47451_v11  ;;  %v20708_v16 = vsub.f32 %v47781_v36, %v47792_v54 }
 0x99f   : > { %40206 = vmatprep.subr.bf16.mxu0 %v50340_v39  ;;  %40260 = vmatprep.subr.bf16.mxu1 %v50340_v39 }
 0x9a0   : > { %35201 = vmatprep.mubr.msk.f32.mxu0 %vm41567_vm1, %v50341_v28  ;;  %35303 = vmatprep.mubr.msk.f32.mxu1 %vm41567_vm1, %v50341_v28  ;;  %v47804_v58 = vand.u32 4294901760, %v20708_v16  ;;  %v27476_v16 = vld [vmem:[%s49499_s3 + $0x228] sm:$0xff] }
 0x9a2   : > { %40208 = vmatpush3.bf16.msra.mxu0 %v47483_v38  ;;  %40262 = vmatpush3.bf16.msra.mxu1 %v47485_v50 }
 0x9a3   : > { %40209 = vmatprep.subr.bf16.mxu0 %v50340_v39  ;;  %40263 = vmatprep.subr.bf16.mxu1 %v50340_v39 }
 0x9a6   : > { %40211 = vmatpush3.bf16.msra.mxu0 %v47521_v46  ;;  %40265 = vmatpush3.bf16.msra.mxu1 %v47523_v23 }
 0x9a7   : > { %35199 = vmatprep.subr.mxu0 %v50341_v28  ;;  %35301 = vmatprep.subr.mxu1 %v50341_v28 }
 0x9aa   : > { %35200 = vmatpush3.msra.mxu0 %v47551_v31  ;;  %35302 = vmatpush3.msra.mxu1 %v47553_v22 }
 0x9ab   : > { %35202 = vmatmul.mubr.f32.vlgmr.msra.gmra.mrb[6].mxu0 %v47804_v58  ;;  %40212 = vmatprep.subr.bf16.mxu0 %v50340_v39 }
 0x9ac   : > { %35304 = vmatmul.mubr.f32.vlgmr.msra.gmra.mrb[8].mxu1 %v47804_v58  ;;  %40266 = vmatprep.subr.bf16.mxu1 %v50340_v39 }
 0x9ad   : > { %40214 = vmatpush3.bf16.msra.mxu0 %v47557_v7  ;;  %40268 = vmatpush3.bf16.msra.mxu1 %v47559_v18 }
 0x9ae   : > { %40215 = vmatprep.subr.bf16.mxu0 %v50340_v39  ;;  %40269 = vmatprep.subr.bf16.mxu1 %v50340_v39 }
 0x9af   : > { %35218 = vmatprep.mubr.msk.f32.mxu0 %vm41567_vm1, %v50341_v28  ;;  %35320 = vmatprep.mubr.msk.f32.mxu1 %vm41567_vm1, %v50341_v28 }
 0x9b1   : > { %40217 = vmatpush3.bf16.msra.mxu0 %v47585_v62  ;;  %40271 = vmatpush3.bf16.msra.mxu1 %v47587_v8  ;;  %v27475_v62 = vld [vmem:[%s49499_s3 + $0x220] sm:$0xff] }
 0x9b2   : > { %40218 = vmatprep.subr.bf16.mxu0 %v50340_v39  ;;  %40272 = vmatprep.subr.bf16.mxu1 %v50340_v39  ;;  %v22240_v17 = vand.u32 4294901760, %v27475_v62 }
 0x9b5   : > { %40220 = vmatpush3.bf16.msra.mxu0 %v47603_v47  ;;  %40274 = vmatpush3.bf16.msra.mxu1 %v47607_v13 }
 0x9b6   : > { %35216 = vmatprep.subr.mxu0 %v50341_v28  ;;  %35318 = vmatprep.subr.mxu1 %v50341_v28 }
 0x9b9   : > { %35217 = vmatpush3.msra.mxu0 %v47617_v4  ;;  %35319 = vmatpush3.msra.mxu1 %v47619_v3 }
 0x9ba   : > { %35219 = vmatmul.mubr.f32.vlgmr.msra.gmra.mrb[6].mxu0 %v47772_v10  ;;  %40221 = vmatprep.subr.bf16.mxu0 %v50340_v39 }
 0x9bb   : > { %35321 = vmatmul.mubr.f32.vlgmr.msra.gmra.mrb[8].mxu1 %v47772_v10  ;;  %40275 = vmatprep.subr.bf16.mxu1 %v50340_v39 }
 0x9bc   : > { %40223 = vmatpush3.bf16.msra.mxu0 %v47625_v21  ;;  %40277 = vmatpush3.bf16.msra.mxu1 %v47629_v2  ;;  %v22317_v21 = vsub.f32 %v47944_v63, %v22316_v41  ;;  %v21798_v2 = vand.u32 4294901760, %v47970_v9 }
 0x9bd   : > { %40224 = vmatprep.subr.bf16.mxu0 %v50340_v39  ;;  %40278 = vmatprep.subr.bf16.mxu1 %v50340_v39 }
 0x9be   : > { %35235 = vmatprep.mubr.msk.f32.mxu0 %vm41567_vm1, %v50341_v28  ;;  %35337 = vmatprep.mubr.msk.f32.mxu1 %vm41567_vm1, %v50341_v28 }
 0x9c0   : > { %40226 = vmatpush3.bf16.msra.mxu0 %v47641_v32  ;;  %40280 = vmatpush3.bf16.msra.mxu1 %v47645_v26  ;;  %v21805_v32 = vand.u32 4294901760, %v47972_v19 }
 0x9c1   : > { %40227 = vmatprep.subr.bf16.mxu0 %v50340_v39  ;;  %40281 = vmatprep.subr.bf16.mxu1 %v50340_v39 }
 0x9c2   : > { %v21806_v55 = vsub.f32 %v47972_v19, %v21805_v32 }
 0x9c4   : > { %40229 = vmatpush3.bf16.msra.mxu0 %v47657_v14  ;;  %40283 = vmatpush3.bf16.msra.mxu1 %v47661_v48 }
 0x9c5   : > { %35233 = vmatprep.subr.mxu0 %v50341_v28  ;;  %35335 = vmatprep.subr.mxu1 %v50341_v28 }
 0x9c8   : > { %35234 = vmatpush3.msra.mxu0 %v47574_v52  ;;  %35336 = vmatpush3.msra.mxu1 %v47577_v33  ;;  %v27474_v33 = vld [vmem:[%s49499_s3 + $0x218] sm:$0xff] }
 0x9c9   : > { %35236 = vmatmul.mubr.f32.vlgmr.msra.gmra.mrb[6].mxu0 %v47781_v36  ;;  %40230 = vmatprep.subr.bf16.mxu0 %v50340_v39  ;;  %v22237_v13 = vand.u32 4294901760, %v27474_v33 }
 0x9ca   : > { %35338 = vmatmul.mubr.f32.vlgmr.msra.gmra.mrb[8].mxu1 %v47781_v36  ;;  %40284 = vmatprep.subr.bf16.mxu1 %v50340_v39 }
 0x9cb   : > { %40232 = vmatpush3.bf16.msra.mxu0 %v47449_v35  ;;  %40286 = vmatpush3.bf16.msra.mxu1 %v47451_v11 }
 0x9cc   : > { %40233 = vmatprep.subr.bf16.mxu0 %v50340_v39  ;;  %40287 = vmatprep.subr.bf16.mxu1 %v50340_v39 }
 0x9cd   : > { %35252 = vmatprep.mubr.msk.f32.mxu0 %vm41567_vm1, %v50341_v28  ;;  %35354 = vmatprep.mubr.msk.f32.mxu1 %vm41567_vm1, %v50341_v28 }
 0x9cf   : > { %40235 = vmatpush3.bf16.msra.mxu0 %v47483_v38  ;;  %40289 = vmatpush3.bf16.msra.mxu1 %v47485_v50 }
 0x9d0   : > { %40236 = vmatprep.subr.bf16.mxu0 %v50340_v39  ;;  %40290 = vmatprep.subr.bf16.mxu1 %v50340_v39 }
 0x9d3   : > { %40238 = vmatpush3.bf16.msra.mxu0 %v47521_v46  ;;  %40292 = vmatpush3.bf16.msra.mxu1 %v47523_v23 }
 0x9d4   : > { %35250 = vmatprep.subr.mxu0 %v50341_v28  ;;  %35352 = vmatprep.subr.mxu1 %v50341_v28 }
 0x9d7   : > { %35251 = vmatpush3.msra.mxu0 %v47551_v31  ;;  %35353 = vmatpush3.msra.mxu1 %v47553_v22 }
 0x9d8   : > { %35253 = vmatmul.mubr.f32.vlgmr.msra.gmra.mrb[6].mxu0 %v47792_v54  ;;  %40239 = vmatprep.subr.bf16.mxu0 %v50340_v39 }
 0x9d9   : > { %35355 = vmatmul.mubr.f32.vlgmr.msra.gmra.mrb[8].mxu1 %v47792_v54  ;;  %40293 = vmatprep.subr.bf16.mxu1 %v50340_v39 }
 0x9da   : > { %40241 = vmatpush3.bf16.msra.mxu0 %v47695_v45  ;;  %40295 = vmatpush3.bf16.msra.mxu1 %v47701_v43  ;;  %v48014_v43 = vsub.f32 %v27474_v33, %v22237_v13 }
 0x9db   : > { %40242 = vmatprep.subr.bf16.mxu0 %v50340_v39  ;;  %40296 = vmatprep.subr.bf16.mxu1 %v50340_v39 }
 0x9dc   : > { %35269 = vmatprep.mubr.msk.f32.mxu0 %vm41567_vm1, %v50341_v28  ;;  %35371 = vmatprep.mubr.msk.f32.mxu1 %vm41567_vm1, %v50341_v28  ;;  %v22337_v34 = vand.u32 4294901760, %v48014_v43 }
 0x9de   : > { %40244 = vmatpush3.bf16.msra.mxu0 %v47715_v30  ;;  %40298 = vmatpush3.bf16.msra.mxu1 %v47721_v60  ;;  %v48016_v30 = vsub.f32 %v27475_v62, %v22240_v17 }
 0x9df   : > { %40245 = vmatprep.subr.bf16.mxu0 %v50340_v39  ;;  %40299 = vmatprep.subr.bf16.mxu1 %v50340_v39 }
 0x9e0   : > { %v22344_v15 = vand.u32 4294901760, %v48016_v30 }
 0x9e2   : > { %40247 = vmatpush3.bf16.msra.mxu0 %v47735_v12  ;;  %40301 = vmatpush3.bf16.msra.mxu1 %v47741_v29  ;;  %v48022_v12 = vpack.c.bf16 %v22240_v17, %v22237_v13  ;;  %v21786_v29 = vand.u32 4294901760, %v21785_v56 }
 0x9e3   : > { %35267 = vmatprep.subr.mxu0 %v50341_v28  ;;  %35369 = vmatprep.subr.mxu1 %v50341_v28 }
 0x9e6   : > { %35268 = vmatpush3.msra.mxu0 %v47592_v1  ;;  %35370 = vmatpush3.msra.mxu1 %v47595_v59 }
 0x9e7   : > { %35270 = vmatmul.mubr.f32.vlgmr.msra.gmra.mrb[6].mxu0 %v47772_v10  ;;  %40248 = vmatprep.subr.bf16.mxu0 %v50340_v39 }
 0x9e8   : > { %35372 = vmatmul.mubr.f32.vlgmr.msra.gmra.mrb[8].mxu1 %v47772_v10  ;;  %40302 = vmatprep.subr.bf16.mxu1 %v50340_v39 }
 0x9e9   : > { %40250 = vmatpush3.bf16.msra.mxu0 %v47449_v35  ;;  %40304 = vmatpush3.bf16.msra.mxu1 %v47451_v11  ;;  %v27464_v35 = vld [vmem:[%s49499_s3 + $0x1c8] sm:$0xff]  ;;  %v27470_v11 = vld [vmem:[%s49499_s3 + $0x1f8] sm:$0xff] }
 0x9ea   : > { %40251 = vmatprep.subr.bf16.mxu0 %v50340_v39  ;;  %40305 = vmatprep.subr.bf16.mxu1 %v50340_v39  ;;  %v21703_v6 = vand.u32 4294901760, %v27464_v35  ;;  %v22225_v40 = vand.u32 4294901760, %v27470_v11 }
 0x9eb   : > { %35286 = vmatprep.mubr.msk.f32.mxu0 %vm41567_vm1, %v50341_v28  ;;  %35388 = vmatprep.mubr.msk.f32.mxu1 %vm41567_vm1, %v50341_v28 }
 0x9ec   : > { %v47938_v44 = vsub.f32 %v27464_v35, %v21703_v6  ;;  %v47942_v57 = vsub.f32 %v27470_v11, %v22225_v40  ;;  %v47948_v18 = vpack.c.bf16 %v21703_v6, %v21700_v0  ;;  %v47950_v20 = vpack.c.bf16 %v22228_v61, %v22225_v40 }
 0x9ed   : > { %40253 = vmatpush3.bf16.msra.mxu0 %v47483_v38  ;;  %40307 = vmatpush3.bf16.msra.mxu1 %v47485_v50  ;;  %v27472_v38 = vld [vmem:[%s49499_s3 + $0x208] sm:$0xff]  ;;  %v27473_v50 = vld [vmem:[%s49499_s3 + $0x210] sm:$0xff]  ;;  %v22318_v35 = vand.u32 4294901760, %v22317_v21  ;;  %v21799_v11 = vsub.f32 %v47970_v9, %v21798_v2 }
 0x9ee   : > { %40254 = vmatprep.subr.bf16.mxu0 %v50340_v39  ;;  %40308 = vmatprep.subr.bf16.mxu1 %v50340_v39  ;;  %v22231_v49 = vand.u32 4294901760, %v27472_v38  ;;  %v22234_v7 = vand.u32 4294901760, %v27473_v50  ;;  %v21791_v52 = vand.u32 4294901760, %v47938_v44  ;;  %v22309_v8 = vand.u32 4294901760, %v47942_v57 }
 0x9f0   : > { %v47984_v1 = vpack.c.bf16 %v22234_v7, %v22231_v49  ;;  %v21792_v4 = vsub.f32 %v47938_v44, %v21791_v52  ;;  %v22310_v3 = vsub.f32 %v47942_v57, %v22309_v8 }
 0x9f1   : > { %40256 = vmatpush3.bf16.msra.mxu0 %v47521_v46  ;;  %40310 = vmatpush3.bf16.msra.mxu1 %v47523_v23  ;;  %v27467_v46 = vld [vmem:[%s49499_s3 + $0x1e0] sm:$0xff]  ;;  %v27468_v23 = vld [vmem:[%s49499_s3 + $0x1e8] sm:$0xff] }
 0x9f2   : > { %35284 = vmatprep.subr.mxu0 %v50341_v28  ;;  %35386 = vmatprep.subr.mxu1 %v50341_v28  ;;  %v21712_v59 = vand.u32 4294901760, %v27467_v46  ;;  %v21715_v47 = vand.u32 4294901760, %v27468_v23  ;;  %v21793_v24 = vand.u32 4294901760, %v21792_v4  ;;  %v22311_v37 = vand.u32 4294901760, %v22310_v3 }
 0x9f4   : > { %v48010_v48 = vsub.f32 %v27467_v46, %v21712_v59  ;;  %v48012_v45 = vsub.f32 %v27468_v23, %v21715_v47  ;;  %v48020_v60 = vpack.c.bf16 %v21715_v47, %v21712_v59  ;;  %v48056_v53 = vpack.c.bf16 %v21793_v24, %v21786_v29 }
 0x9f5   : > { %35285 = vmatpush3.msra.mxu0 %v47551_v31  ;;  %35387 = vmatpush3.msra.mxu1 %v47553_v22  ;;  %v47976_v31 = vsub.f32 %v27472_v38, %v22231_v49  ;;  %v47978_v22 = vsub.f32 %v27473_v50, %v22234_v7  ;;  %v48050_v38 = vand.u32 4294901760, %v27469_v51  ;;  %v48052_v50 = vand.u32 4294901760, %v27476_v16 }
 0x9f6   : > { %35287 = vmatmul.mubr.f32.vlgmr.msra.gmra.mrb[6].mxu0 %v47772_v10  ;;  %35389 = vmatmul.mubr.f32.vlgmr.msra.gmra.mrb[8].mxu1 %v47772_v10  ;;  %v21812_v40 = vand.u32 4294901760, %v48010_v48  ;;  %v21819_v61 = vand.u32 4294901760, %v48012_v45  ;;  %v48058_v5 = vpack.c.bf16 %v22318_v35, %v22311_v37  ;;  %v21800_v49 = vand.u32 4294901760, %v21799_v11 }
 0x9f7   : > { %40311 = vmatprep.subr.bf16.mxu0 %v50340_v39  ;;  %40365 = vmatprep.subr.bf16.mxu1 %v50340_v39  ;;  %v22323_v26 = vand.u32 4294901760, %v47976_v31  ;;  %v22330_v14 = vand.u32 4294901760, %v47978_v22  ;;  %v21807_v7 = vand.u32 4294901760, %v21806_v55  ;;  %v22338_v59 = vsub.f32 %v48014_v43, %v22337_v34 }
 0x9f8   : > { %40313 = vmatpush3.bf16.msra.mxu0 %v47948_v18  ;;  %40367 = vmatpush3.bf16.msra.mxu1 %v47950_v20  ;;  %v21813_v33 = vsub.f32 %v48010_v48, %v21812_v40  ;;  %v21820_v62 = vsub.f32 %v48012_v45, %v21819_v61  ;;  %v22345_v47 = vsub.f32 %v48016_v30, %v22344_v15 }
 0x9f9   : > { %40314 = vmatprep.subr.bf16.mxu0 %v50340_v39  ;;  %40368 = vmatprep.subr.bf16.mxu1 %v50340_v39  ;;  %v22324_v0 = vsub.f32 %v47976_v31, %v22323_v26  ;;  %v22331_v6 = vsub.f32 %v47978_v22, %v22330_v14  ;;  %v48073_v13 = vsub.f32 %v27469_v51, %v48050_v38  ;;  %v22339_v29 = vand.u32 4294901760, %v22338_v59 }
 0x9fa   : > { %35405 = vmatprep.mubr.msk.f32.mxu0 %vm41567_vm1, %v50341_v28  ;;  %35507 = vmatprep.mubr.msk.f32.mxu1 %vm41567_vm1, %v50341_v28  ;;  %v48076_v17 = vsub.f32 %v27476_v16, %v48052_v50  ;;  %v48084_v56 = vpack.c.bf16 %v21807_v7, %v21800_v49  ;;  %v21814_v3 = vand.u32 4294901760, %v21813_v33  ;;  %v21821_v21 = vand.u32 4294901760, %v21820_v62 }
 0x9fb   : > { %v22325_v46 = vand.u32 4294901760, %v22324_v0  ;;  %v22332_v23 = vand.u32 4294901760, %v22331_v6  ;;  %v22346_v24 = vand.u32 4294901760, %v22345_v47  ;;  %v48091_v51 = vand.u32 4294901760, %v48073_v13 }
 0x9fc   : > { %40316 = vmatpush3.bf16.msra.mxu0 %v47982_v27  ;;  %40370 = vmatpush3.bf16.msra.mxu1 %v47984_v1  ;;  %v48094_v16 = vand.u32 4294901760, %v48076_v17  ;;  %v48124_v6 = vpack.c.bf16 %v47938_v44, %v47936_v25  ;;  %v48128_v49 = vpack.c.bf16 %v47944_v63, %v47942_v57  ;;  %v48140_v7 = vpack.c.bf16 %v47972_v19, %v47970_v9  ;;  %v22750_v63 = vld [vmem:[#allocation2 + $0x5] ss:$2 sm:$0x1f] }
 0x9fd   : > { %40317 = vmatprep.subr.bf16.mxu0 %v50340_v39  ;;  %40371 = vmatprep.subr.bf16.mxu1 %v50340_v39  ;;  %v48086_v4 = vpack.c.bf16 %v22332_v23, %v22325_v46  ;;  %v48106_v37 = vpack.c.bf16 %v22346_v24, %v22339_v29  ;;  %v21827_v35 = vsub.f32 %v48073_v13, %v48091_v51 }
 0x9fe   : > { %v22352_v11 = vsub.f32 %v48076_v17, %v48094_v16  ;;  %v48144_v46 = vpack.c.bf16 %v47978_v22, %v47976_v31  ;;  %v48156_v23 = vpack.c.bf16 %v48012_v45, %v48010_v48  ;;  %v48160_v33 = vpack.c.bf16 %v48016_v30, %v48014_v43  ;;  %v23821_v22 = vld [vmem:[%s49501_s5 + $0x10] sm:$0xff]  ;;  %v23824_v48 = vld [vmem:[%s49501_s5 + $0x28] sm:$0xff]  ;;  %v23826_v43 = vld [vmem:[%s49501_s5 + $0x38] sm:$0xf] }
 0x9ff   : > { %v48116_v55 = vand.u32 4294901760, %v21827_v35  ;;  %v48200_v62 = vpack.c.bf16 %v22316_v41, %v22309_v8  ;;  %v48214_v25 = vpack.c.bf16 %v21805_v32, %v21798_v2  ;;  %v48220_v44 = vpack.c.bf16 %v22330_v14, %v22323_v26  ;;  %v23825_v45 = vld [vmem:[%s49501_s5 + $0x30] sm:$0xff] }
 0xa00   : > { %40319 = vmatpush3.bf16.msra.mxu0 %v48020_v60  ;;  %40373 = vmatpush3.bf16.msra.mxu1 %v48022_v12  ;;  %v48118_v0 = vand.u32 4294901760, %v22352_v11  ;;  %v48240_v57 = vpack.c.bf16 %v22344_v15, %v22337_v34  ;;  %v23842_v14 = vand.u32 4294901760, %v23821_v22  ;;  %v23854_v34 = vand.u32 4294901760, %v23825_v45 }
 0xa01   : > { %35403 = vmatprep.subr.mxu0 %v50341_v28  ;;  %35505 = vmatprep.subr.mxu1 %v50341_v28 }
 0xa02   : > { %v48458_v59 = vsub.f32 %v23825_v45, %v23854_v34 }
 0xa04   : > { %35404 = vmatpush3.msra.mxu0 %v48050_v38  ;;  %35506 = vmatpush3.msra.mxu1 %v48052_v50 }
 0xa05   : > { %35406 = vmatmul.mubr.f32.vlgmr.msra.gmra.mrb[4].mxu0 %v47804_v58  ;;  %40320 = vmatprep.subr.bf16.mxu0 %v50340_v39 }
 0xa06   : > { %35508 = vmatmul.mubr.f32.vlgmr.msra.gmra.mrb[6].mxu1 %v47804_v58  ;;  %40374 = vmatprep.subr.bf16.mxu1 %v50340_v39  ;;  %v48102_v58 = vpack.c.bf16 %v21821_v21, %v21814_v3 }
 0xa07   : > { %40322 = vmatpush3.bf16.msra.mxu0 %v48056_v53  ;;  %40376 = vmatpush3.bf16.msra.mxu1 %v48058_v5 }
 0xa08   : > { %40323 = vmatprep.subr.bf16.mxu0 %v50340_v39  ;;  %40377 = vmatprep.subr.bf16.mxu1 %v50340_v39 }
 0xa09   : > { %35422 = vmatprep.mubr.msk.f32.mxu0 %vm41567_vm1, %v50341_v28  ;;  %35524 = vmatprep.mubr.msk.f32.mxu1 %vm41567_vm1, %v50341_v28 }
 0xa0b   : > { %40325 = vmatpush3.bf16.msra.mxu0 %v48084_v56  ;;  %40379 = vmatpush3.bf16.msra.mxu1 %v48086_v4 }
 0xa0c   : > { %40326 = vmatprep.subr.bf16.mxu0 %v50340_v39  ;;  %40380 = vmatprep.subr.bf16.mxu1 %v50340_v39 }
 0xa0f   : > { %40328 = vmatpush3.bf16.msra.mxu0 %v48102_v58  ;;  %40382 = vmatpush3.bf16.msra.mxu1 %v48106_v37 }
 0xa10   : > { %35420 = vmatprep.subr.mxu0 %v50341_v28  ;;  %35522 = vmatprep.subr.mxu1 %v50341_v28 }
 0xa13   : > { %35421 = vmatpush3.msra.mxu0 %v48116_v55  ;;  %35523 = vmatpush3.msra.mxu1 %v48118_v0 }
 0xa14   : > { %35423 = vmatmul.mubr.f32.vlgmr.msra.gmra.mrb[4].mxu0 %v47772_v10  ;;  %40329 = vmatprep.subr.bf16.mxu0 %v50340_v39 }
 0xa15   : > { %35525 = vmatmul.mubr.f32.vlgmr.msra.gmra.mrb[6].mxu1 %v47772_v10  ;;  %40383 = vmatprep.subr.bf16.mxu1 %v50340_v39 }
 0xa16   : > { %40331 = vmatpush3.bf16.msra.mxu0 %v48124_v6  ;;  %40385 = vmatpush3.bf16.msra.mxu1 %v48128_v49 }
 0xa17   : > { %40332 = vmatprep.subr.bf16.mxu0 %v50340_v39  ;;  %40386 = vmatprep.subr.bf16.mxu1 %v50340_v39 }
 0xa18   : > { %35439 = vmatprep.mubr.msk.f32.mxu0 %vm41567_vm1, %v50341_v28  ;;  %35541 = vmatprep.mubr.msk.f32.mxu1 %vm41567_vm1, %v50341_v28 }
 0xa1a   : > { %40334 = vmatpush3.bf16.msra.mxu0 %v48140_v7  ;;  %40388 = vmatpush3.bf16.msra.mxu1 %v48144_v46 }
 0xa1b   : > { %40335 = vmatprep.subr.bf16.mxu0 %v50340_v39  ;;  %40389 = vmatprep.subr.bf16.mxu1 %v50340_v39 }
 0xa1e   : > { %40337 = vmatpush3.bf16.msra.mxu0 %v48156_v23  ;;  %40391 = vmatpush3.bf16.msra.mxu1 %v48160_v33 }
 0xa1f   : > { %35437 = vmatprep.subr.mxu0 %v50341_v28  ;;  %35539 = vmatprep.subr.mxu1 %v50341_v28 }
 0xa22   : > { %35438 = vmatpush3.msra.mxu0 %v48073_v13  ;;  %35540 = vmatpush3.msra.mxu1 %v48076_v17 }
 0xa23   : > { %35440 = vmatmul.mubr.f32.vlgmr.msra.gmra.mrb[4].mxu0 %v47781_v36  ;;  %40338 = vmatprep.subr.bf16.mxu0 %v50340_v39 }
 0xa24   : > { %35542 = vmatmul.mubr.f32.vlgmr.msra.gmra.mrb[6].mxu1 %v47781_v36  ;;  %40392 = vmatprep.subr.bf16.mxu1 %v50340_v39  ;;  %v48194_v36 = vpack.c.bf16 %v21791_v52, %v21784_v42  ;;  %v22752_v42 = vsel %vm13199_vm3, %v22750_v63, 0 }
 0xa25   : > { %40340 = vmatpush3.bf16.msra.mxu0 %v47948_v18  ;;  %40394 = vmatpush3.bf16.msra.mxu1 %v47950_v20  ;;  %v48271_v52 = vand.u32 4294901760, %v22752_v42 }
 0xa26   : > { %40341 = vmatprep.subr.bf16.mxu0 %v50340_v39  ;;  %40395 = vmatprep.subr.bf16.mxu1 %v50340_v39 }
 0xa27   : > { %35456 = vmatprep.mubr.msk.f32.mxu0 %vm41567_vm1, %v50341_v28  ;;  %35558 = vmatprep.mubr.msk.f32.mxu1 %vm41567_vm1, %v50341_v28  ;;  %v22827_v8 = vsub.f32 %v22752_v42, %v48271_v52 }
 0xa29   : > { %40343 = vmatpush3.bf16.msra.mxu0 %v47982_v27  ;;  %40397 = vmatpush3.bf16.msra.mxu1 %v47984_v1 }
 0xa2a   : > { %40344 = vmatprep.subr.bf16.mxu0 %v50340_v39  ;;  %40398 = vmatprep.subr.bf16.mxu1 %v50340_v39 }
 0xa2d   : > { %40346 = vmatpush3.bf16.msra.mxu0 %v48020_v60  ;;  %40400 = vmatpush3.bf16.msra.mxu1 %v48022_v12 }
 0xa2e   : > { %35454 = vmatprep.subr.mxu0 %v50341_v28  ;;  %35556 = vmatprep.subr.mxu1 %v50341_v28 }
 0xa31   : > { %35455 = vmatpush3.msra.mxu0 %v48050_v38  ;;  %35557 = vmatpush3.msra.mxu1 %v48052_v50 }
 0xa32   : > { %35457 = vmatmul.mubr.f32.vlgmr.msra.gmra.mrb[4].mxu0 %v47792_v54  ;;  %40347 = vmatprep.subr.bf16.mxu0 %v50340_v39 }
 0xa33   : > { %35559 = vmatmul.mubr.f32.vlgmr.msra.gmra.mrb[6].mxu1 %v47792_v54  ;;  %40401 = vmatprep.subr.bf16.mxu1 %v50340_v39  ;;  %v48234_v54 = vpack.c.bf16 %v21819_v61, %v21812_v40  ;;  %v48447_v40 = vsub.f32 %v23821_v22, %v23842_v14  ;;  %v23851_v61 = vand.u32 4294901760, %v23824_v48 }
 0xa34   : > { %40349 = vmatpush3.bf16.msra.mxu0 %v48194_v36  ;;  %40403 = vmatpush3.bf16.msra.mxu1 %v48200_v62 }
 0xa35   : > { %40350 = vmatprep.subr.bf16.mxu0 %v50340_v39  ;;  %40404 = vmatprep.subr.bf16.mxu1 %v50340_v39 }
 0xa36   : > { %35473 = vmatprep.mubr.msk.f32.mxu0 %vm41567_vm1, %v50341_v28  ;;  %35575 = vmatprep.mubr.msk.f32.mxu1 %vm41567_vm1, %v50341_v28 }
 0xa38   : > { %40352 = vmatpush3.bf16.msra.mxu0 %v48214_v25  ;;  %40406 = vmatpush3.bf16.msra.mxu1 %v48220_v44 }
 0xa39   : > { %40353 = vmatprep.subr.bf16.mxu0 %v50340_v39  ;;  %40407 = vmatprep.subr.bf16.mxu1 %v50340_v39 }
 0xa3c   : > { %40355 = vmatpush3.bf16.msra.mxu0 %v48234_v54  ;;  %40409 = vmatpush3.bf16.msra.mxu1 %v48240_v57 }
 0xa3d   : > { %35471 = vmatprep.subr.mxu0 %v50341_v28  ;;  %35573 = vmatprep.subr.mxu1 %v50341_v28 }
 0xa40   : > { %35472 = vmatpush3.msra.mxu0 %v48091_v51  ;;  %35574 = vmatpush3.msra.mxu1 %v48094_v16 }
 0xa41   : > { %35474 = vmatmul.mubr.f32.vlgmr.msra.gmra.mrb[4].mxu0 %v47772_v10  ;;  %40356 = vmatprep.subr.bf16.mxu0 %v50340_v39 }
 0xa42   : > { %35576 = vmatmul.mubr.f32.vlgmr.msra.gmra.mrb[6].mxu1 %v47772_v10  ;;  %40410 = vmatprep.subr.bf16.mxu1 %v50340_v39 }
 0xa43   : > { %40358 = vmatpush3.bf16.msra.mxu0 %v47948_v18  ;;  %40412 = vmatpush3.bf16.msra.mxu1 %v47950_v20 }
 0xa44   : > { %40359 = vmatprep.subr.bf16.mxu0 %v50340_v39  ;;  %40413 = vmatprep.subr.bf16.mxu1 %v50340_v39 }
 0xa45   : > { %35490 = vmatprep.mubr.msk.f32.mxu0 %vm41567_vm1, %v50341_v28  ;;  %35592 = vmatprep.mubr.msk.f32.mxu1 %vm41567_vm1, %v50341_v28 }
 0xa47   : > { %40361 = vmatpush3.bf16.msra.mxu0 %v47982_v27  ;;  %40415 = vmatpush3.bf16.msra.mxu1 %v47984_v1 }
 0xa48   : > { %40362 = vmatprep.subr.bf16.mxu0 %v50340_v39  ;;  %40416 = vmatprep.subr.bf16.mxu1 %v50340_v39 }
 0xa4b   : > { %40364 = vmatpush3.bf16.msra.mxu0 %v48020_v60  ;;  %40418 = vmatpush3.bf16.msra.mxu1 %v48022_v12 }
 0xa4c   : > { %35488 = vmatprep.subr.mxu0 %v50341_v28  ;;  %35590 = vmatprep.subr.mxu1 %v50341_v28 }
 0xa4f   : > { %35489 = vmatpush3.msra.mxu0 %v48050_v38  ;;  %35591 = vmatpush3.msra.mxu1 %v48052_v50 }
 0xa50   : > { %35491 = vmatmul.mubr.f32.vlgmr.msra.gmra.mrb[4].mxu0 %v47772_v10  ;;  %35593 = vmatmul.mubr.f32.vlgmr.msra.gmra.mrb[6].mxu1 %v47772_v10  ;;  %v48288_v10 = vand.u32 4294901760, %v22827_v8 }
 0xa51   : > { %40419 = vmatprep.subr.bf16.mxu0 %v50340_v39  ;;  %40473 = vmatprep.subr.bf16.mxu1 %v50340_v39 }
 0xa52   : > { %40421 = vmatpush3.bf16.msra.mxu0 %v47948_v18  ;;  %40475 = vmatpush3.bf16.msra.mxu1 %v47950_v20  ;;  %v22829_v41 = vsub.f32 %v22827_v8, %v48288_v10 }
 0xa53   : > { %40422 = vmatprep.subr.bf16.mxu0 %v50340_v39  ;;  %40476 = vmatprep.subr.bf16.mxu1 %v50340_v39 }
 0xa54   : > { %35609 = vmatprep.mubr.msk.f32.mxu0 %vm41567_vm1, %v50341_v28  ;;  %35711 = vmatprep.mubr.msk.f32.mxu1 %vm41567_vm1, %v50341_v28  ;;  %v22830_v9 = vand.u32 4294901760, %v22829_v41 }
 0xa56   : > { %40424 = vmatpush3.bf16.msra.mxu0 %v47982_v27  ;;  %40478 = vmatpush3.bf16.msra.mxu1 %v47984_v1 }
 0xa57   : > { %40425 = vmatprep.subr.bf16.mxu0 %v50340_v39  ;;  %40479 = vmatprep.subr.bf16.mxu1 %v50340_v39 }
 0xa5a   : > { %40427 = vmatpush3.bf16.msra.mxu0 %v48020_v60  ;;  %40481 = vmatpush3.bf16.msra.mxu1 %v48022_v12 }
 0xa5b   : > { %35607 = vmatprep.subr.mxu0 %v50341_v28  ;;  %35709 = vmatprep.subr.mxu1 %v50341_v28 }
 0xa5e   : > { %35608 = vmatpush3.msra.mxu0 %v48050_v38  ;;  %35710 = vmatpush3.msra.mxu1 %v48052_v50 }
 0xa5f   : > { %35610 = vmatmul.mubr.f32.vlgmr.msra.gmra.mrb[6].mxu0 %v22830_v9  ;;  %40428 = vmatprep.subr.bf16.mxu0 %v50340_v39 }
 0xa60   : > { %35712 = vmatmul.mubr.f32.vlgmr.msra.gmra.mrb[8].mxu1 %v22830_v9  ;;  %40482 = vmatprep.subr.bf16.mxu1 %v50340_v39 }
 0xa61   : > { %40430 = vmatpush3.bf16.msra.mxu0 %v48056_v53  ;;  %40484 = vmatpush3.bf16.msra.mxu1 %v48058_v5  ;;  %v48456_v5 = vsub.f32 %v23824_v48, %v23851_v61 }
 0xa62   : > { %40431 = vmatprep.subr.bf16.mxu0 %v50340_v39  ;;  %40485 = vmatprep.subr.bf16.mxu1 %v50340_v39 }
 0xa63   : > { %35626 = vmatprep.mubr.msk.f32.mxu0 %vm41567_vm1, %v50341_v28  ;;  %35728 = vmatprep.mubr.msk.f32.mxu1 %vm41567_vm1, %v50341_v28 }
 0xa65   : > { %40433 = vmatpush3.bf16.msra.mxu0 %v48084_v56  ;;  %40487 = vmatpush3.bf16.msra.mxu1 %v48086_v4 }
 0xa66   : > { %40434 = vmatprep.subr.bf16.mxu0 %v50340_v39  ;;  %40488 = vmatprep.subr.bf16.mxu1 %v50340_v39 }
 0xa69   : > { %40436 = vmatpush3.bf16.msra.mxu0 %v48102_v58  ;;  %40490 = vmatpush3.bf16.msra.mxu1 %v48106_v37 }
 0xa6a   : > { %35624 = vmatprep.subr.mxu0 %v50341_v28  ;;  %35726 = vmatprep.subr.mxu1 %v50341_v28 }
 0xa6d   : > { %35625 = vmatpush3.msra.mxu0 %v48116_v55  ;;  %35727 = vmatpush3.msra.mxu1 %v48118_v0 }
 0xa6e   : > { %35627 = vmatmul.mubr.f32.vlgmr.msra.gmra.mrb[6].mxu0 %v48271_v52  ;;  %40437 = vmatprep.subr.bf16.mxu0 %v50340_v39 }
 0xa6f   : > { %35729 = vmatmul.mubr.f32.vlgmr.msra.gmra.mrb[8].mxu1 %v48271_v52  ;;  %40491 = vmatprep.subr.bf16.mxu1 %v50340_v39 }
 0xa70   : > { %40439 = vmatpush3.bf16.msra.mxu0 %v48124_v6  ;;  %40493 = vmatpush3.bf16.msra.mxu1 %v48128_v49  ;;  %v23956_v6 = vand.u32 4294901760, %v48456_v5 }
 0xa71   : > { %40440 = vmatprep.subr.bf16.mxu0 %v50340_v39  ;;  %40494 = vmatprep.subr.bf16.mxu1 %v50340_v39 }
 0xa72   : > { %35643 = vmatprep.mubr.msk.f32.mxu0 %vm41567_vm1, %v50341_v28  ;;  %35745 = vmatprep.mubr.msk.f32.mxu1 %vm41567_vm1, %v50341_v28 }
 0xa74   : > { %40442 = vmatpush3.bf16.msra.mxu0 %v48140_v7  ;;  %40496 = vmatpush3.bf16.msra.mxu1 %v48144_v46  ;;  %v23957_v46 = vsub.f32 %v48456_v5, %v23956_v6 }
 0xa75   : > { %40443 = vmatprep.subr.bf16.mxu0 %v50340_v39  ;;  %40497 = vmatprep.subr.bf16.mxu1 %v50340_v39 }
 0xa78   : > { %40445 = vmatpush3.bf16.msra.mxu0 %v48156_v23  ;;  %40499 = vmatpush3.bf16.msra.mxu1 %v48160_v33  ;;  %v23958_v33 = vand.u32 4294901760, %v23957_v46 }
 0xa79   : > { %35641 = vmatprep.subr.mxu0 %v50341_v28  ;;  %35743 = vmatprep.subr.mxu1 %v50341_v28 }
 0xa7c   : > { %35642 = vmatpush3.msra.mxu0 %v48073_v13  ;;  %35744 = vmatpush3.msra.mxu1 %v48076_v17 }
 0xa7d   : > { %35644 = vmatmul.mubr.f32.vlgmr.msra.gmra.mrb[6].mxu0 %v22827_v8  ;;  %40446 = vmatprep.subr.bf16.mxu0 %v50340_v39 }
 0xa7e   : > { %35746 = vmatmul.mubr.f32.vlgmr.msra.gmra.mrb[8].mxu1 %v22827_v8  ;;  %40500 = vmatprep.subr.bf16.mxu1 %v50340_v39 }
 0xa7f   : > { %40448 = vmatpush3.bf16.msra.mxu0 %v47948_v18  ;;  %40502 = vmatpush3.bf16.msra.mxu1 %v47950_v20 }
 0xa80   : > { %40449 = vmatprep.subr.bf16.mxu0 %v50340_v39  ;;  %40503 = vmatprep.subr.bf16.mxu1 %v50340_v39 }
 0xa81   : > { %35660 = vmatprep.mubr.msk.f32.mxu0 %vm41567_vm1, %v50341_v28  ;;  %35762 = vmatprep.mubr.msk.f32.mxu1 %vm41567_vm1, %v50341_v28 }
 0xa83   : > { %40451 = vmatpush3.bf16.msra.mxu0 %v47982_v27  ;;  %40505 = vmatpush3.bf16.msra.mxu1 %v47984_v1 }
 0xa84   : > { %40452 = vmatprep.subr.bf16.mxu0 %v50340_v39  ;;  %40506 = vmatprep.subr.bf16.mxu1 %v50340_v39 }
 0xa87   : > { %40454 = vmatpush3.bf16.msra.mxu0 %v48020_v60  ;;  %40508 = vmatpush3.bf16.msra.mxu1 %v48022_v12 }
 0xa88   : > { %35658 = vmatprep.subr.mxu0 %v50341_v28  ;;  %35760 = vmatprep.subr.mxu1 %v50341_v28 }
 0xa8b   : > { %35659 = vmatpush3.msra.mxu0 %v48050_v38  ;;  %35761 = vmatpush3.msra.mxu1 %v48052_v50 }
 0xa8c   : > { %35661 = vmatmul.mubr.f32.vlgmr.msra.gmra.mrb[6].mxu0 %v48288_v10  ;;  %40455 = vmatprep.subr.bf16.mxu0 %v50340_v39 }
 0xa8d   : > { %35763 = vmatmul.mubr.f32.vlgmr.msra.gmra.mrb[8].mxu1 %v48288_v10  ;;  %40509 = vmatprep.subr.bf16.mxu1 %v50340_v39 }
 0xa8e   : > { %40457 = vmatpush3.bf16.msra.mxu0 %v48194_v36  ;;  %40511 = vmatpush3.bf16.msra.mxu1 %v48200_v62  ;;  %v23963_v36 = vand.u32 4294901760, %v48458_v59 }
 0xa8f   : > { %40458 = vmatprep.subr.bf16.mxu0 %v50340_v39  ;;  %40512 = vmatprep.subr.bf16.mxu1 %v50340_v39 }
 0xa90   : > { %35677 = vmatprep.mubr.msk.f32.mxu0 %vm41567_vm1, %v50341_v28  ;;  %35779 = vmatprep.mubr.msk.f32.mxu1 %vm41567_vm1, %v50341_v28 }
 0xa92   : > { %40460 = vmatpush3.bf16.msra.mxu0 %v48214_v25  ;;  %40514 = vmatpush3.bf16.msra.mxu1 %v48220_v44  ;;  %v23964_v44 = vsub.f32 %v48458_v59, %v23963_v36 }
 0xa93   : > { %40461 = vmatprep.subr.bf16.mxu0 %v50340_v39  ;;  %40515 = vmatprep.subr.bf16.mxu1 %v50340_v39 }
 0xa96   : > { %40463 = vmatpush3.bf16.msra.mxu0 %v48234_v54  ;;  %40517 = vmatpush3.bf16.msra.mxu1 %v48240_v57  ;;  %v23965_v57 = vand.u32 4294901760, %v23964_v44 }
 0xa97   : > { %35675 = vmatprep.subr.mxu0 %v50341_v28  ;;  %35777 = vmatprep.subr.mxu1 %v50341_v28 }
 0xa9a   : > { %35676 = vmatpush3.msra.mxu0 %v48091_v51  ;;  %35778 = vmatpush3.msra.mxu1 %v48094_v16  ;;  %v23935_v51 = vand.u32 4294901760, %v48447_v40 }
 0xa9b   : > { %35678 = vmatmul.mubr.f32.vlgmr.msra.gmra.mrb[6].mxu0 %v48271_v52  ;;  %40464 = vmatprep.subr.bf16.mxu0 %v50340_v39 }
 0xa9c   : > { %35780 = vmatmul.mubr.f32.vlgmr.msra.gmra.mrb[8].mxu1 %v48271_v52  ;;  %40518 = vmatprep.subr.bf16.mxu1 %v50340_v39  ;;  %v23936_v37 = vsub.f32 %v48447_v40, %v23935_v51 }
 0xa9d   : > { %40466 = vmatpush3.bf16.msra.mxu0 %v47948_v18  ;;  %40520 = vmatpush3.bf16.msra.mxu1 %v47950_v20  ;;  %v23819_v18 = vld [vmem:[%s49501_s5] sm:$0xff]  ;;  %v23820_v20 = vld [vmem:[%s49501_s5 + $0x8] sm:$0xff] }
 0xa9e   : > { %40467 = vmatprep.subr.bf16.mxu0 %v50340_v39  ;;  %40521 = vmatprep.subr.bf16.mxu1 %v50340_v39  ;;  %v23836_v19 = vand.u32 4294901760, %v23819_v18  ;;  %v23839_v31 = vand.u32 4294901760, %v23820_v20  ;;  %v23937_v11 = vand.u32 4294901760, %v23936_v37  ;;  %v27485_v37 = vld [vmem:[%s49501_s5 + $0x78] sm:$0xf] }
 0xa9f   : > { %35694 = vmatprep.mubr.msk.f32.mxu0 %vm41567_vm1, %v50341_v28  ;;  %35796 = vmatprep.mubr.msk.f32.mxu1 %vm41567_vm1, %v50341_v28 }
 0xaa0   : > { %v48430_v2 = vpack.c.bf16 %v23839_v31, %v23836_v19  ;;  %v48432_v32 = vsub.f32 %v23819_v18, %v23836_v19  ;;  %v48434_v26 = vsub.f32 %v23820_v20, %v23839_v31 }
 0xaa1   : > { %40469 = vmatpush3.bf16.msra.mxu0 %v47982_v27  ;;  %40523 = vmatpush3.bf16.msra.mxu1 %v47984_v1  ;;  %v23822_v27 = vld [vmem:[%s49501_s5 + $0x18] sm:$0xff]  ;;  %v23823_v1 = vld [vmem:[%s49501_s5 + $0x20] sm:$0xff] }
 0xaa2   : > { %40470 = vmatprep.subr.bf16.mxu0 %v50340_v39  ;;  %40524 = vmatprep.subr.bf16.mxu1 %v50340_v39  ;;  %v23845_v30 = vand.u32 4294901760, %v23822_v27  ;;  %v23921_v56 = vand.u32 4294901760, %v48432_v32  ;;  %v23928_v4 = vand.u32 4294901760, %v48434_v26  ;;  %v40552_v18 = vpack.c.bf16 %v48434_v26, %v48432_v32 }
 0xaa4   : > { %v23922_v3 = vsub.f32 %v48432_v32, %v23921_v56  ;;  %v23929_v21 = vsub.f32 %v48434_v26, %v23928_v4  ;;  %v40576_v22 = vpack.c.bf16 %v23928_v4, %v23921_v56  ;;  %v27477_v32 = vld [vmem:[%s49500_s4] ss:$0 sm:$0xff]  ;;  %v27479_v56 = vld [vmem:[%s49501_s5 + $0x48] sm:$0xff] }
 0xaa5   : > { %40472 = vmatpush3.bf16.msra.mxu0 %v48020_v60  ;;  %40526 = vmatpush3.bf16.msra.mxu1 %v48022_v12  ;;  %v23848_v60 = vand.u32 4294901760, %v23823_v1  ;;  %v23833_v12 = vsel %vm23831_vm4, %v23826_v43, 0 }
 0xaa6   : > { %35692 = vmatprep.subr.mxu0 %v50341_v28  ;;  %35794 = vmatprep.subr.mxu1 %v50341_v28  ;;  %v23857_v15 = vand.u32 4294901760, %v23833_v12  ;;  %v23923_v29 = vand.u32 4294901760, %v23922_v3  ;;  %v23930_v24 = vand.u32 4294901760, %v23929_v21  ;;  %v24393_v3 = vand.u32 4294901760, %v27479_v56  ;;  %v27481_v21 = vld [vmem:[%s49501_s5 + $0x58] sm:$0xff] }
 0xaa7   : > { %v48454_v53 = vsub.f32 %v23823_v1, %v23848_v60  ;;  %v48463_v13 = vpack.c.bf16 %v23851_v61, %v23848_v60 }
 0xaa8   : > { %v48460_v47 = vsub.f32 %v23833_v12, %v23857_v15  ;;  %v48467_v17 = vpack.c.bf16 %v23857_v15, %v23854_v34  ;;  %v40540_v58 = vpack.c.bf16 %v23930_v24, %v23923_v29 }
 0xaa9   : > { %35693 = vmatpush3.msra.mxu0 %v48050_v38  ;;  %35795 = vmatpush3.msra.mxu1 %v48052_v50  ;;  %v48450_v38 = vpack.c.bf16 %v23845_v30, %v23842_v14  ;;  %v48452_v50 = vsub.f32 %v23822_v27, %v23845_v30  ;;  %v23949_v0 = vand.u32 4294901760, %v48454_v53  ;;  %v40558_v19 = vpack.c.bf16 %v48456_v5, %v48454_v53 }
 0xaaa   : > { %35695 = vmatmul.mubr.f32.vlgmr.msra.gmra.mrb[6].mxu0 %v48271_v52  ;;  %35797 = vmatmul.mubr.f32.vlgmr.msra.gmra.mrb[8].mxu1 %v48271_v52  ;;  %v23970_v62 = vand.u32 4294901760, %v48460_v47  ;;  %v40561_v31 = vpack.c.bf16 %v48460_v47, %v48458_v59 }
 0xaab   : > { %40527 = vmatprep.subr.bf16.mxu0 %v50340_v39  ;;  %35815 = vmatprep.mubr.msk.f32.mxu0 %vm41567_vm1, %v50341_v28  ;;  %v23942_v16 = vand.u32 4294901760, %v48452_v50  ;;  %v23950_v7 = vsub.f32 %v48454_v53, %v23949_v0  ;;  %v40555_v20 = vpack.c.bf16 %v48452_v50, %v48447_v40  ;;  %v40582_v1 = vpack.c.bf16 %v23956_v6, %v23949_v0  ;;  %v27484_v6 = vld [vmem:[%s49501_s5 + $0x70] sm:$0xff] }
 0xaac   : > { %40887 = vmatprep.subr.bf16.mxu1 %v50340_v39  ;;  %36399 = vmatprep.mubr.msk.f32.mxu1 %vm41567_vm1, %v50341_v28  ;;  %v23971_v54 = vsub.f32 %v48460_v47, %v23970_v62  ;;  %v40585_v14 = vpack.c.bf16 %v23970_v62, %v23963_v36  ;;  %v27478_v47 = vld [vmem:[%s49501_s5 + $0x40] sm:$0xff] }
 0xaad   : > { %40529 = vmatpush3.bf16.msra.mxu0 %v48430_v2  ;;  %v23943_v35 = vsub.f32 %v48452_v50, %v23942_v16  ;;  %v23951_v23 = vand.u32 4294901760, %v23950_v7  ;;  %v40579_v27 = vpack.c.bf16 %v23942_v16, %v23935_v51  ;;  %v48556_v51 = vsub.f32 %v27479_v56, %v24393_v3 }
 0xaae   : > { %40530 = vmatprep.subr.bf16.mxu0 %v50340_v39  ;;  %v23972_v63 = vand.u32 4294901760, %v23971_v54 }
 0xaaf   : > { %v23944_v55 = vand.u32 4294901760, %v23943_v35  ;;  %v40546_v25 = vpack.c.bf16 %v23958_v33, %v23951_v23  ;;  %v27482_v35 = vld [vmem:[%s49501_s5 + $0x60] sm:$0xff]  ;;  %v24482_v46 = vand.u32 4294901760, %v48556_v51 }
 0xab0   : > { %v40549_v9 = vpack.c.bf16 %v23972_v63, %v23965_v57  ;;  %v24402_v33 = vand.u32 4294901760, %v27482_v35 }
 0xab1   : > { %40532 = vmatpush3.bf16.msra.mxu0 %v48450_v38  ;;  %v40543_v49 = vpack.c.bf16 %v23944_v55, %v23937_v11  ;;  %v27483_v11 = vld [vmem:[%s49501_s5 + $0x68] sm:$0xff]  ;;  %v24483_v57 = vsub.f32 %v48556_v51, %v24482_v46 }
 0xab2   : > { %40533 = vmatprep.subr.bf16.mxu0 %v50340_v39  ;;  %v24405_v36 = vand.u32 4294901760, %v27483_v11 }
 0xab5   : > { %40535 = vmatpush3.bf16.msra.mxu0 %v48463_v13 }
 0xab6   : > { %40536 = vmatprep.subr.bf16.mxu0 %v50340_v39 }
 0xab9   : > { %40538 = vmatpush3.bf16.msra.mxu0 %v48467_v17 }
 0xaba   : > { %40539 = vmatprep.subr.bf16.mxu0 %v50340_v39 }
 0xb23   : > { %v22219_v42 = vpop.f32.mrb[4].mxu0  ;;  %v22744_v52 = vpop.f32.mrb[6].mxu1 }
 0xb24   : > { %v23804_v8 = vmax.f32 %v22219_v42, %v22744_v52  ;;  %v35492_v10 = vpop.f32.mrb[5].mxu0  ;;  %v35594_v41 = vpop.f32.mrb[7].mxu1  ;;  %v48602_v52 = vpack.c.bf16 %v24405_v36, %v24402_v33 }
 0xb25   : > { %v48606_v10 = vsub.f32 %v27483_v11, %v24405_v36  ;;  %v27488_v11 = vld [vmem:[%s49501_s5 + $0x90] sm:$0xff]  ;;  %v27490_v36 = vld [vmem:[%s49501_s5 + $0xa0] sm:$0xff] }
 0xb7d   : > { %v23274_v48 = vpop.f32.mrb[6].mxu0  ;;  %v23799_v45 = vpop.f32.mrb[8].mxu1 }
 0xb7e   : > { %v23805_v43 = vmax.f32 %v23274_v48, %v23799_v45  ;;  %v35696_v30 = vpop.f32.mrb[7].mxu0  ;;  %v35798_v60 = vpop.f32.mrb[9].mxu1 }
 0xb80   : > { %v23806_v26 = vmax.f32 %v23804_v8, %v23805_v43  ;;  %v48604_v8 = vsub.f32 %v27482_v35, %v24402_v33  ;;  %v27493_v33 = vld [vmem:[%s49501_s5 + $0xb8] sm:$0xf] }
 0xb82   : > { %v23813_v12 = vadd.f32 %v27477_v32, %v23806_v26 }
 0xb84   : > { %v23814_v40 = vmax.f32 %v23813_v12, 0.0 }
 0xb86   : > { %23816 = vst.msk [vmem:[#allocation3] sm:$0x1f] %vm23815_vm5, %v23814_v40 }
 0xb8d   : > { %v23818_v61 = vld [vmem:[#allocation3] sm:$0x1]  ;;  %v24373_v4 = vld [vmem:[#allocation3 + $0x1] sm:$0x1] }
 0xb8e   : > { %v23829_v34 = vsel %vm23827_vm6, %v23818_v61, 0  ;;  %v24384_v29 = vsel %vm23827_vm6, %v24373_v4, 0 }
 0xb8f   : > { %v48500_v15 = vand.u32 4294901760, %v23829_v34  ;;  %v48571_v55 = vand.u32 4294901760, %v24384_v29 }
 0xb91   : > { %v23909_v50 = vsub.f32 %v23829_v34, %v48500_v15  ;;  %v48591_v62 = vsub.f32 %v24384_v29, %v48571_v55 }
 0xb93   : > { %v23910_v53 = vand.u32 4294901760, %v23909_v50  ;;  %v24464_v41 = vand.u32 4294901760, %v48591_v62 }
 0xb95   : > { %v23911_v5 = vsub.f32 %v23909_v50, %v23910_v53  ;;  %v24465_v48 = vsub.f32 %v48591_v62, %v24464_v41 }
 0xb97   : > { %v23912_v59 = vand.u32 4294901760, %v23911_v5  ;;  %v24466_v40 = vand.u32 4294901760, %v24465_v48 }
 0xb99   : > { %35816 = vmatmul.mubr.f32.vlgmr.msra.gmra.mrb[8].mxu0 %v23912_v59 }
 0xb9a   : > { %40541 = vmatpush3.bf16.msra.mxu0 %v40540_v58  ;;  %35834 = vmatprep.mubr.msk.f32.mxu0 %vm41567_vm1, %v50341_v28  ;;  %v24399_v58 = vand.u32 4294901760, %v27481_v21 }
 0xb9b   : > { %40542 = vmatprep.subr.bf16.mxu0 %v50340_v39 }
 0xb9c   : > { %v48576_v0 = vsub.f32 %v27481_v21, %v24399_v58 }
 0xb9e   : > { %40544 = vmatpush3.bf16.msra.mxu0 %v40543_v49  ;;  %v24387_v49 = vsel %vm23831_vm4, %v27485_v37, 0  ;;  %v24496_v42 = vand.u32 4294901760, %v48576_v0  ;;  %v24927_v37 = vld [vmem:[#allocation3 + $0x2] sm:$0x1] }
 0xb9f   : > { %40545 = vmatprep.subr.bf16.mxu0 %v50340_v39  ;;  %v24411_v44 = vand.u32 4294901760, %v24387_v49 }
 0xba2   : > { %40547 = vmatpush3.bf16.msra.mxu0 %v40546_v25  ;;  %v24408_v25 = vand.u32 4294901760, %v27484_v6 }
 0xba3   : > { %40548 = vmatprep.subr.bf16.mxu0 %v50340_v39 }
 0xba6   : > { %40550 = vmatpush3.bf16.msra.mxu0 %v40549_v9  ;;  %v48610_v9 = vpack.c.bf16 %v24411_v44, %v24408_v25 }
 0xba7   : > { %40551 = vmatprep.subr.bf16.mxu0 %v50340_v39 }
 0xba9   : > { %35835 = vmatmul.mubr.f32.vlgmr.msra.gmra.mrb[8].mxu0 %v48500_v15 }
 0xbaa   : > { %40553 = vmatpush3.bf16.msra.mxu0 %v40552_v18  ;;  %35853 = vmatprep.mubr.msk.f32.mxu0 %vm41567_vm1, %v50341_v28 }
 0xbab   : > { %40554 = vmatprep.subr.bf16.mxu0 %v50340_v39 }
 0xbae   : > { %40556 = vmatpush3.bf16.msra.mxu0 %v40555_v20  ;;  %v24484_v20 = vand.u32 4294901760, %v24483_v57  ;;  %v27492_v57 = vld [vmem:[%s49501_s5 + $0xb0] sm:$0xff] }
 0xbaf   : > { %40557 = vmatprep.subr.bf16.mxu0 %v50340_v39 }
 0xbb2   : > { %40559 = vmatpush3.bf16.msra.mxu0 %v40558_v19 }
 0xbb3   : > { %40560 = vmatprep.subr.bf16.mxu0 %v50340_v39 }
 0xbb6   : > { %40562 = vmatpush3.bf16.msra.mxu0 %v40561_v31  ;;  %v24497_v31 = vsub.f32 %v48576_v0, %v24496_v42 }
 0xbb7   : > { %40563 = vmatprep.subr.bf16.mxu0 %v50340_v39 }
 0xbb8   : > { %v24498_v30 = vand.u32 4294901760, %v24497_v31 }
 0xbb9   : > { %35854 = vmatmul.mubr.f32.vlgmr.msra.gmra.mrb[8].mxu0 %v23909_v50 }
 0xbba   : > { %40565 = vmatpush3.bf16.msra.mxu0 %v48430_v2  ;;  %35872 = vmatprep.mubr.msk.f32.mxu0 %vm41567_vm1, %v50341_v28 }
 0xbbb   : > { %40566 = vmatprep.subr.bf16.mxu0 %v50340_v39 }
 0xbbe   : > { %40568 = vmatpush3.bf16.msra.mxu0 %v48450_v38 }
 0xbbf   : > { %40569 = vmatprep.subr.bf16.mxu0 %v50340_v39 }
 0xbc2   : > { %40571 = vmatpush3.bf16.msra.mxu0 %v48463_v13 }
 0xbc3   : > { %40572 = vmatprep.subr.bf16.mxu0 %v50340_v39 }
 0xbc6   : > { %40574 = vmatpush3.bf16.msra.mxu0 %v48467_v17 }
 0xbc7   : > { %40575 = vmatprep.subr.bf16.mxu0 %v50340_v39 }
 0xbc9   : > { %35873 = vmatmul.mubr.f32.vlgmr.msra.gmra.mrb[8].mxu0 %v23910_v53 }
 0xbca   : > { %40577 = vmatpush3.bf16.msra.mxu0 %v40576_v22  ;;  %35891 = vmatprep.mubr.msk.f32.mxu0 %vm41567_vm1, %v50341_v28  ;;  %v48619_v22 = vsub.f32 %v27484_v6, %v24408_v25 }
 0xbcb   : > { %40578 = vmatprep.subr.bf16.mxu0 %v50340_v39 }
 0xbcc   : > { %v24517_v26 = vand.u32 4294901760, %v48619_v22 }
 0xbce   : > { %40580 = vmatpush3.bf16.msra.mxu0 %v40579_v27  ;;  %v48621_v27 = vsub.f32 %v24387_v49, %v24411_v44  ;;  %v24518_v50 = vsub.f32 %v48619_v22, %v24517_v26 }
 0xbcf   : > { %40581 = vmatprep.subr.bf16.mxu0 %v50340_v39 }
 0xbd0   : > { %v24524_v12 = vand.u32 4294901760, %v48621_v27  ;;  %v24519_v59 = vand.u32 4294901760, %v24518_v50 }
 0xbd2   : > { %40583 = vmatpush3.bf16.msra.mxu0 %v40582_v1  ;;  %v24503_v1 = vand.u32 4294901760, %v48604_v8  ;;  %v24525_v53 = vsub.f32 %v48621_v27, %v24524_v12 }
 0xbd3   : > { %40584 = vmatprep.subr.bf16.mxu0 %v50340_v39 }
 0xbd4   : > { %v24504_v60 = vsub.f32 %v48604_v8, %v24503_v1 }
 0xbd6   : > { %40586 = vmatpush3.bf16.msra.mxu0 %v40585_v14  ;;  %v24510_v14 = vand.u32 4294901760, %v48606_v10  ;;  %v24505_v34 = vand.u32 4294901760, %v24504_v60 }
 0xbd7   : > { %40587 = vmatprep.subr.bf16.mxu0 %v50340_v39 }
 0xbd8   : > { %v24511_v32 = vsub.f32 %v48606_v10, %v24510_v14 }
 0xbd9   : > { %35892 = vmatmul.mubr.f32.vlgmr.msra.gmra.mrb[8].mxu0 %v48500_v15 }
 0xbda   : > { %40589 = vmatpush3.bf16.msra.mxu0 %v48430_v2  ;;  %35910 = vmatprep.mubr.msk.f32.mxu0 %vm41567_vm1, %v50341_v28  ;;  %v24390_v2 = vand.u32 4294901760, %v27478_v47 }
 0xbdb   : > { %40590 = vmatprep.subr.bf16.mxu0 %v50340_v39 }
 0xbdc   : > { %v48554_v24 = vsub.f32 %v27478_v47, %v24390_v2  ;;  %v24526_v47 = vand.u32 4294901760, %v24525_v53 }
 0xbde   : > { %40592 = vmatpush3.bf16.msra.mxu0 %v48450_v38  ;;  %v27480_v38 = vld [vmem:[%s49501_s5 + $0x50] sm:$0xff]  ;;  %v24475_v7 = vand.u32 4294901760, %v48554_v24  ;;  %v40621_v56 = vpack.c.bf16 %v24526_v47, %v24519_v59  ;;  %v40624_v4 = vpack.c.bf16 %v48556_v51, %v48554_v24  ;;  %v40657_v51 = vpack.c.bf16 %v24524_v12, %v24517_v26 }
 0xbdf   : > { %40593 = vmatprep.subr.bf16.mxu0 %v50340_v39  ;;  %v24396_v16 = vand.u32 4294901760, %v27480_v38 }
 0xbe0   : > { %v24476_v54 = vsub.f32 %v48554_v24, %v24475_v7  ;;  %v40648_v21 = vpack.c.bf16 %v24482_v46, %v24475_v7  ;;  %v40654_v24 = vpack.c.bf16 %v24510_v14, %v24503_v1  ;;  %v24950_v46 = vand.u32 4294901760, %v27488_v11 }
 0xbe1   : > { %v48585_v23 = vpack.c.bf16 %v24399_v58, %v24396_v16  ;;  %v27487_v58 = vld [vmem:[%s49501_s5 + $0x88] sm:$0xff] }
 0xbe2   : > { %40595 = vmatpush3.bf16.msra.mxu0 %v48463_v13  ;;  %v48559_v13 = vpack.c.bf16 %v24393_v3, %v24390_v2  ;;  %v24477_v18 = vand.u32 4294901760, %v24476_v54  ;;  %v40630_v3 = vpack.c.bf16 %v48606_v10, %v48604_v8  ;;  %v24947_v35 = vand.u32 4294901760, %v27487_v58 }
 0xbe3   : > { %40596 = vmatprep.subr.bf16.mxu0 %v50340_v39  ;;  %v48734_v44 = vsub.f32 %v27488_v11, %v24950_v46  ;;  %v24956_v10 = vand.u32 4294901760, %v27490_v36 }
 0xbe4   : > { %v40612_v45 = vpack.c.bf16 %v24484_v20, %v24477_v18  ;;  %v48717_v49 = vsub.f32 %v27487_v58, %v24947_v35 }
 0xbe5   : > { %v25043_v31 = vand.u32 4294901760, %v48734_v44  ;;  %v48765_v1 = vsub.f32 %v27490_v36, %v24956_v10 }
 0xbe6   : > { %40598 = vmatpush3.bf16.msra.mxu0 %v48467_v17  ;;  %v48573_v17 = vsub.f32 %v27480_v38, %v24396_v16  ;;  %v40633_v38 = vpack.c.bf16 %v48621_v27, %v48619_v22  ;;  %v27486_v16 = vld [vmem:[%s49501_s5 + $0x80] sm:$0xff] }
 0xbe7   : > { %40599 = vmatprep.subr.bf16.mxu0 %v50340_v39  ;;  %v25044_v60 = vsub.f32 %v48734_v44, %v25043_v31 }
 0xbe8   : > { %v24489_v63 = vand.u32 4294901760, %v48573_v17  ;;  %v40627_v2 = vpack.c.bf16 %v48576_v0, %v48573_v17  ;;  %v24938_v0 = vsel %vm23827_vm6, %v24927_v37, 0 }
 0xbe9   : > { %35911 = vmatmul.mubr.f32.vlgmr.msra.gmra.mrb[8].mxu0 %v48500_v15  ;;  %v24512_v15 = vand.u32 4294901760, %v24511_v32  ;;  %v48732_v25 = vand.u32 4294901760, %v24938_v0  ;;  %v25045_v50 = vand.u32 4294901760, %v25044_v60 }
 0xbea   : > { %40601 = vmatpush3.bf16.msra.mxu0 %v48559_v13  ;;  %35929 = vmatprep.mubr.msk.f32.mxu0 %vm41567_vm1, %v50341_v28  ;;  %v24490_v19 = vsub.f32 %v48573_v17, %v24489_v63  ;;  %v40651_v29 = vpack.c.bf16 %v24496_v42, %v24489_v63  ;;  %v27489_v17 = vld [vmem:[%s49501_s5 + $0x98] sm:$0xff]  ;;  %v24941_v63 = vsel %vm23831_vm4, %v27493_v33, 0  ;;  %v25481_v33 = vld [vmem:[#allocation3 + $0x3] sm:$0x1] }
 0xbeb   : > { %40602 = vmatprep.subr.bf16.mxu0 %v50340_v39  ;;  %v40618_v5 = vpack.c.bf16 %v24512_v15, %v24505_v34  ;;  %v24965_v18 = vand.u32 4294901760, %v24941_v63 }
 0xbec   : > { %v24491_v43 = vand.u32 4294901760, %v24490_v19 }
 0xbed   : > { %v48782_v12 = vsub.f32 %v24941_v63, %v24965_v18 }
 0xbee   : > { %40604 = vmatpush3.bf16.msra.mxu0 %v48585_v23  ;;  %v40615_v61 = vpack.c.bf16 %v24498_v30, %v24491_v43 }
 0xbef   : > { %40605 = vmatprep.subr.bf16.mxu0 %v50340_v39 }
 0xbf2   : > { %40607 = vmatpush3.bf16.msra.mxu0 %v48602_v52 }
 0xbf3   : > { %40608 = vmatprep.subr.bf16.mxu0 %v50340_v39 }
 0xbf6   : > { %40610 = vmatpush3.bf16.msra.mxu0 %v48610_v9 }
 0xbf7   : > { %40611 = vmatprep.subr.bf16.mxu0 %v50340_v39 }
 0xbf9   : > { %35930 = vmatmul.mubr.f32.vlgmr.msra.gmra.mrb[8].mxu0 %v24466_v40  ;;  %v25057_v40 = vand.u32 4294901760, %v48765_v1 }
 0xbfa   : > { %40613 = vmatpush3.bf16.msra.mxu0 %v40612_v45  ;;  %35948 = vmatprep.mubr.msk.f32.mxu0 %vm41567_vm1, %v50341_v28 }
 0xbfb   : > { %40614 = vmatprep.subr.bf16.mxu0 %v50340_v39 }
 0xbfe   : > { %40616 = vmatpush3.bf16.msra.mxu0 %v40615_v61 }
 0xbff   : > { %40617 = vmatprep.subr.bf16.mxu0 %v50340_v39 }
 0xc02   : > { %40619 = vmatpush3.bf16.msra.mxu0 %v40618_v5  ;;  %v25058_v5 = vsub.f32 %v48765_v1, %v25057_v40 }
 0xc03   : > { %40620 = vmatprep.subr.bf16.mxu0 %v50340_v39 }
 0xc06   : > { %40622 = vmatpush3.bf16.msra.mxu0 %v40621_v56  ;;  %v25078_v56 = vand.u32 4294901760, %v48782_v12 }
 0xc07   : > { %40623 = vmatprep.subr.bf16.mxu0 %v50340_v39 }
 0xc09   : > { %35949 = vmatmul.mubr.f32.vlgmr.msra.gmra.mrb[8].mxu0 %v48571_v55 }
 0xc0a   : > { %40625 = vmatpush3.bf16.msra.mxu0 %v40624_v4  ;;  %35967 = vmatprep.mubr.msk.f32.mxu0 %vm41567_vm1, %v50341_v28 }
 0xc0b   : > { %40626 = vmatprep.subr.bf16.mxu0 %v50340_v39 }
 0xc0e   : > { %40628 = vmatpush3.bf16.msra.mxu0 %v40627_v2 }
 0xc0f   : > { %40629 = vmatprep.subr.bf16.mxu0 %v50340_v39 }
 0xc12   : > { %40631 = vmatpush3.bf16.msra.mxu0 %v40630_v3  ;;  %v25059_v3 = vand.u32 4294901760, %v25058_v5 }
 0xc13   : > { %40632 = vmatprep.subr.bf16.mxu0 %v50340_v39 }
 0xc16   : > { %40634 = vmatpush3.bf16.msra.mxu0 %v40633_v38 }
 0xc17   : > { %40635 = vmatprep.subr.bf16.mxu0 %v50340_v39 }
 0xc19   : > { %35968 = vmatmul.mubr.f32.vlgmr.msra.gmra.mrb[8].mxu0 %v48591_v62  ;;  %v27491_v62 = vld [vmem:[%s49501_s5 + $0xa8] sm:$0xff] }
 0xc1a   : > { %40637 = vmatpush3.bf16.msra.mxu0 %v48559_v13  ;;  %35986 = vmatprep.mubr.msk.f32.mxu0 %vm41567_vm1, %v50341_v28 }
 0xc1b   : > { %40638 = vmatprep.subr.bf16.mxu0 %v50340_v39 }
 0xc1e   : > { %40640 = vmatpush3.bf16.msra.mxu0 %v48585_v23 }
 0xc1f   : > { %40641 = vmatprep.subr.bf16.mxu0 %v50340_v39 }
 0xc22   : > { %40643 = vmatpush3.bf16.msra.mxu0 %v48602_v52 }
 0xc23   : > { %40644 = vmatprep.subr.bf16.mxu0 %v50340_v39 }
 0xc26   : > { %40646 = vmatpush3.bf16.msra.mxu0 %v48610_v9 }
 0xc27   : > { %40647 = vmatprep.subr.bf16.mxu0 %v50340_v39 }
 0xc29   : > { %35987 = vmatmul.mubr.f32.vlgmr.msra.gmra.mrb[8].mxu0 %v24464_v41  ;;  %v24959_v41 = vand.u32 4294901760, %v27491_v62 }
 0xc2a   : > { %40649 = vmatpush3.bf16.msra.mxu0 %v40648_v21  ;;  %36005 = vmatprep.mubr.msk.f32.mxu0 %vm41567_vm1, %v50341_v28 }
 0xc2b   : > { %40650 = vmatprep.subr.bf16.mxu0 %v50340_v39  ;;  %v48763_v27 = vpack.c.bf16 %v24959_v41, %v24956_v10  ;;  %v48767_v14 = vsub.f32 %v27491_v62, %v24959_v41  ;;  %v27496_v62 = vld [vmem:[%s49501_s5 + $0xd0] sm:$0xff]  ;;  %v27501_v10 = vld [vmem:[%s49501_s5 + $0xf8] sm:$0xf]  ;;  %v27498_v41 = vld [vmem:[%s49501_s5 + $0xe0] sm:$0xff] }
 0xc2d   : > { %v25064_v61 = vand.u32 4294901760, %v48767_v14 }
 0xc2e   : > { %40652 = vmatpush3.bf16.msra.mxu0 %v40651_v29  ;;  %v25079_v29 = vsub.f32 %v48782_v12, %v25078_v56 }
 0xc2f   : > { %40653 = vmatprep.subr.bf16.mxu0 %v50340_v39  ;;  %v25065_v59 = vsub.f32 %v48767_v14, %v25064_v61 }
 0xc31   : > { %v25066_v38 = vand.u32 4294901760, %v25065_v59 }
 0xc32   : > { %40655 = vmatpush3.bf16.msra.mxu0 %v40654_v24 }
 0xc33   : > { %40656 = vmatprep.subr.bf16.mxu0 %v50340_v39  ;;  %v40690_v24 = vpack.c.bf16 %v25066_v38, %v25059_v3 }
 0xc36   : > { %40658 = vmatpush3.bf16.msra.mxu0 %v40657_v51 }
 0xc37   : > { %40659 = vmatprep.subr.bf16.mxu0 %v50340_v39 }
 0xc39   : > { %36006 = vmatmul.mubr.f32.vlgmr.msra.gmra.mrb[8].mxu0 %v48571_v55 }
 0xc3a   : > { %40661 = vmatpush3.bf16.msra.mxu0 %v48559_v13  ;;  %36024 = vmatprep.mubr.msk.f32.mxu0 %vm41567_vm1, %v50341_v28  ;;  %v24944_v13 = vand.u32 4294901760, %v27486_v16 }
 0xc3b   : > { %40662 = vmatprep.subr.bf16.mxu0 %v50340_v39 }
 0xc3c   : > { %v48715_v6 = vsub.f32 %v27486_v16, %v24944_v13  ;;  %v48720_v7 = vpack.c.bf16 %v24947_v35, %v24944_v13  ;;  %v25080_v16 = vand.u32 4294901760, %v25079_v29  ;;  %v40702_v35 = vpack.c.bf16 %v48767_v14, %v48765_v1 }
 0xc3d   : > { %v25510_v14 = vand.u32 4294901760, %v27498_v41 }
 0xc3e   : > { %40664 = vmatpush3.bf16.msra.mxu0 %v48585_v23  ;;  %v24953_v23 = vand.u32 4294901760, %v27489_v17  ;;  %v25029_v42 = vand.u32 4294901760, %v48715_v6  ;;  %v40696_v37 = vpack.c.bf16 %v48717_v49, %v48715_v6 }
 0xc3f   : > { %40665 = vmatprep.subr.bf16.mxu0 %v50340_v39 }
 0xc40   : > { %v48737_v54 = vsub.f32 %v27489_v17, %v24953_v23  ;;  %v48746_v8 = vpack.c.bf16 %v24953_v23, %v24950_v46  ;;  %v25030_v20 = vsub.f32 %v48715_v6, %v25029_v42  ;;  %v40726_v6 = vpack.c.bf16 %v25064_v61, %v25057_v40  ;;  %v27494_v46 = vld [vmem:[%s49501_s5 + $0xc0] sm:$0xff]  ;;  %v27495_v23 = vld [vmem:[%s49501_s5 + $0xc8] sm:$0xff] }
 0xc41   : > { %v25501_v36 = vand.u32 4294901760, %v27495_v23  ;;  %v48926_v40 = vsub.f32 %v27498_v41, %v25510_v14  ;;  %v26593_v41 = vld [vmem:[%s49503_s7 + $0x18] sm:$0xff] }
 0xc42   : > { %40667 = vmatpush3.bf16.msra.mxu0 %v48602_v52  ;;  %v25036_v52 = vand.u32 4294901760, %v48717_v49  ;;  %v25050_v22 = vand.u32 4294901760, %v48737_v54  ;;  %v25031_v43 = vand.u32 4294901760, %v25030_v20  ;;  %v40699_v13 = vpack.c.bf16 %v48737_v54, %v48734_v44  ;;  %v27497_v44 = vld [vmem:[%s49501_s5 + $0xd8] sm:$0xff] }
 0xc43   : > { %40668 = vmatprep.subr.bf16.mxu0 %v50340_v39  ;;  %v48878_v63 = vsub.f32 %v27495_v23, %v25501_v36 }
 0xc44   : > { %v25037_v19 = vsub.f32 %v48717_v49, %v25036_v52  ;;  %v25051_v32 = vsub.f32 %v48737_v54, %v25050_v22  ;;  %v40720_v17 = vpack.c.bf16 %v25036_v52, %v25029_v42  ;;  %v25492_v54 = vsel %vm23827_vm6, %v25481_v33, 0 }
 0xc45   : > { %v25504_v52 = vand.u32 4294901760, %v27496_v62 }
 0xc46   : > { %40670 = vmatpush3.bf16.msra.mxu0 %v48610_v9  ;;  %v24962_v9 = vand.u32 4294901760, %v27492_v57  ;;  %v25038_v30 = vand.u32 4294901760, %v25037_v19  ;;  %v25052_v53 = vand.u32 4294901760, %v25051_v32  ;;  %v27500_v19 = vld [vmem:[%s49501_s5 + $0xf0] sm:$0xff] }
 0xc47   : > { %40671 = vmatprep.subr.bf16.mxu0 %v50340_v39 }
 0xc48   : > { %v48771_v45 = vpack.c.bf16 %v24965_v18, %v24962_v9  ;;  %v48780_v26 = vsub.f32 %v27492_v57, %v24962_v9  ;;  %v40684_v15 = vpack.c.bf16 %v25038_v30, %v25031_v43  ;;  %v40687_v2 = vpack.c.bf16 %v25052_v53, %v25045_v50 }
 0xc49   : > { %36025 = vmatmul.mubr.f32.vlgmr.msra.gmra.mrb[8].mxu0 %v48571_v55  ;;  %v48752_v55 = vsub.f32 %v24938_v0, %v48732_v25  ;;  %v40723_v0 = vpack.c.bf16 %v25050_v22, %v25043_v31  ;;  %v48893_v9 = vand.u32 4294901760, %v25492_v54  ;;  %v48895_v18 = vsub.f32 %v27496_v62, %v25504_v52 }
 0xc4a   : > { %40673 = vmatpush3.bf16.msra.mxu0 %v48720_v7  ;;  %36043 = vmatprep.mubr.msk.f32.mxu0 %vm41567_vm1, %v50341_v28  ;;  %v25071_v47 = vand.u32 4294901760, %v48780_v26  ;;  %v40705_v11 = vpack.c.bf16 %v48782_v12, %v48780_v26  ;;  %v25495_v31 = vsel %vm23831_vm4, %v27501_v10, 0 }
 0xc4b   : > { %40674 = vmatprep.subr.bf16.mxu0 %v50340_v39  ;;  %v25018_v48 = vand.u32 4294901760, %v48752_v55  ;;  %v25519_v43 = vand.u32 4294901760, %v25495_v31  ;;  %v25597_v32 = vand.u32 4294901760, %v48895_v18 }
 0xc4c   : > { %v25072_v21 = vsub.f32 %v48780_v26, %v25071_v47  ;;  %v40729_v49 = vpack.c.bf16 %v25078_v56, %v25071_v47 }
 0xc4d   : > { %v25019_v34 = vsub.f32 %v48752_v55, %v25018_v48  ;;  %v25598_v5 = vsub.f32 %v48895_v18, %v25597_v32  ;;  %v48943_v56 = vsub.f32 %v25495_v31, %v25519_v43 }
 0xc4e   : > { %40676 = vmatpush3.bf16.msra.mxu0 %v48746_v8  ;;  %v25073_v51 = vand.u32 4294901760, %v25072_v21 }
 0xc4f   : > { %40677 = vmatprep.subr.bf16.mxu0 %v50340_v39  ;;  %v25020_v4 = vand.u32 4294901760, %v25019_v34  ;;  %v25599_v21 = vand.u32 4294901760, %v25598_v5 }
 0xc50   : > { %v40693_v58 = vpack.c.bf16 %v25080_v16, %v25073_v51 }
 0xc52   : > { %40679 = vmatpush3.bf16.msra.mxu0 %v48763_v27 }
 0xc53   : > { %40680 = vmatprep.subr.bf16.mxu0 %v50340_v39 }
 0xc56   : > { %40682 = vmatpush3.bf16.msra.mxu0 %v48771_v45 }
 0xc57   : > { %40683 = vmatprep.subr.bf16.mxu0 %v50340_v39 }
 0xc59   : > { %36044 = vmatmul.mubr.f32.vlgmr.msra.gmra.mrb[8].mxu0 %v25020_v4  ;;  %v25611_v4 = vand.u32 4294901760, %v48926_v40 }
 0xc5a   : > { %40685 = vmatpush3.bf16.msra.mxu0 %v40684_v15  ;;  %36062 = vmatprep.mubr.msk.f32.mxu0 %vm41567_vm1, %v50341_v28 }
 0xc5b   : > { %40686 = vmatprep.subr.bf16.mxu0 %v50340_v39 }
 0xc5e   : > { %40688 = vmatpush3.bf16.msra.mxu0 %v40687_v2 }
 0xc5f   : > { %40689 = vmatprep.subr.bf16.mxu0 %v50340_v39 }
 0xc62   : > { %40691 = vmatpush3.bf16.msra.mxu0 %v40690_v24  ;;  %v25612_v24 = vsub.f32 %v48926_v40, %v25611_v4 }
 0xc63   : > { %40692 = vmatprep.subr.bf16.mxu0 %v50340_v39 }
 0xc66   : > { %40694 = vmatpush3.bf16.msra.mxu0 %v40693_v58  ;;  %v25632_v58 = vand.u32 4294901760, %v48943_v56 }
 0xc67   : > { %40695 = vmatprep.subr.bf16.mxu0 %v50340_v39 }
 0xc69   : > { %36063 = vmatmul.mubr.f32.vlgmr.msra.gmra.mrb[8].mxu0 %v48732_v25 }
 0xc6a   : > { %40697 = vmatpush3.bf16.msra.mxu0 %v40696_v37  ;;  %36081 = vmatprep.mubr.msk.f32.mxu0 %vm41567_vm1, %v50341_v28 }
 0xc6b   : > { %40698 = vmatprep.subr.bf16.mxu0 %v50340_v39 }
 0xc6e   : > { %40700 = vmatpush3.bf16.msra.mxu0 %v40699_v13 }
 0xc6f   : > { %40701 = vmatprep.subr.bf16.mxu0 %v50340_v39 }
 0xc72   : > { %40703 = vmatpush3.bf16.msra.mxu0 %v40702_v35  ;;  %v25613_v35 = vand.u32 4294901760, %v25612_v24 }
 0xc73   : > { %40704 = vmatprep.subr.bf16.mxu0 %v50340_v39 }
 0xc76   : > { %40706 = vmatpush3.bf16.msra.mxu0 %v40705_v11 }
 0xc77   : > { %40707 = vmatprep.subr.bf16.mxu0 %v50340_v39 }
 0xc79   : > { %36082 = vmatmul.mubr.f32.vlgmr.msra.gmra.mrb[8].mxu0 %v48752_v55  ;;  %v27499_v55 = vld [vmem:[%s49501_s5 + $0xe8] sm:$0xff] }
 0xc7a   : > { %40709 = vmatpush3.bf16.msra.mxu0 %v48720_v7  ;;  %36100 = vmatprep.mubr.msk.f32.mxu0 %vm41567_vm1, %v50341_v28 }
 0xc7b   : > { %40710 = vmatprep.subr.bf16.mxu0 %v50340_v39 }
 0xc7e   : > { %40712 = vmatpush3.bf16.msra.mxu0 %v48746_v8 }
 0xc7f   : > { %40713 = vmatprep.subr.bf16.mxu0 %v50340_v39 }
 0xc82   : > { %40715 = vmatpush3.bf16.msra.mxu0 %v48763_v27 }
 0xc83   : > { %40716 = vmatprep.subr.bf16.mxu0 %v50340_v39 }
 0xc86   : > { %40718 = vmatpush3.bf16.msra.mxu0 %v48771_v45 }
 0xc87   : > { %40719 = vmatprep.subr.bf16.mxu0 %v50340_v39 }
 0xc89   : > { %36101 = vmatmul.mubr.f32.vlgmr.msra.gmra.mrb[8].mxu0 %v25018_v48  ;;  %v25513_v48 = vand.u32 4294901760, %v27499_v55 }
 0xc8a   : > { %40721 = vmatpush3.bf16.msra.mxu0 %v40720_v17  ;;  %36119 = vmatprep.mubr.msk.f32.mxu0 %vm41567_vm1, %v50341_v28 }
 0xc8b   : > { %40722 = vmatprep.subr.bf16.mxu0 %v50340_v39  ;;  %v48924_v12 = vpack.c.bf16 %v25513_v48, %v25510_v14  ;;  %v48928_v61 = vsub.f32 %v27499_v55, %v25513_v48  ;;  %v26597_v14 = vld [vmem:[%s49503_s7 + $0x38] sm:$0xff] }
 0xc8d   : > { %v25618_v2 = vand.u32 4294901760, %v48928_v61 }
 0xc8e   : > { %40724 = vmatpush3.bf16.msra.mxu0 %v40723_v0  ;;  %v25633_v0 = vsub.f32 %v48943_v56, %v25632_v58 }
 0xc8f   : > { %40725 = vmatprep.subr.bf16.mxu0 %v50340_v39  ;;  %v25619_v51 = vsub.f32 %v48928_v61, %v25618_v2 }
 0xc91   : > { %v25620_v11 = vand.u32 4294901760, %v25619_v51 }
 0xc92   : > { %40727 = vmatpush3.bf16.msra.mxu0 %v40726_v6 }
 0xc93   : > { %40728 = vmatprep.subr.bf16.mxu0 %v50340_v39  ;;  %v40762_v6 = vpack.c.bf16 %v25620_v11, %v25613_v35 }
 0xc96   : > { %40730 = vmatpush3.bf16.msra.mxu0 %v40729_v49 }
 0xc97   : > { %40731 = vmatprep.subr.bf16.mxu0 %v50340_v39 }
 0xc99   : > { %36120 = vmatmul.mubr.f32.vlgmr.msra.gmra.mrb[8].mxu0 %v48732_v25 }
 0xc9a   : > { %40733 = vmatpush3.bf16.msra.mxu0 %v48720_v7  ;;  %36138 = vmatprep.mubr.msk.f32.mxu0 %vm41567_vm1, %v50341_v28  ;;  %v25498_v7 = vand.u32 4294901760, %v27494_v46 }
 0xc9b   : > { %40734 = vmatprep.subr.bf16.mxu0 %v50340_v39 }
 0xc9c   : > { %v48876_v57 = vsub.f32 %v27494_v46, %v25498_v7  ;;  %v48881_v42 = vpack.c.bf16 %v25501_v36, %v25498_v7  ;;  %v25634_v46 = vand.u32 4294901760, %v25633_v0  ;;  %v40774_v36 = vpack.c.bf16 %v48928_v61, %v48926_v40 }
 0xc9e   : > { %40736 = vmatpush3.bf16.msra.mxu0 %v48746_v8  ;;  %v25507_v8 = vand.u32 4294901760, %v27497_v44  ;;  %v25583_v22 = vand.u32 4294901760, %v48876_v57  ;;  %v40768_v33 = vpack.c.bf16 %v48878_v63, %v48876_v57 }
 0xc9f   : > { %40737 = vmatprep.subr.bf16.mxu0 %v50340_v39 }
 0xca0   : > { %v48898_v20 = vsub.f32 %v27497_v44, %v25507_v8  ;;  %v48907_v1 = vpack.c.bf16 %v25507_v8, %v25504_v52  ;;  %v25584_v30 = vsub.f32 %v48876_v57, %v25583_v22  ;;  %v26591_v52 = vld [vmem:[%s49503_s7 + $0x8] sm:$0xff]  ;;  %v26592_v57 = vld [vmem:[%s49503_s7 + $0x10] sm:$0xff] }
 0xca1   : > { %v26614_v10 = vand.u32 4294901760, %v26591_v52  ;;  %v26617_v55 = vand.u32 4294901760, %v26592_v57 }
 0xca2   : > { %40739 = vmatpush3.bf16.msra.mxu0 %v48763_v27  ;;  %v25590_v27 = vand.u32 4294901760, %v48878_v63  ;;  %v25604_v26 = vand.u32 4294901760, %v48898_v20  ;;  %v25585_v50 = vand.u32 4294901760, %v25584_v30  ;;  %v40771_v7 = vpack.c.bf16 %v48898_v20, %v48895_v18  ;;  %v26595_v18 = vld [vmem:[%s49503_s7 + $0x28] sm:$0xff] }
 0xca3   : > { %40740 = vmatprep.subr.bf16.mxu0 %v50340_v39  ;;  %v40798_v30 = vpack.c.bf16 %v25618_v2, %v25611_v4 }
 0xca4   : > { %v25591_v60 = vsub.f32 %v48878_v63, %v25590_v27  ;;  %v25605_v59 = vsub.f32 %v48898_v20, %v25604_v26  ;;  %v40792_v44 = vpack.c.bf16 %v25590_v27, %v25583_v22  ;;  %v40795_v63 = vpack.c.bf16 %v25604_v26, %v25597_v32  ;;  %v26596_v27 = vld [vmem:[%s49503_s7 + $0x30] sm:$0xff] }
 0xca5   : > { %v26620_v20 = vand.u32 4294901760, %v26593_v41  ;;  %v26626_v22 = vand.u32 4294901760, %v26595_v18 }
 0xca6   : > { %40742 = vmatpush3.bf16.msra.mxu0 %v48771_v45  ;;  %v25516_v45 = vand.u32 4294901760, %v27500_v19  ;;  %v25592_v53 = vand.u32 4294901760, %v25591_v60  ;;  %v25606_v29 = vand.u32 4294901760, %v25605_v59 }
 0xca7   : > { %40743 = vmatprep.subr.bf16.mxu0 %v50340_v39  ;;  %v49048_v60 = vsub.f32 %v26593_v41, %v26620_v20  ;;  %v49053_v26 = vpack.c.bf16 %v26620_v20, %v26617_v55 }
 0xca8   : > { %v48932_v15 = vpack.c.bf16 %v25519_v43, %v25516_v45  ;;  %v48941_v47 = vsub.f32 %v27500_v19, %v25516_v45  ;;  %v40756_v38 = vpack.c.bf16 %v25592_v53, %v25585_v50  ;;  %v40759_v13 = vpack.c.bf16 %v25606_v29, %v25599_v21  ;;  %v26594_v19 = vld [vmem:[%s49503_s7 + $0x20] sm:$0xff] }
 0xca9   : > { %36139 = vmatmul.mubr.f32.vlgmr.msra.gmra.mrb[8].mxu0 %v48732_v25  ;;  %v48913_v25 = vsub.f32 %v25492_v54, %v48893_v9  ;;  %v26590_v54 = vld [vmem:[%s49503_s7] sm:$0xff]  ;;  %v26623_v31 = vand.u32 4294901760, %v26594_v19  ;;  %v49040_v45 = vsub.f32 %v26591_v52, %v26614_v10  ;;  %v49042_v43 = vsub.f32 %v26592_v57, %v26617_v55 }
 0xcaa   : > { %40745 = vmatpush3.bf16.msra.mxu0 %v48881_v42  ;;  %36157 = vmatprep.mubr.msk.f32.mxu0 %vm41567_vm1, %v50341_v28  ;;  %v25625_v16 = vand.u32 4294901760, %v48941_v47  ;;  %v40777_v62 = vpack.c.bf16 %v48943_v56, %v48941_v47  ;;  %v26611_v8 = vand.u32 4294901760, %v26590_v54  ;;  %v26629_v50 = vand.u32 4294901760, %v26596_v27  ;;  %v26035_v56 = vld [vmem:[#allocation3 + $0x4] sm:$0x1] }
 0xcab   : > { %40746 = vmatprep.subr.bf16.mxu0 %v50340_v39  ;;  %v25572_v34 = vand.u32 4294901760, %v48913_v25  ;;  %v49050_v32 = vsub.f32 %v26594_v19, %v26623_v31  ;;  %v26632_v53 = vand.u32 4294901760, %v26597_v14  ;;  %v49068_v59 = vpack.c.bf16 %v26626_v22, %v26623_v31 }
 0xcac   : > { %v25626_v17 = vsub.f32 %v48941_v47, %v25625_v16  ;;  %v49036_v48 = vpack.c.bf16 %v26614_v10, %v26611_v8  ;;  %v49059_v40 = vsub.f32 %v26596_v27, %v26629_v50  ;;  %v40801_v5 = vpack.c.bf16 %v25632_v58, %v25625_v16  ;;  %v27502_v47 = vld [vmem:[%s49501_s5 + $0x100] sm:$0xff]  ;;  %v27509_v58 = vld [vmem:[%s49501_s5 + $0x138] sm:$0xf] }
 0xcad   : > { %v25573_v3 = vsub.f32 %v48913_v25, %v25572_v34  ;;  %v49061_v61 = vsub.f32 %v26597_v14, %v26632_v53  ;;  %v49075_v4 = vpack.c.bf16 %v26632_v53, %v26629_v50  ;;  %v26052_v2 = vand.u32 4294901760, %v27502_v47 }
 0xcae   : > { %40748 = vmatpush3.bf16.msra.mxu0 %v48907_v1  ;;  %v25627_v49 = vand.u32 4294901760, %v25626_v17  ;;  %40889 = vmatpush3.bf16.msra.mxu1 %v49036_v48  ;;  %v26046_v21 = vsel %vm23827_vm6, %v26035_v56, 0  ;;  %v27508_v17 = vld [vmem:[%s49501_s5 + $0x130] sm:$0xff]  ;;  %v26049_v0 = vsel %vm23831_vm4, %v27509_v58, 0 }
 0xcaf   : > { %40749 = vmatprep.subr.bf16.mxu0 %v50340_v39  ;;  %v25574_v37 = vand.u32 4294901760, %v25573_v3  ;;  %40890 = vmatprep.subr.bf16.mxu1 %v50340_v39  ;;  %v49101_v29 = vsub.f32 %v27502_v47, %v26052_v2  ;;  %v49118_v35 = vand.u32 4294901760, %v26046_v21 }
 0xcb0   : > { %v40765_v23 = vpack.c.bf16 %v25634_v46, %v25627_v49 }
 0xcb2   : > { %40751 = vmatpush3.bf16.msra.mxu0 %v48924_v12  ;;  %40892 = vmatpush3.bf16.msra.mxu1 %v49053_v26 }
 0xcb3   : > { %40752 = vmatprep.subr.bf16.mxu0 %v50340_v39  ;;  %40893 = vmatprep.subr.bf16.mxu1 %v50340_v39 }
 0xcb6   : > { %40754 = vmatpush3.bf16.msra.mxu0 %v48932_v15  ;;  %40895 = vmatpush3.bf16.msra.mxu1 %v49068_v59 }
 0xcb7   : > { %40755 = vmatprep.subr.bf16.mxu0 %v50340_v39  ;;  %40896 = vmatprep.subr.bf16.mxu1 %v50340_v39 }
 0xcb9   : > { %36158 = vmatmul.mubr.f32.vlgmr.msra.gmra.mrb[8].mxu0 %v25574_v37  ;;  %v27506_v37 = vld [vmem:[%s49501_s5 + $0x120] sm:$0xff] }
 0xcba   : > { %40757 = vmatpush3.bf16.msra.mxu0 %v40756_v38  ;;  %36176 = vmatprep.mubr.msk.f32.mxu0 %vm41567_vm1, %v50341_v28  ;;  %v27505_v38 = vld [vmem:[%s49501_s5 + $0x118] sm:$0xff] }
 0xcbb   : > { %40758 = vmatprep.subr.bf16.mxu0 %v50340_v39  ;;  %40898 = vmatpush3.bf16.msra.mxu1 %v49075_v4  ;;  %v26061_v16 = vand.u32 4294901760, %v27505_v38 }
 0xcbc   : > { %40899 = vmatprep.subr.bf16.mxu1 %v50340_v39 }
 0xcbd   : > { %v49123_v11 = vsub.f32 %v27505_v38, %v26061_v16 }
 0xcbe   : > { %40760 = vmatpush3.bf16.msra.mxu0 %v40759_v13  ;;  %v27507_v13 = vld [vmem:[%s49501_s5 + $0x128] sm:$0xff] }
 0xcbf   : > { %40761 = vmatprep.subr.bf16.mxu0 %v50340_v39  ;;  %v26158_v52 = vand.u32 4294901760, %v49123_v11 }
 0xcc1   : > { %v26159_v20 = vsub.f32 %v49123_v11, %v26158_v52 }
 0xcc2   : > { %40763 = vmatpush3.bf16.msra.mxu0 %v40762_v6  ;;  %v26137_v6 = vand.u32 4294901760, %v49101_v29 }
 0xcc3   : > { %40764 = vmatprep.subr.bf16.mxu0 %v50340_v39 }
 0xcc6   : > { %40766 = vmatpush3.bf16.msra.mxu0 %v40765_v23  ;;  %v26064_v23 = vand.u32 4294901760, %v27506_v37 }
 0xcc7   : > { %40767 = vmatprep.subr.bf16.mxu0 %v50340_v39 }
 0xcc9   : > { %36177 = vmatmul.mubr.f32.vlgmr.msra.gmra.mrb[8].mxu0 %v48893_v9 }
 0xcca   : > { %40769 = vmatpush3.bf16.msra.mxu0 %v40768_v33  ;;  %36195 = vmatprep.mubr.msk.f32.mxu0 %vm41567_vm1, %v50341_v28  ;;  %v26067_v33 = vand.u32 4294901760, %v27507_v13 }
 0xccb   : > { %40770 = vmatprep.subr.bf16.mxu0 %v50340_v39 }
 0xccc   : > { %v49149_v57 = vpack.c.bf16 %v26067_v33, %v26064_v23 }
 0xcce   : > { %40772 = vmatpush3.bf16.msra.mxu0 %v40771_v7  ;;  %v26070_v7 = vand.u32 4294901760, %v27508_v17 }
 0xccf   : > { %40773 = vmatprep.subr.bf16.mxu0 %v50340_v39 }
 0xcd0   : > { %v49166_v31 = vsub.f32 %v27508_v17, %v26070_v7 }
 0xcd2   : > { %40775 = vmatpush3.bf16.msra.mxu0 %v40774_v36  ;;  %v26073_v36 = vand.u32 4294901760, %v26049_v0  ;;  %v26179_v56 = vand.u32 4294901760, %v49166_v31 }
 0xcd3   : > { %40776 = vmatprep.subr.bf16.mxu0 %v50340_v39 }
 0xcd4   : > { %v49157_v41 = vpack.c.bf16 %v26073_v36, %v26070_v7 }
 0xcd6   : > { %40778 = vmatpush3.bf16.msra.mxu0 %v40777_v62  ;;  %v26138_v62 = vsub.f32 %v49101_v29, %v26137_v6 }
 0xcd7   : > { %40779 = vmatprep.subr.bf16.mxu0 %v50340_v39 }
 0xcd8   : > { %v26139_v55 = vand.u32 4294901760, %v26138_v62 }
 0xcd9   : > { %36196 = vmatmul.mubr.f32.vlgmr.msra.gmra.mrb[8].mxu0 %v48913_v25  ;;  %v49038_v25 = vsub.f32 %v26590_v54, %v26611_v8  ;;  %v49153_v8 = vsub.f32 %v27507_v13, %v26067_v33 }
 0xcda   : > { %40781 = vmatpush3.bf16.msra.mxu0 %v48881_v42  ;;  %36214 = vmatprep.mubr.msk.f32.mxu0 %vm41567_vm1, %v50341_v28 }
 0xcdb   : > { %40782 = vmatprep.subr.bf16.mxu0 %v50340_v39  ;;  %v26172_v14 = vand.u32 4294901760, %v49153_v8 }
 0xcde   : > { %40784 = vmatpush3.bf16.msra.mxu0 %v48907_v1 }
 0xcdf   : > { %40785 = vmatprep.subr.bf16.mxu0 %v50340_v39 }
 0xce2   : > { %40787 = vmatpush3.bf16.msra.mxu0 %v48924_v12 }
 0xce3   : > { %40788 = vmatprep.subr.bf16.mxu0 %v50340_v39 }
 0xce6   : > { %40790 = vmatpush3.bf16.msra.mxu0 %v48932_v15 }
 0xce7   : > { %40791 = vmatprep.subr.bf16.mxu0 %v50340_v39 }
 0xce9   : > { %36215 = vmatmul.mubr.f32.vlgmr.msra.gmra.mrb[8].mxu0 %v25572_v34  ;;  %v49055_v34 = vsub.f32 %v26595_v18, %v26626_v22  ;;  %v49168_v22 = vsub.f32 %v26049_v0, %v26073_v36 }
 0xcea   : > { %40793 = vmatpush3.bf16.msra.mxu0 %v40792_v44  ;;  %36233 = vmatprep.mubr.msk.f32.mxu0 %vm41567_vm1, %v50341_v28 }
 0xceb   : > { %40794 = vmatprep.subr.bf16.mxu0 %v50340_v39  ;;  %v40849_v7 = vpack.c.bf16 %v49168_v22, %v49166_v31 }
 0xcee   : > { %40796 = vmatpush3.bf16.msra.mxu0 %v40795_v63  ;;  %v49151_v63 = vsub.f32 %v27506_v37, %v26064_v23 }
 0xcef   : > { %40797 = vmatprep.subr.bf16.mxu0 %v50340_v39 }
 0xcf0   : > { %v26165_v27 = vand.u32 4294901760, %v49151_v63  ;;  %v40846_v33 = vpack.c.bf16 %v49153_v8, %v49151_v63 }
 0xcf2   : > { %40799 = vmatpush3.bf16.msra.mxu0 %v40798_v30  ;;  %v26166_v47 = vsub.f32 %v49151_v63, %v26165_v27 }
 0xcf3   : > { %40800 = vmatprep.subr.bf16.mxu0 %v50340_v39 }
 0xcf4   : > { %v26167_v38 = vand.u32 4294901760, %v26166_v47  ;;  %v26724_v47 = vand.u32 4294901760, %v49048_v60 }
 0xcf6   : > { %40802 = vmatpush3.bf16.msra.mxu0 %v40801_v5  ;;  %v26160_v5 = vand.u32 4294901760, %v26159_v20 }
 0xcf7   : > { %40803 = vmatprep.subr.bf16.mxu0 %v50340_v39 }
 0xcf9   : > { %36234 = vmatmul.mubr.f32.vlgmr.msra.gmra.mrb[8].mxu0 %v48893_v9 }
 0xcfa   : > { %40805 = vmatpush3.bf16.msra.mxu0 %v48881_v42  ;;  %36252 = vmatprep.mubr.msk.f32.mxu0 %vm41567_vm1, %v50341_v28  ;;  %v27503_v42 = vld [vmem:[%s49501_s5 + $0x108] sm:$0xff] }
 0xcfb   : > { %40806 = vmatprep.subr.bf16.mxu0 %v50340_v39  ;;  %v26055_v3 = vand.u32 4294901760, %v27503_v42 }
 0xcfd   : > { %v49103_v24 = vsub.f32 %v27503_v42, %v26055_v3  ;;  %v26173_v42 = vsub.f32 %v49153_v8, %v26172_v14 }
 0xcfe   : > { %40808 = vmatpush3.bf16.msra.mxu0 %v48907_v1  ;;  %v27504_v1 = vld [vmem:[%s49501_s5 + $0x110] sm:$0xff] }
 0xcff   : > { %40809 = vmatprep.subr.bf16.mxu0 %v50340_v39  ;;  %v26058_v51 = vand.u32 4294901760, %v27504_v1  ;;  %v26144_v49 = vand.u32 4294901760, %v49103_v24  ;;  %v40840_v0 = vpack.c.bf16 %v49103_v24, %v49101_v29  ;;  %v40870_v29 = vpack.c.bf16 %v26172_v14, %v26165_v27 }
 0xd00   : > { %v26703_v27 = vand.u32 4294901760, %v49038_v25  ;;  %v26710_v14 = vand.u32 4294901760, %v49040_v45 }
 0xd01   : > { %v49132_v46 = vpack.c.bf16 %v26061_v16, %v26058_v51  ;;  %v26145_v44 = vsub.f32 %v49103_v24, %v26144_v49  ;;  %v40864_v36 = vpack.c.bf16 %v26144_v49, %v26137_v6 }
 0xd02   : > { %40811 = vmatpush3.bf16.msra.mxu0 %v48924_v12  ;;  %v49106_v12 = vpack.c.bf16 %v26055_v3, %v26052_v2  ;;  %v26186_v2 = vand.u32 4294901760, %v49168_v22 }
 0xd03   : > { %40812 = vmatprep.subr.bf16.mxu0 %v50340_v39  ;;  %v26146_v19 = vand.u32 4294901760, %v26145_v44 }
 0xd04   : > { %v26187_v16 = vsub.f32 %v49168_v22, %v26186_v2  ;;  %v40873_v24 = vpack.c.bf16 %v26186_v2, %v26179_v56 }
 0xd05   : > { %v40828_v50 = vpack.c.bf16 %v26146_v19, %v26139_v55 }
 0xd06   : > { %40814 = vmatpush3.bf16.msra.mxu0 %v48932_v15  ;;  %v49120_v15 = vsub.f32 %v27504_v1, %v26058_v51  ;;  %v26180_v51 = vsub.f32 %v49166_v31, %v26179_v56  ;;  %v26188_v13 = vand.u32 4294901760, %v26187_v16  ;;  %v26738_v16 = vand.u32 4294901760, %v49055_v34 }
 0xd07   : > { %40815 = vmatprep.subr.bf16.mxu0 %v50340_v39 }
 0xd08   : > { %v26151_v54 = vand.u32 4294901760, %v49120_v15  ;;  %v26181_v37 = vand.u32 4294901760, %v26180_v51  ;;  %v40843_v23 = vpack.c.bf16 %v49123_v11, %v49120_v15  ;;  %v26731_v51 = vand.u32 4294901760, %v49050_v32 }
 0xd09   : > { %36253 = vmatmul.mubr.f32.vlgmr.msra.gmra.mrb[8].mxu0 %v48893_v9  ;;  %v49138_v9 = vsub.f32 %v26046_v21, %v49118_v35  ;;  %v26174_v21 = vand.u32 4294901760, %v26173_v42 }
 0xd0a   : > { %40817 = vmatpush3.bf16.msra.mxu0 %v49106_v12  ;;  %36271 = vmatprep.mubr.msk.f32.mxu0 %vm41567_vm1, %v50341_v28  ;;  %v26152_v18 = vsub.f32 %v49120_v15, %v26151_v54  ;;  %v40837_v17 = vpack.c.bf16 %v26188_v13, %v26181_v37  ;;  %v40867_v62 = vpack.c.bf16 %v26158_v52, %v26151_v54  ;;  %v26599_v15 = vld [vmem:[%s49503_s7 + $0x48] sm:$0xff]  ;;  %v26602_v52 = vld [vmem:[%s49503_s7 + $0x60] sm:$0xff] }
 0xd0b   : > { %40818 = vmatprep.subr.bf16.mxu0 %v50340_v39  ;;  %v26126_v10 = vand.u32 4294901760, %v49138_v9  ;;  %v40834_v58 = vpack.c.bf16 %v26174_v21, %v26167_v38  ;;  %v26638_v6 = vand.u32 4294901760, %v26599_v15  ;;  %v26647_v63 = vand.u32 4294901760, %v26602_v52 }
 0xd0c   : > { %v26153_v53 = vand.u32 4294901760, %v26152_v18  ;;  %v49288_v18 = vld [vmem:[%s49503_s7 + $0x70] sm:$0xff]  ;;  %v26732_v37 = vsub.f32 %v49050_v32, %v26731_v51  ;;  %v26739_v13 = vsub.f32 %v49055_v34, %v26738_v16 }
 0xd0d   : > { %v26127_v30 = vsub.f32 %v49138_v9, %v26126_v10  ;;  %v49292_v31 = vsub.f32 %v26602_v52, %v26647_v63 }
 0xd0e   : > { %40820 = vmatpush3.bf16.msra.mxu0 %v49132_v46  ;;  %v40831_v1 = vpack.c.bf16 %v26160_v5, %v26153_v53  ;;  %v26711_v53 = vsub.f32 %v49040_v45, %v26710_v14  ;;  %v26717_v5 = vand.u32 4294901760, %v49042_v43 }
 0xd0f   : > { %40821 = vmatprep.subr.bf16.mxu0 %v50340_v39  ;;  %v26128_v3 = vand.u32 4294901760, %v26127_v30  ;;  %v49300_v30 = vand.u32 4294901760, %v49288_v18 }
 0xd10   : > { %v26712_v56 = vand.u32 4294901760, %v26711_v53  ;;  %v26718_v2 = vsub.f32 %v49042_v43, %v26717_v5 }
 0xd12   : > { %40823 = vmatpush3.bf16.msra.mxu0 %v49149_v57  ;;  %v26719_v38 = vand.u32 4294901760, %v26718_v2 }
 0xd13   : > { %40824 = vmatprep.subr.bf16.mxu0 %v50340_v39 }
 0xd16   : > { %40826 = vmatpush3.bf16.msra.mxu0 %v49157_v41 }
 0xd17   : > { %40827 = vmatprep.subr.bf16.mxu0 %v50340_v39 }
 0xd19   : > { %36272 = vmatmul.mubr.f32.vlgmr.msra.gmra.mrb[8].mxu0 %v26128_v3  ;;  %v26725_v3 = vsub.f32 %v49048_v60, %v26724_v47 }
 0xd1a   : > { %40829 = vmatpush3.bf16.msra.mxu0 %v40828_v50  ;;  %36290 = vmatprep.mubr.msk.f32.mxu0 %vm41567_vm1, %v50341_v28  ;;  %v26704_v50 = vsub.f32 %v49038_v25, %v26703_v27 }
 0xd1b   : > { %40830 = vmatprep.subr.bf16.mxu0 %v50340_v39  ;;  %v26726_v21 = vand.u32 4294901760, %v26725_v3 }
 0xd1c   : > { %v26705_v42 = vand.u32 4294901760, %v26704_v50 }
 0xd1e   : > { %40832 = vmatpush3.bf16.msra.mxu0 %v40831_v1  ;;  %v40909_v1 = vpack.c.bf16 %v26712_v56, %v26705_v42  ;;  %v26787_v42 = vand.u32 4294901760, %v49292_v31 }
 0xd1f   : > { %40833 = vmatprep.subr.bf16.mxu0 %v50340_v39 }
 0xd20   : > { %v26788_v3 = vsub.f32 %v49292_v31, %v26787_v42 }
 0xd22   : > { %40835 = vmatpush3.bf16.msra.mxu0 %v40834_v58  ;;  %v40912_v58 = vpack.c.bf16 %v26726_v21, %v26719_v38  ;;  %v26789_v21 = vand.u32 4294901760, %v26788_v3 }
 0xd23   : > { %40836 = vmatprep.subr.bf16.mxu0 %v50340_v39 }
 0xd26   : > { %40838 = vmatpush3.bf16.msra.mxu0 %v40837_v17  ;;  %v26733_v17 = vand.u32 4294901760, %v26732_v37 }
 0xd27   : > { %40839 = vmatprep.subr.bf16.mxu0 %v50340_v39 }
 0xd29   : > { %36291 = vmatmul.mubr.f32.vlgmr.msra.gmra.mrb[8].mxu0 %v49118_v35 }
 0xd2a   : > { %40841 = vmatpush3.bf16.msra.mxu0 %v40840_v0  ;;  %36309 = vmatprep.mubr.msk.f32.mxu0 %vm41567_vm1, %v50341_v28  ;;  %v26745_v0 = vand.u32 4294901760, %v49059_v40 }
 0xd2b   : > { %40842 = vmatprep.subr.bf16.mxu0 %v50340_v39 }
 0xd2e   : > { %40844 = vmatpush3.bf16.msra.mxu0 %v40843_v23  ;;  %v26752_v23 = vand.u32 4294901760, %v49061_v61 }
 0xd2f   : > { %40845 = vmatprep.subr.bf16.mxu0 %v50340_v39 }
 0xd32   : > { %40847 = vmatpush3.bf16.msra.mxu0 %v40846_v33  ;;  %v26740_v33 = vand.u32 4294901760, %v26739_v13 }
 0xd33   : > { %40848 = vmatprep.subr.bf16.mxu0 %v50340_v39 }
 0xd36   : > { %40850 = vmatpush3.bf16.msra.mxu0 %v40849_v7  ;;  %v26746_v7 = vsub.f32 %v49059_v40, %v26745_v0 }
 0xd37   : > { %40851 = vmatprep.subr.bf16.mxu0 %v50340_v39 }
 0xd39   : > { %36310 = vmatmul.mubr.f32.vlgmr.msra.gmra.mrb[8].mxu0 %v49138_v9 }
 0xd3a   : > { %40853 = vmatpush3.bf16.msra.mxu0 %v49106_v12  ;;  %36328 = vmatprep.mubr.msk.f32.mxu0 %vm41567_vm1, %v50341_v28 }
 0xd3b   : > { %40854 = vmatprep.subr.bf16.mxu0 %v50340_v39 }
 0xd3e   : > { %40856 = vmatpush3.bf16.msra.mxu0 %v49132_v46 }
 0xd3f   : > { %40857 = vmatprep.subr.bf16.mxu0 %v50340_v39 }
 0xd42   : > { %40859 = vmatpush3.bf16.msra.mxu0 %v49149_v57 }
 0xd43   : > { %40860 = vmatprep.subr.bf16.mxu0 %v50340_v39 }
 0xd46   : > { %40862 = vmatpush3.bf16.msra.mxu0 %v49157_v41 }
 0xd47   : > { %40863 = vmatprep.subr.bf16.mxu0 %v50340_v39 }
 0xd49   : > { %36329 = vmatmul.mubr.f32.vlgmr.msra.gmra.mrb[8].mxu0 %v26126_v10 }
 0xd4a   : > { %40865 = vmatpush3.bf16.msra.mxu0 %v40864_v36  ;;  %36347 = vmatprep.mubr.msk.f32.mxu0 %vm41567_vm1, %v50341_v28  ;;  %v26753_v36 = vsub.f32 %v49061_v61, %v26752_v23 }
 0xd4b   : > { %40866 = vmatprep.subr.bf16.mxu0 %v50340_v39 }
 0xd4e   : > { %40868 = vmatpush3.bf16.msra.mxu0 %v40867_v62  ;;  %v40915_v62 = vpack.c.bf16 %v26740_v33, %v26733_v17  ;;  %v40930_v17 = vpack.c.bf16 %v49040_v45, %v49038_v25  ;;  %v40933_v33 = vpack.c.bf16 %v49048_v60, %v49042_v43  ;;  %v40978_v25 = vpack.c.bf16 %v26738_v16, %v26731_v51 }
 0xd4f   : > { %40869 = vmatprep.subr.bf16.mxu0 %v50340_v39  ;;  %v40981_v45 = vpack.c.bf16 %v26752_v23, %v26745_v0 }
 0xd52   : > { %40871 = vmatpush3.bf16.msra.mxu0 %v40870_v29  ;;  %v26747_v29 = vand.u32 4294901760, %v26746_v7  ;;  %v40936_v7 = vpack.c.bf16 %v49055_v34, %v49050_v32 }
 0xd53   : > { %40872 = vmatprep.subr.bf16.mxu0 %v50340_v39 }
 0xd56   : > { %40874 = vmatpush3.bf16.msra.mxu0 %v40873_v24  ;;  %v26754_v24 = vand.u32 4294901760, %v26753_v36  ;;  %v40939_v36 = vpack.c.bf16 %v49061_v61, %v49059_v40 }
 0xd57   : > { %40875 = vmatprep.subr.bf16.mxu0 %v50340_v39 }
 0xd59   : > { %36348 = vmatmul.mubr.f32.vlgmr.msra.gmra.mrb[8].mxu0 %v49118_v35 }
 0xd5a   : > { %40877 = vmatpush3.bf16.msra.mxu0 %v49106_v12  ;;  %36366 = vmatprep.mubr.msk.f32.mxu0 %vm41567_vm1, %v50341_v28  ;;  %v26598_v12 = vld [vmem:[%s49503_s7 + $0x40] sm:$0xff] }
 0xd5b   : > { %40878 = vmatprep.subr.bf16.mxu0 %v50340_v39  ;;  %v26635_v11 = vand.u32 4294901760, %v26598_v12 }
 0xd5d   : > { %v49257_v49 = vpack.c.bf16 %v26638_v6, %v26635_v11  ;;  %v49277_v10 = vsub.f32 %v26598_v12, %v26635_v11  ;;  %v40918_v11 = vpack.c.bf16 %v26754_v24, %v26747_v29 }
 0xd5e   : > { %40880 = vmatpush3.bf16.msra.mxu0 %v49132_v46  ;;  %v26600_v46 = vld [vmem:[%s49503_s7 + $0x50] sm:$0xff] }
 0xd5f   : > { %40881 = vmatprep.subr.bf16.mxu0 %v50340_v39  ;;  %40901 = vmatpush3.bf16.msra.mxu1 %v49257_v49  ;;  %v26641_v9 = vand.u32 4294901760, %v26600_v46  ;;  %v26759_v12 = vand.u32 4294901760, %v49277_v10 }
 0xd60   : > { %40902 = vmatprep.subr.bf16.mxu1 %v50340_v39 }
 0xd61   : > { %v49281_v55 = vsub.f32 %v26600_v46, %v26641_v9 }
 0xd62   : > { %40883 = vmatpush3.bf16.msra.mxu0 %v49149_v57  ;;  %v26603_v57 = vld [vmem:[%s49503_s7 + $0x68] sm:$0xff] }
 0xd63   : > { %40884 = vmatprep.subr.bf16.mxu0 %v50340_v39  ;;  %v26650_v8 = vand.u32 4294901760, %v26603_v57 }
 0xd65   : > { %v49290_v20 = vpack.c.bf16 %v26650_v8, %v26647_v63  ;;  %v49294_v22 = vsub.f32 %v26603_v57, %v26650_v8 }
 0xd66   : > { %40886 = vmatpush3.bf16.msra.mxu0 %v49157_v41  ;;  %v49279_v41 = vsub.f32 %v26599_v15, %v26638_v6  ;;  %v26760_v6 = vsub.f32 %v49277_v10, %v26759_v12 }
 0xd67   : > { %v26794_v56 = vand.u32 4294901760, %v49294_v22 }
 0xd68   : > { %v26766_v15 = vand.u32 4294901760, %v49279_v41  ;;  %v40942_v29 = vpack.c.bf16 %v49279_v41, %v49277_v10 }
 0xd69   : > { %36367 = vmatmul.mubr.f32.vlgmr.msra.gmra.mrb[8].mxu0 %v49118_v35  ;;  %v26601_v35 = vld [vmem:[%s49503_s7 + $0x58] sm:$0xff]  ;;  %v26795_v38 = vsub.f32 %v49294_v22, %v26794_v56  ;;  %v40990_v32 = vpack.c.bf16 %v26794_v56, %v26787_v42 }
 0xd6a   : > { %v26644_v44 = vand.u32 4294901760, %v26601_v35  ;;  %v26767_v46 = vsub.f32 %v49279_v41, %v26766_v15  ;;  %v40984_v43 = vpack.c.bf16 %v26766_v15, %v26759_v12 }
 0xd6b   : > { %v26796_v37 = vand.u32 4294901760, %v26795_v38 }
 0xd6c   : > { %v49267_v54 = vpack.c.bf16 %v26644_v44, %v26641_v9  ;;  %v49283_v19 = vsub.f32 %v26601_v35, %v26644_v44  ;;  %v26761_v35 = vand.u32 4294901760, %v26760_v6  ;;  %v26768_v9 = vand.u32 4294901760, %v26767_v46  ;;  %v23817_v46 = vld [vmem:[%s49502_s6] sm:$0x1] }
 0xd6d   : > { %v26773_v44 = vand.u32 4294901760, %v49281_v55  ;;  %v40927_v13 = vpack.c.bf16 %v26796_v37, %v26789_v21  ;;  %v40948_v6 = vpack.c.bf16 %v49294_v22, %v49292_v31 }
 0xd6e   : > { %40904 = vmatpush3.bf16.msra.mxu1 %v49267_v54  ;;  %v26780_v52 = vand.u32 4294901760, %v49283_v19  ;;  %v40921_v57 = vpack.c.bf16 %v26768_v9, %v26761_v35  ;;  %v40945_v24 = vpack.c.bf16 %v49283_v19, %v49281_v55 }
 0xd6f   : > { %40905 = vmatprep.subr.bf16.mxu1 %v50340_v39  ;;  %v26774_v63 = vsub.f32 %v49281_v55, %v26773_v44 }
 0xd70   : > { %v26781_v8 = vsub.f32 %v49283_v19, %v26780_v52  ;;  %v40987_v60 = vpack.c.bf16 %v26780_v52, %v26773_v44 }
 0xd71   : > { %v26775_v50 = vand.u32 4294901760, %v26774_v63 }
 0xd72   : > { %40907 = vmatpush3.bf16.msra.mxu1 %v49290_v20  ;;  %v26782_v53 = vand.u32 4294901760, %v26781_v8 }
 0xd73   : > { %36397 = vmatprep.subr.mxu1 %v50341_v28 }
 0xd74   : > { %v40924_v2 = vpack.c.bf16 %v26782_v53, %v26775_v50 }
 0xd76   : > { %36398 = vmatpush3.msra.mxu1 %v49300_v30 }
 0xd77   : > { %40908 = vmatprep.subr.bf16.mxu1 %v50340_v39 }
 0xe3c   : > { %v26584_v35 = vpop.f32.mrb[8].mxu0 }
 0xe3d   : > { %v41015_v9 = vadd.f32 %v26584_v35, %v23817_v46  ;;  %v36368_v63 = vpop.f32.mrb[9].mxu0  ;;  %v49386_v46 = vsub.f32 %v49288_v18, %v49300_v30  ;;  %v40972_v18 = vpack.c.bf16 %v26710_v14, %v26703_v27 }
 0xe3f   : > { %v26589_v8 = vmax.f32 %v41015_v9, 0.0 }
 0xe41   : > { %v26608_v50 = vsel %vm26606_vm7, %v26589_v8, 0 }
 0xe42   : > { %v49376_v53 = vand.u32 4294901760, %v26608_v50 }
 0xe44   : > { %v26691_v3 = vsub.f32 %v26608_v50, %v49376_v53 }
 0xe46   : > { %v26692_v38 = vand.u32 4294901760, %v26691_v3 }
 0xe48   : > { %v26693_v21 = vsub.f32 %v26691_v3, %v26692_v38 }
 0xe4a   : > { %v26694_v37 = vand.u32 4294901760, %v26693_v21 }
 0xe4c   : > { %36400 = vmatmul.mubr.f32.vlgmr.msra.gmra.mrb[10].mxu1 %v26694_v37 }
 0xe4d   : > { %40910 = vmatpush3.bf16.msra.mxu1 %v40909_v1  ;;  %36432 = vmatprep.mubr.msk.f32.mxu1 %vm41567_vm1, %v50341_v28  ;;  %v26801_v1 = vand.u32 4294901760, %v49386_v46 }
 0xe4e   : > { %40911 = vmatprep.subr.bf16.mxu1 %v50340_v39 }
 0xe51   : > { %40913 = vmatpush3.bf16.msra.mxu1 %v40912_v58  ;;  %v26802_v58 = vsub.f32 %v49386_v46, %v26801_v1 }
 0xe52   : > { %40914 = vmatprep.subr.bf16.mxu1 %v50340_v39 }
 0xe55   : > { %40916 = vmatpush3.bf16.msra.mxu1 %v40915_v62  ;;  %v26803_v62 = vand.u32 4294901760, %v26802_v58 }
 0xe56   : > { %40917 = vmatprep.subr.bf16.mxu1 %v50340_v39 }
 0xe59   : > { %40919 = vmatpush3.bf16.msra.mxu1 %v40918_v11  ;;  %v40975_v11 = vpack.c.bf16 %v26724_v47, %v26717_v5 }
 0xe5a   : > { %40920 = vmatprep.subr.bf16.mxu1 %v50340_v39 }
 0xe5d   : > { %40922 = vmatpush3.bf16.msra.mxu1 %v40921_v57 }
 0xe5e   : > { %40923 = vmatprep.subr.bf16.mxu1 %v50340_v39 }
 0xe61   : > { %40925 = vmatpush3.bf16.msra.mxu1 %v40924_v2 }
 0xe62   : > { %40926 = vmatprep.subr.bf16.mxu1 %v50340_v39 }
 0xe65   : > { %40928 = vmatpush3.bf16.msra.mxu1 %v40927_v13 }
 0xe66   : > { %36430 = vmatprep.subr.mxu1 %v50341_v28 }
 0xe69   : > { %36431 = vmatpush3.msra.mxu1 %v26803_v62 }
 0xe6a   : > { %36433 = vmatmul.mubr.f32.vlgmr.msra.gmra.mrb[10].mxu1 %v49376_v53  ;;  %40929 = vmatprep.subr.bf16.mxu1 %v50340_v39 }
 0xe6b   : > { %40931 = vmatpush3.bf16.msra.mxu1 %v40930_v17  ;;  %36465 = vmatprep.mubr.msk.f32.mxu1 %vm41567_vm1, %v50341_v28 }
 0xe6c   : > { %40932 = vmatprep.subr.bf16.mxu1 %v50340_v39 }
 0xe6f   : > { %40934 = vmatpush3.bf16.msra.mxu1 %v40933_v33 }
 0xe70   : > { %40935 = vmatprep.subr.bf16.mxu1 %v50340_v39 }
 0xe73   : > { %40937 = vmatpush3.bf16.msra.mxu1 %v40936_v7 }
 0xe74   : > { %40938 = vmatprep.subr.bf16.mxu1 %v50340_v39 }
 0xe77   : > { %40940 = vmatpush3.bf16.msra.mxu1 %v40939_v36 }
 0xe78   : > { %40941 = vmatprep.subr.bf16.mxu1 %v50340_v39 }
 0xe7b   : > { %40943 = vmatpush3.bf16.msra.mxu1 %v40942_v29 }
 0xe7c   : > { %40944 = vmatprep.subr.bf16.mxu1 %v50340_v39 }
 0xe7f   : > { %40946 = vmatpush3.bf16.msra.mxu1 %v40945_v24 }
 0xe80   : > { %40947 = vmatprep.subr.bf16.mxu1 %v50340_v39 }
 0xe83   : > { %40949 = vmatpush3.bf16.msra.mxu1 %v40948_v6 }
 0xe84   : > { %36463 = vmatprep.subr.mxu1 %v50341_v28 }
 0xe87   : > { %36464 = vmatpush3.msra.mxu1 %v49386_v46 }
 0xe88   : > { %36466 = vmatmul.mubr.f32.vlgmr.msra.gmra.mrb[10].mxu1 %v26691_v3  ;;  %40950 = vmatprep.subr.bf16.mxu1 %v50340_v39 }
 0xe89   : > { %40952 = vmatpush3.bf16.msra.mxu1 %v49036_v48  ;;  %36498 = vmatprep.mubr.msk.f32.mxu1 %vm41567_vm1, %v50341_v28 }
 0xe8a   : > { %40953 = vmatprep.subr.bf16.mxu1 %v50340_v39 }
 0xe8d   : > { %40955 = vmatpush3.bf16.msra.mxu1 %v49053_v26 }
 0xe8e   : > { %40956 = vmatprep.subr.bf16.mxu1 %v50340_v39 }
 0xe91   : > { %40958 = vmatpush3.bf16.msra.mxu1 %v49068_v59 }
 0xe92   : > { %40959 = vmatprep.subr.bf16.mxu1 %v50340_v39 }
 0xe95   : > { %40961 = vmatpush3.bf16.msra.mxu1 %v49075_v4 }
 0xe96   : > { %40962 = vmatprep.subr.bf16.mxu1 %v50340_v39 }
 0xe99   : > { %40964 = vmatpush3.bf16.msra.mxu1 %v49257_v49 }
 0xe9a   : > { %40965 = vmatprep.subr.bf16.mxu1 %v50340_v39 }
 0xe9d   : > { %40967 = vmatpush3.bf16.msra.mxu1 %v49267_v54 }
 0xe9e   : > { %40968 = vmatprep.subr.bf16.mxu1 %v50340_v39 }
 0xea1   : > { %40970 = vmatpush3.bf16.msra.mxu1 %v49290_v20 }
 0xea2   : > { %36496 = vmatprep.subr.mxu1 %v50341_v28 }
 0xea5   : > { %36497 = vmatpush3.msra.mxu1 %v49300_v30 }
 0xea6   : > { %36499 = vmatmul.mubr.f32.vlgmr.msra.gmra.mrb[10].mxu1 %v26692_v38  ;;  %40971 = vmatprep.subr.bf16.mxu1 %v50340_v39 }
 0xea7   : > { %40973 = vmatpush3.bf16.msra.mxu1 %v40972_v18  ;;  %36531 = vmatprep.mubr.msk.f32.mxu1 %vm41567_vm1, %v50341_v28 }
 0xea8   : > { %40974 = vmatprep.subr.bf16.mxu1 %v50340_v39 }
 0xeab   : > { %40976 = vmatpush3.bf16.msra.mxu1 %v40975_v11 }
 0xeac   : > { %40977 = vmatprep.subr.bf16.mxu1 %v50340_v39 }
 0xeaf   : > { %40979 = vmatpush3.bf16.msra.mxu1 %v40978_v25 }
 0xeb0   : > { %40980 = vmatprep.subr.bf16.mxu1 %v50340_v39 }
 0xeb3   : > { %40982 = vmatpush3.bf16.msra.mxu1 %v40981_v45 }
 0xeb4   : > { %40983 = vmatprep.subr.bf16.mxu1 %v50340_v39 }
 0xeb7   : > { %40985 = vmatpush3.bf16.msra.mxu1 %v40984_v43 }
 0xeb8   : > { %40986 = vmatprep.subr.bf16.mxu1 %v50340_v39 }
 0xebb   : > { %40988 = vmatpush3.bf16.msra.mxu1 %v40987_v60 }
 0xebc   : > { %40989 = vmatprep.subr.bf16.mxu1 %v50340_v39 }
 0xebf   : > { %40991 = vmatpush3.bf16.msra.mxu1 %v40990_v32 }
 0xec0   : > { %36529 = vmatprep.subr.mxu1 %v50341_v28 }
 0xec3   : > { %36530 = vmatpush3.msra.mxu1 %v26801_v1 }
 0xec4   : > { %36532 = vmatmul.mubr.f32.vlgmr.msra.gmra.mrb[10].mxu1 %v49376_v53  ;;  %40992 = vmatprep.subr.bf16.mxu1 %v50340_v39 }
 0xec5   : > { %40994 = vmatpush3.bf16.msra.mxu1 %v49036_v48  ;;  %36564 = vmatprep.mubr.msk.f32.mxu1 %vm41567_vm1, %v50341_v28  ;;  %v26605_v48 = vld [vmem:[%s49504_s8] sm:$0x1] }
 0xec6   : > { %40995 = vmatprep.subr.bf16.mxu1 %v50340_v39 }
 0xec9   : > { %40997 = vmatpush3.bf16.msra.mxu1 %v49053_v26 }
 0xeca   : > { %40998 = vmatprep.subr.bf16.mxu1 %v50340_v39 }
 0xecd   : > { %41000 = vmatpush3.bf16.msra.mxu1 %v49068_v59 }
 0xece   : > { %41001 = vmatprep.subr.bf16.mxu1 %v50340_v39 }
 0xed1   : > { %41003 = vmatpush3.bf16.msra.mxu1 %v49075_v4 }
 0xed2   : > { %41004 = vmatprep.subr.bf16.mxu1 %v50340_v39 }
 0xed5   : > { %41006 = vmatpush3.bf16.msra.mxu1 %v49257_v49 }
 0xed6   : > { %41007 = vmatprep.subr.bf16.mxu1 %v50340_v39 }
 0xed9   : > { %41009 = vmatpush3.bf16.msra.mxu1 %v49267_v54 }
 0xeda   : > { %41010 = vmatprep.subr.bf16.mxu1 %v50340_v39 }
 0xedd   : > { %41012 = vmatpush3.bf16.msra.mxu1 %v49290_v20 }
 0xede   : > { %36562 = vmatprep.subr.mxu1 %v50341_v28 }
 0xee1   : > { %36563 = vmatpush3.msra.mxu1 %v49300_v30 }
 0xee2   : > { %36565 = vmatmul.mubr.f32.vlgmr.msra.gmra.mrb[10].mxu1 %v49376_v53 }
 0xfb5   : > { %v27234_v26 = vpop.f32.mrb[10].mxu1 }
 0xfb6   : > { %v41016_v34 = vadd.f32 %v27234_v26, %v26605_v48  ;;  %v36566_v39 = vpop.f32.mrb[11].mxu1 }
 0xfb8   : > { %27239 = vst.msk [vmem:[%s328_s12] sm:$0x1] %vm27238_vm8, %v41016_v34 }
 0xfb9 PF: > { %s19_s30 = sadd.s32 1, %s41564_s30  }
 0xfba   : > { %p16_p4 = scmp.ge.s32.totalorder %s19_s30, 4  }
 0xfbc   :  { %18 = sbr.rel (!%p16_p4) target bundleno = 1 (0x1), region = 124 }

</bundles_post_ra>
